<compile_context>
chip_gen: v6e
topology: v6e:2x2x1
jax: 0.10.0
libtpu: 0.0.40
codegen_flags: <defaults>
</compile_context>

<pallas_src>
import numpy as np

import jax
import jax.numpy as jnp
from jax.experimental import pallas as pl
from jax.experimental.pallas import tpu as pltpu

# ---------------------------------------------------------------------------
# Frame geometry (input fixed at 3x32x32 by LeNet's 16*5*5 classifier input).
# Spatial maps are flattened into lanes with a fixed row stride (32 then 16).
# ---------------------------------------------------------------------------
_L1 = 892     # conv1 output frame length (valid outputs at r*32+c, r,c<28; max 891)
_Q1 = 859     # pool1 shifted-max frame length (anchors 2u*32+2v <= 858)
_LXS1 = 1020  # dj-stacked conv1 operand width (4*32 + _L1); fits raw 1024 lanes
_P1 = 256     # pooled1 frame: 14x14 valid, row stride 16
_L2 = 176     # conv2 output frame length (valid outputs at r*16+c, r,c<10)
_Q2 = 144     # pool2 shifted-max frame length (anchors 2u*16+2v <= 136)
_LXS2 = 240   # dj-stacked conv2 operand width (4*16 + _L2); fits the 256-lane p1
_P2 = 32      # pooled2 frame: 5x5 valid per channel, padded to 32 lanes


def _pool_selection_matrix(q_len, out_w, n_valid, in_stride, out_stride):
    """0/1 matrix: picks the 2x2-max anchors and repacks them to the next frame layout."""
    s = np.zeros((q_len, out_w), np.float32)
    for u in range(n_valid):
        for v in range(n_valid):
            s[2 * u * in_stride + 2 * v, u * out_stride + v] = 1.0
    return s


def _conv_block_weights(w, bblk, batch_major_in):
    """Block-diagonal (over the batch block), dj-stacked conv weights.

    w: (OC, IC, 5, 5).  Returns (5, OC*bblk, 5*IC*bblk) so that
        acc[oc*bblk + b, p] += sum_col W[di][oc*bblk + b, col] * xs[col, di*stride + p]
    where the dj-stacked operand xs has row layout
        dj*(IC*bblk) + (b*IC + ic)   if batch_major_in  (raw input block)
        dj*(IC*bblk) + (ic*bblk + b) otherwise          (channel-major frames).
    """
    w = np.asarray(w, np.float32)
    OC, IC, KH, KW = w.shape
    out = np.zeros((KH, OC * bblk, KW * IC * bblk), np.float32)
    bb = np.arange(bblk)
    for di in range(KH):
        for dj in range(KW):
            for oc in range(OC):
                for ic in range(IC):
                    rows = oc * bblk + bb
                    if batch_major_in:
                        cols = dj * IC * bblk + bb * IC + ic
                    else:
                        cols = dj * IC * bblk + ic * bblk + bb
                    out[di, rows, cols] = w[oc, ic, di, dj]
    return out


# ---------------------------------------------------------------------------
# Fused Pallas kernel: one batch BLOCK per grid step, everything in VMEM.
# ---------------------------------------------------------------------------
def _make_lenet_kernel(bblk):
    CB1 = 3 * bblk      # raw input rows per block   (batch-major: b*3 + ic)
    CO1 = 6 * bblk      # conv1 / pool1 rows         (channel-major: oc*bblk + b)
    CO2 = 16 * bblk     # conv2 / pool2 rows

    def kernel(x_ref, w1_ref, b1_ref, w2_ref, b2_ref, s1_ref, s2_ref,
               wf1_ref, bf1_ref, wf2_ref, bf2_ref, wf3_ref, bf3_ref,
               o_ref, xs1_ref, xs2_ref):
        f32 = jnp.float32
        x = x_ref[0]                                              # (3*bblk, 1024)

        # ---- conv1: 5 dj-shifted copies stacked along K, 5 block-diag GEMMs ----
        for dj in range(5):
            xs1_ref[dj * CB1:(dj + 1) * CB1, :] = x[:, dj:dj + _LXS1]
        acc1 = jnp.zeros((CO1, _L1), f32)
        for di in range(5):
            acc1 = acc1 + jnp.dot(w1_ref[di], xs1_ref[:, di * 32:di * 32 + _L1],
                                  preferred_element_type=f32)
        a1 = jnp.maximum(acc1 + b1_ref[...], 0.0)                 # bias + ReLU (6B, 892)

        # ---- pool1 (2x2/2): shifted maxima + one shared selection matmul ----
        q1 = jnp.maximum(jnp.maximum(a1[:, 0:_Q1], a1[:, 1:_Q1 + 1]),
                         jnp.maximum(a1[:, 32:_Q1 + 32], a1[:, 33:_Q1 + 33]))
        p1 = jnp.dot(q1, s1_ref[...], preferred_element_type=f32)  # (6B, 256), stride 16

        # ---- conv2: same dj-stacked scheme on the pooled frame ----
        for dj in range(5):
            xs2_ref[dj * CO1:(dj + 1) * CO1, :] = p1[:, dj:dj + _LXS2]
        acc2 = jnp.zeros((CO2, _L2), f32)
        for di in range(5):
            acc2 = acc2 + jnp.dot(w2_ref[di], xs2_ref[:, di * 16:di * 16 + _L2],
                                  preferred_element_type=f32)
        a2 = jnp.maximum(acc2 + b2_ref[...], 0.0)                 # (16B, 176)

        # ---- pool2 ----
        q2 = jnp.maximum(jnp.maximum(a2[:, 0:_Q2], a2[:, 1:_Q2 + 1]),
                         jnp.maximum(a2[:, 16:_Q2 + 16], a2[:, 17:_Q2 + 17]))
        p2 = jnp.dot(q2, s2_ref[...], preferred_element_type=f32)  # (16B, 32)

        # ---- classifier: batch block in the M (sublane) dim, one matmul per layer ----
        p2f = jnp.concatenate(
            [p2[c * bblk:(c + 1) * bblk, :] for c in range(16)], axis=1)   # (B, 512)
        h = jnp.maximum(jnp.dot(p2f, wf1_ref[...], preferred_element_type=f32)
                        + bf1_ref[...], 0.0)                               # (B, 120)
        h = jnp.maximum(jnp.dot(h, wf2_ref[...], preferred_element_type=f32)
                        + bf2_ref[...], 0.0)                               # (B, 84)
        o_ref[0] = (jnp.dot(h, wf3_ref[...], preferred_element_type=f32)
                    + bf3_ref[...])                                        # (B, 128)

    return kernel


# ---------------------------------------------------------------------------
# One-time parameter re-layout (PyTorch layout -> kernel layout).
# ---------------------------------------------------------------------------
def prepare_lenet_params(params, bblk=8):
    classes = params["fc3_w"].shape[0]
    npad = ((classes + 127) // 128) * 128

    w1s = _conv_block_weights(params["conv1_w"], bblk, batch_major_in=True)
    w2s = _conv_block_weights(params["conv2_w"], bblk, batch_major_in=False)

    b1 = np.repeat(np.asarray(params["conv1_b"], np.float32), bblk).reshape(6 * bblk, 1)
    b2 = np.repeat(np.asarray(params["conv2_b"], np.float32), bblk).reshape(16 * bblk, 1)

    # fc1 weight packed channel-major to match p2f's (channel, 32-lane chunk) layout.
    wf1 = np.asarray(params["fc1_w"], np.float32).reshape(120, 16, 25).transpose(1, 2, 0)
    wf1 = np.pad(wf1, ((0, 0), (0, _P2 - 25), (0, 0))).reshape(16 * _P2, 120)

    wf3 = np.pad(np.asarray(params["fc3_w"], np.float32).T, ((0, 0), (0, npad - classes)))
    bf3 = np.pad(np.asarray(params["fc3_b"], np.float32), (0, npad - classes)).reshape(1, npad)

    return {
        "w1": jnp.asarray(w1s),                                   # (5, 6B, 15B)
        "b1": jnp.asarray(b1),
        "w2": jnp.asarray(w2s),                                   # (5, 16B, 30B)
        "b2": jnp.asarray(b2),
        "s1": jnp.asarray(_pool_selection_matrix(_Q1, _P1, 14, 32, 16)),
        "s2": jnp.asarray(_pool_selection_matrix(_Q2, _P2, 5, 16, 5)),
        "wf1": jnp.asarray(wf1),                                  # (512, 120)
        "bf1": jnp.asarray(np.asarray(params["fc1_b"], np.float32).reshape(1, 120)),
        "wf2": jnp.asarray(np.asarray(params["fc2_w"], np.float32).T),   # (120, 84)
        "bf2": jnp.asarray(np.asarray(params["fc2_b"], np.float32).reshape(1, 84)),
        "wf3": jnp.asarray(wf3),                                  # (84, npad)
        "bf3": jnp.asarray(bf3),
    }


# ---------------------------------------------------------------------------
# Forward wrapper: single fused pallas_call, batch-block-parallel grid.
# ---------------------------------------------------------------------------
def lenet_forward(prepped, x, classes):
    """x: (B, 3, 32, 32) NCHW float32.  `classes` must be static under jit."""
    bblk = prepped["b1"].shape[0] // 6
    npad = prepped["wf3"].shape[1]
    B = x.shape[0]
    nblk = (B + bblk - 1) // bblk
    Bp = nblk * bblk

    xf = x.astype(jnp.float32).reshape(B, 3, 1024)        # free reshape, no HBM copy
    if Bp != B:
        xf = jnp.pad(xf, ((0, Bp - B), (0, 0), (0, 0)))
    xf = xf.reshape(nblk, bblk * 3, 1024)                 # free reshape

    weights = (prepped["w1"], prepped["b1"], prepped["w2"], prepped["b2"],
               prepped["s1"], prepped["s2"], prepped["wf1"], prepped["bf1"],
               prepped["wf2"], prepped["bf2"], prepped["wf3"], prepped["bf3"])

    def resident(a):  # whole array VMEM-resident across the grid (constant index_map)
        nd = a.ndim
        return pl.BlockSpec(a.shape, lambda i: (0,) * nd)

    in_specs = [pl.BlockSpec((1, 3 * bblk, 1024), lambda i: (i, 0, 0))]
    in_specs += [resident(a) for a in weights]

    out = pl.pallas_call(
        _make_lenet_kernel(bblk),
        out_shape=jax.ShapeDtypeStruct((nblk, bblk, npad), jnp.float32),
        grid_spec=pltpu.PrefetchScalarGridSpec(
            num_scalar_prefetch=0,
            grid=(nblk,),
            in_specs=in_specs,
            out_specs=pl.BlockSpec((1, bblk, npad), lambda i: (i, 0, 0)),
            scratch_shapes=[pltpu.VMEM((5 * 3 * bblk, _LXS1), jnp.float32),
                            pltpu.VMEM((5 * 6 * bblk, _LXS2), jnp.float32)]),
        compiler_params=pltpu.CompilerParams(
            dimension_semantics=("parallel",)),
    )(xf, *weights)
    return out.reshape(Bp, npad)[:B, :classes]


# ---------------------------------------------------------------------------
# Init + pure-JAX reference (correctness self-check).
# ---------------------------------------------------------------------------
def init_lenet_params(key, classes):
    ks = jax.random.split(key, 10)

    def u(k, shape, fan_in):
        bound = 1.0 / (fan_in ** 0.5)
        return jax.random.uniform(k, shape, jnp.float32, -bound, bound)

    return {
        "conv1_w": u(ks[0], (6, 3, 5, 5), 3 * 5 * 5),
        "conv1_b": u(ks[1], (6,), 3 * 5 * 5),
        "conv2_w": u(ks[2], (16, 6, 5, 5), 6 * 5 * 5),
        "conv2_b": u(ks[3], (16,), 6 * 5 * 5),
        "fc1_w": u(ks[4], (120, 16 * 5 * 5), 16 * 5 * 5),
        "fc1_b": u(ks[5], (120,), 16 * 5 * 5),
        "fc2_w": u(ks[6], (84, 120), 120),
        "fc2_b": u(ks[7], (84,), 120),
        "fc3_w": u(ks[8], (classes, 84), 84),
        "fc3_b": u(ks[9], (classes,), 84),
    }


def lenet_reference(params, x):
    def conv_relu(x, w, b):
        y = jax.lax.conv_general_dilated(
            x, w, window_strides=(1, 1), padding="VALID",
            dimension_numbers=("NCHW", "OIHW", "NCHW"))
        return jax.nn.relu(y + b[None, :, None, None])

    def pool(x):
        B, C, H, W = x.shape
        return x.reshape(B, C, H // 2, 2, W // 2, 2).max(axis=(3, 5))

    x = pool(conv_relu(x, params["conv1_w"], params["conv1_b"]))
    x = pool(conv_relu(x, params["conv2_w"], params["conv2_b"]))
    x = x.reshape(x.shape[0], -1)
    x = jax.nn.relu(x @ params["fc1_w"].T + params["fc1_b"])
    x = jax.nn.relu(x @ params["fc2_w"].T + params["fc2_b"])
    return x @ params["fc3_w"].T + params["fc3_b"]


if __name__ == "__main__":
    classes = 10
    key = jax.random.PRNGKey(0)
    pkey, xkey = jax.random.split(key)
    params = init_lenet_params(pkey, classes)
    # LeNet's 16*5*5 classifier input implies a 3x32x32 input.
    x = jax.random.normal(xkey, (16, 3, 32, 32), dtype=jnp.float32)

    prepped = prepare_lenet_params(params, bblk=8)   # one-time weight re-layout
    fwd = jax.jit(lenet_forward, static_argnums=2)
    out = fwd(prepped, x, classes)
    jax.block_until_ready(out)

    assert out.shape == (16, classes), out.shape
    assert out.dtype == jnp.float32

    with jax.default_matmul_precision("highest"):
        ref = lenet_reference(params, x)
    if not jnp.allclose(out, ref, rtol=1e-2, atol=1e-2):
        raise AssertionError("Pallas LeNet output mismatches the pure-JAX reference")

    print("KERNEL_OK")
</pallas_src>

<mosaic_0001>
module attributes {stable_mosaic.version = 11 : i64} {
  func.func @kernel(%arg0: i32, %arg1: memref<1x24x1024xf32, #tpu.memory_space<vmem>>, %arg2: memref<5x48x120xf32, #tpu.memory_space<vmem>>, %arg3: memref<48x1xf32, #tpu.memory_space<vmem>>, %arg4: memref<5x128x240xf32, #tpu.memory_space<vmem>>, %arg5: memref<128x1xf32, #tpu.memory_space<vmem>>, %arg6: memref<859x256xf32, #tpu.memory_space<vmem>>, %arg7: memref<144x32xf32, #tpu.memory_space<vmem>>, %arg8: memref<512x120xf32, #tpu.memory_space<vmem>>, %arg9: memref<1x120xf32, #tpu.memory_space<vmem>>, %arg10: memref<120x84xf32, #tpu.memory_space<vmem>>, %arg11: memref<1x84xf32, #tpu.memory_space<vmem>>, %arg12: memref<84x128xf32, #tpu.memory_space<vmem>>, %arg13: memref<1x128xf32, #tpu.memory_space<vmem>>, %arg14: memref<1x8x128xf32, #tpu.memory_space<vmem>>, %arg15: memref<120x1020xf32, #tpu.memory_space<vmem>>, %arg16: memref<240x240xf32, #tpu.memory_space<vmem>>) attributes {dimension_semantics = [#tpu.dimension_semantics<parallel>], iteration_bounds = array<i64: 2>, scalar_prefetch = 0 : i64, scratch_operands = 2 : i64, tpu.core_type = #tpu.core_type<tc>, window_params = [{transform_indices = @transform_0, window_bounds = array<i64: 1, 24, 1024>}, {pipeline_mode = #tpu.pipeline_mode<synchronous>, transform_indices = @transform_1, window_bounds = array<i64: 5, 48, 120>}, {pipeline_mode = #tpu.pipeline_mode<synchronous>, transform_indices = @transform_2, window_bounds = array<i64: 48, 1>}, {pipeline_mode = #tpu.pipeline_mode<synchronous>, transform_indices = @transform_3, window_bounds = array<i64: 5, 128, 240>}, {pipeline_mode = #tpu.pipeline_mode<synchronous>, transform_indices = @transform_4, window_bounds = array<i64: 128, 1>}, {pipeline_mode = #tpu.pipeline_mode<synchronous>, transform_indices = @transform_5, window_bounds = array<i64: 859, 256>}, {pipeline_mode = #tpu.pipeline_mode<synchronous>, transform_indices = @transform_6, window_bounds = array<i64: 144, 32>}, {pipeline_mode = #tpu.pipeline_mode<synchronous>, transform_indices = @transform_7, window_bounds = array<i64: 512, 120>}, {pipeline_mode = #tpu.pipeline_mode<synchronous>, transform_indices = @transform_8, window_bounds = array<i64: 1, 120>}, {pipeline_mode = #tpu.pipeline_mode<synchronous>, transform_indices = @transform_9, window_bounds = array<i64: 120, 84>}, {pipeline_mode = #tpu.pipeline_mode<synchronous>, transform_indices = @transform_10, window_bounds = array<i64: 1, 84>}, {pipeline_mode = #tpu.pipeline_mode<synchronous>, transform_indices = @transform_11, window_bounds = array<i64: 84, 128>}, {pipeline_mode = #tpu.pipeline_mode<synchronous>, transform_indices = @transform_12, window_bounds = array<i64: 1, 128>}, {transform_indices = @transform_13, window_bounds = array<i64: 1, 8, 128>}]} {
    %c0 = arith.constant 0 : index
    %c0_0 = arith.constant 0 : index
    %c0_1 = arith.constant 0 : index
    %0 = vector.load %arg1[%c0, %c0_0, %c0_1] : memref<1x24x1024xf32, #tpu.memory_space<vmem>>, vector<1x24x1024xf32>
    %1 = vector.shape_cast %0 : vector<1x24x1024xf32> to vector<24x1024xf32>
    %2 = vector.extract_strided_slice %1 {offsets = [0, 0], sizes = [24, 1020], strides = [1, 1]} : vector<24x1024xf32> to vector<24x1020xf32>
    %c0_2 = arith.constant 0 : index
    %c0_3 = arith.constant 0 : index
    %3 = vector.load %arg15[%c0_2, %c0_3] : memref<120x1020xf32, #tpu.memory_space<vmem>>, vector<24x1020xf32>
    tpu.vector_store %arg15[%c0_2, %c0_3], %2 {strides = array<i32>} : memref<120x1020xf32, #tpu.memory_space<vmem>>, vector<24x1020xf32>,
    %4 = vector.extract_strided_slice %1 {offsets = [0, 1], sizes = [24, 1020], strides = [1, 1]} : vector<24x1024xf32> to vector<24x1020xf32>
    %c24 = arith.constant 24 : index
    %c0_4 = arith.constant 0 : index
    %5 = vector.load %arg15[%c24, %c0_4] : memref<120x1020xf32, #tpu.memory_space<vmem>>, vector<24x1020xf32>
    tpu.vector_store %arg15[%c24, %c0_4], %4 {strides = array<i32>} : memref<120x1020xf32, #tpu.memory_space<vmem>>, vector<24x1020xf32>,
    %6 = vector.extract_strided_slice %1 {offsets = [0, 2], sizes = [24, 1020], strides = [1, 1]} : vector<24x1024xf32> to vector<24x1020xf32>
    %c48 = arith.constant 48 : index
    %c0_5 = arith.constant 0 : index
    %7 = vector.load %arg15[%c48, %c0_5] : memref<120x1020xf32, #tpu.memory_space<vmem>>, vector<24x1020xf32>
    tpu.vector_store %arg15[%c48, %c0_5], %6 {strides = array<i32>} : memref<120x1020xf32, #tpu.memory_space<vmem>>, vector<24x1020xf32>,
    %8 = vector.extract_strided_slice %1 {offsets = [0, 3], sizes = [24, 1020], strides = [1, 1]} : vector<24x1024xf32> to vector<24x1020xf32>
    %c72 = arith.constant 72 : index
    %c0_6 = arith.constant 0 : index
    %9 = vector.load %arg15[%c72, %c0_6] : memref<120x1020xf32, #tpu.memory_space<vmem>>, vector<24x1020xf32>
    tpu.vector_store %arg15[%c72, %c0_6], %8 {strides = array<i32>} : memref<120x1020xf32, #tpu.memory_space<vmem>>, vector<24x1020xf32>,
    %10 = vector.extract_strided_slice %1 {offsets = [0, 4], sizes = [24, 1020], strides = [1, 1]} : vector<24x1024xf32> to vector<24x1020xf32>
    %c96 = arith.constant 96 : index
    %c0_7 = arith.constant 0 : index
    %11 = vector.load %arg15[%c96, %c0_7] : memref<120x1020xf32, #tpu.memory_space<vmem>>, vector<24x1020xf32>
    tpu.vector_store %arg15[%c96, %c0_7], %10 {strides = array<i32>} : memref<120x1020xf32, #tpu.memory_space<vmem>>, vector<24x1020xf32>,
    %cst = arith.constant 0.000000e+00 : f32
    %12 = vector.broadcast %cst : f32 to vector<48x892xf32>
    %c0_8 = arith.constant 0 : index
    %c0_9 = arith.constant 0 : index
    %c0_10 = arith.constant 0 : index
    %13 = vector.load %arg2[%c0_8, %c0_9, %c0_10] : memref<5x48x120xf32, #tpu.memory_space<vmem>>, vector<1x48x120xf32>
    %14 = vector.shape_cast %13 : vector<1x48x120xf32> to vector<48x120xf32>
    %c0_11 = arith.constant 0 : index
    %c0_12 = arith.constant 0 : index
    %15 = vector.load %arg15[%c0_11, %c0_12] : memref<120x1020xf32, #tpu.memory_space<vmem>>, vector<120x892xf32>
    %cst_13 = arith.constant dense<0.000000e+00> : vector<48x892xf32>
    %16 = tpu.matmul %14, %15, %cst_13 {dimension_numbers = #tpu.dot_dimension_numbers<[1], [0], [0], [1], [0, 0, 1, 1], [], []>} : vector<48x120xf32>, vector<120x892xf32>, vector<48x892xf32> -> vector<48x892xf32>
    %17 = arith.addf %12, %16 : vector<48x892xf32>
    %c1 = arith.constant 1 : index
    %c0_14 = arith.constant 0 : index
    %c0_15 = arith.constant 0 : index
    %18 = vector.load %arg2[%c1, %c0_14, %c0_15] : memref<5x48x120xf32, #tpu.memory_space<vmem>>, vector<1x48x120xf32>
    %19 = vector.shape_cast %18 : vector<1x48x120xf32> to vector<48x120xf32>
    %c0_16 = arith.constant 0 : index
    %c32 = arith.constant 32 : index
    %20 = vector.load %arg15[%c0_16, %c32] : memref<120x1020xf32, #tpu.memory_space<vmem>>, vector<120x892xf32>
    %cst_17 = arith.constant dense<0.000000e+00> : vector<48x892xf32>
    %21 = tpu.matmul %19, %20, %cst_17 {dimension_numbers = #tpu.dot_dimension_numbers<[1], [0], [0], [1], [0, 0, 1, 1], [], []>} : vector<48x120xf32>, vector<120x892xf32>, vector<48x892xf32> -> vector<48x892xf32>
    %22 = arith.addf %17, %21 : vector<48x892xf32>
    %c2 = arith.constant 2 : index
    %c0_18 = arith.constant 0 : index
    %c0_19 = arith.constant 0 : index
    %23 = vector.load %arg2[%c2, %c0_18, %c0_19] : memref<5x48x120xf32, #tpu.memory_space<vmem>>, vector<1x48x120xf32>
    %24 = vector.shape_cast %23 : vector<1x48x120xf32> to vector<48x120xf32>
    %c0_20 = arith.constant 0 : index
    %c64 = arith.constant 64 : index
    %25 = vector.load %arg15[%c0_20, %c64] : memref<120x1020xf32, #tpu.memory_space<vmem>>, vector<120x892xf32>
    %cst_21 = arith.constant dense<0.000000e+00> : vector<48x892xf32>
    %26 = tpu.matmul %24, %25, %cst_21 {dimension_numbers = #tpu.dot_dimension_numbers<[1], [0], [0], [1], [0, 0, 1, 1], [], []>} : vector<48x120xf32>, vector<120x892xf32>, vector<48x892xf32> -> vector<48x892xf32>
    %27 = arith.addf %22, %26 : vector<48x892xf32>
    %c3 = arith.constant 3 : index
    %c0_22 = arith.constant 0 : index
    %c0_23 = arith.constant 0 : index
    %28 = vector.load %arg2[%c3, %c0_22, %c0_23] : memref<5x48x120xf32, #tpu.memory_space<vmem>>, vector<1x48x120xf32>
    %29 = vector.shape_cast %28 : vector<1x48x120xf32> to vector<48x120xf32>
    %c0_24 = arith.constant 0 : index
    %c96_25 = arith.constant 96 : index
    %30 = vector.load %arg15[%c0_24, %c96_25] : memref<120x1020xf32, #tpu.memory_space<vmem>>, vector<120x892xf32>
    %cst_26 = arith.constant dense<0.000000e+00> : vector<48x892xf32>
    %31 = tpu.matmul %29, %30, %cst_26 {dimension_numbers = #tpu.dot_dimension_numbers<[1], [0], [0], [1], [0, 0, 1, 1], [], []>} : vector<48x120xf32>, vector<120x892xf32>, vector<48x892xf32> -> vector<48x892xf32>
    %32 = arith.addf %27, %31 : vector<48x892xf32>
    %c4 = arith.constant 4 : index
    %c0_27 = arith.constant 0 : index
    %c0_28 = arith.constant 0 : index
    %33 = vector.load %arg2[%c4, %c0_27, %c0_28] : memref<5x48x120xf32, #tpu.memory_space<vmem>>, vector<1x48x120xf32>
    %34 = vector.shape_cast %33 : vector<1x48x120xf32> to vector<48x120xf32>
    %c0_29 = arith.constant 0 : index
    %c128 = arith.constant 128 : index
    %35 = vector.load %arg15[%c0_29, %c128] : memref<120x1020xf32, #tpu.memory_space<vmem>>, vector<120x892xf32>
    %cst_30 = arith.constant dense<0.000000e+00> : vector<48x892xf32>
    %36 = tpu.matmul %34, %35, %cst_30 {dimension_numbers = #tpu.dot_dimension_numbers<[1], [0], [0], [1], [0, 0, 1, 1], [], []>} : vector<48x120xf32>, vector<120x892xf32>, vector<48x892xf32> -> vector<48x892xf32>
    %37 = arith.addf %32, %36 : vector<48x892xf32>
    %c0_31 = arith.constant 0 : index
    %c0_32 = arith.constant 0 : index
    %38 = vector.load %arg3[%c0_31, %c0_32] : memref<48x1xf32, #tpu.memory_space<vmem>>, vector<48x1xf32>
    %39 = vector.broadcast %38 : vector<48x1xf32> to vector<48x892xf32>
    %40 = arith.addf %37, %39 : vector<48x892xf32>
    %cst_33 = arith.constant 0.000000e+00 : f32
    %41 = vector.broadcast %cst_33 : f32 to vector<48x892xf32>
    %42 = arith.maximumf %40, %41 : vector<48x892xf32>
    %43 = vector.extract_strided_slice %42 {offsets = [0, 0], sizes = [48, 859], strides = [1, 1]} : vector<48x892xf32> to vector<48x859xf32>
    %44 = vector.extract_strided_slice %42 {offsets = [0, 1], sizes = [48, 859], strides = [1, 1]} : vector<48x892xf32> to vector<48x859xf32>
    %45 = arith.maximumf %43, %44 : vector<48x859xf32>
    %46 = vector.extract_strided_slice %42 {offsets = [0, 32], sizes = [48, 859], strides = [1, 1]} : vector<48x892xf32> to vector<48x859xf32>
    %47 = vector.extract_strided_slice %42 {offsets = [0, 33], sizes = [48, 859], strides = [1, 1]} : vector<48x892xf32> to vector<48x859xf32>
    %48 = arith.maximumf %46, %47 : vector<48x859xf32>
    %49 = arith.maximumf %45, %48 : vector<48x859xf32>
    %c0_34 = arith.constant 0 : index
    %c0_35 = arith.constant 0 : index
    %50 = vector.load %arg6[%c0_34, %c0_35] : memref<859x256xf32, #tpu.memory_space<vmem>>, vector<859x256xf32>
    %cst_36 = arith.constant dense<0.000000e+00> : vector<48x256xf32>
    %51 = tpu.matmul %49, %50, %cst_36 {dimension_numbers = #tpu.dot_dimension_numbers<[1], [0], [0], [1], [0, 0, 1, 1], [], []>} : vector<48x859xf32>, vector<859x256xf32>, vector<48x256xf32> -> vector<48x256xf32>
    %52 = vector.extract_strided_slice %51 {offsets = [0, 0], sizes = [48, 240], strides = [1, 1]} : vector<48x256xf32> to vector<48x240xf32>
    %c0_37 = arith.constant 0 : index
    %c0_38 = arith.constant 0 : index
    %53 = vector.load %arg16[%c0_37, %c0_38] : memref<240x240xf32, #tpu.memory_space<vmem>>, vector<48x240xf32>
    tpu.vector_store %arg16[%c0_37, %c0_38], %52 {strides = array<i32>} : memref<240x240xf32, #tpu.memory_space<vmem>>, vector<48x240xf32>,
    %54 = vector.extract_strided_slice %51 {offsets = [0, 1], sizes = [48, 240], strides = [1, 1]} : vector<48x256xf32> to vector<48x240xf32>
    %c48_39 = arith.constant 48 : index
    %c0_40 = arith.constant 0 : index
    %55 = vector.load %arg16[%c48_39, %c0_40] : memref<240x240xf32, #tpu.memory_space<vmem>>, vector<48x240xf32>
    tpu.vector_store %arg16[%c48_39, %c0_40], %54 {strides = array<i32>} : memref<240x240xf32, #tpu.memory_space<vmem>>, vector<48x240xf32>,
    %56 = vector.extract_strided_slice %51 {offsets = [0, 2], sizes = [48, 240], strides = [1, 1]} : vector<48x256xf32> to vector<48x240xf32>
    %c96_41 = arith.constant 96 : index
    %c0_42 = arith.constant 0 : index
    %57 = vector.load %arg16[%c96_41, %c0_42] : memref<240x240xf32, #tpu.memory_space<vmem>>, vector<48x240xf32>
    tpu.vector_store %arg16[%c96_41, %c0_42], %56 {strides = array<i32>} : memref<240x240xf32, #tpu.memory_space<vmem>>, vector<48x240xf32>,
    %58 = vector.extract_strided_slice %51 {offsets = [0, 3], sizes = [48, 240], strides = [1, 1]} : vector<48x256xf32> to vector<48x240xf32>
    %c144 = arith.constant 144 : index
    %c0_43 = arith.constant 0 : index
    %59 = vector.load %arg16[%c144, %c0_43] : memref<240x240xf32, #tpu.memory_space<vmem>>, vector<48x240xf32>
    tpu.vector_store %arg16[%c144, %c0_43], %58 {strides = array<i32>} : memref<240x240xf32, #tpu.memory_space<vmem>>, vector<48x240xf32>,
    %60 = vector.extract_strided_slice %51 {offsets = [0, 4], sizes = [48, 240], strides = [1, 1]} : vector<48x256xf32> to vector<48x240xf32>
    %c192 = arith.constant 192 : index
    %c0_44 = arith.constant 0 : index
    %61 = vector.load %arg16[%c192, %c0_44] : memref<240x240xf32, #tpu.memory_space<vmem>>, vector<48x240xf32>
    tpu.vector_store %arg16[%c192, %c0_44], %60 {strides = array<i32>} : memref<240x240xf32, #tpu.memory_space<vmem>>, vector<48x240xf32>,
    %cst_45 = arith.constant 0.000000e+00 : f32
    %62 = vector.broadcast %cst_45 : f32 to vector<128x176xf32>
    %c0_46 = arith.constant 0 : index
    %c0_47 = arith.constant 0 : index
    %c0_48 = arith.constant 0 : index
    %63 = vector.load %arg4[%c0_46, %c0_47, %c0_48] : memref<5x128x240xf32, #tpu.memory_space<vmem>>, vector<1x128x240xf32>
    %64 = vector.shape_cast %63 : vector<1x128x240xf32> to vector<128x240xf32>
    %c0_49 = arith.constant 0 : index
    %c0_50 = arith.constant 0 : index
    %65 = vector.load %arg16[%c0_49, %c0_50] : memref<240x240xf32, #tpu.memory_space<vmem>>, vector<240x176xf32>
    %cst_51 = arith.constant dense<0.000000e+00> : vector<128x176xf32>
    %66 = tpu.matmul %64, %65, %cst_51 {dimension_numbers = #tpu.dot_dimension_numbers<[1], [0], [0], [1], [0, 0, 1, 1], [], []>} : vector<128x240xf32>, vector<240x176xf32>, vector<128x176xf32> -> vector<128x176xf32>
    %67 = arith.addf %62, %66 : vector<128x176xf32>
    %c1_52 = arith.constant 1 : index
    %c0_53 = arith.constant 0 : index
    %c0_54 = arith.constant 0 : index
    %68 = vector.load %arg4[%c1_52, %c0_53, %c0_54] : memref<5x128x240xf32, #tpu.memory_space<vmem>>, vector<1x128x240xf32>
    %69 = vector.shape_cast %68 : vector<1x128x240xf32> to vector<128x240xf32>
    %c0_55 = arith.constant 0 : index
    %c16 = arith.constant 16 : index
    %70 = vector.load %arg16[%c0_55, %c16] : memref<240x240xf32, #tpu.memory_space<vmem>>, vector<240x176xf32>
    %cst_56 = arith.constant dense<0.000000e+00> : vector<128x176xf32>
    %71 = tpu.matmul %69, %70, %cst_56 {dimension_numbers = #tpu.dot_dimension_numbers<[1], [0], [0], [1], [0, 0, 1, 1], [], []>} : vector<128x240xf32>, vector<240x176xf32>, vector<128x176xf32> -> vector<128x176xf32>
    %72 = arith.addf %67, %71 : vector<128x176xf32>
    %c2_57 = arith.constant 2 : index
    %c0_58 = arith.constant 0 : index
    %c0_59 = arith.constant 0 : index
    %73 = vector.load %arg4[%c2_57, %c0_58, %c0_59] : memref<5x128x240xf32, #tpu.memory_space<vmem>>, vector<1x128x240xf32>
    %74 = vector.shape_cast %73 : vector<1x128x240xf32> to vector<128x240xf32>
    %c0_60 = arith.constant 0 : index
    %c32_61 = arith.constant 32 : index
    %75 = vector.load %arg16[%c0_60, %c32_61] : memref<240x240xf32, #tpu.memory_space<vmem>>, vector<240x176xf32>
    %cst_62 = arith.constant dense<0.000000e+00> : vector<128x176xf32>
    %76 = tpu.matmul %74, %75, %cst_62 {dimension_numbers = #tpu.dot_dimension_numbers<[1], [0], [0], [1], [0, 0, 1, 1], [], []>} : vector<128x240xf32>, vector<240x176xf32>, vector<128x176xf32> -> vector<128x176xf32>
    %77 = arith.addf %72, %76 : vector<128x176xf32>
    %c3_63 = arith.constant 3 : index
    %c0_64 = arith.constant 0 : index
    %c0_65 = arith.constant 0 : index
    %78 = vector.load %arg4[%c3_63, %c0_64, %c0_65] : memref<5x128x240xf32, #tpu.memory_space<vmem>>, vector<1x128x240xf32>
    %79 = vector.shape_cast %78 : vector<1x128x240xf32> to vector<128x240xf32>
    %c0_66 = arith.constant 0 : index
    %c48_67 = arith.constant 48 : index
    %80 = vector.load %arg16[%c0_66, %c48_67] : memref<240x240xf32, #tpu.memory_space<vmem>>, vector<240x176xf32>
    %cst_68 = arith.constant dense<0.000000e+00> : vector<128x176xf32>
    %81 = tpu.matmul %79, %80, %cst_68 {dimension_numbers = #tpu.dot_dimension_numbers<[1], [0], [0], [1], [0, 0, 1, 1], [], []>} : vector<128x240xf32>, vector<240x176xf32>, vector<128x176xf32> -> vector<128x176xf32>
    %82 = arith.addf %77, %81 : vector<128x176xf32>
    %c4_69 = arith.constant 4 : index
    %c0_70 = arith.constant 0 : index
    %c0_71 = arith.constant 0 : index
    %83 = vector.load %arg4[%c4_69, %c0_70, %c0_71] : memref<5x128x240xf32, #tpu.memory_space<vmem>>, vector<1x128x240xf32>
    %84 = vector.shape_cast %83 : vector<1x128x240xf32> to vector<128x240xf32>
    %c0_72 = arith.constant 0 : index
    %c64_73 = arith.constant 64 : index
    %85 = vector.load %arg16[%c0_72, %c64_73] : memref<240x240xf32, #tpu.memory_space<vmem>>, vector<240x176xf32>
    %cst_74 = arith.constant dense<0.000000e+00> : vector<128x176xf32>
    %86 = tpu.matmul %84, %85, %cst_74 {dimension_numbers = #tpu.dot_dimension_numbers<[1], [0], [0], [1], [0, 0, 1, 1], [], []>} : vector<128x240xf32>, vector<240x176xf32>, vector<128x176xf32> -> vector<128x176xf32>
    %87 = arith.addf %82, %86 : vector<128x176xf32>
    %c0_75 = arith.constant 0 : index
    %c0_76 = arith.constant 0 : index
    %88 = vector.load %arg5[%c0_75, %c0_76] : memref<128x1xf32, #tpu.memory_space<vmem>>, vector<128x1xf32>
    %89 = vector.broadcast %88 : vector<128x1xf32> to vector<128x176xf32>
    %90 = arith.addf %87, %89 : vector<128x176xf32>
    %cst_77 = arith.constant 0.000000e+00 : f32
    %91 = vector.broadcast %cst_77 : f32 to vector<128x176xf32>
    %92 = arith.maximumf %90, %91 : vector<128x176xf32>
    %93 = vector.extract_strided_slice %92 {offsets = [0, 0], sizes = [128, 144], strides = [1, 1]} : vector<128x176xf32> to vector<128x144xf32>
    %94 = vector.extract_strided_slice %92 {offsets = [0, 1], sizes = [128, 144], strides = [1, 1]} : vector<128x176xf32> to vector<128x144xf32>
    %95 = arith.maximumf %93, %94 : vector<128x144xf32>
    %96 = vector.extract_strided_slice %92 {offsets = [0, 16], sizes = [128, 144], strides = [1, 1]} : vector<128x176xf32> to vector<128x144xf32>
    %97 = vector.extract_strided_slice %92 {offsets = [0, 17], sizes = [128, 144], strides = [1, 1]} : vector<128x176xf32> to vector<128x144xf32>
    %98 = arith.maximumf %96, %97 : vector<128x144xf32>
    %99 = arith.maximumf %95, %98 : vector<128x144xf32>
    %c0_78 = arith.constant 0 : index
    %c0_79 = arith.constant 0 : index
    %100 = vector.load %arg7[%c0_78, %c0_79] : memref<144x32xf32, #tpu.memory_space<vmem>>, vector<144x32xf32>
    %cst_80 = arith.constant dense<0.000000e+00> : vector<128x32xf32>
    %101 = tpu.matmul %99, %100, %cst_80 {dimension_numbers = #tpu.dot_dimension_numbers<[1], [0], [0], [1], [0, 0, 1, 1], [], []>} : vector<128x144xf32>, vector<144x32xf32>, vector<128x32xf32> -> vector<128x32xf32>
    %102 = vector.extract_strided_slice %101 {offsets = [0, 0], sizes = [8, 32], strides = [1, 1]} : vector<128x32xf32> to vector<8x32xf32>
    %103 = vector.extract_strided_slice %101 {offsets = [8, 0], sizes = [8, 32], strides = [1, 1]} : vector<128x32xf32> to vector<8x32xf32>
    %104 = vector.extract_strided_slice %101 {offsets = [16, 0], sizes = [8, 32], strides = [1, 1]} : vector<128x32xf32> to vector<8x32xf32>
    %105 = vector.extract_strided_slice %101 {offsets = [24, 0], sizes = [8, 32], strides = [1, 1]} : vector<128x32xf32> to vector<8x32xf32>
    %106 = vector.extract_strided_slice %101 {offsets = [32, 0], sizes = [8, 32], strides = [1, 1]} : vector<128x32xf32> to vector<8x32xf32>
    %107 = vector.extract_strided_slice %101 {offsets = [40, 0], sizes = [8, 32], strides = [1, 1]} : vector<128x32xf32> to vector<8x32xf32>
    %108 = vector.extract_strided_slice %101 {offsets = [48, 0], sizes = [8, 32], strides = [1, 1]} : vector<128x32xf32> to vector<8x32xf32>
    %109 = vector.extract_strided_slice %101 {offsets = [56, 0], sizes = [8, 32], strides = [1, 1]} : vector<128x32xf32> to vector<8x32xf32>
    %110 = vector.extract_strided_slice %101 {offsets = [64, 0], sizes = [8, 32], strides = [1, 1]} : vector<128x32xf32> to vector<8x32xf32>
    %111 = vector.extract_strided_slice %101 {offsets = [72, 0], sizes = [8, 32], strides = [1, 1]} : vector<128x32xf32> to vector<8x32xf32>
    %112 = vector.extract_strided_slice %101 {offsets = [80, 0], sizes = [8, 32], strides = [1, 1]} : vector<128x32xf32> to vector<8x32xf32>
    %113 = vector.extract_strided_slice %101 {offsets = [88, 0], sizes = [8, 32], strides = [1, 1]} : vector<128x32xf32> to vector<8x32xf32>
    %114 = vector.extract_strided_slice %101 {offsets = [96, 0], sizes = [8, 32], strides = [1, 1]} : vector<128x32xf32> to vector<8x32xf32>
    %115 = vector.extract_strided_slice %101 {offsets = [104, 0], sizes = [8, 32], strides = [1, 1]} : vector<128x32xf32> to vector<8x32xf32>
    %116 = vector.extract_strided_slice %101 {offsets = [112, 0], sizes = [8, 32], strides = [1, 1]} : vector<128x32xf32> to vector<8x32xf32>
    %117 = vector.extract_strided_slice %101 {offsets = [120, 0], sizes = [8, 32], strides = [1, 1]} : vector<128x32xf32> to vector<8x32xf32>
    %118 = tpu.concatenate %102, %103, %104, %105, %106, %107, %108, %109, %110, %111, %112, %113, %114, %115, %116, %117 in 1 : vector<8x32xf32>, vector<8x32xf32>, vector<8x32xf32>, vector<8x32xf32>, vector<8x32xf32>, vector<8x32xf32>, vector<8x32xf32>, vector<8x32xf32>, vector<8x32xf32>, vector<8x32xf32>, vector<8x32xf32>, vector<8x32xf32>, vector<8x32xf32>, vector<8x32xf32>, vector<8x32xf32>, vector<8x32xf32> -> vector<8x512xf32>
    %c0_81 = arith.constant 0 : index
    %c0_82 = arith.constant 0 : index
    %119 = vector.load %arg8[%c0_81, %c0_82] : memref<512x120xf32, #tpu.memory_space<vmem>>, vector<512x120xf32>
    %cst_83 = arith.constant dense<0.000000e+00> : vector<8x120xf32>
    %120 = tpu.matmul %118, %119, %cst_83 {dimension_numbers = #tpu.dot_dimension_numbers<[1], [0], [0], [1], [0, 0, 1, 1], [], []>} : vector<8x512xf32>, vector<512x120xf32>, vector<8x120xf32> -> vector<8x120xf32>
    %c0_84 = arith.constant 0 : index
    %c0_85 = arith.constant 0 : index
    %121 = vector.load %arg9[%c0_84, %c0_85] : memref<1x120xf32, #tpu.memory_space<vmem>>, vector<1x120xf32>
    %122 = vector.broadcast %121 : vector<1x120xf32> to vector<8x120xf32>
    %123 = arith.addf %120, %122 : vector<8x120xf32>
    %cst_86 = arith.constant 0.000000e+00 : f32
    %124 = vector.broadcast %cst_86 : f32 to vector<8x120xf32>
    %125 = arith.maximumf %123, %124 : vector<8x120xf32>
    %c0_87 = arith.constant 0 : index
    %c0_88 = arith.constant 0 : index
    %126 = vector.load %arg10[%c0_87, %c0_88] : memref<120x84xf32, #tpu.memory_space<vmem>>, vector<120x84xf32>
    %cst_89 = arith.constant dense<0.000000e+00> : vector<8x84xf32>
    %127 = tpu.matmul %125, %126, %cst_89 {dimension_numbers = #tpu.dot_dimension_numbers<[1], [0], [0], [1], [0, 0, 1, 1], [], []>} : vector<8x120xf32>, vector<120x84xf32>, vector<8x84xf32> -> vector<8x84xf32>
    %c0_90 = arith.constant 0 : index
    %c0_91 = arith.constant 0 : index
    %128 = vector.load %arg11[%c0_90, %c0_91] : memref<1x84xf32, #tpu.memory_space<vmem>>, vector<1x84xf32>
    %129 = vector.broadcast %128 : vector<1x84xf32> to vector<8x84xf32>
    %130 = arith.addf %127, %129 : vector<8x84xf32>
    %cst_92 = arith.constant 0.000000e+00 : f32
    %131 = vector.broadcast %cst_92 : f32 to vector<8x84xf32>
    %132 = arith.maximumf %130, %131 : vector<8x84xf32>
    %c0_93 = arith.constant 0 : index
    %c0_94 = arith.constant 0 : index
    %133 = vector.load %arg12[%c0_93, %c0_94] : memref<84x128xf32, #tpu.memory_space<vmem>>, vector<84x128xf32>
    %cst_95 = arith.constant dense<0.000000e+00> : vector<8x128xf32>
    %134 = tpu.matmul %132, %133, %cst_95 {dimension_numbers = #tpu.dot_dimension_numbers<[1], [0], [0], [1], [0, 0, 1, 1], [], []>} : vector<8x84xf32>, vector<84x128xf32>, vector<8x128xf32> -> vector<8x128xf32>
    %c0_96 = arith.constant 0 : index
    %c0_97 = arith.constant 0 : index
    %135 = vector.load %arg13[%c0_96, %c0_97] : memref<1x128xf32, #tpu.memory_space<vmem>>, vector<1x128xf32>
    %136 = vector.broadcast %135 : vector<1x128xf32> to vector<8x128xf32>
    %137 = arith.addf %134, %136 : vector<8x128xf32>
    %c0_98 = arith.constant 0 : index
    %c0_99 = arith.constant 0 : index
    %c0_100 = arith.constant 0 : index
    %138 = vector.load %arg14[%c0_98, %c0_99, %c0_100] : memref<1x8x128xf32, #tpu.memory_space<vmem>>, vector<1x8x128xf32>
    %139 = vector.shape_cast %138 : vector<1x8x128xf32> to vector<8x128xf32>
    %140 = vector.shape_cast %137 : vector<8x128xf32> to vector<1x8x128xf32>
    tpu.vector_store %arg14[%c0_98, %c0_99, %c0_100], %140 {strides = array<i32>} : memref<1x8x128xf32, #tpu.memory_space<vmem>>, vector<1x8x128xf32>,
    return
  }
  func.func @transform_0(%arg0: i32) -> (i32, i32, i32) {
    %c0_i32 = arith.constant 0 : i32
    %c0_i32_0 = arith.constant 0 : i32
    %c0_i32_1 = arith.constant 0 : i32
    return %arg0, %c0_i32, %c0_i32_0 : i32, i32, i32
  }
  func.func @transform_1(%arg0: i32) -> (i32, i32, i32) {
    %c0_i32 = arith.constant 0 : i32
    %c0_i32_0 = arith.constant 0 : i32
    %c0_i32_1 = arith.constant 0 : i32
    %c0_i32_2 = arith.constant 0 : i32
    return %c0_i32, %c0_i32_0, %c0_i32_1 : i32, i32, i32
  }
  func.func @transform_2(%arg0: i32) -> (i32, i32) {
    %c0_i32 = arith.constant 0 : i32
    %c0_i32_0 = arith.constant 0 : i32
    %c0_i32_1 = arith.constant 0 : i32
    return %c0_i32, %c0_i32_0 : i32, i32
  }
  func.func @transform_3(%arg0: i32) -> (i32, i32, i32) {
    %c0_i32 = arith.constant 0 : i32
    %c0_i32_0 = arith.constant 0 : i32
    %c0_i32_1 = arith.constant 0 : i32
    %c0_i32_2 = arith.constant 0 : i32
    return %c0_i32, %c0_i32_0, %c0_i32_1 : i32, i32, i32
  }
  func.func @transform_4(%arg0: i32) -> (i32, i32) {
    %c0_i32 = arith.constant 0 : i32
    %c0_i32_0 = arith.constant 0 : i32
    %c0_i32_1 = arith.constant 0 : i32
    return %c0_i32, %c0_i32_0 : i32, i32
  }
  func.func @transform_5(%arg0: i32) -> (i32, i32) {
    %c0_i32 = arith.constant 0 : i32
    %c0_i32_0 = arith.constant 0 : i32
    %c0_i32_1 = arith.constant 0 : i32
    return %c0_i32, %c0_i32_0 : i32, i32
  }
  func.func @transform_6(%arg0: i32) -> (i32, i32) {
    %c0_i32 = arith.constant 0 : i32
    %c0_i32_0 = arith.constant 0 : i32
    %c0_i32_1 = arith.constant 0 : i32
    return %c0_i32, %c0_i32_0 : i32, i32
  }
  func.func @transform_7(%arg0: i32) -> (i32, i32) {
    %c0_i32 = arith.constant 0 : i32
    %c0_i32_0 = arith.constant 0 : i32
    %c0_i32_1 = arith.constant 0 : i32
    return %c0_i32, %c0_i32_0 : i32, i32
  }
  func.func @transform_8(%arg0: i32) -> (i32, i32) {
    %c0_i32 = arith.constant 0 : i32
    %c0_i32_0 = arith.constant 0 : i32
    %c0_i32_1 = arith.constant 0 : i32
    return %c0_i32, %c0_i32_0 : i32, i32
  }
  func.func @transform_9(%arg0: i32) -> (i32, i32) {
    %c0_i32 = arith.constant 0 : i32
    %c0_i32_0 = arith.constant 0 : i32
    %c0_i32_1 = arith.constant 0 : i32
    return %c0_i32, %c0_i32_0 : i32, i32
  }
  func.func @transform_10(%arg0: i32) -> (i32, i32) {
    %c0_i32 = arith.constant 0 : i32
    %c0_i32_0 = arith.constant 0 : i32
    %c0_i32_1 = arith.constant 0 : i32
    return %c0_i32, %c0_i32_0 : i32, i32
  }
  func.func @transform_11(%arg0: i32) -> (i32, i32) {
    %c0_i32 = arith.constant 0 : i32
    %c0_i32_0 = arith.constant 0 : i32
    %c0_i32_1 = arith.constant 0 : i32
    return %c0_i32, %c0_i32_0 : i32, i32
  }
  func.func @transform_12(%arg0: i32) -> (i32, i32) {
    %c0_i32 = arith.constant 0 : i32
    %c0_i32_0 = arith.constant 0 : i32
    %c0_i32_1 = arith.constant 0 : i32
    return %c0_i32, %c0_i32_0 : i32, i32
  }
  func.func @transform_13(%arg0: i32) -> (i32, i32, i32) {
    %c0_i32 = arith.constant 0 : i32
    %c0_i32_0 = arith.constant 0 : i32
    %c0_i32_1 = arith.constant 0 : i32
    return %arg0, %c0_i32, %c0_i32_0 : i32, i32, i32
  }
}

</mosaic_0001>

<bundles_post_ra>
// kernel: lenet_forward.1
= control target key start
LH: loop header
LB: loop body
LE: loop exit
PB: predicated region body
PF: predicated region fallthrough
CT: control target
= control target key end

     0   :  { %s19366_s0 = inlined_call_operand.vmem [shape: f32[2,24,1024], index: 0, kind: input, shape index: {}]   ;;  %s19367_s1 = inlined_call_operand.vmem [shape: f32[5,48,120], index: 1, kind: input, shape index: {}]   ;;  %s19368_s2 = inlined_call_operand.vmem [shape: f32[48,1], index: 2, kind: input, shape index: {}]   ;;  %s19369_s3 = inlined_call_operand.vmem [shape: f32[5,128,240], index: 3, kind: input, shape index: {}]   ;;  %s19370_s4 = inlined_call_operand.vmem [shape: f32[128,1], index: 4, kind: input, shape index: {}]   ;;  %s19371_s5 = inlined_call_operand.vmem [shape: f32[859,256], index: 5, kind: input, shape index: {}]   ;;  %s19372_s6 = inlined_call_operand.vmem [shape: f32[144,32], index: 6, kind: input, shape index: {}]   ;;  %s19373_s7 = inlined_call_operand.vmem [shape: f32[512,120], index: 7, kind: input, shape index: {}]   ;;  %s19374_s8 = inlined_call_operand.vmem [shape: f32[1,120], index: 8, kind: input, shape index: {}]   ;;  %s19375_s9 = inlined_call_operand.vmem [shape: f32[120,84], index: 9, kind: input, shape index: {}]   ;;  %s19376_s10 = inlined_call_operand.vmem [shape: f32[1,84], index: 10, kind: input, shape index: {}]   ;;  %s19377_s11 = inlined_call_operand.vmem [shape: f32[84,128], index: 11, kind: input, shape index: {}]   ;;  %s19378_s12 = inlined_call_operand.vmem [shape: f32[1,128], index: 12, kind: input, shape index: {}]   ;;  %s19379_s13 = inlined_call_operand.hbm [shape: f32[2,8,128], index: 13, kind: output, shape index: {}]  }
   0x1   :  { %19523 = sst [smem:[#allocation82_spill]] %s19366_s0 }
   0x2   :  { %19524 = sst [smem:[#allocation83_spill]] %s19367_s1 }
   0x3   :  { %19525 = sst [smem:[#allocation84_spill]] %s19368_s2 }
   0x4   :  { %18 = vsyncpa [#allocation5], 0 }
   0x5   :  { %20 = vsyncpa [#allocation5 + $0x1], 0  ;;  %s11504_s25 = smov 0   ;;  %s11506_s26 = smov 0  }
   0x6   :  { %s11508_s27 = smov 0   ;;  %s11510_s28 = smov 0  }
   0x7 LB: > { %s11525_s29 = sadd.s32 4294967295, %s11419_s28   ;;  %s9844_s30 = sadd.s32 4294967294, %s11419_s28   ;;  %s11419_s28 = sphi %s11510_s28, %s19959_s28   ;;  %s11415_s27 = sphi %s11508_s27, %s19958_s27   ;;  %s11411_s26 = sphi %s11506_s26, %s19957_s26   ;;  %s11407_s25 = sphi %s11504_s25, %s19956_s25  }
   0x8   : > { %s11529_s14 = sadd.s32 1, %s11419_s28   ;;  %s311_s15 = sadd.s32 1, %s11415_s27 }
   0x9   : > { %s308_s16 = ssub.s32 %s11419_s28, %s11529_s14  ;;  %p321_p0 = scmp.ne.s32.totalorder %s11415_s27, %s11411_s26 }
   0xa   : > { %p309_p1 = scmp.eq.s32.totalorder %s308_s16, 0  ;;  %p322_p2 = scmp.eq.s32.totalorder %s11525_s29, 1 }
   0xb   : > { %p327_p3 = scmp.ne.s32.totalorder %s11411_s26, %s11407_s25  ;;  %p328_p4 = scmp.eq.s32.totalorder %s9844_s30, 1 }
   0xc   : > { %s11540_s17 = scalar_select %p309_p1, %s11415_s27, %s311_s15  }
   0xd   : > { %p11542_p5 = por %p322_p2, %p321_p0  ;;  %p11546_p6 = por %p328_p4, %p327_p3 }
   0xe   : > { %19526 = sst [smem:[#allocation7_spill]] %s11540_s17  ;;  %p9847_p7 = scmp.ge.s32.totalorder %s11419_s28, 1 }
   0xf   : > { %p390_p8 = scmp.lt.s32.totalorder %s11419_s28, 3 }
  0x11   : > { %p391_p9 = pnand %p9847_p7, %p390_p8 }
  0x13   : > { %394 = sbr.rel (%p391_p9) target bundleno = 4070 (0xfe6), region = 72 }
  0x18   : > { %p434_p10 = scmp.lt.s32.totalorder %s11525_s29, 1  ;;  %s19529_s0 = sld [smem:[#allocation82_spill]]  ;;  %vm470_vm0 = vcmask 1014784   ;;  %vm796_vm1 = vcmask 1022976   ;;  %vm678_vm2 = vcmask 1031168   ;;  %vm560_vm3 = vcmask 1039360  }
  0x19   : > { %s19415_s30 = smov 124   ;;  %s19413_s15 = smov 125   ;;  %vm1476_vm4 = vcmask 785408   ;;  %vm1687_vm5 = vcmask 982016   ;;  %vm2767_vm6 = vcmask 523264   ;;  %vm3683_vm7 = vcmask 261120  }
  0x1a   : > { %s435_s20 = scalar_select %p434_p10, %s11525_s29, 1  ;;  %vm5664_vm8 = vcmask 1042432   ;;  %vm5645_vm9 = vcmask 744448   ;;  %vm6076_vm10 = vcmask 916480   ;;  %vm7766_vm11 = vcmask 654336  }
  0x1b   : > { %s19440_s16 = smov 126   ;;  %s19438_s22 = smov 64   ;;  %vm9112_vm12 = vcmask 130048   ;;  %vm11432_vm13 = vmmov 0   ;;  %vm9696_vm14 = vcmask 1043456   ;;  %vm9692_vm15 = vcmask 687104  }
  0x1c   : > { %s10692_s21 = smul.u32 192, %s435_s20  ;;  %s19445_s20 = smov 127  }
  0x1d   : > { %s19530_s1 = sld [smem:[#allocation83_spill]]  ;;  %s19417_s23 = smov 32  }
  0x1e   : > { %s11557_s24 = scalar_lea.vmem %s19529_s0, %s10692_s21  ;;  %s19443_s21 = smov 96  }
  0x1f   : > { %v11560_v0 = vld [vmem:[%s11557_s24 + $0x98] sm:$0xff]  ;;  %v11563_v1 = vld [vmem:[%s11557_s24 + $0x88] sm:$0xff]  ;;  %v11566_v2 = vld [vmem:[%s11557_s24 + $0xa0] sm:$0xff]  ;;  %s19644_s2 = sld [smem:[#allocation84_spill]]  ;;  %s19867_s0 = smov 64  }
  0x20   : > { %904 = vrot.lane.b32.xlu1 %v11560_v0, %s19415_s30  ;;  %483 = vst [vmem:[#allocation2 + $0x98] sm:$0xff] %v11560_v0  ;;  %900 = vrot.lane.b32.xlu0 %v11563_v1, %s19415_s30  ;;  %481 = vst [vmem:[#allocation2 + $0x88] sm:$0xff] %v11563_v1  ;;  %v11576_v3 = vld [vmem:[%s11557_s24 + $0x90] sm:$0xff]  ;;  %v11579_v4 = vld [vmem:[%s11557_s24 + $0xa8] sm:$0xff] }
  0x21   : > { %484 = vst [vmem:[#allocation2 + $0xa0] sm:$0xff] %v11566_v2  ;;  %482 = vst [vmem:[#allocation2 + $0x90] sm:$0xff] %v11576_v3  ;;  %v11584_v5 = vld [vmem:[%s11557_s24 + $0x80] sm:$0xff]  ;;  %v11587_v6 = vld [vmem:[%s11557_s24 + $0x50] sm:$0xff] }
  0x22   : > { %485 = vst [vmem:[#allocation2 + $0xa8] sm:$0xff] %v11579_v4  ;;  %v11590_v7 = vld [vmem:[%s11557_s24 + $0x48] sm:$0xff]  ;;  %480 = vst [vmem:[#allocation2 + $0x80] sm:$0xff] %v11584_v5  ;;  %v11596_v8 = vld [vmem:[%s11557_s24 + $0x60] sm:$0xff] }
  0x23   : > { %474 = vst [vmem:[#allocation2 + $0x50] sm:$0xff] %v11587_v6  ;;  %473 = vst [vmem:[#allocation2 + $0x48] sm:$0xff] %v11590_v7  ;;  %v11599_v9 = vld [vmem:[%s11557_s24 + $0x58] sm:$0xff]  ;;  %v11602_v10 = vld [vmem:[%s11557_s24 + $0x68] sm:$0xff] }
  0x24   : > { %476 = vst [vmem:[#allocation2 + $0x60] sm:$0xff] %v11596_v8  ;;  %475 = vst [vmem:[#allocation2 + $0x58] sm:$0xff] %v11599_v9  ;;  %v11608_v11 = vld [vmem:[%s11557_s24 + $0x40] sm:$0xff]  ;;  %v11611_v12 = vld [vmem:[%s11557_s24 + $0x10] sm:$0xff]  ;;  %906 = vrot.lane.b32.xlu1 %v11566_v2, %s19415_s30  ;;  %902 = vrot.lane.b32.xlu0 %v11576_v3, %s19415_s30 }
  0x25   : > { %477 = vst [vmem:[#allocation2 + $0x68] sm:$0xff] %v11602_v10  ;;  %v11614_v13 = vld [vmem:[%s11557_s24 + $0x8] sm:$0xff]  ;;  %472 = vst [vmem:[#allocation2 + $0x40] sm:$0xff] %v11608_v11  ;;  %v11624_v14 = vld [vmem:[%s11557_s24 + $0x20] sm:$0xff] }
  0x26   : > { %465 = vst [vmem:[#allocation2 + $0x10] sm:$0xff] %v11611_v12  ;;  %464 = vst [vmem:[#allocation2 + $0x8] sm:$0xff] %v11614_v13  ;;  %v11627_v15 = vld [vmem:[%s11557_s24 + $0x18] sm:$0xff]  ;;  %v11632_v16 = vld [vmem:[%s11557_s24 + $0x28] sm:$0xff] }
  0x27   : > { %467 = vst [vmem:[#allocation2 + $0x20] sm:$0xff] %v11624_v14  ;;  %466 = vst [vmem:[#allocation2 + $0x18] sm:$0xff] %v11627_v15  ;;  %v11635_v17 = vld [vmem:[%s11557_s24] sm:$0xff]  ;;  %v11648_v18 = vld [vmem:[%s11557_s24 + $0xb0] sm:$0xff] }
  0x28   : > { %468 = vst [vmem:[#allocation2 + $0x28] sm:$0xff] %v11632_v16  ;;  %463 = vst [vmem:[#allocation2] sm:$0xff] %v11635_v17  ;;  %908 = vrot.lane.b32.xlu0 %v11579_v4, %s19415_s30  ;;  %898 = vrot.lane.b32.xlu1 %v11584_v5, %s19415_s30  ;;  %v11651_v19 = vld [vmem:[%s11557_s24 + $0xb8] sm:$0xff]  ;;  %v11661_v20 = vld [vmem:[%s11557_s24 + $0x70] sm:$0xff] }
  0x29   : > { %486 = vst [vmem:[#allocation2 + $0xb0] sm:$0xff] %v11648_v18  ;;  %487 = vst.msk [vmem:[#allocation2 + $0xb8] sm:$0xff] %vm470_vm0, %v11651_v19  ;;  %v11664_v21 = vld [vmem:[%s11557_s24 + $0x78] sm:$0xff]  ;;  %v11674_v22 = vld [vmem:[%s11557_s24 + $0x30] sm:$0xff] }
  0x2a   : > { %478 = vst [vmem:[#allocation2 + $0x70] sm:$0xff] %v11661_v20  ;;  %479 = vst.msk [vmem:[#allocation2 + $0x78] sm:$0xff] %vm470_vm0, %v11664_v21  ;;  %v11677_v23 = vld [vmem:[%s11557_s24 + $0x38] sm:$0xff]  ;;  %s11431_s24 = smov 80  }
  0x2b   : > { %469 = vst [vmem:[#allocation2 + $0x30] sm:$0xff] %v11674_v22  ;;  %471 = vst.msk [vmem:[#allocation2 + $0x38] sm:$0xff] %vm470_vm0, %v11677_v23 }
  0x2c   : > { %886 = vrot.lane.b32.xlu1 %v11587_v6, %s19415_s30  ;;  %884 = vrot.lane.b32.xlu0 %v11590_v7, %s19415_s30 }
  0x30   : > { %890 = vrot.lane.b32.xlu1 %v11596_v8, %s19415_s30  ;;  %888 = vrot.lane.b32.xlu0 %v11599_v9, %s19415_s30 }
  0x34   : > { %892 = vrot.lane.b32.xlu0 %v11602_v10, %s19415_s30  ;;  %882 = vrot.lane.b32.xlu1 %v11608_v11, %s19415_s30 }
  0x38   : > { %870 = vrot.lane.b32.xlu1 %v11611_v12, %s19415_s30  ;;  %868 = vrot.lane.b32.xlu0 %v11614_v13, %s19415_s30 }
  0x3c   : > { %874 = vrot.lane.b32.xlu1 %v11624_v14, %s19415_s30  ;;  %872 = vrot.lane.b32.xlu0 %v11627_v15, %s19415_s30 }
  0x40   : > { %876 = vrot.lane.b32.xlu0 %v11632_v16, %s19415_s30  ;;  %866 = vrot.lane.b32.xlu1 %v11635_v17, %s19415_s30 }
  0x44   : > { %782 = vrot.lane.b32.xlu0 %v11563_v1, %s19413_s15  ;;  %784 = vrot.lane.b32.xlu1 %v11576_v3, %s19413_s15 }
  0x48   : > { %786 = vrot.lane.b32.xlu0 %v11560_v0, %s19413_s15  ;;  %788 = vrot.lane.b32.xlu1 %v11566_v2, %s19413_s15 }
  0x4c   : > { %790 = vrot.lane.b32.xlu0 %v11579_v4, %s19413_s15  ;;  %780 = vrot.lane.b32.xlu1 %v11584_v5, %s19413_s15 }
  0x50   : > { %766 = vrot.lane.b32.xlu0 %v11590_v7, %s19413_s15  ;;  %768 = vrot.lane.b32.xlu1 %v11587_v6, %s19413_s15 }
  0x54   : > { %770 = vrot.lane.b32.xlu0 %v11599_v9, %s19413_s15  ;;  %772 = vrot.lane.b32.xlu1 %v11596_v8, %s19413_s15 }
  0x58   : > { %774 = vrot.lane.b32.xlu0 %v11602_v10, %s19413_s15  ;;  %764 = vrot.lane.b32.xlu1 %v11608_v11, %s19413_s15 }
  0x5c   : > { %750 = vrot.lane.b32.xlu0 %v11614_v13, %s19413_s15  ;;  %752 = vrot.lane.b32.xlu1 %v11611_v12, %s19413_s15 }
  0x60   : > { %754 = vrot.lane.b32.xlu0 %v11627_v15, %s19413_s15  ;;  %756 = vrot.lane.b32.xlu1 %v11624_v14, %s19413_s15 }
  0x64   : > { %758 = vrot.lane.b32.xlu0 %v11632_v16, %s19413_s15  ;;  %748 = vrot.lane.b32.xlu1 %v11635_v17, %s19413_s15 }
  0x68   : > { %664 = vrot.lane.b32.xlu0 %v11563_v1, %s19440_s16  ;;  %666 = vrot.lane.b32.xlu1 %v11576_v3, %s19440_s16 }
  0x6c   : > { %668 = vrot.lane.b32.xlu0 %v11560_v0, %s19440_s16  ;;  %670 = vrot.lane.b32.xlu1 %v11566_v2, %s19440_s16 }
  0x70   : > { %672 = vrot.lane.b32.xlu0 %v11579_v4, %s19440_s16  ;;  %662 = vrot.lane.b32.xlu1 %v11584_v5, %s19440_s16 }
  0x74   : > { %648 = vrot.lane.b32.xlu0 %v11590_v7, %s19440_s16  ;;  %650 = vrot.lane.b32.xlu1 %v11587_v6, %s19440_s16 }
  0x78   : > { %652 = vrot.lane.b32.xlu0 %v11599_v9, %s19440_s16  ;;  %654 = vrot.lane.b32.xlu1 %v11596_v8, %s19440_s16 }
  0x7c   : > { %656 = vrot.lane.b32.xlu0 %v11602_v10, %s19440_s16  ;;  %646 = vrot.lane.b32.xlu1 %v11608_v11, %s19440_s16 }
  0x80   : > { %632 = vrot.lane.b32.xlu0 %v11614_v13, %s19440_s16  ;;  %634 = vrot.lane.b32.xlu1 %v11611_v12, %s19440_s16 }
  0x84   : > { %636 = vrot.lane.b32.xlu0 %v11627_v15, %s19440_s16  ;;  %638 = vrot.lane.b32.xlu1 %v11624_v14, %s19440_s16 }
  0x88   : > { %640 = vrot.lane.b32.xlu0 %v11632_v16, %s19440_s16  ;;  %630 = vrot.lane.b32.xlu1 %v11635_v17, %s19440_s16 }
  0x8c   : > { %546 = vrot.lane.b32.xlu0 %v11563_v1, %s19445_s20  ;;  %548 = vrot.lane.b32.xlu1 %v11576_v3, %s19445_s20 }
  0x90   : > { %550 = vrot.lane.b32.xlu0 %v11560_v0, %s19445_s20  ;;  %552 = vrot.lane.b32.xlu1 %v11566_v2, %s19445_s20 }
  0x92   : > { %v905_v24 = vpop.permute.xlu1 %904  ;;  %v901_v25 = vpop.permute.xlu0 %900 }
  0x94   : > { %554 = vrot.lane.b32.xlu0 %v11579_v4, %s19445_s20  ;;  %544 = vrot.lane.b32.xlu1 %v11584_v5, %s19445_s20 }
  0x96   : > { %v907_v26 = vpop.permute.xlu1 %906  ;;  %v903_v27 = vpop.permute.xlu0 %902 }
  0x97   : > { %v11779_v28 = vsel %vm470_vm0, %v905_v24, %v907_v26  ;;  %v11782_v29 = vsel %vm470_vm0, %v901_v25, %v903_v27  ;;  %v11785_v30 = vsel %vm470_vm0, %v903_v27, %v905_v24 }
  0x98   : > { %978 = vst [vmem:[#allocation2 + $0x398] sm:$0xff] %v11779_v28  ;;  %976 = vst [vmem:[#allocation2 + $0x388] sm:$0xff] %v11782_v29  ;;  %530 = vrot.lane.b32.xlu0 %v11590_v7, %s19445_s20  ;;  %532 = vrot.lane.b32.xlu1 %v11587_v6, %s19445_s20 }
  0x99   : > { %977 = vst [vmem:[#allocation2 + $0x390] sm:$0xff] %v11785_v30 }
  0x9a   : > { %v11794_v31 = vpop.permute.xlu0 %908  ;;  %v899_v32 = vpop.permute.xlu1 %898 }
  0x9b   : > { %v11798_v33 = vsel %vm470_vm0, %v907_v26, %v11794_v31  ;;  %v11801_v34 = vsel %vm470_vm0, %v899_v32, %v901_v25 }
  0x9c   : > { %979 = vst [vmem:[#allocation2 + $0x3a0] sm:$0xff] %v11798_v33  ;;  %975 = vst [vmem:[#allocation2 + $0x380] sm:$0xff] %v11801_v34  ;;  %534 = vrot.lane.b32.xlu0 %v11599_v9, %s19445_s20  ;;  %536 = vrot.lane.b32.xlu1 %v11596_v8, %s19445_s20 }
  0x9e   : > { %v887_v35 = vpop.permute.xlu1 %886  ;;  %v885_v36 = vpop.permute.xlu0 %884 }
  0x9f   : > { %v11810_v37 = vsel %vm470_vm0, %v885_v36, %v887_v35 }
  0xa0   : > { %968 = vst [vmem:[#allocation2 + $0x348] sm:$0xff] %v11810_v37  ;;  %538 = vrot.lane.b32.xlu0 %v11602_v10, %s19445_s20  ;;  %528 = vrot.lane.b32.xlu1 %v11608_v11, %s19445_s20 }
  0xa2   : > { %v891_v38 = vpop.permute.xlu1 %890  ;;  %v889_v39 = vpop.permute.xlu0 %888 }
  0xa3   : > { %v11818_v40 = vsel %vm470_vm0, %v887_v35, %v889_v39  ;;  %v11821_v41 = vsel %vm470_vm0, %v889_v39, %v891_v38 }
  0xa4   : > { %969 = vst [vmem:[#allocation2 + $0x350] sm:$0xff] %v11818_v40  ;;  %970 = vst [vmem:[#allocation2 + $0x358] sm:$0xff] %v11821_v41  ;;  %514 = vrot.lane.b32.xlu0 %v11614_v13, %s19445_s20  ;;  %516 = vrot.lane.b32.xlu1 %v11611_v12, %s19445_s20 }
  0xa6   : > { %v11829_v42 = vpop.permute.xlu0 %892  ;;  %v883_v43 = vpop.permute.xlu1 %882 }
  0xa7   : > { %v11833_v44 = vsel %vm470_vm0, %v891_v38, %v11829_v42  ;;  %v11836_v45 = vsel %vm470_vm0, %v883_v43, %v885_v36 }
  0xa8   : > { %971 = vst [vmem:[#allocation2 + $0x360] sm:$0xff] %v11833_v44  ;;  %967 = vst [vmem:[#allocation2 + $0x340] sm:$0xff] %v11836_v45  ;;  %518 = vrot.lane.b32.xlu0 %v11627_v15, %s19445_s20  ;;  %520 = vrot.lane.b32.xlu1 %v11624_v14, %s19445_s20 }
  0xaa   : > { %v871_v46 = vpop.permute.xlu1 %870  ;;  %v869_v47 = vpop.permute.xlu0 %868 }
  0xab   : > { %v11845_v48 = vsel %vm470_vm0, %v869_v47, %v871_v46 }
  0xac   : > { %960 = vst [vmem:[#allocation2 + $0x308] sm:$0xff] %v11845_v48  ;;  %522 = vrot.lane.b32.xlu0 %v11632_v16, %s19445_s20  ;;  %512 = vrot.lane.b32.xlu1 %v11635_v17, %s19445_s20 }
  0xae   : > { %v875_v49 = vpop.permute.xlu1 %874  ;;  %v873_v50 = vpop.permute.xlu0 %872 }
  0xaf   : > { %v11853_v51 = vsel %vm470_vm0, %v871_v46, %v873_v50  ;;  %v11856_v52 = vsel %vm470_vm0, %v873_v50, %v875_v49 }
  0xb0   : > { %961 = vst [vmem:[#allocation2 + $0x310] sm:$0xff] %v11853_v51  ;;  %962 = vst [vmem:[#allocation2 + $0x318] sm:$0xff] %v11856_v52  ;;  %910 = vrot.lane.b32.xlu0 %v11648_v18, %s19415_s30  ;;  %912 = vrot.lane.b32.xlu1 %v11651_v19, %s19415_s30 }
  0xb2   : > { %v11864_v53 = vpop.permute.xlu0 %876  ;;  %v867_v54 = vpop.permute.xlu1 %866 }
  0xb3   : > { %v11868_v55 = vsel %vm470_vm0, %v875_v49, %v11864_v53  ;;  %v11871_v56 = vsel %vm470_vm0, %v867_v54, %v869_v47 }
  0xb4   : > { %963 = vst [vmem:[#allocation2 + $0x320] sm:$0xff] %v11868_v55  ;;  %959 = vst [vmem:[#allocation2 + $0x300] sm:$0xff] %v11871_v56  ;;  %894 = vrot.lane.b32.xlu0 %v11661_v20, %s19415_s30  ;;  %896 = vrot.lane.b32.xlu1 %v11664_v21, %s19415_s30 }
  0xb6   : > { %v783_v57 = vpop.permute.xlu0 %782  ;;  %v785_v58 = vpop.permute.xlu1 %784 }
  0xb7   : > { %v11880_v59 = vsel %vm796_vm1, %v783_v57, %v785_v58 }
  0xb8   : > { %859 = vst [vmem:[#allocation2 + $0x2c8] sm:$0xff] %v11880_v59  ;;  %878 = vrot.lane.b32.xlu0 %v11674_v22, %s19415_s30  ;;  %880 = vrot.lane.b32.xlu1 %v11677_v23, %s19415_s30  ;;  %s10233_s30 = sshll.u32 %s11525_s29, 7 }
  0xba   : > { %v787_v60 = vpop.permute.xlu0 %786  ;;  %v789_v61 = vpop.permute.xlu1 %788 }
  0xbb   : > { %v11888_v62 = vsel %vm796_vm1, %v785_v58, %v787_v60  ;;  %v11891_v63 = vsel %vm796_vm1, %v787_v60, %v789_v61 }
  0xbc   : > { %860 = vst [vmem:[#allocation2 + $0x2d0] sm:$0xff] %v11888_v62  ;;  %861 = vst [vmem:[#allocation2 + $0x2d8] sm:$0xff] %v11891_v63  ;;  %792 = vrot.lane.b32.xlu0 %v11648_v18, %s19413_s15  ;;  %794 = vrot.lane.b32.xlu1 %v11651_v19, %s19413_s15 }
  0xbe   : > { %v11899_v0 = vpop.permute.xlu0 %790  ;;  %v781_v1 = vpop.permute.xlu1 %780 }
  0xbf   : > { %v11903_v2 = vsel %vm796_vm1, %v789_v61, %v11899_v0  ;;  %v11906_v3 = vsel %vm796_vm1, %v781_v1, %v783_v57 }
  0xc0   : > { %862 = vst [vmem:[#allocation2 + $0x2e0] sm:$0xff] %v11903_v2  ;;  %858 = vst [vmem:[#allocation2 + $0x2c0] sm:$0xff] %v11906_v3  ;;  %776 = vrot.lane.b32.xlu0 %v11661_v20, %s19413_s15  ;;  %778 = vrot.lane.b32.xlu1 %v11664_v21, %s19413_s15 }
  0xc2   : > { %v767_v4 = vpop.permute.xlu0 %766  ;;  %v769_v5 = vpop.permute.xlu1 %768 }
  0xc3   : > { %v11915_v6 = vsel %vm796_vm1, %v767_v4, %v769_v5 }
  0xc4   : > { %851 = vst [vmem:[#allocation2 + $0x288] sm:$0xff] %v11915_v6  ;;  %760 = vrot.lane.b32.xlu0 %v11674_v22, %s19413_s15  ;;  %762 = vrot.lane.b32.xlu1 %v11677_v23, %s19413_s15  ;;  %s19757_s15 = smov 127  }
  0xc6   : > { %v771_v7 = vpop.permute.xlu0 %770  ;;  %v773_v8 = vpop.permute.xlu1 %772 }
  0xc7   : > { %v11923_v9 = vsel %vm796_vm1, %v769_v5, %v771_v7  ;;  %v11926_v10 = vsel %vm796_vm1, %v771_v7, %v773_v8 }
  0xc8   : > { %852 = vst [vmem:[#allocation2 + $0x290] sm:$0xff] %v11923_v9  ;;  %853 = vst [vmem:[#allocation2 + $0x298] sm:$0xff] %v11926_v10  ;;  %674 = vrot.lane.b32.xlu0 %v11648_v18, %s19440_s16  ;;  %676 = vrot.lane.b32.xlu1 %v11651_v19, %s19440_s16 }
  0xca   : > { %v11934_v11 = vpop.permute.xlu0 %774  ;;  %v765_v12 = vpop.permute.xlu1 %764 }
  0xcb   : > { %v11938_v13 = vsel %vm796_vm1, %v773_v8, %v11934_v11  ;;  %v11941_v14 = vsel %vm796_vm1, %v765_v12, %v767_v4 }
  0xcc   : > { %854 = vst [vmem:[#allocation2 + $0x2a0] sm:$0xff] %v11938_v13  ;;  %850 = vst [vmem:[#allocation2 + $0x280] sm:$0xff] %v11941_v14  ;;  %658 = vrot.lane.b32.xlu0 %v11661_v20, %s19440_s16  ;;  %660 = vrot.lane.b32.xlu1 %v11664_v21, %s19440_s16 }
  0xce   : > { %v751_v15 = vpop.permute.xlu0 %750  ;;  %v753_v16 = vpop.permute.xlu1 %752 }
  0xcf   : > { %v11950_v17 = vsel %vm796_vm1, %v751_v15, %v753_v16 }
  0xd0   : > { %843 = vst [vmem:[#allocation2 + $0x248] sm:$0xff] %v11950_v17  ;;  %642 = vrot.lane.b32.xlu0 %v11674_v22, %s19440_s16  ;;  %644 = vrot.lane.b32.xlu1 %v11677_v23, %s19440_s16 }
  0xd2   : > { %v755_v24 = vpop.permute.xlu0 %754  ;;  %v757_v25 = vpop.permute.xlu1 %756 }
  0xd3   : > { %v11958_v26 = vsel %vm796_vm1, %v753_v16, %v755_v24  ;;  %v11961_v27 = vsel %vm796_vm1, %v755_v24, %v757_v25 }
  0xd4   : > { %844 = vst [vmem:[#allocation2 + $0x250] sm:$0xff] %v11958_v26  ;;  %845 = vst [vmem:[#allocation2 + $0x258] sm:$0xff] %v11961_v27  ;;  %556 = vrot.lane.b32.xlu0 %v11648_v18, %s19445_s20  ;;  %558 = vrot.lane.b32.xlu1 %v11651_v19, %s19445_s20 }
  0xd6   : > { %v11969_v32 = vpop.permute.xlu0 %758  ;;  %v749_v35 = vpop.permute.xlu1 %748 }
  0xd7   : > { %v11973_v36 = vsel %vm796_vm1, %v757_v25, %v11969_v32  ;;  %v11976_v38 = vsel %vm796_vm1, %v749_v35, %v751_v15 }
  0xd8   : > { %846 = vst [vmem:[#allocation2 + $0x260] sm:$0xff] %v11973_v36  ;;  %842 = vst [vmem:[#allocation2 + $0x240] sm:$0xff] %v11976_v38  ;;  %540 = vrot.lane.b32.xlu0 %v11661_v20, %s19445_s20  ;;  %542 = vrot.lane.b32.xlu1 %v11664_v21, %s19445_s20 }
  0xda   : > { %v665_v18 = vpop.permute.xlu0 %664  ;;  %v667_v19 = vpop.permute.xlu1 %666 }
  0xdb   : > { %v11985_v39 = vsel %vm678_vm2, %v665_v18, %v667_v19 }
  0xdc   : > { %741 = vst [vmem:[#allocation2 + $0x208] sm:$0xff] %v11985_v39  ;;  %524 = vrot.lane.b32.xlu0 %v11674_v22, %s19445_s20  ;;  %526 = vrot.lane.b32.xlu1 %v11677_v23, %s19445_s20 }
  0xde   : > { %v669_v43 = vpop.permute.xlu0 %668  ;;  %v671_v46 = vpop.permute.xlu1 %670 }
  0xdf   : > { %v11993_v20 = vsel %vm678_vm2, %v667_v19, %v669_v43  ;;  %v11996_v21 = vsel %vm678_vm2, %v669_v43, %v671_v46 }
  0xe0   : > { %742 = vst [vmem:[#allocation2 + $0x210] sm:$0xff] %v11993_v20  ;;  %743 = vst [vmem:[#allocation2 + $0x218] sm:$0xff] %v11996_v21  ;;  %1462 = vrot.lane.b32.xlu0 %v11782_v29, %s19443_s21  ;;  %1464 = vrot.lane.b32.xlu1 %v11785_v30, %s19443_s21 }
  0xe2   : > { %v12004_v22 = vpop.permute.xlu0 %672  ;;  %v663_v23 = vpop.permute.xlu1 %662 }
  0xe3   : > { %v12008_v47 = vsel %vm678_vm2, %v671_v46, %v12004_v22  ;;  %v12011_v49 = vsel %vm678_vm2, %v663_v23, %v665_v18 }
  0xe4   : > { %744 = vst [vmem:[#allocation2 + $0x220] sm:$0xff] %v12008_v47  ;;  %740 = vst [vmem:[#allocation2 + $0x200] sm:$0xff] %v12011_v49  ;;  %1466 = vrot.lane.b32.xlu0 %v11779_v28, %s19443_s21  ;;  %1468 = vrot.lane.b32.xlu1 %v11798_v33, %s19443_s21 }
  0xe6   : > { %v649_v29 = vpop.permute.xlu0 %648  ;;  %v651_v30 = vpop.permute.xlu1 %650 }
  0xe7   : > { %v12020_v50 = vsel %vm678_vm2, %v649_v29, %v651_v30 }
  0xe8   : > { %733 = vst [vmem:[#allocation2 + $0x1c8] sm:$0xff] %v12020_v50  ;;  %1460 = vrot.lane.b32.xlu0 %v11801_v34, %s19443_s21  ;;  %1446 = vrot.lane.b32.xlu1 %v11810_v37, %s19443_s21 }
  0xea   : > { %v653_v54 = vpop.permute.xlu0 %652  ;;  %v655_v57 = vpop.permute.xlu1 %654 }
  0xeb   : > { %v12028_v28 = vsel %vm678_vm2, %v651_v30, %v653_v54  ;;  %v12031_v33 = vsel %vm678_vm2, %v653_v54, %v655_v57 }
  0xec   : > { %734 = vst [vmem:[#allocation2 + $0x1d0] sm:$0xff] %v12028_v28  ;;  %735 = vst [vmem:[#allocation2 + $0x1d8] sm:$0xff] %v12031_v33  ;;  %1448 = vrot.lane.b32.xlu0 %v11818_v40, %s19443_s21  ;;  %1450 = vrot.lane.b32.xlu1 %v11821_v41, %s19443_s21 }
  0xee   : > { %v12039_v34 = vpop.permute.xlu0 %656  ;;  %v647_v37 = vpop.permute.xlu1 %646 }
  0xef   : > { %v12043_v58 = vsel %vm678_vm2, %v655_v57, %v12039_v34  ;;  %v12046_v60 = vsel %vm678_vm2, %v647_v37, %v649_v29 }
  0xf0   : > { %736 = vst [vmem:[#allocation2 + $0x1e0] sm:$0xff] %v12043_v58  ;;  %732 = vst [vmem:[#allocation2 + $0x1c0] sm:$0xff] %v12046_v60  ;;  %1452 = vrot.lane.b32.xlu0 %v11833_v44, %s19443_s21  ;;  %1444 = vrot.lane.b32.xlu1 %v11836_v45, %s19443_s21 }
  0xf2   : > { %v633_v40 = vpop.permute.xlu0 %632  ;;  %v635_v41 = vpop.permute.xlu1 %634 }
  0xf3   : > { %v12055_v61 = vsel %vm678_vm2, %v633_v40, %v635_v41 }
  0xf4   : > { %725 = vst [vmem:[#allocation2 + $0x188] sm:$0xff] %v12055_v61  ;;  %1430 = vrot.lane.b32.xlu0 %v11845_v48, %s19443_s21  ;;  %1432 = vrot.lane.b32.xlu1 %v11853_v51, %s19443_s21 }
  0xf6   : > { %v637_v1 = vpop.permute.xlu0 %636  ;;  %v639_v4 = vpop.permute.xlu1 %638 }
  0xf7   : > { %v12063_v44 = vsel %vm678_vm2, %v635_v41, %v637_v1  ;;  %v12066_v45 = vsel %vm678_vm2, %v637_v1, %v639_v4 }
  0xf8   : > { %726 = vst [vmem:[#allocation2 + $0x190] sm:$0xff] %v12063_v44  ;;  %727 = vst [vmem:[#allocation2 + $0x198] sm:$0xff] %v12066_v45  ;;  %1434 = vrot.lane.b32.xlu0 %v11856_v52, %s19443_s21  ;;  %1436 = vrot.lane.b32.xlu1 %v11868_v55, %s19443_s21 }
  0xfa   : > { %v12074_v48 = vpop.permute.xlu0 %640  ;;  %v631_v51 = vpop.permute.xlu1 %630 }
  0xfb   : > { %v12078_v5 = vsel %vm678_vm2, %v639_v4, %v12074_v48  ;;  %v12081_v7 = vsel %vm678_vm2, %v631_v51, %v633_v40 }
  0xfc   : > { %728 = vst [vmem:[#allocation2 + $0x1a0] sm:$0xff] %v12078_v5  ;;  %724 = vst [vmem:[#allocation2 + $0x180] sm:$0xff] %v12081_v7  ;;  %1428 = vrot.lane.b32.xlu0 %v11871_v56, %s19443_s21  ;;  %1414 = vrot.lane.b32.xlu1 %v11880_v59, %s19443_s21 }
  0xfe   : > { %v547_v52 = vpop.permute.xlu0 %546  ;;  %v549_v55 = vpop.permute.xlu1 %548 }
  0xff   : > { %v12090_v8 = vsel %vm560_vm3, %v547_v52, %v549_v55 }
 0x100   : > { %623 = vst [vmem:[#allocation2 + $0x148] sm:$0xff] %v12090_v8  ;;  %1416 = vrot.lane.b32.xlu0 %v11888_v62, %s19443_s21  ;;  %1418 = vrot.lane.b32.xlu1 %v11891_v63, %s19443_s21 }
 0x102   : > { %v551_v12 = vpop.permute.xlu0 %550  ;;  %v553_v15 = vpop.permute.xlu1 %552 }
 0x103   : > { %v12098_v56 = vsel %vm560_vm3, %v549_v55, %v551_v12  ;;  %v12101_v59 = vsel %vm560_vm3, %v551_v12, %v553_v15 }
 0x104   : > { %624 = vst [vmem:[#allocation2 + $0x150] sm:$0xff] %v12098_v56  ;;  %625 = vst [vmem:[#allocation2 + $0x158] sm:$0xff] %v12101_v59  ;;  %1420 = vrot.lane.b32.xlu0 %v11903_v2, %s19443_s21  ;;  %1412 = vrot.lane.b32.xlu1 %v11906_v3, %s19443_s21 }
 0x106   : > { %v12109_v62 = vpop.permute.xlu0 %554  ;;  %v545_v63 = vpop.permute.xlu1 %544 }
 0x107   : > { %v12113_v16 = vsel %vm560_vm3, %v553_v15, %v12109_v62  ;;  %v12116_v24 = vsel %vm560_vm3, %v545_v63, %v547_v52 }
 0x108   : > { %626 = vst [vmem:[#allocation2 + $0x160] sm:$0xff] %v12113_v16  ;;  %622 = vst [vmem:[#allocation2 + $0x140] sm:$0xff] %v12116_v24  ;;  %1400 = vrot.lane.b32.xlu1 %v11923_v9, %s19443_s21  ;;  %1398 = vrot.lane.b32.xlu0 %v11915_v6, %s19443_s21 }
 0x10a   : > { %v531_v2 = vpop.permute.xlu0 %530  ;;  %v533_v3 = vpop.permute.xlu1 %532 }
 0x10b   : > { %v12125_v25 = vsel %vm560_vm3, %v531_v2, %v533_v3 }
 0x10c   : > { %615 = vst [vmem:[#allocation2 + $0x108] sm:$0xff] %v12125_v25  ;;  %1404 = vrot.lane.b32.xlu1 %v11938_v13, %s19443_s21  ;;  %1402 = vrot.lane.b32.xlu0 %v11926_v10, %s19443_s21 }
 0x10e   : > { %v535_v35 = vpop.permute.xlu0 %534  ;;  %v537_v18 = vpop.permute.xlu1 %536 }
 0x10f   : > { %v12133_v9 = vsel %vm560_vm3, %v533_v3, %v535_v35  ;;  %v12136_v6 = vsel %vm560_vm3, %v535_v35, %v537_v18 }
 0x110   : > { %616 = vst [vmem:[#allocation2 + $0x110] sm:$0xff] %v12133_v9  ;;  %617 = vst [vmem:[#allocation2 + $0x118] sm:$0xff] %v12136_v6  ;;  %1396 = vrot.lane.b32.xlu0 %v11941_v14, %s19443_s21  ;;  %1382 = vrot.lane.b32.xlu1 %v11950_v17, %s19443_s21 }
 0x112   : > { %v12144_v13 = vpop.permute.xlu0 %538  ;;  %v529_v10 = vpop.permute.xlu1 %528 }
 0x113   : > { %v12148_v19 = vsel %vm560_vm3, %v537_v18, %v12144_v13  ;;  %v12151_v43 = vsel %vm560_vm3, %v529_v10, %v531_v2 }
 0x114   : > { %618 = vst [vmem:[#allocation2 + $0x120] sm:$0xff] %v12148_v19  ;;  %614 = vst [vmem:[#allocation2 + $0x100] sm:$0xff] %v12151_v43  ;;  %1384 = vrot.lane.b32.xlu0 %v11958_v26, %s19443_s21  ;;  %1386 = vrot.lane.b32.xlu1 %v11961_v27, %s19443_s21 }
 0x116   : > { %v515_v14 = vpop.permute.xlu0 %514  ;;  %v517_v17 = vpop.permute.xlu1 %516 }
 0x117   : > { %v12160_v46 = vsel %vm560_vm3, %v515_v14, %v517_v17 }
 0x118   : > { %607 = vst [vmem:[#allocation2 + $0xc8] sm:$0xff] %v12160_v46  ;;  %1388 = vrot.lane.b32.xlu0 %v11973_v36, %s19443_s21  ;;  %1380 = vrot.lane.b32.xlu1 %v11976_v38, %s19443_s21 }
 0x11a   : > { %v519_v23 = vpop.permute.xlu0 %518  ;;  %v521_v29 = vpop.permute.xlu1 %520 }
 0x11b   : > { %v12168_v26 = vsel %vm560_vm3, %v517_v17, %v519_v23  ;;  %v12171_v27 = vsel %vm560_vm3, %v519_v23, %v521_v29 }
 0x11c   : > { %608 = vst [vmem:[#allocation2 + $0xd0] sm:$0xff] %v12168_v26  ;;  %609 = vst [vmem:[#allocation2 + $0xd8] sm:$0xff] %v12171_v27  ;;  %1368 = vrot.lane.b32.xlu1 %v11993_v20, %s19443_s21  ;;  %1366 = vrot.lane.b32.xlu0 %v11985_v39, %s19443_s21 }
 0x11e   : > { %v12179_v36 = vpop.permute.xlu0 %522  ;;  %v513_v38 = vpop.permute.xlu1 %512 }
 0x11f   : > { %v12183_v30 = vsel %vm560_vm3, %v521_v29, %v12179_v36  ;;  %v12186_v54 = vsel %vm560_vm3, %v513_v38, %v515_v14  ;;  %v1006_v29 = vld [vmem:[#allocation2 + $0x98] sm:$0xff] }
 0x120   : > { %610 = vst [vmem:[#allocation2 + $0xe0] sm:$0xff] %v12183_v30  ;;  %606 = vst [vmem:[#allocation2 + $0xc0] sm:$0xff] %v12186_v54  ;;  %1372 = vrot.lane.b32.xlu1 %v12008_v47, %s19443_s21  ;;  %1370 = vrot.lane.b32.xlu0 %v11996_v21, %s19443_s21 }
 0x122   : > { %v911_v39 = vpop.permute.xlu0 %910  ;;  %v913_v20 = vpop.permute.xlu1 %912 }
 0x123   : > { %v12196_v57 = vsel %vm470_vm0, %v11794_v31, %v911_v39  ;;  %v12199_v37 = vsel %vm470_vm0, %v911_v39, %v913_v20  ;;  %982 = vst.msk [vmem:[#allocation2 + $0x3b8] sm:$0xff] %vm470_vm0, %v913_v20 }
 0x124   : > { %980 = vst [vmem:[#allocation2 + $0x3a8] sm:$0xff] %v12196_v57  ;;  %981 = vst [vmem:[#allocation2 + $0x3b0] sm:$0xff] %v12199_v37  ;;  %1364 = vrot.lane.b32.xlu0 %v12011_v49, %s19443_s21  ;;  %1350 = vrot.lane.b32.xlu1 %v12020_v50, %s19443_s21 }
 0x126   : > { %v895_v21 = vpop.permute.xlu0 %894  ;;  %v897_v47 = vpop.permute.xlu1 %896 }
 0x127   : > { %v12210_v31 = vsel %vm470_vm0, %v11829_v42, %v895_v21  ;;  %v12213_v40 = vsel %vm470_vm0, %v895_v21, %v897_v47  ;;  %974 = vst.msk [vmem:[#allocation2 + $0x378] sm:$0xff] %vm470_vm0, %v897_v47  ;;  %v998_v47 = vld [vmem:[#allocation2 + $0x50] sm:$0xff] }
 0x128   : > { %972 = vst [vmem:[#allocation2 + $0x368] sm:$0xff] %v12210_v31  ;;  %973 = vst [vmem:[#allocation2 + $0x370] sm:$0xff] %v12213_v40  ;;  %1352 = vrot.lane.b32.xlu0 %v12028_v28, %s19443_s21  ;;  %1354 = vrot.lane.b32.xlu1 %v12031_v33, %s19443_s21 }
 0x12a   : > { %v879_v49 = vpop.permute.xlu0 %878  ;;  %v881_v50 = vpop.permute.xlu1 %880 }
 0x12b   : > { %v12224_v42 = vsel %vm470_vm0, %v11864_v53, %v879_v49  ;;  %v12227_v41 = vsel %vm470_vm0, %v879_v49, %v881_v50  ;;  %966 = vst.msk [vmem:[#allocation2 + $0x338] sm:$0xff] %vm470_vm0, %v881_v50  ;;  %v999_v49 = vld [vmem:[#allocation2 + $0x58] sm:$0xff] }
 0x12c   : > { %964 = vst [vmem:[#allocation2 + $0x328] sm:$0xff] %v12224_v42  ;;  %965 = vst [vmem:[#allocation2 + $0x330] sm:$0xff] %v12227_v41  ;;  %1356 = vrot.lane.b32.xlu0 %v12043_v58, %s19443_s21  ;;  %1348 = vrot.lane.b32.xlu1 %v12046_v60, %s19443_s21 }
 0x12e   : > { %v793_v28 = vpop.permute.xlu0 %792  ;;  %v795_v33 = vpop.permute.xlu1 %794 }
 0x12f   : > { %v12238_v53 = vsel %vm796_vm1, %v11899_v0, %v793_v28  ;;  %v12241_v1 = vsel %vm796_vm1, %v793_v28, %v795_v33  ;;  %865 = vst.msk [vmem:[#allocation2 + $0x2f8] sm:$0xff] %vm470_vm0, %v795_v33 }
 0x130   : > { %863 = vst [vmem:[#allocation2 + $0x2e8] sm:$0xff] %v12238_v53  ;;  %864 = vst [vmem:[#allocation2 + $0x2f0] sm:$0xff] %v12241_v1  ;;  %1336 = vrot.lane.b32.xlu1 %v12063_v44, %s19443_s21  ;;  %1334 = vrot.lane.b32.xlu0 %v12055_v61, %s19443_s21 }
 0x132   : > { %v777_v58 = vpop.permute.xlu0 %776  ;;  %v779_v60 = vpop.permute.xlu1 %778 }
 0x133   : > { %v12252_v0 = vsel %vm796_vm1, %v11934_v11, %v777_v58  ;;  %v12255_v4 = vsel %vm796_vm1, %v777_v58, %v779_v60  ;;  %857 = vst.msk [vmem:[#allocation2 + $0x2b8] sm:$0xff] %vm470_vm0, %v779_v60 }
 0x134   : > { %855 = vst [vmem:[#allocation2 + $0x2a8] sm:$0xff] %v12252_v0  ;;  %856 = vst [vmem:[#allocation2 + $0x2b0] sm:$0xff] %v12255_v4  ;;  %1340 = vrot.lane.b32.xlu1 %v12078_v5, %s19443_s21  ;;  %1338 = vrot.lane.b32.xlu0 %v12066_v45, %s19443_s21 }
 0x136   : > { %v761_v61 = vpop.permute.xlu0 %760  ;;  %v763_v44 = vpop.permute.xlu1 %762 }
 0x137   : > { %v12266_v11 = vsel %vm796_vm1, %v11969_v32, %v761_v61  ;;  %v12269_v51 = vsel %vm796_vm1, %v761_v61, %v763_v44  ;;  %849 = vst.msk [vmem:[#allocation2 + $0x278] sm:$0xff] %vm470_vm0, %v763_v44  ;;  %v1000_v61 = vld [vmem:[#allocation2 + $0x60] sm:$0xff] }
 0x138   : > { %847 = vst [vmem:[#allocation2 + $0x268] sm:$0xff] %v12266_v11  ;;  %848 = vst [vmem:[#allocation2 + $0x270] sm:$0xff] %v12269_v51  ;;  %1332 = vrot.lane.b32.xlu0 %v12081_v7, %s19443_s21  ;;  %1318 = vrot.lane.b32.xlu1 %v12090_v8, %s19443_s21  ;;  %v996_v44 = vld [vmem:[#allocation2 + $0x40] sm:$0xff] }
 0x13a   : > { %v675_v45 = vpop.permute.xlu0 %674  ;;  %v677_v5 = vpop.permute.xlu1 %676 }
 0x13b   : > { %v12280_v32 = vsel %vm678_vm2, %v12004_v22, %v675_v45  ;;  %v12283_v52 = vsel %vm678_vm2, %v675_v45, %v677_v5  ;;  %747 = vst.msk [vmem:[#allocation2 + $0x238] sm:$0xff] %vm470_vm0, %v677_v5 }
 0x13c   : > { %745 = vst [vmem:[#allocation2 + $0x228] sm:$0xff] %v12280_v32  ;;  %746 = vst [vmem:[#allocation2 + $0x230] sm:$0xff] %v12283_v52  ;;  %1320 = vrot.lane.b32.xlu0 %v12098_v56, %s19443_s21  ;;  %1322 = vrot.lane.b32.xlu1 %v12101_v59, %s19443_s21 }
 0x13e   : > { %v659_v7 = vpop.permute.xlu0 %658  ;;  %v661_v55 = vpop.permute.xlu1 %660 }
 0x13f   : > { %v12294_v22 = vsel %vm678_vm2, %v12039_v34, %v659_v7  ;;  %v12297_v8 = vsel %vm678_vm2, %v659_v7, %v661_v55  ;;  %739 = vst.msk [vmem:[#allocation2 + $0x1f8] sm:$0xff] %vm470_vm0, %v661_v55  ;;  %v990_v55 = vld [vmem:[#allocation2 + $0x8] sm:$0xff] }
 0x140   : > { %737 = vst [vmem:[#allocation2 + $0x1e8] sm:$0xff] %v12294_v22  ;;  %738 = vst [vmem:[#allocation2 + $0x1f0] sm:$0xff] %v12297_v8  ;;  %1324 = vrot.lane.b32.xlu0 %v12113_v16, %s19443_s21  ;;  %1316 = vrot.lane.b32.xlu1 %v12116_v24, %s19443_s21 }
 0x142   : > { %v643_v12 = vpop.permute.xlu0 %642  ;;  %v645_v15 = vpop.permute.xlu1 %644 }
 0x143   : > { %v12308_v34 = vsel %vm678_vm2, %v12074_v48, %v643_v12  ;;  %v12311_v56 = vsel %vm678_vm2, %v643_v12, %v645_v15  ;;  %731 = vst.msk [vmem:[#allocation2 + $0x1b8] sm:$0xff] %vm470_vm0, %v645_v15  ;;  %v991_v12 = vld [vmem:[#allocation2 + $0x10] sm:$0xff] }
 0x144   : > { %729 = vst [vmem:[#allocation2 + $0x1a8] sm:$0xff] %v12308_v34  ;;  %730 = vst [vmem:[#allocation2 + $0x1b0] sm:$0xff] %v12311_v56  ;;  %1304 = vrot.lane.b32.xlu1 %v12133_v9, %s19443_s21  ;;  %1302 = vrot.lane.b32.xlu0 %v12125_v25, %s19443_s21 }
 0x146   : > { %v557_v59 = vpop.permute.xlu0 %556  ;;  %v559_v63 = vpop.permute.xlu1 %558 }
 0x147   : > { %v12322_v48 = vsel %vm560_vm3, %v12109_v62, %v557_v59  ;;  %v12325_v16 = vsel %vm560_vm3, %v557_v59, %v559_v63  ;;  %629 = vst.msk [vmem:[#allocation2 + $0x178] sm:$0xff] %vm470_vm0, %v559_v63 }
 0x148   : > { %627 = vst [vmem:[#allocation2 + $0x168] sm:$0xff] %v12322_v48  ;;  %628 = vst [vmem:[#allocation2 + $0x170] sm:$0xff] %v12325_v16  ;;  %1308 = vrot.lane.b32.xlu1 %v12148_v19, %s19443_s21  ;;  %1306 = vrot.lane.b32.xlu0 %v12136_v6, %s19443_s21  ;;  %v1004_v19 = vld [vmem:[#allocation2 + $0x88] sm:$0xff] }
 0x14a   : > { %v541_v24 = vpop.permute.xlu0 %540  ;;  %v543_v2 = vpop.permute.xlu1 %542 }
 0x14b   : > { %v12336_v62 = vsel %vm560_vm3, %v12144_v13, %v541_v24  ;;  %v12339_v3 = vsel %vm560_vm3, %v541_v24, %v543_v2  ;;  %621 = vst.msk [vmem:[#allocation2 + $0x138] sm:$0xff] %vm470_vm0, %v543_v2  ;;  %v992_v2 = vld [vmem:[#allocation2 + $0x18] sm:$0xff] }
 0x14c   : > { %619 = vst [vmem:[#allocation2 + $0x128] sm:$0xff] %v12336_v62  ;;  %620 = vst [vmem:[#allocation2 + $0x130] sm:$0xff] %v12339_v3  ;;  %1300 = vrot.lane.b32.xlu0 %v12151_v43, %s19443_s21  ;;  %1286 = vrot.lane.b32.xlu1 %v12160_v46, %s19443_s21  ;;  %v1005_v43 = vld [vmem:[#allocation2 + $0x90] sm:$0xff] }
 0x14e   : > { %v525_v25 = vpop.permute.xlu0 %524  ;;  %v527_v35 = vpop.permute.xlu1 %526 }
 0x14f   : > { %v12350_v18 = vsel %vm560_vm3, %v12179_v36, %v525_v25  ;;  %v12353_v9 = vsel %vm560_vm3, %v525_v25, %v527_v35  ;;  %613 = vst.msk [vmem:[#allocation2 + $0xf8] sm:$0xff] %vm470_vm0, %v527_v35  ;;  %v993_v25 = vld [vmem:[#allocation2 + $0x20] sm:$0xff]  ;;  %v19380_v35 = vmov 0.0  }
 0x150   : > { %611 = vst [vmem:[#allocation2 + $0xe8] sm:$0xff] %v12350_v18  ;;  %612 = vst [vmem:[#allocation2 + $0xf0] sm:$0xff] %v12353_v9  ;;  %1288 = vrot.lane.b32.xlu0 %v12168_v26, %s19443_s21  ;;  %1290 = vrot.lane.b32.xlu1 %v12171_v27, %s19443_s21  ;;  %v1007_v26 = vld [vmem:[#allocation2 + $0xa0] sm:$0xff] }
 0x151   : > { %1770 = vmatprep.mubr.f32.mxu0 %v19380_v35  ;;  %1871 = vmatprep.mubr.f32.mxu1 %v19380_v35 }
 0x152   : > { %v1463_v6 = vpop.permute.xlu0 %1462  ;;  %v1465_v13 = vpop.permute.xlu1 %1464 }
 0x153   : > { %v1576_v10 = vsel %vm1476_vm4, %v1463_v6, %v1465_v13 }
 0x154   : > { %1292 = vrot.lane.b32.xlu0 %v12183_v30, %s19443_s21  ;;  %1284 = vrot.lane.b32.xlu1 %v12186_v54, %s19443_s21  ;;  %v1003_v30 = vld [vmem:[#allocation2 + $0x80] sm:$0xff]  ;;  %v997_v54 = vld [vmem:[#allocation2 + $0x48] sm:$0xff] }
 0x155   : > { %1708 = vmatprep.subr.mxu0 %v1576_v10 }
 0x156   : > { %v1467_v14 = vpop.permute.xlu0 %1466  ;;  %v12367_v17 = vpop.permute.xlu1 %1468 }
 0x157   : > { %v1578_v46 = vsel %vm1476_vm4, %v1467_v14, %v12367_v17  ;;  %v1577_v23 = vsel %vm1476_vm4, %v1465_v13, %v1467_v14  ;;  %v989_v14 = vld [vmem:[#allocation2] sm:$0xff] }
 0x158   : > { %1270 = vrot.lane.b32.xlu0 %v1004_v19, %s19443_s21  ;;  %1272 = vrot.lane.b32.xlu1 %v1005_v43, %s19443_s21 }
 0x159   : > { %1809 = vmatprep.subr.mxu1 %v1578_v46 }
 0x15a   : > { %1810 = vmatpush1.msra.mxu1 %v1577_v23  ;;  %v1461_v27 = vpop.permute.xlu0 %1460  ;;  %v1447_v36 = vpop.permute.xlu1 %1446 }
 0x15b   : > { %v1575_v38 = vsel %vm1476_vm4, %v1461_v27, %v1463_v6 }
 0x15c   : > { %1274 = vrot.lane.b32.xlu0 %v1006_v29, %s19443_s21  ;;  %1276 = vrot.lane.b32.xlu1 %v1007_v26, %s19443_s21  ;;  %v1115_v26 = vld [vmem:[#allocation2 + $0x3b8] sm:$0xff] }
 0x15d   : > { %1709 = vmatpush1.msra.mxu0 %v1575_v38 }
 0x15e   : > { %v1449_v39 = vpop.permute.xlu0 %1448  ;;  %v1451_v20 = vpop.permute.xlu1 %1450 }
 0x15f   : > { %v1569_v21 = vsel %vm1476_vm4, %v1447_v36, %v1449_v39  ;;  %v1570_v60 = vsel %vm1476_vm4, %v1449_v39, %v1451_v20 }
 0x160   : > { %1268 = vrot.lane.b32.xlu0 %v1003_v30, %s19443_s21  ;;  %1254 = vrot.lane.b32.xlu1 %v997_v54, %s19443_s21 }
 0x161   : > { %1710 = vmatprep.subr.mxu0 %v1569_v21 }
 0x162   : > { %v12380_v50 = vpop.permute.xlu0 %1452  ;;  %v1445_v28 = vpop.permute.xlu1 %1444 }
 0x163   : > { %v1568_v33 = vsel %vm1476_vm4, %v1445_v28, %v1447_v36  ;;  %v1571_v58 = vsel %vm1476_vm4, %v1451_v20, %v12380_v50  ;;  %v1113_v28 = vld [vmem:[#allocation2 + $0x338] sm:$0xff] }
 0x164   : > { %1256 = vrot.lane.b32.xlu0 %v998_v47, %s19443_s21  ;;  %1258 = vrot.lane.b32.xlu1 %v999_v49, %s19443_s21  ;;  %v1114_v47 = vld [vmem:[#allocation2 + $0x378] sm:$0xff] }
 0x165   : > { %1711 = vmatpush1.msra.mxu0 %v1568_v33  ;;  %1811 = vmatprep.subr.mxu1 %v1571_v58 }
 0x166   : > { %1812 = vmatpush1.msra.mxu1 %v1570_v60  ;;  %v1431_v45 = vpop.permute.xlu0 %1430  ;;  %v1433_v5 = vpop.permute.xlu1 %1432 }
 0x167   : > { %v1562_v7 = vsel %vm1476_vm4, %v1431_v45, %v1433_v5 }
 0x168   : > { %1260 = vrot.lane.b32.xlu0 %v1000_v61, %s19443_s21  ;;  %1252 = vrot.lane.b32.xlu1 %v996_v44, %s19443_s21 }
 0x169   : > { %1712 = vmatprep.subr.mxu0 %v1562_v7  ;;  %v1111_v7 = vld [vmem:[#allocation2 + $0x2b8] sm:$0xff] }
 0x16a   : > { %v1435_v15 = vpop.permute.xlu0 %1434  ;;  %v12391_v59 = vpop.permute.xlu1 %1436 }
 0x16b   : > { %v1564_v63 = vsel %vm1476_vm4, %v1435_v15, %v12391_v59  ;;  %v1563_v24 = vsel %vm1476_vm4, %v1433_v5, %v1435_v15 }
 0x16c   : > { %1238 = vrot.lane.b32.xlu0 %v990_v55, %s19443_s21  ;;  %1240 = vrot.lane.b32.xlu1 %v991_v12, %s19443_s21 }
 0x16d   : > { %1813 = vmatprep.subr.mxu1 %v1564_v63 }
 0x16e   : > { %1814 = vmatpush1.msra.mxu1 %v1563_v24  ;;  %v1429_v6 = vpop.permute.xlu0 %1428  ;;  %v1415_v13 = vpop.permute.xlu1 %1414 }
 0x16f   : > { %v1561_v10 = vsel %vm1476_vm4, %v1429_v6, %v1431_v45 }
 0x170   : > { %1242 = vrot.lane.b32.xlu0 %v992_v2, %s19443_s21  ;;  %1244 = vrot.lane.b32.xlu1 %v993_v25, %s19443_s21  ;;  %v1110_v25 = vld [vmem:[#allocation2 + $0x278] sm:$0xff] }
 0x171   : > { %1713 = vmatpush1.msra.mxu0 %v1561_v10  ;;  %v1109_v10 = vld [vmem:[#allocation2 + $0x238] sm:$0xff] }
 0x172   : > { %v1417_v19 = vpop.permute.xlu0 %1416  ;;  %v1419_v43 = vpop.permute.xlu1 %1418 }
 0x173   : > { %v1555_v46 = vsel %vm1476_vm4, %v1415_v13, %v1417_v19 }
 0x174   : > { %1470 = vrot.lane.b32.xlu1 %v12196_v57, %s19443_s21  ;;  %1714 = vmatprep.subr.mxu0 %v1555_v46  ;;  %v1556_v57 = vsel %vm1476_vm4, %v1417_v19, %v1419_v43 }
 0x175   : > { %1236 = vrot.lane.b32.xlu0 %v989_v14, %s19443_s21 }
 0x176   : > { %v12407_v23 = vpop.permute.xlu0 %1420  ;;  %v1413_v29 = vpop.permute.xlu1 %1412 }
 0x177   : > { %v1554_v27 = vsel %vm1476_vm4, %v1413_v29, %v1415_v13  ;;  %v1557_v36 = vsel %vm1476_vm4, %v1419_v43, %v12407_v23 }
 0x178   : > { %1474 = vrot.lane.b32.xlu1 %v1115_v26, %s19443_s21  ;;  %1715 = vmatpush1.msra.mxu0 %v1554_v27  ;;  %v1108_v26 = vld [vmem:[#allocation2 + $0x1f8] sm:$0xff] }
 0x179   : > { %1815 = vmatprep.subr.mxu1 %v1557_v36  ;;  %1472 = vrot.lane.b32.xlu0 %v12199_v37, %s19443_s21  ;;  %v1107_v36 = vld [vmem:[#allocation2 + $0x1b8] sm:$0xff] }
 0x17a   : > { %1816 = vmatpush1.msra.mxu1 %v1556_v57  ;;  %v1399_v38 = vpop.permute.xlu0 %1398  ;;  %v1401_v30 = vpop.permute.xlu1 %1400 }
 0x17b   : > { %v1548_v54 = vsel %vm1476_vm4, %v1399_v38, %v1401_v30 }
 0x17c   : > { %1456 = vrot.lane.b32.xlu1 %v12213_v40, %s19443_s21  ;;  %1716 = vmatprep.subr.mxu0 %v1548_v54 }
 0x17d   : > { %1454 = vrot.lane.b32.xlu0 %v12210_v31, %s19443_s21 }
 0x17e   : > { %v1403_v39 = vpop.permute.xlu0 %1402  ;;  %v12421_v20 = vpop.permute.xlu1 %1404 }
 0x17f   : > { %v1550_v37 = vsel %vm1476_vm4, %v1403_v39, %v12421_v20  ;;  %v1549_v21 = vsel %vm1476_vm4, %v1401_v30, %v1403_v39 }
 0x180   : > { %1438 = vrot.lane.b32.xlu1 %v12224_v42, %s19443_s21  ;;  %1817 = vmatprep.subr.mxu1 %v1550_v37 }
 0x181   : > { %1458 = vrot.lane.b32.xlu0 %v1114_v47, %s19443_s21  ;;  %1818 = vmatpush1.msra.mxu1 %v1549_v21 }
 0x182   : > { %v1397_v40 = vpop.permute.xlu0 %1396  ;;  %v1383_v49 = vpop.permute.xlu1 %1382 }
 0x183   : > { %v1547_v31 = vsel %vm1476_vm4, %v1397_v40, %v1399_v38  ;;  %v1105_v40 = vld [vmem:[#allocation2 + $0x138] sm:$0xff] }
 0x184   : > { %1442 = vrot.lane.b32.xlu1 %v1113_v28, %s19443_s21  ;;  %1717 = vmatpush1.msra.mxu0 %v1547_v31 }
 0x185   : > { %1440 = vrot.lane.b32.xlu0 %v12227_v41, %s19443_s21  ;;  %v1112_v41 = vld [vmem:[#allocation2 + $0x2f8] sm:$0xff] }
 0x186   : > { %v1385_v33 = vpop.permute.xlu0 %1384  ;;  %v1387_v58 = vpop.permute.xlu1 %1386 }
 0x187   : > { %v1541_v42 = vsel %vm1476_vm4, %v1383_v49, %v1385_v33 }
 0x188   : > { %1424 = vrot.lane.b32.xlu1 %v12241_v1, %s19443_s21  ;;  %1718 = vmatprep.subr.mxu0 %v1541_v42  ;;  %v1542_v1 = vsel %vm1476_vm4, %v1385_v33, %v1387_v58  ;;  %v1008_v33 = vld [vmem:[#allocation2 + $0xa8] sm:$0xff] }
 0x189   : > { %1422 = vrot.lane.b32.xlu0 %v12238_v53, %s19443_s21 }
 0x18a   : > { %v12438_v60 = vpop.permute.xlu0 %1388  ;;  %v1381_v61 = vpop.permute.xlu1 %1380 }
 0x18b   : > { %v1540_v44 = vsel %vm1476_vm4, %v1381_v61, %v1383_v49  ;;  %v1543_v45 = vsel %vm1476_vm4, %v1387_v58, %v12438_v60 }
 0x18c   : > { %1406 = vrot.lane.b32.xlu1 %v12252_v0, %s19443_s21  ;;  %1719 = vmatpush1.msra.mxu0 %v1540_v44  ;;  %v1104_v44 = vld [vmem:[#allocation2 + $0xf8] sm:$0xff] }
 0x18d   : > { %1819 = vmatprep.subr.mxu1 %v1543_v45  ;;  %1426 = vrot.lane.b32.xlu0 %v1112_v41, %s19443_s21 }
 0x18e   : > { %1820 = vmatpush1.msra.mxu1 %v1542_v1  ;;  %v1367_v53 = vpop.permute.xlu0 %1366  ;;  %v1369_v5 = vpop.permute.xlu1 %1368 }
 0x18f   : > { %v1534_v55 = vsel %vm1476_vm4, %v1367_v53, %v1369_v5 }
 0x190   : > { %1410 = vrot.lane.b32.xlu1 %v1111_v7, %s19443_s21  ;;  %1720 = vmatprep.subr.mxu0 %v1534_v55  ;;  %v1001_v55 = vld [vmem:[#allocation2 + $0x68] sm:$0xff] }
 0x191   : > { %1408 = vrot.lane.b32.xlu0 %v12255_v4, %s19443_s21 }
 0x192   : > { %v1371_v0 = vpop.permute.xlu0 %1370  ;;  %v12451_v12 = vpop.permute.xlu1 %1372 }
 0x193   : > { %v1536_v15 = vsel %vm1476_vm4, %v1371_v0, %v12451_v12  ;;  %v1535_v63 = vsel %vm1476_vm4, %v1369_v5, %v1371_v0 }
 0x194   : > { %1392 = vrot.lane.b32.xlu1 %v12269_v51, %s19443_s21  ;;  %1821 = vmatprep.subr.mxu1 %v1536_v15  ;;  %v994_v15 = vld [vmem:[#allocation2 + $0x28] sm:$0xff] }
 0x195   : > { %1390 = vrot.lane.b32.xlu0 %v12266_v11, %s19443_s21  ;;  %1822 = vmatpush1.msra.mxu1 %v1535_v63 }
 0x196   : > { %v1365_v24 = vpop.permute.xlu0 %1364  ;;  %v1351_v2 = vpop.permute.xlu1 %1350 }
 0x197   : > { %v1533_v4 = vsel %vm1476_vm4, %v1365_v24, %v1367_v53  ;;  %v1002_v53 = vld [vmem:[#allocation2 + $0x70] sm:$0xff] }
 0x198   : > { %1374 = vrot.lane.b32.xlu1 %v12280_v32, %s19443_s21  ;;  %1721 = vmatpush1.msra.mxu0 %v1533_v4 }
 0x199   : > { %1394 = vrot.lane.b32.xlu0 %v1110_v25, %s19443_s21 }
 0x19a   : > { %v1353_v6 = vpop.permute.xlu0 %1352  ;;  %v1355_v13 = vpop.permute.xlu1 %1354 }
 0x19b   : > { %v1527_v51 = vsel %vm1476_vm4, %v1351_v2, %v1353_v6  ;;  %v1528_v14 = vsel %vm1476_vm4, %v1353_v6, %v1355_v13 }
 0x19c   : > { %1378 = vrot.lane.b32.xlu1 %v1109_v10, %s19443_s21  ;;  %1722 = vmatprep.subr.mxu0 %v1527_v51 }
 0x19d   : > { %1376 = vrot.lane.b32.xlu0 %v12283_v52, %s19443_s21 }
 0x19e   : > { %v12468_v11 = vpop.permute.xlu0 %1356  ;;  %v1349_v19 = vpop.permute.xlu1 %1348 }
 0x19f   : > { %v1526_v32 = vsel %vm1476_vm4, %v1349_v19, %v1351_v2  ;;  %v1529_v43 = vsel %vm1476_vm4, %v1355_v13, %v12468_v11  ;;  %v1102_v2 = vld [vmem:[#allocation2 + $0x78] sm:$0xff]  ;;  %v995_v19 = vld [vmem:[#allocation2 + $0x30] sm:$0xff] }
 0x1a0   : > { %1360 = vrot.lane.b32.xlu1 %v12297_v8, %s19443_s21  ;;  %1723 = vmatpush1.msra.mxu0 %v1526_v32  ;;  %v1101_v13 = vld [vmem:[#allocation2 + $0x38] sm:$0xff] }
 0x1a1   : > { %1823 = vmatprep.subr.mxu1 %v1529_v43  ;;  %1358 = vrot.lane.b32.xlu0 %v12294_v22, %s19443_s21 }
 0x1a2   : > { %1824 = vmatpush1.msra.mxu1 %v1528_v14  ;;  %v1335_v52 = vpop.permute.xlu0 %1334  ;;  %v1337_v46 = vpop.permute.xlu1 %1336 }
 0x1a3   : > { %v1520_v29 = vsel %vm1476_vm4, %v1335_v52, %v1337_v46 }
 0x1a4   : > { %1342 = vrot.lane.b32.xlu1 %v12308_v34, %s19443_s21  ;;  %1724 = vmatprep.subr.mxu0 %v1520_v29  ;;  %v12542_v29 = vld [vmem:[#allocation2 + $0x390] sm:$0xff] }
 0x1a5   : > { %1362 = vrot.lane.b32.xlu0 %v1108_v26, %s19443_s21  ;;  %v12546_v26 = vld [vmem:[#allocation2 + $0x388] sm:$0xff] }
 0x1a6   : > { %v1339_v8 = vpop.permute.xlu0 %1338  ;;  %v12482_v27 = vpop.permute.xlu1 %1340 }
 0x1a7   : > { %v1522_v22 = vsel %vm1476_vm4, %v1339_v8, %v12482_v27  ;;  %v1521_v57 = vsel %vm1476_vm4, %v1337_v46, %v1339_v8 }
 0x1a8   : > { %1346 = vrot.lane.b32.xlu1 %v1107_v36, %s19443_s21  ;;  %1825 = vmatprep.subr.mxu1 %v1522_v22 }
 0x1a9   : > { %1344 = vrot.lane.b32.xlu0 %v12311_v56, %s19443_s21  ;;  %1826 = vmatpush1.msra.mxu1 %v1521_v57  ;;  %v1106_v56 = vld [vmem:[#allocation2 + $0x178] sm:$0xff]  ;;  %v12551_v57 = vld [vmem:[#allocation2 + $0x3a0] sm:$0xff] }
 0x1aa   : > { %v1333_v34 = vpop.permute.xlu0 %1332  ;;  %v1319_v38 = vpop.permute.xlu1 %1318 }
 0x1ab   : > { %v1519_v30 = vsel %vm1476_vm4, %v1333_v34, %v1335_v52  ;;  %v12555_v34 = vld [vmem:[#allocation2 + $0x398] sm:$0xff] }
 0x1ac   : > { %1328 = vrot.lane.b32.xlu1 %v12325_v16, %s19443_s21  ;;  %1725 = vmatpush1.msra.mxu0 %v1519_v30 }
 0x1ad   : > { %1326 = vrot.lane.b32.xlu0 %v12322_v48, %s19443_s21 }
 0x1ae   : > { %v1321_v54 = vpop.permute.xlu0 %1320  ;;  %v1323_v39 = vpop.permute.xlu1 %1322 }
 0x1af   : > { %v1513_v37 = vsel %vm1476_vm4, %v1319_v38, %v1321_v54 }
 0x1b0   : > { %1310 = vrot.lane.b32.xlu1 %v12336_v62, %s19443_s21  ;;  %1726 = vmatprep.subr.mxu0 %v1513_v37  ;;  %v1514_v62 = vsel %vm1476_vm4, %v1321_v54, %v1323_v39  ;;  %v12564_v37 = vld [vmem:[#allocation2 + $0x380] sm:$0xff] }
 0x1b1   : > { %1330 = vrot.lane.b32.xlu0 %v1106_v56, %s19443_s21 }
 0x1b2   : > { %v12499_v21 = vpop.permute.xlu0 %1324  ;;  %v1317_v47 = vpop.permute.xlu1 %1316 }
 0x1b3   : > { %v1512_v16 = vsel %vm1476_vm4, %v1317_v47, %v1319_v38  ;;  %v1515_v48 = vsel %vm1476_vm4, %v1323_v39, %v12499_v21  ;;  %v12560_v39 = vld [vmem:[#allocation2 + $0x348] sm:$0xff] }
 0x1b4   : > { %1314 = vrot.lane.b32.xlu1 %v1105_v40, %s19443_s21  ;;  %1727 = vmatpush1.msra.mxu0 %v1512_v16 }
 0x1b5   : > { %1827 = vmatprep.subr.mxu1 %v1515_v48  ;;  %1312 = vrot.lane.b32.xlu0 %v12339_v3, %s19443_s21  ;;  %v12573_v48 = vld [vmem:[#allocation2 + $0x358] sm:$0xff] }
 0x1b6   : > { %1828 = vmatpush1.msra.mxu1 %v1514_v62  ;;  %v1303_v49 = vpop.permute.xlu0 %1302  ;;  %v1305_v28 = vpop.permute.xlu1 %1304  ;;  %v12577_v62 = vld [vmem:[#allocation2 + $0x350] sm:$0xff] }
 0x1b7   : > { %v1506_v31 = vsel %vm1476_vm4, %v1303_v49, %v1305_v28 }
 0x1b8   : > { %1296 = vrot.lane.b32.xlu1 %v12353_v9, %s19443_s21  ;;  %1728 = vmatprep.subr.mxu0 %v1506_v31  ;;  %v1103_v9 = vld [vmem:[#allocation2 + $0xb8] sm:$0xff] }
 0x1b9   : > { %1294 = vrot.lane.b32.xlu0 %v12350_v18, %s19443_s21  ;;  %v1009_v18 = vld [vmem:[#allocation2 + $0xb0] sm:$0xff] }
 0x1ba   : > { %v1307_v58 = vpop.permute.xlu0 %1306  ;;  %v12513_v42 = vpop.permute.xlu1 %1308 }
 0x1bb   : > { %v1508_v3 = vsel %vm1476_vm4, %v1307_v58, %v12513_v42  ;;  %v1507_v61 = vsel %vm1476_vm4, %v1305_v28, %v1307_v58  ;;  %v12583_v58 = vld [vmem:[#allocation2 + $0x340] sm:$0xff] }
 0x1bc   : > { %1278 = vrot.lane.b32.xlu1 %v1008_v33, %s19443_s21  ;;  %1829 = vmatprep.subr.mxu1 %v1508_v3  ;;  %v12587_v3 = vld [vmem:[#allocation2 + $0x360] sm:$0xff] }
 0x1bd   : > { %1298 = vrot.lane.b32.xlu0 %v1104_v44, %s19443_s21  ;;  %1830 = vmatpush1.msra.mxu1 %v1507_v61 }
 0x1be   : > { %v1301_v45 = vpop.permute.xlu0 %1300  ;;  %v1287_v41 = vpop.permute.xlu1 %1286 }
 0x1bf   : > { %v1505_v1 = vsel %vm1476_vm4, %v1301_v45, %v1303_v49 }
 0x1c0   : > { %1282 = vrot.lane.b32.xlu1 %v1103_v9, %s19443_s21  ;;  %1729 = vmatpush1.msra.mxu0 %v1505_v1  ;;  %v12605_v1 = vld [vmem:[#allocation2 + $0x308] sm:$0xff] }
 0x1c1   : > { %1280 = vrot.lane.b32.xlu0 %v1009_v18, %s19443_s21  ;;  %v12601_v18 = vld [vmem:[#allocation2 + $0x310] sm:$0xff] }
 0x1c2   : > { %v1289_v5 = vpop.permute.xlu0 %1288  ;;  %v1291_v7 = vpop.permute.xlu1 %1290 }
 0x1c3   : > { %v1499_v0 = vsel %vm1476_vm4, %v1287_v41, %v1289_v5  ;;  %v1500_v6 = vsel %vm1476_vm4, %v1289_v5, %v1291_v7 }
 0x1c4   : > { %1264 = vrot.lane.b32.xlu1 %v1002_v53, %s19443_s21  ;;  %1730 = vmatprep.subr.mxu0 %v1499_v0 }
 0x1c5   : > { %1262 = vrot.lane.b32.xlu0 %v1001_v55, %s19443_s21  ;;  %v12617_v55 = vld [vmem:[#allocation2 + $0x320] sm:$0xff] }
 0x1c6   : > { %v12526_v63 = vpop.permute.xlu0 %1292  ;;  %v1285_v24 = vpop.permute.xlu1 %1284  ;;  %19531 = vst [vmem:[#allocation8_spill] sm:$0xff] %v12617_v55 }
 0x1c7   : > { %v1498_v4 = vsel %vm1476_vm4, %v1285_v24, %v1287_v41  ;;  %v1501_v25 = vsel %vm1476_vm4, %v1291_v7, %v12526_v63  ;;  %v12599_v41 = vld [vmem:[%s19530_s1 + $0x30] sm:$0xff]  ;;  %v12615_v7 = vld [vmem:[%s19530_s1 + $0x38] sm:$0xff] }
 0x1c8   : > { %1246 = vrot.lane.b32.xlu1 %v994_v15, %s19443_s21  ;;  %1731 = vmatpush1.msra.mxu0 %v1498_v4  ;;  %v12622_v15 = vld [vmem:[#allocation2 + $0x318] sm:$0xff]  ;;  %v12632_v4 = vld [vmem:[#allocation2 + $0x2c8] sm:$0xff] }
 0x1c9   : > { %1831 = vmatprep.subr.mxu1 %v1501_v25  ;;  %1266 = vrot.lane.b32.xlu0 %v1102_v2, %s19443_s21 }
 0x1ca   : > { %1832 = vmatpush1.msra.mxu1 %v1500_v6  ;;  %v1271_v10 = vpop.permute.xlu0 %1270  ;;  %v1273_v51 = vpop.permute.xlu1 %1272 }
 0x1cb   : > { %v1492_v32 = vsel %vm1476_vm4, %v1271_v10, %v1273_v51 }
 0x1cc   : > { %1250 = vrot.lane.b32.xlu1 %v1101_v13, %s19443_s21  ;;  %1732 = vmatprep.subr.mxu0 %v1492_v32  ;;  %v12638_v13 = vld [vmem:[#allocation2 + $0x300] sm:$0xff] }
 0x1cd   : > { %1248 = vrot.lane.b32.xlu0 %v995_v19, %s19443_s21  ;;  %v12649_v32 = vld [vmem:[%s19530_s1 + $0x40] sm:$0xff]  ;;  %s19826_s21 = smov 126  }
 0x1ce   : > { %v1275_v43 = vpop.permute.xlu0 %1274  ;;  %v12537_v14 = vpop.permute.xlu1 %1276 }
 0x1cf   : > { %v1494_v52 = vsel %vm1476_vm4, %v1275_v43, %v12537_v14  ;;  %v1493_v46 = vsel %vm1476_vm4, %v1273_v51, %v1275_v43  ;;  %v12651_v43 = vld [vmem:[#allocation2 + $0x2d8] sm:$0xff] }
 0x1d0   : > { %2755 = vrot.lane.b32.xlu1 %v12542_v29, %s19438_s22  ;;  %1833 = vmatprep.subr.mxu1 %v1494_v52 }
 0x1d1   : > { %2753 = vrot.lane.b32.xlu0 %v12546_v26, %s19438_s22  ;;  %1834 = vmatpush1.msra.mxu1 %v1493_v46  ;;  %v12659_v46 = vld [vmem:[#allocation2 + $0x2d0] sm:$0xff] }
 0x1d2   : > { %v1269_v8 = vpop.permute.xlu0 %1268  ;;  %v1255_v36 = vpop.permute.xlu1 %1254 }
 0x1d3   : > { %v1491_v22 = vsel %vm1476_vm4, %v1269_v8, %v1271_v10 }
 0x1d4   : > { %2759 = vrot.lane.b32.xlu1 %v12551_v57, %s19438_s22  ;;  %1733 = vmatpush1.msra.mxu0 %v1491_v22 }
 0x1d5   : > { %2757 = vrot.lane.b32.xlu0 %v12555_v34, %s19438_s22 }
 0x1d6   : > { %v1257_v38 = vpop.permute.xlu0 %1256  ;;  %v1259_v30 = vpop.permute.xlu1 %1258 }
 0x1d7   : > { %v1485_v54 = vsel %vm1476_vm4, %v1255_v36, %v1257_v38  ;;  %v1486_v49 = vsel %vm1476_vm4, %v1257_v38, %v1259_v30  ;;  %v12677_v38 = vld [vmem:[%s19530_s1 + $0x48] sm:$0xff] }
 0x1d8   : > { %2737 = vrot.lane.b32.xlu1 %v12560_v39, %s19438_s22  ;;  %1734 = vmatprep.subr.mxu0 %v1485_v54 }
 0x1d9   : > { %2751 = vrot.lane.b32.xlu0 %v12564_v37, %s19438_s22 }
 0x1da   : > { %v12568_v56 = vpop.permute.xlu0 %1260  ;;  %v1253_v47 = vpop.permute.xlu1 %1252 }
 0x1db   : > { %v1484_v40 = vsel %vm1476_vm4, %v1253_v47, %v1255_v36  ;;  %v1487_v16 = vsel %vm1476_vm4, %v1259_v30, %v12568_v56  ;;  %v12679_v30 = vld [vmem:[#allocation2 + $0x2e0] sm:$0xff] }
 0x1dc   : > { %2741 = vrot.lane.b32.xlu1 %v12573_v48, %s19438_s22  ;;  %1735 = vmatpush1.msra.mxu0 %v1484_v40  ;;  %19532 = vst [vmem:[#allocation9_spill] sm:$0xff] %v12679_v30  ;;  %v12687_v40 = vld [vmem:[#allocation2 + $0x290] sm:$0xff] }
 0x1dd   : > { %1835 = vmatprep.subr.mxu1 %v1487_v16  ;;  %2739 = vrot.lane.b32.xlu0 %v12577_v62, %s19438_s22 }
 0x1de   : > { %1836 = vmatpush1.msra.mxu1 %v1486_v49  ;;  %v1239_v28 = vpop.permute.xlu0 %1238  ;;  %v1241_v31 = vpop.permute.xlu1 %1240 }
 0x1df   : > { %v1478_v33 = vsel %vm1476_vm4, %v1239_v28, %v1241_v31 }
 0x1e0   : > { %2735 = vrot.lane.b32.xlu1 %v12583_v58, %s19438_s22  ;;  %1736 = vmatprep.subr.mxu0 %v1478_v33  ;;  %v12703_v33 = vld [vmem:[%s19530_s1 + $0x50] sm:$0xff] }
 0x1e1   : > { %2743 = vrot.lane.b32.xlu0 %v12587_v3, %s19438_s22 }
 0x1e2   : > { %v1243_v61 = vpop.permute.xlu0 %1242  ;;  %v12591_v44 = vpop.permute.xlu1 %1244 }
 0x1e3   : > { %v1480_v9 = vsel %vm1476_vm4, %v1243_v61, %v12591_v44  ;;  %v1479_v45 = vsel %vm1476_vm4, %v1241_v31, %v1243_v61 }
 0x1e4   : > { %2723 = vrot.lane.b32.xlu1 %v12601_v18, %s19438_s22  ;;  %1837 = vmatprep.subr.mxu1 %v1480_v9 }
 0x1e5   : > { %2721 = vrot.lane.b32.xlu0 %v12605_v1, %s19438_s22  ;;  %1838 = vmatpush1.msra.mxu1 %v1479_v45  ;;  %v12706_v45 = vld [vmem:[#allocation2 + $0x2a0] sm:$0xff] }
 0x1e6   : > { %v1471_v53 = vpop.permute.xlu1 %1470  ;;  %9862 = vmatmul.mubr.msk.f32.vlgmr.msra.gmra.mxu1 %vm1687_vm5, %v12599_v41  ;;  %19533 = vst [vmem:[#allocation10_spill] sm:$0xff] %v12706_v45 }
 0x1e7   : > { %v1237_v5 = vpop.permute.xlu0 %1236  ;;  %1877 = vmatprep.mubr.f32.mxu1 %v19380_v35  ;;  %v1579_v10 = vsel %vm1476_vm4, %v12367_v17, %v1471_v53 }
 0x1e8   : > { %2727 = vrot.lane.b32.xlu1 %v12617_v55, %s19438_s22  ;;  %v1477_v0 = vsel %vm1476_vm4, %v1237_v5, %v1239_v28  ;;  %v12694_v28 = vld [vmem:[#allocation2 + $0x288] sm:$0xff]  ;;  %v12715_v5 = vld [vmem:[#allocation2 + $0x298] sm:$0xff]  ;;  %v12910_v55 = vld [vmem:[#allocation2 + $0xd0] sm:$0xff] }
 0x1e9   : > { %2725 = vrot.lane.b32.xlu0 %v12622_v15, %s19438_s22  ;;  %1737 = vmatpush1.msra.mxu0 %v1477_v0  ;;  %v12722_v0 = vld [vmem:[%s19530_s1 + $0x58] sm:$0xff] }
 0x1ea   : > { %v1475_v24 = vpop.permute.xlu1 %1474  ;;  %9856 = vmatmul.mubr.msk.f32.vlgmr.msra.gmra.mxu0 %vm1687_vm5, %v12599_v41  ;;  %9863 = vmatmul.mubr.msk.f32.gmra.mxu1 %vm1687_vm5, %v12615_v7 }
 0x1eb   : > { %v1473_v2 = vpop.permute.xlu0 %1472  ;;  %1776 = vmatprep.mubr.f32.mxu0 %v19380_v35  ;;  %1883 = vmatprep.mubr.f32.mxu1 %v19380_v35 }
 0x1ec   : > { %2705 = vrot.lane.b32.xlu1 %v12632_v4, %s19438_s22  ;;  %v1580_v25 = vsel %vm1476_vm4, %v1471_v53, %v1473_v2  ;;  %v1581_v6 = vsel %vm1476_vm4, %v1473_v2, %v1475_v24  ;;  %v12728_v2 = vld [vmem:[#allocation2 + $0x248] sm:$0xff] }
 0x1ed   : > { %2719 = vrot.lane.b32.xlu0 %v12638_v13, %s19438_s22  ;;  %1910 = vmatprep.subr.mxu0 %v1580_v25 }
 0x1ee   : > { %10439 = vmatprep.subr.mxu1 %v1581_v6  ;;  %1911 = vmatpush1.msra.mxu0 %v1579_v10  ;;  %v1457_v51 = vpop.permute.xlu1 %1456 }
 0x1ef   : > { %10440 = vmatpush3.msra.mxu1 %v1581_v6  ;;  %v1455_v19 = vpop.permute.xlu0 %1454  ;;  %9857 = vmatmul.mubr.msk.f32.gmra.mxu0 %vm1687_vm5, %v12615_v7  ;;  %v12735_v6 = vld [vmem:[#allocation2 + $0x280] sm:$0xff] }
 0x1f0   : > { %2709 = vrot.lane.b32.xlu1 %v12651_v43, %s19438_s22  ;;  %v1573_v17 = vsel %vm1476_vm4, %v1455_v19, %v1457_v51  ;;  %v1572_v52 = vsel %vm1476_vm4, %v12380_v50, %v1455_v19  ;;  %1782 = vmatprep.mubr.f32.mxu0 %v19380_v35  ;;  %v12668_v50 = vld [vmem:[#allocation2 + $0x2c0] sm:$0xff]  ;;  %v12742_v19 = vld [vmem:[#allocation2 + $0x258] sm:$0xff] }
 0x1f1   : > { %2707 = vrot.lane.b32.xlu0 %v12659_v46, %s19438_s22  ;;  %1912 = vmatprep.subr.mxu0 %v1573_v17 }
 0x1f2   : > { %1913 = vmatpush1.msra.mxu0 %v1572_v52  ;;  %v1439_v8 = vpop.permute.xlu1 %1438  ;;  %9864 = vmatmul.mubr.msk.f32.gmra.mxu1 %vm1687_vm5, %v12649_v32 }
 0x1f3   : > { %v1459_v36 = vpop.permute.xlu0 %1458  ;;  %9858 = vmatmul.mubr.msk.f32.gmra.mxu0 %vm1687_vm5, %v12649_v32  ;;  %1889 = vmatprep.mubr.f32.mxu1 %v19380_v35  ;;  %v1565_v31 = vsel %vm1476_vm4, %v12391_v59, %v1439_v8 }
 0x1f4   : > { %2703 = vrot.lane.b32.xlu1 %v12668_v50, %s19438_s22  ;;  %v1574_v22 = vsel %vm1476_vm4, %v1457_v51, %v1459_v36  ;;  %1788 = vmatprep.mubr.f32.mxu0 %v19380_v35 }
 0x1f5   : > { %2711 = vrot.lane.b32.xlu0 %v12679_v30, %s19438_s22  ;;  %10441 = vmatprep.subr.mxu1 %v1574_v22  ;;  %v12891_v30 = vld [vmem:[#allocation2 + $0x118] sm:$0xff] }
 0x1f6   : > { %10442 = vmatpush3.msra.mxu1 %v1574_v22  ;;  %v1443_v54 = vpop.permute.xlu1 %1442 }
 0x1f7   : > { %v1441_v47 = vpop.permute.xlu0 %1440  ;;  %9859 = vmatmul.mubr.msk.f32.gmra.mxu0 %vm1687_vm5, %v12677_v38  ;;  %9865 = vmatmul.mubr.msk.f32.gmra.mxu1 %vm1687_vm5, %v12677_v38 }
 0x1f8   : > { %2691 = vrot.lane.b32.xlu1 %v12687_v40, %s19438_s22  ;;  %v1566_v16 = vsel %vm1476_vm4, %v1439_v8, %v1441_v47  ;;  %v1567_v49 = vsel %vm1476_vm4, %v1441_v47, %v1443_v54  ;;  %1895 = vmatprep.mubr.f32.mxu1 %v19380_v35  ;;  %v12750_v8 = vld [vmem:[#allocation2 + $0x250] sm:$0xff]  ;;  %v12756_v47 = vld [vmem:[#allocation2 + $0x240] sm:$0xff] }
 0x1f9   : > { %2689 = vrot.lane.b32.xlu0 %v12694_v28, %s19438_s22  ;;  %1914 = vmatprep.subr.mxu0 %v1566_v16 }
 0x1fa   : > { %10443 = vmatprep.subr.mxu1 %v1567_v49  ;;  %1915 = vmatpush1.msra.mxu0 %v1565_v31  ;;  %v1425_v61 = vpop.permute.xlu1 %1424  ;;  %v12763_v31 = vld [vmem:[#allocation2 + $0x260] sm:$0xff] }
 0x1fb   : > { %10444 = vmatpush3.msra.mxu1 %v1567_v49  ;;  %v1423_v9 = vpop.permute.xlu0 %1422  ;;  %1794 = vmatprep.mubr.f32.mxu0 %v19380_v35  ;;  %19534 = vst [vmem:[#allocation11_spill] sm:$0xff] %v12763_v31 }
 0x1fc   : > { %2695 = vrot.lane.b32.xlu1 %v12706_v45, %s19438_s22  ;;  %v1559_v53 = vsel %vm1476_vm4, %v1423_v9, %v1425_v61  ;;  %v1558_v59 = vsel %vm1476_vm4, %v12407_v23, %v1423_v9  ;;  %9860 = vmatmul.mubr.msk.f32.gmra.mxu0 %vm1687_vm5, %v12703_v33  ;;  %v12767_v9 = vld [vmem:[#allocation2 + $0x210] sm:$0xff]  ;;  %v12878_v45 = vld [vmem:[#allocation2 + $0x108] sm:$0xff] }
 0x1fd   : > { %2693 = vrot.lane.b32.xlu0 %v12715_v5, %s19438_s22  ;;  %1916 = vmatprep.subr.mxu0 %v1559_v53 }
 0x1fe   : > { %1917 = vmatpush1.msra.mxu0 %v1558_v59  ;;  %v1407_v24 = vpop.permute.xlu1 %1406  ;;  %9866 = vmatmul.mubr.msk.f32.gmra.mxu1 %vm1687_vm5, %v12703_v33  ;;  %v12772_v59 = vld [vmem:[#allocation2 + $0x208] sm:$0xff] }
 0x1ff   : > { %v1427_v23 = vpop.permute.xlu0 %1426  ;;  %1901 = vmatprep.mubr.f32.mxu1 %v19380_v35  ;;  %1800 = vmatprep.mubr.f32.mxu0 %v19380_v35  ;;  %v1551_v36 = vsel %vm1476_vm4, %v12421_v20, %v1407_v24 }
 0x200   : > { %2673 = vrot.lane.b32.xlu1 %v12728_v2, %s19438_s22  ;;  %v1560_v25 = vsel %vm1476_vm4, %v1425_v61, %v1427_v23  ;;  %9861 = vmatmul.mubr.msk.f32.gmra.mxu0 %vm1687_vm5, %v12722_v0  ;;  %v12776_v23 = vld [vmem:[#allocation2 + $0x220] sm:$0xff] }
 0x201   : > { %2687 = vrot.lane.b32.xlu0 %v12735_v6, %s19438_s22  ;;  %10445 = vmatprep.subr.mxu1 %v1560_v25  ;;  %19535 = vst [vmem:[#allocation12_spill] sm:$0xff] %v12776_v23 }
 0x202   : > { %10446 = vmatpush3.msra.mxu1 %v1560_v25  ;;  %v1411_v10 = vpop.permute.xlu1 %1410  ;;  %1972 = vmatprep.mubr.f32.mxu0 %v19380_v35 }
 0x203   : > { %v1409_v51 = vpop.permute.xlu0 %1408  ;;  %9867 = vmatmul.mubr.msk.f32.gmra.mxu1 %vm1687_vm5, %v12722_v0 }
 0x204   : > { %2677 = vrot.lane.b32.xlu1 %v12742_v19, %s19438_s22  ;;  %v1552_v17 = vsel %vm1476_vm4, %v1407_v24, %v1409_v51  ;;  %v1553_v52 = vsel %vm1476_vm4, %v1409_v51, %v1411_v10  ;;  %10469 = vmatprep.mubr.msk.f32.mxu1 %vm1687_vm5, %v12599_v41  ;;  %v12782_v51 = vld [vmem:[#allocation2 + $0x218] sm:$0xff] }
 0x205   : > { %2675 = vrot.lane.b32.xlu0 %v12750_v8, %s19438_s22  ;;  %1918 = vmatprep.subr.mxu0 %v1552_v17 }
 0x206   : > { %10447 = vmatprep.subr.mxu1 %v1553_v52  ;;  %1919 = vmatpush1.msra.mxu0 %v1551_v36  ;;  %v1393_v22 = vpop.permute.xlu1 %1392 }
 0x207   : > { %10448 = vmatpush3.msra.mxu1 %v1553_v52  ;;  %v1391_v54 = vpop.permute.xlu0 %1390 }
 0x208   : > { %2671 = vrot.lane.b32.xlu1 %v12756_v47, %s19438_s22  ;;  %v1545_v16 = vsel %vm1476_vm4, %v1391_v54, %v1393_v22  ;;  %v1544_v49 = vsel %vm1476_vm4, %v12438_v60, %v1391_v54 }
 0x209   : > { %2679 = vrot.lane.b32.xlu0 %v12763_v31, %s19438_s22  ;;  %1920 = vmatprep.subr.mxu0 %v1545_v16 }
 0x20a   : > { %1921 = vmatpush1.msra.mxu0 %v1544_v49  ;;  %v1375_v20 = vpop.permute.xlu1 %1374  ;;  %v12795_v49 = vld [vmem:[#allocation2 + $0x200] sm:$0xff] }
 0x20b   : > { %v1395_v61 = vpop.permute.xlu0 %1394  ;;  %v1537_v17 = vsel %vm1476_vm4, %v12451_v12, %v1375_v20 }
 0x20c   : > { %2659 = vrot.lane.b32.xlu1 %v12767_v9, %s19438_s22  ;;  %v1546_v53 = vsel %vm1476_vm4, %v1393_v22, %v1395_v61  ;;  %v12788_v22 = vld [vmem:[#allocation2 + $0x1c8] sm:$0xff]  ;;  %v12799_v61 = vld [vmem:[#allocation2 + $0x1d8] sm:$0xff] }
 0x20d   : > { %2657 = vrot.lane.b32.xlu0 %v12772_v59, %s19438_s22  ;;  %10449 = vmatprep.subr.mxu1 %v1546_v53 }
 0x20e   : > { %10450 = vmatpush3.msra.mxu1 %v1546_v53  ;;  %v1379_v60 = vpop.permute.xlu1 %1378 }
 0x20f   : > { %v1377_v24 = vpop.permute.xlu0 %1376 }
 0x210   : > { %2663 = vrot.lane.b32.xlu1 %v12776_v23, %s19438_s22  ;;  %v1538_v25 = vsel %vm1476_vm4, %v1375_v20, %v1377_v24  ;;  %v1539_v10 = vsel %vm1476_vm4, %v1377_v24, %v1379_v60  ;;  %v12804_v60 = vld [vmem:[#allocation2 + $0x1d0] sm:$0xff] }
 0x211   : > { %2661 = vrot.lane.b32.xlu0 %v12782_v51, %s19438_s22  ;;  %1922 = vmatprep.subr.mxu0 %v1538_v25  ;;  %v12808_v25 = vld [vmem:[#allocation2 + $0x1c0] sm:$0xff]  ;;  %v12859_v23 = vld [vmem:[#allocation2 + $0x150] sm:$0xff] }
 0x212   : > { %10451 = vmatprep.subr.mxu1 %v1539_v10  ;;  %1923 = vmatpush1.msra.mxu0 %v1537_v17  ;;  %v1361_v52 = vpop.permute.xlu1 %1360 }
 0x213   : > { %10452 = vmatpush3.msra.mxu1 %v1539_v10  ;;  %v1359_v36 = vpop.permute.xlu0 %1358 }
 0x214   : > { %2641 = vrot.lane.b32.xlu1 %v12788_v22, %s19438_s22  ;;  %v1531_v54 = vsel %vm1476_vm4, %v1359_v36, %v1361_v52  ;;  %v1530_v16 = vsel %vm1476_vm4, %v12468_v11, %v1359_v36  ;;  %v12814_v36 = vld [vmem:[#allocation2 + $0x1e0] sm:$0xff] }
 0x215   : > { %2655 = vrot.lane.b32.xlu0 %v12795_v49, %s19438_s22  ;;  %1924 = vmatprep.subr.mxu0 %v1531_v54  ;;  %19536 = vst [vmem:[#allocation13_spill] sm:$0xff] %v12814_v36 }
 0x216   : > { %1925 = vmatpush1.msra.mxu0 %v1530_v16  ;;  %v1343_v12 = vpop.permute.xlu1 %1342 }
 0x217   : > { %v1363_v20 = vpop.permute.xlu0 %1362 }
 0x218   : > { %2645 = vrot.lane.b32.xlu1 %v12799_v61, %s19438_s22  ;;  %v1532_v53 = vsel %vm1476_vm4, %v1361_v52, %v1363_v20  ;;  %v1523_v52 = vsel %vm1476_vm4, %v12482_v27, %v1343_v12  ;;  %v12820_v20 = vld [vmem:[#allocation2 + $0x190] sm:$0xff] }
 0x219   : > { %2643 = vrot.lane.b32.xlu0 %v12804_v60, %s19438_s22  ;;  %10453 = vmatprep.subr.mxu1 %v1532_v53 }
 0x21a   : > { %10454 = vmatpush3.msra.mxu1 %v1532_v53  ;;  %v1347_v11 = vpop.permute.xlu1 %1346 }
 0x21b   : > { %v1345_v24 = vpop.permute.xlu0 %1344 }
 0x21c   : > { %2639 = vrot.lane.b32.xlu1 %v12808_v25, %s19438_s22  ;;  %v1524_v10 = vsel %vm1476_vm4, %v1343_v12, %v1345_v24  ;;  %v1525_v17 = vsel %vm1476_vm4, %v1345_v24, %v1347_v11  ;;  %v12827_v24 = vld [vmem:[#allocation2 + $0x188] sm:$0xff] }
 0x21d   : > { %2647 = vrot.lane.b32.xlu0 %v12814_v36, %s19438_s22  ;;  %1926 = vmatprep.subr.mxu0 %v1524_v10  ;;  %v12831_v10 = vld [vmem:[#allocation2 + $0x1a0] sm:$0xff]  ;;  %v12852_v36 = vld [vmem:[#allocation2 + $0x158] sm:$0xff] }
 0x21e   : > { %10455 = vmatprep.subr.mxu1 %v1525_v17  ;;  %1927 = vmatpush1.msra.mxu0 %v1523_v52  ;;  %v1329_v54 = vpop.permute.xlu1 %1328  ;;  %19537 = vst [vmem:[#allocation14_spill] sm:$0xff] %v12831_v10  ;;  %v12836_v52 = vld [vmem:[#allocation2 + $0x198] sm:$0xff] }
 0x21f   : > { %10456 = vmatpush3.msra.mxu1 %v1525_v17  ;;  %v1327_v16 = vpop.permute.xlu0 %1326 }
 0x220   : > { %2627 = vrot.lane.b32.xlu1 %v12820_v20, %s19438_s22  ;;  %v1517_v53 = vsel %vm1476_vm4, %v1327_v16, %v1329_v54  ;;  %v1516_v11 = vsel %vm1476_vm4, %v12499_v21, %v1327_v16 }
 0x221   : > { %2625 = vrot.lane.b32.xlu0 %v12827_v24, %s19438_s22  ;;  %1928 = vmatprep.subr.mxu0 %v1517_v53  ;;  %v12840_v53 = vld [vmem:[#allocation2 + $0x148] sm:$0xff] }
 0x222   : > { %1929 = vmatpush1.msra.mxu0 %v1516_v11  ;;  %v1311_v27 = vpop.permute.xlu1 %1310 }
 0x223   : > { %v1331_v12 = vpop.permute.xlu0 %1330 }
 0x224   : > { %2631 = vrot.lane.b32.xlu1 %v12831_v10, %s19438_s22  ;;  %v1518_v17 = vsel %vm1476_vm4, %v1329_v54, %v1331_v12  ;;  %v12846_v10 = vld [vmem:[#allocation2 + $0x180] sm:$0xff]  ;;  %v1509_v54 = vsel %vm1476_vm4, %v12513_v42, %v1311_v27 }
 0x225   : > { %2629 = vrot.lane.b32.xlu0 %v12836_v52, %s19438_s22  ;;  %10457 = vmatprep.subr.mxu1 %v1518_v17 }
 0x226   : > { %10458 = vmatpush3.msra.mxu1 %v1518_v17  ;;  %v1315_v21 = vpop.permute.xlu1 %1314 }
 0x227   : > { %v1313_v16 = vpop.permute.xlu0 %1312 }
 0x228   : > { %2609 = vrot.lane.b32.xlu1 %v12840_v53, %s19438_s22  ;;  %v1510_v11 = vsel %vm1476_vm4, %v1311_v27, %v1313_v16  ;;  %v1511_v35 = vsel %vm1476_vm4, %v1313_v16, %v1315_v21  ;;  %v12863_v27 = vld [vmem:[#allocation2 + $0x140] sm:$0xff] }
 0x229   : > { %2623 = vrot.lane.b32.xlu0 %v12846_v10, %s19438_s22  ;;  %1930 = vmatprep.subr.mxu0 %v1510_v11 }
 0x22a   : > { %10459 = vmatprep.subr.mxu1 %v1511_v35  ;;  %1931 = vmatpush1.msra.mxu0 %v1509_v54  ;;  %v1297_v12 = vpop.permute.xlu1 %1296  ;;  %v12868_v54 = vld [vmem:[#allocation2 + $0x160] sm:$0xff] }
 0x22b   : > { %10460 = vmatpush3.msra.mxu1 %v1511_v35  ;;  %v1295_v17 = vpop.permute.xlu0 %1294  ;;  %19538 = vst [vmem:[#allocation15_spill] sm:$0xff] %v12868_v54 }
 0x22c   : > { %2613 = vrot.lane.b32.xlu1 %v12852_v36, %s19438_s22  ;;  %v1503_v21 = vsel %vm1476_vm4, %v1295_v17, %v1297_v12  ;;  %v1502_v16 = vsel %vm1476_vm4, %v12526_v63, %v1295_v17 }
 0x22d   : > { %2611 = vrot.lane.b32.xlu0 %v12859_v23, %s19438_s22  ;;  %1932 = vmatprep.subr.mxu0 %v1503_v21  ;;  %v12872_v21 = vld [vmem:[#allocation2 + $0x110] sm:$0xff] }
 0x22e   : > { %1933 = vmatpush1.msra.mxu0 %v1502_v16  ;;  %v1279_v42 = vpop.permute.xlu1 %1278 }
 0x22f   : > { %v1299_v35 = vpop.permute.xlu0 %1298 }
 0x230   : > { %2607 = vrot.lane.b32.xlu1 %v12863_v27, %s19438_s22  ;;  %v1504_v11 = vsel %vm1476_vm4, %v1297_v12, %v1299_v35  ;;  %v1495_v12 = vsel %vm1476_vm4, %v12537_v14, %v1279_v42 }
 0x231   : > { %2615 = vrot.lane.b32.xlu0 %v12868_v54, %s19438_s22  ;;  %10461 = vmatprep.subr.mxu1 %v1504_v11  ;;  %v12884_v54 = vld [vmem:[#allocation2 + $0x120] sm:$0xff] }
 0x232   : > { %10462 = vmatpush3.msra.mxu1 %v1504_v11  ;;  %v1283_v63 = vpop.permute.xlu1 %1282  ;;  %19539 = vst [vmem:[#allocation16_spill] sm:$0xff] %v12884_v54 }
 0x233   : > { %v1281_v17 = vpop.permute.xlu0 %1280 }
 0x234   : > { %2595 = vrot.lane.b32.xlu1 %v12872_v21, %s19438_s22  ;;  %v1496_v16 = vsel %vm1476_vm4, %v1279_v42, %v1281_v17  ;;  %v1497_v31 = vsel %vm1476_vm4, %v1281_v17, %v1283_v63  ;;  %v12895_v42 = vld [vmem:[#allocation2 + $0xc8] sm:$0xff] }
 0x235   : > { %2593 = vrot.lane.b32.xlu0 %v12878_v45, %s19438_s22  ;;  %1934 = vmatprep.subr.mxu0 %v1496_v16 }
 0x236   : > { %10463 = vmatprep.subr.mxu1 %v1497_v31  ;;  %1935 = vmatpush1.msra.mxu0 %v1495_v12  ;;  %v1265_v35 = vpop.permute.xlu1 %1264  ;;  %v12900_v12 = vld [vmem:[#allocation2 + $0x100] sm:$0xff] }
 0x237   : > { %10464 = vmatpush3.msra.mxu1 %v1497_v31  ;;  %v1263_v11 = vpop.permute.xlu0 %1262 }
 0x238   : > { %2599 = vrot.lane.b32.xlu1 %v12884_v54, %s19438_s22  ;;  %v1489_v63 = vsel %vm1476_vm4, %v1263_v11, %v1265_v35  ;;  %v1488_v17 = vsel %vm1476_vm4, %v12568_v56, %v1263_v11 }
 0x239   : > { %2597 = vrot.lane.b32.xlu0 %v12891_v30, %s19438_s22  ;;  %1936 = vmatprep.subr.mxu0 %v1489_v63  ;;  %v12904_v63 = vld [vmem:[#allocation2 + $0xd8] sm:$0xff] }
 0x23a   : > { %1937 = vmatpush1.msra.mxu0 %v1488_v17  ;;  %v1247_v14 = vpop.permute.xlu1 %1246 }
 0x23b   : > { %v1267_v31 = vpop.permute.xlu0 %1266 }
 0x23c   : > { %2577 = vrot.lane.b32.xlu1 %v12895_v42, %s19438_s22  ;;  %v1490_v16 = vsel %vm1476_vm4, %v1265_v35, %v1267_v31  ;;  %v1481_v35 = vsel %vm1476_vm4, %v12591_v44, %v1247_v14  ;;  %v12928_v44 = vld [vmem:[#allocation2 + $0xc0] sm:$0xff] }
 0x23d   : > { %2591 = vrot.lane.b32.xlu0 %v12900_v12, %s19438_s22  ;;  %10465 = vmatprep.subr.mxu1 %v1490_v16 }
 0x23e   : > { %10466 = vmatpush3.msra.mxu1 %v1490_v16  ;;  %v1251_v56 = vpop.permute.xlu1 %1250 }
 0x23f   : > { %v1249_v11 = vpop.permute.xlu0 %1248 }
 0x240   : > { %2581 = vrot.lane.b32.xlu1 %v12904_v63, %s19438_s22  ;;  %v1482_v17 = vsel %vm1476_vm4, %v1247_v14, %v1249_v11  ;;  %v1483_v54 = vsel %vm1476_vm4, %v1249_v11, %v1251_v56  ;;  %v13115_v14 = vld [vmem:[#allocation2 + $0x2f0] sm:$0xff]  ;;  %v11079_v56 = vld [vmem:[#allocation2 + $0x3b8] sm:$0xff]  ;;  %v13124_v11 = vld [vmem:[#allocation2 + $0x2a8] sm:$0xff] }
 0x241   : > { %2579 = vrot.lane.b32.xlu0 %v12910_v55, %s19438_s22  ;;  %1938 = vmatprep.subr.mxu0 %v1482_v17  ;;  %v19544_v17 = vld [vmem:[#allocation10_spill] sm:$0xff] }
 0x242   : > { %10467 = vmatprep.subr.mxu1 %v1483_v54  ;;  %1939 = vmatpush1.msra.mxu0 %v1481_v35  ;;  %v12916_v31 = vpop.permute.xlu1 %2755  ;;  %v13134_v35 = vld [vmem:[%s19530_s1 + $0x8] sm:$0xff] }
 0x243   : > { %10468 = vmatpush3.msra.mxu1 %v1483_v54  ;;  %2124 = vmatprep.subr.mxu0 %v12546_v26  ;;  %v12919_v16 = vpop.permute.xlu0 %2753  ;;  %v12934_v54 = vld [vmem:[#allocation2 + $0xe0] sm:$0xff] }
 0x244   : > { %2225 = vmatprep.subr.mxu1 %v12555_v34  ;;  %9868 = vmatmul.mubr.msk.f32.vlgmr.msra.gmra.mxu0 %vm1687_vm5, %v12599_v41  ;;  %v12972_v41 = vld [vmem:[#allocation2 + $0xa0] sm:$0xff] }
 0x245   : > { %10470 = vmatmul.mubr.msk.f32.vlgmr.msra.gmra.mxu1 %vm1687_vm5, %v12615_v7  ;;  %2125 = vmatpush1.msra.mxu0 %v12564_v37  ;;  %v12950_v37 = vld [vmem:[#allocation2 + $0x90] sm:$0xff] }
 0x246   : > { %2226 = vmatpush1.msra.mxu1 %v12542_v29  ;;  %2575 = vrot.lane.b32.xlu1 %v12928_v44, %s19438_s22  ;;  %v12932_v26 = vpop.permute.xlu1 %2759 }
 0x247   : > { %19540 = vst [vmem:[#allocation17_spill] sm:$0xff] %v12932_v26  ;;  %2583 = vrot.lane.b32.xlu0 %v12934_v54, %s19438_s22  ;;  %2126 = vmatprep.subr.mxu0 %v12560_v39  ;;  %v12939_v34 = vpop.permute.xlu0 %2757 }
 0x248   : > { %2227 = vmatprep.subr.mxu1 %v12573_v48  ;;  %2127 = vmatpush1.msra.mxu0 %v12583_v58  ;;  %v12956_v48 = vld [vmem:[#allocation2 + $0x88] sm:$0xff] }
 0x249   : > { %2228 = vmatpush1.msra.mxu1 %v12577_v62  ;;  %2128 = vmatprep.subr.mxu0 %v12605_v1  ;;  %v19541_v1 = vmov 0.0  }
 0x24a   : > { %2229 = vmatprep.subr.mxu1 %v12622_v15  ;;  %2129 = vmatpush1.msra.mxu0 %v12638_v13  ;;  %v12947_v29 = vpop.permute.xlu1 %2737  ;;  %v11060_v13 = vld [vmem:[#allocation2 + $0x48] sm:$0xff] }
 0x24b   : > { %2230 = vmatpush1.msra.mxu1 %v12601_v18  ;;  %2563 = vrot.lane.b32.xlu1 %v12950_v37, %s19438_s22  ;;  %v12954_v39 = vpop.permute.xlu0 %2751  ;;  %v12976_v18 = vld [vmem:[#allocation2 + $0x98] sm:$0xff] }
 0x24c   : > { %2561 = vrot.lane.b32.xlu0 %v12956_v48, %s19438_s22  ;;  %2130 = vmatprep.subr.mxu0 %v12632_v4 }
 0x24d   : > { %2231 = vmatprep.subr.mxu1 %v12651_v43  ;;  %2131 = vmatpush1.msra.mxu0 %v12668_v50 }
 0x24e   : > { %2232 = vmatpush1.msra.mxu1 %v12659_v46  ;;  %2132 = vmatprep.subr.mxu0 %v12694_v28  ;;  %v12965_v62 = vpop.permute.xlu1 %2741  ;;  %v11062_v28 = vld [vmem:[#allocation2 + $0x58] sm:$0xff] }
 0x24f   : > { %2233 = vmatprep.subr.mxu1 %v12715_v5  ;;  %2133 = vmatpush1.msra.mxu0 %v12735_v6  ;;  %v12969_v58 = vpop.permute.xlu0 %2739  ;;  %v11063_v5 = vld [vmem:[#allocation2 + $0x50] sm:$0xff] }
 0x250   : > { %2234 = vmatpush1.msra.mxu1 %v12687_v40  ;;  %2567 = vrot.lane.b32.xlu1 %v12972_v41, %s19438_s22 }
 0x251   : > { %2565 = vrot.lane.b32.xlu0 %v12976_v18, %s19438_s22  ;;  %1978 = vmatprep.mubr.f32.mxu0 %v19541_v1 }
 0x252   : > { %2134 = vmatprep.subr.mxu0 %v12728_v2  ;;  %2235 = vmatprep.subr.mxu1 %v12742_v19  ;;  %v12983_v15 = vpop.permute.xlu1 %2735  ;;  %v11064_v19 = vld [vmem:[#allocation2 + $0x40] sm:$0xff] }
 0x253   : > { %9869 = vmatmul.mubr.msk.f32.gmra.mxu0 %vm1687_vm5, %v12615_v7  ;;  %2236 = vmatpush1.msra.mxu1 %v12750_v8  ;;  %v12988_v4 = vpop.permute.xlu0 %2743  ;;  %v11061_v7 = vld [vmem:[#allocation2 + $0x80] sm:$0xff] }
 0x254   : > { %2135 = vmatpush1.msra.mxu0 %v12756_v47  ;;  %2237 = vmatprep.subr.mxu1 %v12782_v51  ;;  %v13036_v47 = vld [vmem:[#allocation2 + $0x60] sm:$0xff]  ;;  %v11068_v51 = vld [vmem:[#allocation2 + $0x18] sm:$0xff] }
 0x255   : > { %2136 = vmatprep.subr.mxu0 %v12772_v59  ;;  %2238 = vmatpush1.msra.mxu1 %v12767_v9  ;;  %v11067_v59 = vld [vmem:[#allocation2 + $0x8] sm:$0xff] }
 0x256   : > { %2137 = vmatpush1.msra.mxu0 %v12795_v49  ;;  %2545 = vrot.lane.b32.xlu1 %v11060_v13, %s19438_s22  ;;  %v12996_v43 = vpop.permute.xlu1 %2723  ;;  %v13077_v49 = vld [vmem:[#allocation2 + $0x20] sm:$0xff] }
 0x257   : > { %2559 = vrot.lane.b32.xlu0 %v11061_v7, %s19438_s22  ;;  %1984 = vmatprep.mubr.f32.mxu0 %v19541_v1  ;;  %v13000_v46 = vpop.permute.xlu0 %2721 }
 0x258   : > { %2138 = vmatprep.subr.mxu0 %v12788_v22  ;;  %2239 = vmatprep.subr.mxu1 %v12799_v61  ;;  %v11069_v22 = vld [vmem:[#allocation2] sm:$0xff]  ;;  %v11071_v61 = vld [vmem:[#allocation2 + $0x3a8] sm:$0xff] }
 0x259   : > { %9870 = vmatmul.mubr.msk.f32.gmra.mxu0 %vm1687_vm5, %v12649_v32  ;;  %2240 = vmatpush1.msra.mxu1 %v12804_v60 }
 0x25a   : > { %2139 = vmatpush1.msra.mxu0 %v12808_v25  ;;  %2241 = vmatprep.subr.mxu1 %v12836_v52  ;;  %v13009_v50 = vpop.permute.xlu1 %2727  ;;  %v11072_v25 = vld [vmem:[#allocation2 + $0x3b0] sm:$0xff] }
 0x25b   : > { %2140 = vmatprep.subr.mxu0 %v12827_v24  ;;  %2242 = vmatpush1.msra.mxu1 %v12820_v20  ;;  %v13013_v40 = vpop.permute.xlu0 %2725  ;;  %v11073_v20 = vld [vmem:[#allocation2 + $0x368] sm:$0xff]  ;;  %v11074_v24 = vld [vmem:[#allocation2 + $0x370] sm:$0xff] }
 0x25c   : > { %2141 = vmatpush1.msra.mxu0 %v12846_v10  ;;  %2549 = vrot.lane.b32.xlu1 %v11062_v28, %s19438_s22 }
 0x25d   : > { %2547 = vrot.lane.b32.xlu0 %v11063_v5, %s19438_s22  ;;  %1990 = vmatprep.mubr.f32.mxu0 %v19541_v1 }
 0x25e   : > { %2142 = vmatprep.subr.mxu0 %v12840_v53  ;;  %2243 = vmatprep.subr.mxu1 %v12852_v36  ;;  %v13021_v2 = vpop.permute.xlu1 %2705  ;;  %v11075_v53 = vld [vmem:[#allocation2 + $0x328] sm:$0xff] }
 0x25f   : > { %9871 = vmatmul.mubr.msk.f32.gmra.mxu0 %vm1687_vm5, %v12677_v38  ;;  %2244 = vmatpush1.msra.mxu1 %v12859_v23  ;;  %v13026_v6 = vpop.permute.xlu0 %2719 }
 0x260   : > { %2143 = vmatpush1.msra.mxu0 %v12863_v27  ;;  %2245 = vmatprep.subr.mxu1 %v12891_v30  ;;  %v13105_v27 = vld [vmem:[#allocation2 + $0x330] sm:$0xff] }
 0x261   : > { %2144 = vmatprep.subr.mxu0 %v12878_v45  ;;  %2246 = vmatpush1.msra.mxu1 %v12872_v21 }
 0x262   : > { %2145 = vmatpush1.msra.mxu0 %v12900_v12  ;;  %2543 = vrot.lane.b32.xlu1 %v11064_v19, %s19438_s22  ;;  %v13034_v8 = vpop.permute.xlu1 %2709 }
 0x263   : > { %2551 = vrot.lane.b32.xlu0 %v13036_v47, %s19438_s22  ;;  %1996 = vmatprep.mubr.f32.mxu0 %v19541_v1  ;;  %v13041_v9 = vpop.permute.xlu0 %2707 }
 0x264   : > { %10472 = vmatprep.mubr.msk.f32.mxu1 %vm1687_vm5, %v12649_v32  ;;  %2146 = vmatprep.subr.mxu0 %v12895_v42  ;;  %v11066_v32 = vld [vmem:[#allocation2 + $0x10] sm:$0xff]  ;;  %v19543_v42 = vld [vmem:[#allocation9_spill] sm:$0xff] }
 0x265   : > { %2247 = vmatprep.subr.mxu1 %v12904_v63  ;;  %9872 = vmatmul.mubr.msk.f32.gmra.mxu0 %vm1687_vm5, %v12703_v33  ;;  %v13127_v63 = vld [vmem:[#allocation2 + $0x2b0] sm:$0xff] }
 0x266   : > { %10473 = vmatmul.mubr.msk.f32.gmra.mxu1 %vm1687_vm5, %v12677_v38  ;;  %2147 = vmatpush1.msra.mxu0 %v12928_v44  ;;  %v13052_v30 = vpop.permute.xlu1 %2703 }
 0x267   : > { %2248 = vmatpush1.msra.mxu1 %v12910_v55  ;;  %2148 = vmatprep.subr.mxu0 %v12956_v48  ;;  %v13056_v45 = vpop.permute.xlu0 %2711  ;;  %v13143_v48 = vld [vmem:[#allocation2 + $0x268] sm:$0xff] }
 0x268   : > { %2249 = vmatprep.subr.mxu1 %v12976_v18  ;;  %2149 = vmatpush1.msra.mxu0 %v11061_v7  ;;  %v13146_v18 = vld [vmem:[#allocation2 + $0x270] sm:$0xff] }
 0x269   : > { %2250 = vmatpush1.msra.mxu1 %v12950_v37  ;;  %2531 = vrot.lane.b32.xlu1 %v11066_v32, %s19438_s22 }
 0x26a   : > { %2529 = vrot.lane.b32.xlu0 %v11067_v59, %s19438_s22  ;;  %2002 = vmatprep.mubr.f32.mxu0 %v19541_v1  ;;  %v13063_v38 = vpop.permute.xlu1 %2691 }
 0x26b   : > { %10475 = vmatprep.mubr.msk.f32.mxu1 %vm1687_vm5, %v12703_v33  ;;  %2150 = vmatprep.subr.mxu0 %v11060_v13  ;;  %v13067_v55 = vpop.permute.xlu0 %2689  ;;  %v19545_v13 = vld [vmem:[#allocation11_spill] sm:$0xff] }
 0x26c   : > { %2251 = vmatprep.subr.mxu1 %v11062_v28  ;;  %9873 = vmatmul.mubr.msk.f32.gmra.mxu0 %vm1687_vm5, %v12722_v0 }
 0x26d   : > { %10476 = vmatmul.mubr.msk.f32.gmra.mxu1 %vm1687_vm5, %v12722_v0  ;;  %2151 = vmatpush1.msra.mxu0 %v11064_v19  ;;  %v13084_v0 = vld [vmem:[%s19530_s1] sm:$0xff]  ;;  %v13164_v19 = vld [vmem:[#allocation2 + $0x230] sm:$0xff] }
 0x26e   : > { %2252 = vmatpush1.msra.mxu1 %v11063_v5  ;;  %2152 = vmatprep.subr.mxu0 %v11067_v59  ;;  %v13073_v23 = vpop.permute.xlu1 %2695  ;;  %v13161_v5 = vld [vmem:[#allocation2 + $0x228] sm:$0xff]  ;;  %v13171_v59 = vld [vmem:[%s19530_s1 + $0x10] sm:$0xff] }
 0x26f   : > { %2253 = vmatprep.subr.mxu1 %v11068_v51  ;;  %2153 = vmatpush1.msra.mxu0 %v11069_v22  ;;  %v13075_v33 = vpop.permute.xlu0 %2693 }
 0x270   : > { %2254 = vmatpush1.msra.mxu1 %v11066_v32  ;;  %2535 = vrot.lane.b32.xlu1 %v13077_v49, %s19438_s22  ;;  %v19546_v32 = vld [vmem:[#allocation12_spill] sm:$0xff] }
 0x271   : > { %2533 = vrot.lane.b32.xlu0 %v11068_v51, %s19438_s22  ;;  %2186 = vmatprep.mubr.f32.mxu0 %v19541_v1 }
 0x272   : > { %2287 = vmatprep.mubr.f32.mxu1 %v19541_v1  ;;  %2326 = vmatprep.subr.mxu0 %v11071_v61  ;;  %v13089_v60 = vpop.permute.xlu1 %2673 }
 0x273   : > { %10478 = vmatprep.subr.mxu1 %v11072_v25  ;;  %9880 = vmatmul.mubr.msk.f32.vlgmr.msra.gmra.mxu0 %vm1687_vm5, %v13084_v0  ;;  %v13093_v36 = vpop.permute.xlu0 %2687 }
 0x274   : > { %9886 = vmatmul.mubr.msk.f32.vlgmr.msra.gmra.mxu1 %vm1687_vm5, %v13084_v0  ;;  %2327 = vmatpush1.msra.mxu0 %v12551_v57  ;;  %v19542_v57 = vld [vmem:[#allocation8_spill] sm:$0xff] }
 0x275   : > { %10479 = vmatpush3.msra.mxu1 %v11072_v25  ;;  %2328 = vmatprep.subr.mxu0 %v11073_v20  ;;  %19547 = vst [vmem:[#allocation8_spill] sm:$0xff] %v13171_v59 }
 0x276   : > { %10480 = vmatprep.subr.mxu1 %v11074_v24  ;;  %2329 = vmatpush1.msra.mxu0 %v12587_v3  ;;  %v13099_v10 = vpop.permute.xlu1 %2677  ;;  %v13110_v3 = vld [vmem:[#allocation2 + $0x2e8] sm:$0xff] }
 0x277   : > { %10481 = vmatpush3.msra.mxu1 %v11074_v24  ;;  %2761 = vrot.lane.b32.xlu1 %v11071_v61, %s19438_s22  ;;  %v13102_v52 = vpop.permute.xlu0 %2675 }
 0x278   : > { %2527 = vrot.lane.b32.xlu0 %v11069_v22, %s19438_s22  ;;  %2330 = vmatprep.subr.mxu0 %v11075_v53  ;;  %v13178_v22 = vld [vmem:[#allocation2 + $0x1e8] sm:$0xff] }
 0x279   : > { %10482 = vmatprep.subr.mxu1 %v13105_v27  ;;  %2331 = vmatpush1.msra.mxu0 %v19542_v57  ;;  %19548 = vst [vmem:[#allocation9_spill] sm:$0xff] %v13178_v22  ;;  %v11088_v57 = vld [vmem:[#allocation2 + $0x378] sm:$0xff] }
 0x27a   : > { %10483 = vmatpush3.msra.mxu1 %v13105_v27  ;;  %2332 = vmatprep.subr.mxu0 %v13110_v3  ;;  %v13113_v21 = vpop.permute.xlu1 %2671 }
 0x27b   : > { %10484 = vmatprep.subr.mxu1 %v13115_v14  ;;  %2333 = vmatpush1.msra.mxu0 %v19543_v42  ;;  %v13119_v12 = vpop.permute.xlu0 %2679  ;;  %v13196_v42 = vld [vmem:[#allocation2 + $0x1a8] sm:$0xff] }
 0x27c   : > { %10485 = vmatpush3.msra.mxu1 %v13115_v14  ;;  %2765 = vrot.lane.b32.xlu1 %v11079_v56, %s19438_s22  ;;  %19550 = vst [vmem:[#allocation10_spill] sm:$0xff] %v13196_v42 }
 0x27d   : > { %2763 = vrot.lane.b32.xlu0 %v11072_v25, %s19438_s22  ;;  %2334 = vmatprep.subr.mxu0 %v13124_v11  ;;  %v13183_v25 = vld [vmem:[#allocation2 + $0x1f0] sm:$0xff] }
 0x27e   : > { %10486 = vmatprep.subr.mxu1 %v13127_v63  ;;  %2335 = vmatpush1.msra.mxu0 %v19544_v17  ;;  %v13136_v44 = vpop.permute.xlu1 %2659  ;;  %v13201_v17 = vld [vmem:[#allocation2 + $0x1b0] sm:$0xff] }
 0x27f   : > { %10487 = vmatpush3.msra.mxu1 %v13127_v63  ;;  %2192 = vmatprep.mubr.f32.mxu0 %v19541_v1  ;;  %v13140_v37 = vpop.permute.xlu0 %2657  ;;  %19551 = vst [vmem:[#allocation11_spill] sm:$0xff] %v13201_v17 }
 0x280   : > { %2293 = vmatprep.mubr.f32.mxu1 %v19541_v1  ;;  %2336 = vmatprep.subr.mxu0 %v13143_v48 }
 0x281   : > { %10488 = vmatprep.subr.mxu1 %v13146_v18  ;;  %9881 = vmatmul.mubr.msk.f32.gmra.mxu0 %vm1687_vm5, %v13134_v35 }
 0x282   : > { %9887 = vmatmul.mubr.msk.f32.gmra.mxu1 %vm1687_vm5, %v13134_v35  ;;  %2337 = vmatpush1.msra.mxu0 %v19545_v13  ;;  %v13154_v7 = vpop.permute.xlu1 %2663  ;;  %v19552_v13 = vld [vmem:[#allocation14_spill] sm:$0xff] }
 0x283   : > { %10489 = vmatpush3.msra.mxu1 %v13146_v18  ;;  %2747 = vrot.lane.b32.xlu1 %v11074_v24, %s19438_s22  ;;  %v13158_v28 = vpop.permute.xlu0 %2661 }
 0x284   : > { %2745 = vrot.lane.b32.xlu0 %v11073_v20, %s19438_s22  ;;  %2338 = vmatprep.subr.mxu0 %v13161_v5  ;;  %v19549_v20 = vld [vmem:[#allocation13_spill] sm:$0xff] }
 0x285   : > { %10490 = vmatprep.subr.mxu1 %v13164_v19  ;;  %2339 = vmatpush1.msra.mxu0 %v19546_v32  ;;  %v13213_v32 = vld [vmem:[#allocation2 + $0x168] sm:$0xff] }
 0x286   : > { %10491 = vmatpush3.msra.mxu1 %v13164_v19  ;;  %2198 = vmatprep.mubr.f32.mxu0 %v19541_v1  ;;  %v13175_v51 = vpop.permute.xlu1 %2641  ;;  %19554 = vst [vmem:[#allocation13_spill] sm:$0xff] %v13213_v32 }
 0x287   : > { %2299 = vmatprep.mubr.f32.mxu1 %v19541_v1  ;;  %2340 = vmatprep.subr.mxu0 %v13178_v22  ;;  %v13181_v61 = vpop.permute.xlu0 %2655  ;;  %v13237_v22 = vld [vmem:[#allocation2 + $0x130] sm:$0xff] }
 0x288   : > { %10492 = vmatprep.subr.mxu1 %v13183_v25  ;;  %9882 = vmatmul.mubr.msk.f32.gmra.mxu0 %vm1687_vm5, %v13171_v59  ;;  %19558 = vst [vmem:[#allocation18_spill] sm:$0xff] %v13237_v22 }
 0x289   : > { %9888 = vmatmul.mubr.msk.f32.gmra.mxu1 %vm1687_vm5, %v13171_v59  ;;  %2341 = vmatpush1.msra.mxu0 %v19549_v20  ;;  %v19556_v59 = vld [vmem:[#allocation15_spill] sm:$0xff] }
 0x28a   : > { %10493 = vmatpush3.msra.mxu1 %v13183_v25  ;;  %2729 = vrot.lane.b32.xlu1 %v11075_v53, %s19438_s22  ;;  %v13193_v24 = vpop.permute.xlu1 %2645  ;;  %v13208_v53 = vld [vmem:[%s19530_s1 + $0x18] sm:$0xff] }
 0x28b   : > { %2749 = vrot.lane.b32.xlu0 %v11088_v57, %s19438_s22  ;;  %2342 = vmatprep.subr.mxu0 %v13196_v42  ;;  %v13199_v56 = vpop.permute.xlu0 %2643  ;;  %19553 = vst [vmem:[#allocation12_spill] sm:$0xff] %v13208_v53  ;;  %v13218_v57 = vld [vmem:[#allocation2 + $0x170] sm:$0xff] }
 0x28c   : > { %10494 = vmatprep.subr.mxu1 %v13201_v17  ;;  %2343 = vmatpush1.msra.mxu0 %v19552_v13  ;;  %19555 = vst [vmem:[#allocation14_spill] sm:$0xff] %v13218_v57 }
 0x28d   : > { %10495 = vmatpush3.msra.mxu1 %v13201_v17  ;;  %2204 = vmatprep.mubr.f32.mxu0 %v19541_v1  ;;  %v11093_v17 = vld [vmem:[#allocation2 + $0x338] sm:$0xff] }
 0x28e   : > { %2305 = vmatprep.mubr.f32.mxu1 %v19541_v1  ;;  %2344 = vmatprep.subr.mxu0 %v13213_v32  ;;  %v13216_v20 = vpop.permute.xlu1 %2639  ;;  %v13232_v32 = vld [vmem:[#allocation2 + $0x128] sm:$0xff] }
 0x28f   : > { %10496 = vmatprep.subr.mxu1 %v13218_v57  ;;  %9883 = vmatmul.mubr.msk.f32.gmra.mxu0 %vm1687_vm5, %v13208_v53  ;;  %v13223_v13 = vpop.permute.xlu0 %2647  ;;  %19557 = vst [vmem:[#allocation15_spill] sm:$0xff] %v13232_v32 }
 0x290   : > { %9889 = vmatmul.mubr.msk.f32.gmra.mxu1 %vm1687_vm5, %v13208_v53  ;;  %2345 = vmatpush1.msra.mxu0 %v19556_v59  ;;  %v19559_v53 = vld [vmem:[#allocation16_spill] sm:$0xff]  ;;  %v13244_v59 = vld [vmem:[%s19530_s1 + $0x20] sm:$0xff] }
 0x291   : > { %10497 = vmatpush3.msra.mxu1 %v13218_v57  ;;  %2733 = vrot.lane.b32.xlu1 %v11093_v17, %s19438_s22  ;;  %19560 = vst [vmem:[#allocation16_spill] sm:$0xff] %v13244_v59  ;;  %v13274_v57 = vld [vmem:[#allocation2 + $0xb0] sm:$0xff] }
 0x292   : > { %2731 = vrot.lane.b32.xlu0 %v13105_v27, %s19438_s22  ;;  %2346 = vmatprep.subr.mxu0 %v13232_v32  ;;  %v13235_v42 = vpop.permute.xlu1 %2627  ;;  %v13251_v27 = vld [vmem:[#allocation2 + $0xe8] sm:$0xff]  ;;  %v13254_v32 = vld [vmem:[#allocation2 + $0xf0] sm:$0xff]  ;;  %19564 = vst [vmem:[#allocation22_spill] sm:$0xff] %v13274_v57 }
 0x293   : > { %10498 = vmatprep.subr.mxu1 %v13237_v22  ;;  %2347 = vmatpush1.msra.mxu0 %v19559_v53  ;;  %v13246_v17 = vpop.permute.xlu0 %2625  ;;  %19561 = vst [vmem:[#allocation19_spill] sm:$0xff] %v13251_v27  ;;  %19562 = vst [vmem:[#allocation20_spill] sm:$0xff] %v13254_v32 }
 0x294   : > { %10499 = vmatpush3.msra.mxu1 %v13237_v22  ;;  %2210 = vmatprep.mubr.f32.mxu0 %v19541_v1 }
 0x295   : > { %2311 = vmatprep.mubr.f32.mxu1 %v19541_v1  ;;  %2348 = vmatprep.subr.mxu0 %v13251_v27  ;;  %v13271_v27 = vld [vmem:[#allocation2 + $0xa8] sm:$0xff] }
 0x296   : > { %10500 = vmatprep.subr.mxu1 %v13254_v32  ;;  %9884 = vmatmul.mubr.msk.f32.gmra.mxu0 %vm1687_vm5, %v13244_v59  ;;  %v13259_v53 = vpop.permute.xlu1 %2631  ;;  %19563 = vst [vmem:[#allocation21_spill] sm:$0xff] %v13271_v27 }
 0x297   : > { %9890 = vmatmul.mubr.msk.f32.gmra.mxu1 %vm1687_vm5, %v13244_v59  ;;  %2349 = vmatpush1.msra.mxu0 %v12934_v54  ;;  %v13264_v22 = vpop.permute.xlu0 %2629  ;;  %v13281_v54 = vld [vmem:[%s19530_s1 + $0x28] sm:$0xff] }
 0x298   : > { %10501 = vmatpush3.msra.mxu1 %v13254_v32  ;;  %2715 = vrot.lane.b32.xlu1 %v13115_v14, %s19438_s22  ;;  %19565 = vst [vmem:[#allocation23_spill] sm:$0xff] %v13281_v54  ;;  %v13290_v14 = vld [vmem:[#allocation2 + $0x68] sm:$0xff] }
 0x299   : > { %2713 = vrot.lane.b32.xlu0 %v13110_v3, %s19438_s22  ;;  %2350 = vmatprep.subr.mxu0 %v13271_v27  ;;  %19566 = vst [vmem:[#allocation24_spill] sm:$0xff] %v13290_v14  ;;  %v11102_v27 = vld [vmem:[#allocation2 + $0x2f8] sm:$0xff]  ;;  %v13309_v59 = vld [vmem:[#allocation2 + $0x28] sm:$0xff] }
 0x29a   : > { %10502 = vmatprep.subr.mxu1 %v13274_v57  ;;  %2351 = vmatpush1.msra.mxu0 %v12972_v41  ;;  %v13283_v32 = vpop.permute.xlu1 %2609  ;;  %v13293_v41 = vld [vmem:[#allocation2 + $0x70] sm:$0xff]  ;;  %19567 = vst [vmem:[#allocation25_spill] sm:$0xff] %v13309_v59 }
 0x29b   : > { %10503 = vmatpush3.msra.mxu1 %v13274_v57  ;;  %2216 = vmatprep.mubr.f32.mxu0 %v19541_v1  ;;  %v13287_v3 = vpop.permute.xlu0 %2623 }
 0x29c   : > { %2317 = vmatprep.mubr.f32.mxu1 %v19541_v1  ;;  %2352 = vmatprep.subr.mxu0 %v13290_v14 }
 0x29d   : > { %10504 = vmatprep.subr.mxu1 %v13293_v41  ;;  %9885 = vmatmul.mubr.msk.f32.gmra.mxu0 %vm1687_vm5, %v13281_v54 }
 0x29e   : > { %9891 = vmatmul.mubr.msk.f32.gmra.mxu1 %vm1687_vm5, %v13281_v54  ;;  %2353 = vmatpush1.msra.mxu0 %v13036_v47  ;;  %v13301_v57 = vpop.permute.xlu1 %2613  ;;  %v13312_v54 = vld [vmem:[#allocation2 + $0x30] sm:$0xff]  ;;  %v2867_v47 = vsel %vm2767_vm6, %v12919_v16, %v12916_v31 }
 0x29f   : > { %10505 = vmatpush3.msra.mxu1 %v13293_v41  ;;  %2697 = vrot.lane.b32.xlu1 %v13124_v11, %s19438_s22  ;;  %v13306_v14 = vpop.permute.xlu0 %2611 }
 0x2a0   : > { %2717 = vrot.lane.b32.xlu0 %v11102_v27, %s19438_s22  ;;  %2354 = vmatprep.subr.mxu0 %v13309_v59  ;;  %v2869_v27 = vsel %vm2767_vm6, %v12939_v34, %v12932_v26  ;;  %v11105_v26 = vld [vmem:[#allocation2 + $0x2b8] sm:$0xff] }
 0x2a1   : > { %10506 = vmatprep.subr.mxu1 %v13312_v54  ;;  %2355 = vmatpush1.msra.mxu0 %v13077_v49  ;;  %v2866_v49 = vsel %vm2767_vm6, %v12954_v39, %v12919_v16  ;;  %v2860_v16 = vsel %vm2767_vm6, %v12947_v29, %v12969_v58 }
 0x2a2   : > { %10507 = vmatpush3.msra.mxu1 %v13312_v54  ;;  %2388 = vmatprep.mubr.f32.mxu0 %v19541_v1  ;;  %v13321_v11 = vpop.permute.xlu1 %2607 }
 0x2a3   : > { %10508 = vmatprep.mubr.msk.f32.mxu1 %vm1687_vm5, %v13084_v0  ;;  %2998 = vmatprep.subr.mxu0 %v2867_v47  ;;  %v13328_v59 = vpop.permute.xlu0 %2615  ;;  %v2868_v47 = vsel %vm2767_vm6, %v12916_v31, %v12939_v34  ;;  %v2862_v31 = vsel %vm2767_vm6, %v12965_v62, %v12988_v4 }
 0x2a4   : > { %3099 = vmatprep.subr.mxu1 %v2869_v27  ;;  %9892 = vmatmul.mubr.msk.f32.vlgmr.msra.gmra.mxu0 %vm1687_vm5, %v13084_v0  ;;  %v2859_v0 = vsel %vm2767_vm6, %v12983_v15, %v12947_v29  ;;  %v2853_v29 = vsel %vm2767_vm6, %v13000_v46, %v12996_v43  ;;  %v2852_v15 = vsel %vm2767_vm6, %v13026_v6, %v13000_v46 }
 0x2a5   : > { %10509 = vmatmul.mubr.msk.f32.vlgmr.msra.gmra.mxu1 %vm1687_vm5, %v13134_v35  ;;  %2999 = vmatpush1.msra.mxu0 %v2866_v49  ;;  %v2846_v46 = vsel %vm2767_vm6, %v13021_v2, %v13041_v9  ;;  %v2845_v27 = vsel %vm2767_vm6, %v13052_v30, %v13021_v2  ;;  %v2838_v2 = vsel %vm2767_vm6, %v13093_v36, %v13067_v55  ;;  %v11106_v49 = vld [vmem:[#allocation2 + $0x278] sm:$0xff] }
 0x2a6   : > { %3100 = vmatpush1.msra.mxu1 %v2868_v47  ;;  %2701 = vrot.lane.b32.xlu1 %v11105_v26, %s19438_s22  ;;  %v13344_v39 = vpop.permute.xlu1 %2595  ;;  %v2861_v26 = vsel %vm2767_vm6, %v12969_v58, %v12965_v62  ;;  %v2854_v62 = vsel %vm2767_vm6, %v12996_v43, %v13013_v40  ;;  %v2848_v43 = vsel %vm2767_vm6, %v13034_v8, %v13056_v45 }
 0x2a7   : > { %2699 = vrot.lane.b32.xlu0 %v13127_v63, %s19438_s22  ;;  %3000 = vmatprep.subr.mxu0 %v2860_v16  ;;  %v13354_v34 = vpop.permute.xlu0 %2593  ;;  %v2855_v63 = vsel %vm2767_vm6, %v13013_v40, %v13009_v50  ;;  %v2847_v40 = vsel %vm2767_vm6, %v13041_v9, %v13034_v8  ;;  %v2841_v30 = vsel %vm2767_vm6, %v13075_v33, %v13073_v23 }
 0x2a8   : > { %3101 = vmatprep.subr.mxu1 %v2862_v31  ;;  %3001 = vmatpush1.msra.mxu0 %v2859_v0  ;;  %v2840_v8 = vsel %vm2767_vm6, %v13063_v38, %v13075_v33  ;;  %v2831_v36 = vsel %vm2767_vm6, %v13113_v21, %v13089_v60  ;;  %v2833_v33 = vsel %vm2767_vm6, %v13102_v52, %v13099_v10  ;;  %v11107_v0 = vld [vmem:[#allocation2 + $0x238] sm:$0xff] }
 0x2a9   : > { %3102 = vmatpush1.msra.mxu1 %v2861_v26  ;;  %3002 = vmatprep.subr.mxu0 %v2853_v29  ;;  %v2827_v21 = vsel %vm2767_vm6, %v13158_v28, %v13154_v7  ;;  %v2826_v16 = vsel %vm2767_vm6, %v13136_v44, %v13158_v28  ;;  %v2811_v31 = vsel %vm2767_vm6, %v13246_v17, %v13235_v42 }
 0x2aa   : > { %3103 = vmatprep.subr.mxu1 %v2855_v63  ;;  %3003 = vmatpush1.msra.mxu0 %v2852_v15  ;;  %v13371_v58 = vpop.permute.xlu1 %2599  ;;  %v2819_v28 = vsel %vm2767_vm6, %v13199_v56, %v13193_v24  ;;  %v11108_v15 = vld [vmem:[#allocation2 + $0x1f8] sm:$0xff] }
 0x2ab   : > { %3104 = vmatpush1.msra.mxu1 %v2854_v62  ;;  %2683 = vrot.lane.b32.xlu1 %v13146_v18, %s19438_s22  ;;  %v13378_v6 = vpop.permute.xlu0 %2597  ;;  %v2839_v18 = vsel %vm2767_vm6, %v13067_v55, %v13063_v38  ;;  %v2832_v55 = vsel %vm2767_vm6, %v13089_v60, %v13102_v52  ;;  %v2834_v38 = vsel %vm2767_vm6, %v13099_v10, %v13119_v12 }
 0x2ac   : > { %2681 = vrot.lane.b32.xlu0 %v13143_v48, %s19438_s22  ;;  %3004 = vmatprep.subr.mxu0 %v2846_v46  ;;  %v2824_v60 = vsel %vm2767_vm6, %v13181_v61, %v13140_v37  ;;  %v2818_v10 = vsel %vm2767_vm6, %v13175_v51, %v13199_v56  ;;  %v2820_v61 = vsel %vm2767_vm6, %v13193_v24, %v13223_v13  ;;  %v11109_v46 = vld [vmem:[#allocation2 + $0x1b8] sm:$0xff] }
 0x2ad   : > { %3105 = vmatprep.subr.mxu1 %v2848_v43  ;;  %3005 = vmatpush1.msra.mxu0 %v2845_v27  ;;  %v2804_v24 = vsel %vm2767_vm6, %v13283_v32, %v13306_v14  ;;  %v2803_v56 = vsel %vm2767_vm6, %v13321_v11, %v13283_v32  ;;  %v19569_v32 = vld [vmem:[#allocation10_spill] sm:$0xff] }
 0x2ae   : > { %3106 = vmatpush1.msra.mxu1 %v2847_v40  ;;  %3006 = vmatprep.subr.mxu0 %v2839_v18  ;;  %v13400_v48 = vpop.permute.xlu1 %2577 }
 0x2af   : > { %3107 = vmatprep.subr.mxu1 %v2841_v30  ;;  %3007 = vmatpush1.msra.mxu0 %v2838_v2  ;;  %v2592_v9 = vpop.permute.xlu0 %2591  ;;  %v19571_v30 = vld [vmem:[#allocation8_spill] sm:$0xff] }
 0x2b0   : > { %3108 = vmatpush1.msra.mxu1 %v2840_v8  ;;  %2665 = vrot.lane.b32.xlu1 %v13161_v5, %s19438_s22  ;;  %v2825_v5 = vsel %vm2767_vm6, %v13140_v37, %v13136_v44  ;;  %v2817_v37 = vsel %vm2767_vm6, %v13216_v20, %v13175_v51  ;;  %v2813_v44 = vsel %vm2767_vm6, %v13264_v22, %v13259_v53  ;;  %v19573_v8 = vld [vmem:[#allocation13_spill] sm:$0xff] }
 0x2b1   : > { %2685 = vrot.lane.b32.xlu0 %v11106_v49, %s19438_s22  ;;  %3008 = vmatprep.subr.mxu0 %v2832_v55  ;;  %v2812_v51 = vsel %vm2767_vm6, %v13235_v42, %v13264_v22  ;;  %v2806_v20 = vsel %vm2767_vm6, %v13301_v57, %v13328_v59  ;;  %v19568_v42 = vld [vmem:[#allocation9_spill] sm:$0xff]  ;;  %v2796_v29 = vsel %vm2767_vm6, %v2592_v9, %v13354_v34  ;;  %v19574_v9 = vld [vmem:[#allocation12_spill] sm:$0xff]  ;;  %v19576_v49 = vld [vmem:[#allocation15_spill] sm:$0xff] }
 0x2b2   : > { %3109 = vmatprep.subr.mxu1 %v2834_v38  ;;  %3009 = vmatpush1.msra.mxu0 %v2831_v36  ;;  %v13423_v47 = vpop.permute.xlu1 %2581  ;;  %v19575_v36 = vld [vmem:[#allocation16_spill] sm:$0xff] }
 0x2b3   : > { %3110 = vmatpush1.msra.mxu1 %v2833_v33  ;;  %3010 = vmatprep.subr.mxu0 %v2825_v5  ;;  %v2580_v52 = vpop.permute.xlu0 %2579  ;;  %v11110_v33 = vld [vmem:[#allocation2 + $0x178] sm:$0xff] }
 0x2b4   : > { %3111 = vmatprep.subr.mxu1 %v2827_v21  ;;  %3011 = vmatpush1.msra.mxu0 %v2824_v60  ;;  %v2791_v27 = vsel %vm2767_vm6, %v2580_v52, %v13423_v47  ;;  %v19578_v60 = vld [vmem:[#allocation18_spill] sm:$0xff] }
 0x2b5   : > { %3112 = vmatpush1.msra.mxu1 %v2826_v16  ;;  %2669 = vrot.lane.b32.xlu1 %v11107_v0, %s19438_s22  ;;  %v19579_v16 = vld [vmem:[#allocation20_spill] sm:$0xff]  ;;  %v19581_v0 = vld [vmem:[#allocation21_spill] sm:$0xff] }
 0x2b6   : > { %2667 = vrot.lane.b32.xlu0 %v13164_v19, %s19438_s22  ;;  %3012 = vmatprep.subr.mxu0 %v2818_v10  ;;  %v2810_v19 = vsel %vm2767_vm6, %v13287_v3, %v13246_v17  ;;  %v2797_v17 = vsel %vm2767_vm6, %v13354_v34, %v13344_v39  ;;  %v2799_v3 = vsel %vm2767_vm6, %v13378_v6, %v13371_v58 }
 0x2b7   : > { %3013 = vmatpush1.msra.mxu0 %v2817_v37  ;;  %3113 = vmatprep.subr.mxu1 %v2820_v61  ;;  %v19580_v37 = vld [vmem:[#allocation19_spill] sm:$0xff] }
 0x2b8   : > { %3114 = vmatpush1.msra.mxu1 %v2819_v28  ;;  %3014 = vmatprep.subr.mxu0 %v2811_v31  ;;  %v2576_v26 = vpop.permute.xlu1 %2575  ;;  %v11112_v28 = vld [vmem:[#allocation2 + $0xf8] sm:$0xff] }
 0x2b9   : > { %2651 = vrot.lane.b32.xlu1 %v13183_v25, %s19438_s22  ;;  %3115 = vmatprep.subr.mxu1 %v2813_v44  ;;  %v13469_v22 = vpop.permute.xlu0 %2583  ;;  %v2805_v25 = vsel %vm2767_vm6, %v13306_v14, %v13301_v57  ;;  %v2798_v57 = vsel %vm2767_vm6, %v13344_v39, %v13378_v6  ;;  %v2790_v14 = vsel %vm2767_vm6, %v13400_v48, %v2580_v52  ;;  %v19570_v6 = vld [vmem:[#allocation11_spill] sm:$0xff] }
 0x2ba   : > { %2649 = vrot.lane.b32.xlu0 %v19568_v42, %s19438_s22  ;;  %3116 = vmatpush1.msra.mxu1 %v2812_v51  ;;  %v2789_v63 = vsel %vm2767_vm6, %v2576_v26, %v13400_v48  ;;  %v2792_v62 = vsel %vm2767_vm6, %v13423_v47, %v13469_v22  ;;  %v19572_v48 = vld [vmem:[#allocation14_spill] sm:$0xff]  ;;  %v11111_v47 = vld [vmem:[#allocation2 + $0x138] sm:$0xff] }
 0x2bb   : > { %3015 = vmatpush1.msra.mxu0 %v2810_v19  ;;  %3117 = vmatprep.subr.mxu1 %v2806_v20  ;;  %v11113_v20 = vld [vmem:[#allocation2 + $0xb8] sm:$0xff]  ;;  %v19582_v26 = vld [vmem:[#allocation22_spill] sm:$0xff] }
 0x2bc   : > { %3016 = vmatprep.subr.mxu0 %v2804_v24  ;;  %3118 = vmatpush1.msra.mxu1 %v2805_v25  ;;  %v19583_v25 = vld [vmem:[#allocation24_spill] sm:$0xff] }
 0x2bd   : > { %2633 = vrot.lane.b32.xlu1 %v19569_v32, %s19438_s22  ;;  %3017 = vmatpush1.msra.mxu0 %v2803_v56  ;;  %v2564_v11 = vpop.permute.xlu1 %2563 }
 0x2be   : > { %2653 = vrot.lane.b32.xlu0 %v11108_v15, %s19438_s22  ;;  %3018 = vmatprep.subr.mxu0 %v2797_v17  ;;  %v2562_v34 = vpop.permute.xlu0 %2561  ;;  %v19584_v17 = vld [vmem:[#allocation25_spill] sm:$0xff]  ;;  %v13591_v15 = vld [vmem:[%s19530_s1 + $0x68] sm:$0xff] }
 0x2bf   : > { %3119 = vmatprep.subr.mxu1 %v2799_v3  ;;  %3019 = vmatpush1.msra.mxu0 %v2796_v29  ;;  %v2783_v39 = vsel %vm2767_vm6, %v2562_v34, %v2564_v11  ;;  %v11114_v3 = vld [vmem:[#allocation2 + $0x78] sm:$0xff] }
 0x2c0   : > { %3120 = vmatpush1.msra.mxu1 %v2798_v57  ;;  %3020 = vmatprep.subr.mxu0 %v2790_v14  ;;  %v13580_v14 = vld [vmem:[%s19530_s1 + $0x60] sm:$0xff] }
 0x2c1   : > { %2637 = vrot.lane.b32.xlu1 %v11109_v46, %s19438_s22  ;;  %3021 = vmatpush1.msra.mxu0 %v2789_v63  ;;  %v11116_v63 = vld [vmem:[#allocation2 + $0x390] sm:$0xff] }
 0x2c2   : > { %2635 = vrot.lane.b32.xlu0 %v19570_v6, %s19438_s22  ;;  %3121 = vmatprep.subr.mxu1 %v2792_v62  ;;  %v13506_v43 = vpop.permute.xlu1 %2567  ;;  %v11117_v62 = vld [vmem:[#allocation2 + $0x388] sm:$0xff]  ;;  %v13602_v46 = vld [vmem:[%s19530_s1 + $0x70] sm:$0xff]  ;;  %v11118_v6 = vld [vmem:[#allocation2 + $0x3a0] sm:$0xff] }
 0x2c3   : > { %3122 = vmatpush1.msra.mxu1 %v2791_v27  ;;  %3022 = vmatprep.subr.mxu0 %v2783_v39  ;;  %v2566_v40 = vpop.permute.xlu0 %2565  ;;  %v11119_v27 = vld [vmem:[#allocation2 + $0x398] sm:$0xff] }
 0x2c4   : > { %v2785_v18 = vsel %vm2767_vm6, %v2566_v40, %v13506_v43  ;;  %v2784_v2 = vsel %vm2767_vm6, %v2564_v11, %v2566_v40  ;;  %2394 = vmatprep.mubr.f32.mxu0 %v19541_v1  ;;  %10511 = vmatprep.mubr.msk.f32.mxu1 %vm1687_vm5, %v19571_v30  ;;  %v11115_v11 = vld [vmem:[#allocation2 + $0x38] sm:$0xff] }
 0x2c5   : > { %2619 = vrot.lane.b32.xlu1 %v19572_v48, %s19438_s22  ;;  %3123 = vmatprep.subr.mxu1 %v2785_v18  ;;  %v11120_v48 = vld [vmem:[#allocation2 + $0x348] sm:$0xff] }
 0x2c6   : > { %2617 = vrot.lane.b32.xlu0 %v19573_v8, %s19438_s22  ;;  %3124 = vmatpush1.msra.mxu1 %v2784_v2  ;;  %v13618_v8 = vld [vmem:[%s19530_s1 + $0x78] sm:$0xff] }
 0x2c7   : > { %9893 = vmatmul.mubr.msk.f32.gmra.mxu0 %vm1687_vm5, %v13134_v35  ;;  %10512 = vmatmul.mubr.msk.f32.gmra.mxu1 %vm1687_vm5, %v19574_v9  ;;  %v19577_v35 = vld [vmem:[#allocation23_spill] sm:$0xff] }
 0x2c8   : > { %v2546_v55 = vpop.permute.xlu1 %2545  ;;  %2400 = vmatprep.mubr.f32.mxu0 %v19541_v1  ;;  %10514 = vmatprep.mubr.msk.f32.mxu1 %vm1687_vm5, %v19575_v36 }
 0x2c9   : > { %2601 = vrot.lane.b32.xlu1 %v19576_v49, %s19438_s22  ;;  %v2560_v38 = vpop.permute.xlu0 %2559  ;;  %v11122_v49 = vld [vmem:[#allocation2 + $0x358] sm:$0xff] }
 0x2ca   : > { %2621 = vrot.lane.b32.xlu0 %v11110_v33, %s19438_s22  ;;  %v2782_v5 = vsel %vm2767_vm6, %v2560_v38, %v2562_v34  ;;  %v11123_v33 = vld [vmem:[#allocation2 + $0x350] sm:$0xff] }
 0x2cb   : > { %3023 = vmatpush1.msra.mxu0 %v2782_v5  ;;  %10515 = vmatmul.mubr.msk.f32.gmra.mxu1 %vm1687_vm5, %v19577_v35 }
 0x2cc   : > { %9894 = vmatmul.mubr.msk.f32.gmra.mxu0 %vm1687_vm5, %v19571_v30  ;;  %3161 = vmatprep.mubr.f32.mxu1 %v19541_v1 }
 0x2cd   : > { %2605 = vrot.lane.b32.xlu1 %v11111_v47, %s19438_s22  ;;  %2406 = vmatprep.mubr.f32.mxu0 %v19541_v1 }
 0x2ce   : > { %2603 = vrot.lane.b32.xlu0 %v19578_v60, %s19438_s22  ;;  %v2550_v21 = vpop.permute.xlu1 %2549  ;;  %v13639_v60 = vld [vmem:[%s19530_s1 + $0x80] sm:$0xff] }
 0x2cf   : > { %v2548_v10 = vpop.permute.xlu0 %2547 }
 0x2d0   : > { %v2776_v52 = vsel %vm2767_vm6, %v2546_v55, %v2548_v10  ;;  %9895 = vmatmul.mubr.msk.f32.gmra.mxu0 %vm1687_vm5, %v19574_v9  ;;  %v2777_v19 = vsel %vm2767_vm6, %v2548_v10, %v2550_v21  ;;  %v11121_v9 = vld [vmem:[#allocation2 + $0x380] sm:$0xff] }
 0x2d1   : > { %2587 = vrot.lane.b32.xlu1 %v19579_v16, %s19438_s22  ;;  %3024 = vmatprep.subr.mxu0 %v2776_v52  ;;  %v11125_v10 = vld [vmem:[#allocation2 + $0x360] sm:$0xff]  ;;  %v11126_v52 = vld [vmem:[#allocation2 + $0x310] sm:$0xff] }
 0x2d2   : > { %2585 = vrot.lane.b32.xlu0 %v19580_v37, %s19438_s22  ;;  %2412 = vmatprep.mubr.f32.mxu0 %v19541_v1 }
 0x2d4   : > { %v2544_v61 = vpop.permute.xlu1 %2543  ;;  %9896 = vmatmul.mubr.msk.f32.gmra.mxu0 %vm1687_vm5, %v19575_v36 }
 0x2d5   : > { %2569 = vrot.lane.b32.xlu1 %v19581_v0, %s19438_s22  ;;  %v2775_v31 = vsel %vm2767_vm6, %v2544_v61, %v2546_v55  ;;  %v13551_v44 = vpop.permute.xlu0 %2551  ;;  %2418 = vmatprep.mubr.f32.mxu0 %v19541_v1  ;;  %v19585_v55 = vld [vmem:[#allocation17_spill] sm:$0xff]  ;;  %v11127_v61 = vld [vmem:[#allocation2 + $0x308] sm:$0xff] }
 0x2d6   : > { %2589 = vrot.lane.b32.xlu0 %v11112_v28, %s19438_s22  ;;  %3025 = vmatpush1.msra.mxu0 %v2775_v31  ;;  %v2778_v51 = vsel %vm2767_vm6, %v2550_v21, %v13551_v44  ;;  %v11124_v21 = vld [vmem:[#allocation2 + $0x340] sm:$0xff]  ;;  %v11129_v28 = vld [vmem:[#allocation2 + $0x318] sm:$0xff] }
 0x2d7   : > { %3125 = vmatprep.subr.mxu1 %v2778_v51  ;;  %v11128_v31 = vld [vmem:[#allocation2 + $0x320] sm:$0xff] }
 0x2d8   : > { %3126 = vmatpush1.msra.mxu1 %v2777_v19  ;;  %9897 = vmatmul.mubr.msk.f32.gmra.mxu0 %vm1687_vm5, %v19577_v35 }
 0x2d9   : > { %2573 = vrot.lane.b32.xlu1 %v11113_v20, %s19438_s22  ;;  %3060 = vmatprep.mubr.f32.mxu0 %v19541_v1  ;;  %v11130_v20 = vld [vmem:[#allocation2 + $0x2c8] sm:$0xff] }
 0x2da   : > { %2571 = vrot.lane.b32.xlu0 %v19582_v26, %s19438_s22 }
 0x2db   : > { %v2532_v24 = vpop.permute.xlu1 %2531 }
 0x2dc   : > { %v2530_v42 = vpop.permute.xlu0 %2529 }
 0x2dd   : > { %2555 = vrot.lane.b32.xlu1 %v13293_v41, %s19438_s22  ;;  %v2769_v56 = vsel %vm2767_vm6, %v2530_v42, %v2532_v24 }
 0x2de   : > { %2553 = vrot.lane.b32.xlu0 %v19583_v25, %s19438_s22  ;;  %3026 = vmatprep.subr.mxu0 %v2769_v56  ;;  %v11132_v25 = vld [vmem:[#allocation2 + $0x2d8] sm:$0xff] }
 0x2e1   : > { %2537 = vrot.lane.b32.xlu1 %v19584_v17, %s19438_s22  ;;  %v11133_v17 = vld [vmem:[#allocation2 + $0x2d0] sm:$0xff] }
 0x2e2   : > { %2557 = vrot.lane.b32.xlu0 %v11114_v3, %s19438_s22  ;;  %v13572_v29 = vpop.permute.xlu1 %2535 }
 0x2e3   : > { %v2534_v32 = vpop.permute.xlu0 %2533 }
 0x2e4   : > { %v2771_v57 = vsel %vm2767_vm6, %v2534_v32, %v13572_v29  ;;  %v2770_v41 = vsel %vm2767_vm6, %v2532_v24, %v2534_v32 }
 0x2e5   : > { %2541 = vrot.lane.b32.xlu1 %v11115_v11, %s19438_s22  ;;  %3127 = vmatprep.subr.mxu1 %v2771_v57  ;;  %v11134_v11 = vld [vmem:[#allocation2 + $0x2c0] sm:$0xff] }
 0x2e6   : > { %2539 = vrot.lane.b32.xlu0 %v13312_v54, %s19438_s22  ;;  %3128 = vmatpush1.msra.mxu1 %v2770_v41  ;;  %s19331_s22 = scalar_lea.hbm %s19379_s13, %s10233_s30 }
 0x2e7   : > { %9916 = vmatmul.mubr.msk.f32.vlgmr.msra.gmra.mxu1 %vm1687_vm5, %v13580_v14 }
 0x2e8   : > { %3167 = vmatprep.mubr.f32.mxu1 %v19541_v1 }
 0x2e9   : > { %3671 = vrot.lane.b32.xlu1 %v11116_v63, %s19417_s23  ;;  %v2762_v34 = vpop.permute.xlu1 %2761  ;;  %v11136_v63 = vld [vmem:[#allocation2 + $0x290] sm:$0xff] }
 0x2ea   : > { %3669 = vrot.lane.b32.xlu0 %v11117_v62, %s19417_s23  ;;  %v2528_v54 = vpop.permute.xlu0 %2527  ;;  %v2870_v36 = vsel %vm2767_vm6, %v19585_v55, %v2762_v34  ;;  %v11142_v55 = vld [vmem:[#allocation2 + $0x258] sm:$0xff] }
 0x2eb   : > { %v2768_v39 = vsel %vm2767_vm6, %v2528_v54, %v2530_v42  ;;  %9917 = vmatmul.mubr.msk.f32.gmra.mxu1 %vm1687_vm5, %v13591_v15  ;;  %v11131_v42 = vld [vmem:[#allocation2 + $0x300] sm:$0xff] }
 0x2ec   : > { %3027 = vmatpush1.msra.mxu0 %v2768_v39  ;;  %3173 = vmatprep.mubr.f32.mxu1 %v19541_v1 }
 0x2ed   : > { %3675 = vrot.lane.b32.xlu1 %v11118_v6, %s19417_s23  ;;  %9910 = vmatmul.mubr.msk.f32.vlgmr.msra.gmra.mxu0 %vm1687_vm5, %v13580_v14  ;;  %v11139_v6 = vld [vmem:[#allocation2 + $0x298] sm:$0xff] }
 0x2ee   : > { %3673 = vrot.lane.b32.xlu0 %v11119_v27, %s19417_s23  ;;  %v2766_v40 = vpop.permute.xlu1 %2765  ;;  %3066 = vmatprep.mubr.f32.mxu0 %v19541_v1 }
 0x2ef   : > { %v2764_v18 = vpop.permute.xlu0 %2763  ;;  %9918 = vmatmul.mubr.msk.f32.gmra.mxu1 %vm1687_vm5, %v13602_v46 }
 0x2f0   : > { %v2871_v2 = vsel %vm2767_vm6, %v2762_v34, %v2764_v18  ;;  %v2872_v30 = vsel %vm2767_vm6, %v2764_v18, %v2766_v40  ;;  %3179 = vmatprep.mubr.f32.mxu1 %v19541_v1  ;;  %v11137_v34 = vld [vmem:[#allocation2 + $0x288] sm:$0xff] }
 0x2f1   : > { %3653 = vrot.lane.b32.xlu1 %v11120_v48, %s19417_s23  ;;  %3200 = vmatprep.subr.mxu0 %v2871_v2  ;;  %v11140_v40 = vld [vmem:[#allocation2 + $0x248] sm:$0xff]  ;;  %v11141_v2 = vld [vmem:[#allocation2 + $0x280] sm:$0xff] }
 0x2f2   : > { %3667 = vrot.lane.b32.xlu0 %v11121_v9, %s19417_s23  ;;  %10517 = vmatprep.subr.mxu1 %v2872_v30 }
 0x2f3   : > { %3201 = vmatpush1.msra.mxu0 %v2870_v36  ;;  %10518 = vmatpush3.msra.mxu1 %v2872_v30 }
 0x2f4   : > { %9911 = vmatmul.mubr.msk.f32.gmra.mxu0 %vm1687_vm5, %v13591_v15  ;;  %9919 = vmatmul.mubr.msk.f32.gmra.mxu1 %vm1687_vm5, %v13618_v8 }
 0x2f5   : > { %3657 = vrot.lane.b32.xlu1 %v11122_v49, %s19417_s23  ;;  %v2748_v38 = vpop.permute.xlu1 %2747  ;;  %3072 = vmatprep.mubr.f32.mxu0 %v19541_v1  ;;  %v11143_v49 = vld [vmem:[#allocation2 + $0x250] sm:$0xff] }
 0x2f6   : > { %3655 = vrot.lane.b32.xlu0 %v11123_v33, %s19417_s23  ;;  %v2746_v5 = vpop.permute.xlu0 %2745  ;;  %3185 = vmatprep.mubr.f32.mxu1 %v19541_v1 }
 0x2f7   : > { %v2864_v35 = vsel %vm2767_vm6, %v2746_v5, %v2748_v38  ;;  %v2863_v47 = vsel %vm2767_vm6, %v12988_v4, %v2746_v5  ;;  %v13652_v4 = vld [vmem:[%s19530_s1 + $0x88] sm:$0xff] }
 0x2f8   : > { %3202 = vmatprep.subr.mxu0 %v2864_v35  ;;  %9912 = vmatmul.mubr.msk.f32.gmra.mxu0 %vm1687_vm5, %v13602_v46  ;;  %v11144_v35 = vld [vmem:[#allocation2 + $0x240] sm:$0xff] }
 0x2f9   : > { %3651 = vrot.lane.b32.xlu1 %v11124_v21, %s19417_s23  ;;  %3203 = vmatpush1.msra.mxu0 %v2863_v47 }
 0x2fa   : > { %3659 = vrot.lane.b32.xlu0 %v11125_v10, %s19417_s23  ;;  %3078 = vmatprep.mubr.f32.mxu0 %v19541_v1 }
 0x2fb   : > { %9920 = vmatmul.mubr.msk.f32.gmra.mxu1 %vm1687_vm5, %v13639_v60 }
 0x2fc   : > { %9913 = vmatmul.mubr.msk.f32.gmra.mxu0 %vm1687_vm5, %v13618_v8  ;;  %3191 = vmatprep.mubr.f32.mxu1 %v19541_v1  ;;  %v2730_v16 = vpop.permute.xlu1 %2729 }
 0x2fd   : > { %3639 = vrot.lane.b32.xlu1 %v11126_v52, %s19417_s23  ;;  %v2750_v37 = vpop.permute.xlu0 %2749  ;;  %3084 = vmatprep.mubr.f32.mxu0 %v19541_v1  ;;  %v2856_v56 = vsel %vm2767_vm6, %v13009_v50, %v2730_v16  ;;  %v11135_v50 = vld [vmem:[#allocation2 + $0x2e0] sm:$0xff]  ;;  %v11146_v52 = vld [vmem:[#allocation2 + $0x210] sm:$0xff] }
 0x2fe   : > { %3637 = vrot.lane.b32.xlu0 %v11127_v61, %s19417_s23  ;;  %v2865_v0 = vsel %vm2767_vm6, %v2748_v38, %v2750_v37  ;;  %v11148_v61 = vld [vmem:[#allocation2 + $0x220] sm:$0xff] }
 0x2ff   : > { %10519 = vmatprep.subr.mxu1 %v2865_v0  ;;  %9921 = vmatmul.mubr.msk.f32.gmra.mxu1 %vm1687_vm5, %v13652_v4 }
 0x300   : > { %10520 = vmatpush3.msra.mxu1 %v2865_v0  ;;  %9914 = vmatmul.mubr.msk.f32.gmra.mxu0 %vm1687_vm5, %v13639_v60 }
 0x301   : > { %3643 = vrot.lane.b32.xlu1 %v11128_v31, %s19417_s23  ;;  %3090 = vmatprep.mubr.f32.mxu0 %v19541_v1 }
 0x302   : > { %3641 = vrot.lane.b32.xlu0 %v11129_v28, %s19417_s23  ;;  %10547 = vmatprep.mubr.msk.f32.mxu1 %vm1687_vm5, %v13580_v14  ;;  %v11149_v28 = vld [vmem:[#allocation2 + $0x218] sm:$0xff] }
 0x303   : > { %v2734_v51 = vpop.permute.xlu1 %2733 }
 0x304   : > { %v2732_v19 = vpop.permute.xlu0 %2731  ;;  %9915 = vmatmul.mubr.msk.f32.gmra.mxu0 %vm1687_vm5, %v13652_v4 }
 0x305   : > { %3621 = vrot.lane.b32.xlu1 %v11130_v20, %s19417_s23  ;;  %v2857_v26 = vsel %vm2767_vm6, %v2730_v16, %v2732_v19  ;;  %v2858_v24 = vsel %vm2767_vm6, %v2732_v19, %v2734_v51  ;;  %3262 = vmatprep.mubr.f32.mxu0 %v19541_v1  ;;  %v11147_v16 = vld [vmem:[#allocation2 + $0x208] sm:$0xff] }
 0x306   : > { %3635 = vrot.lane.b32.xlu0 %v11131_v42, %s19417_s23  ;;  %3204 = vmatprep.subr.mxu0 %v2857_v26  ;;  %v11150_v26 = vld [vmem:[#allocation2 + $0x1c8] sm:$0xff] }
 0x307   : > { %10521 = vmatprep.subr.mxu1 %v2858_v24  ;;  %3205 = vmatpush1.msra.mxu0 %v2856_v56  ;;  %v11151_v56 = vld [vmem:[#allocation2 + $0x200] sm:$0xff] }
 0x308   : > { %10522 = vmatpush3.msra.mxu1 %v2858_v24 }
 0x309   : > { %3625 = vrot.lane.b32.xlu1 %v11132_v25, %s19417_s23 }
 0x30a   : > { %3623 = vrot.lane.b32.xlu0 %v11133_v17, %s19417_s23  ;;  %v2716_v3 = vpop.permute.xlu1 %2715  ;;  %v11152_v17 = vld [vmem:[#allocation2 + $0x1d8] sm:$0xff] }
 0x30b   : > { %v2714_v32 = vpop.permute.xlu0 %2713 }
 0x30c   : > { %v2850_v57 = vsel %vm2767_vm6, %v2714_v32, %v2716_v3  ;;  %v2849_v41 = vsel %vm2767_vm6, %v13056_v45, %v2714_v32  ;;  %v11138_v45 = vld [vmem:[#allocation2 + $0x2a0] sm:$0xff]  ;;  %v11153_v32 = vld [vmem:[#allocation2 + $0x1d0] sm:$0xff] }
 0x30d   : > { %3619 = vrot.lane.b32.xlu1 %v11134_v11, %s19417_s23  ;;  %3206 = vmatprep.subr.mxu0 %v2850_v57 }
 0x30e   : > { %3627 = vrot.lane.b32.xlu0 %v11135_v50, %s19417_s23  ;;  %3207 = vmatpush1.msra.mxu0 %v2849_v41 }
 0x311   : > { %3607 = vrot.lane.b32.xlu1 %v11136_v63, %s19417_s23  ;;  %v2698_v62 = vpop.permute.xlu1 %2697  ;;  %v11155_v63 = vld [vmem:[#allocation2 + $0x1e0] sm:$0xff] }
 0x312   : > { %3605 = vrot.lane.b32.xlu0 %v11137_v34, %s19417_s23  ;;  %v2718_v54 = vpop.permute.xlu0 %2717  ;;  %v2842_v9 = vsel %vm2767_vm6, %v13073_v23, %v2698_v62  ;;  %v11145_v23 = vld [vmem:[#allocation2 + $0x260] sm:$0xff] }
 0x313   : > { %v2851_v39 = vsel %vm2767_vm6, %v2716_v3, %v2718_v54 }
 0x314   : > { %10523 = vmatprep.subr.mxu1 %v2851_v39 }
 0x315   : > { %3611 = vrot.lane.b32.xlu1 %v11138_v45, %s19417_s23  ;;  %10524 = vmatpush3.msra.mxu1 %v2851_v39  ;;  %v11156_v39 = vld [vmem:[#allocation2 + $0x190] sm:$0xff] }
 0x316   : > { %3609 = vrot.lane.b32.xlu0 %v11139_v6, %s19417_s23 }
 0x318   : > { %v2702_v27 = vpop.permute.xlu1 %2701 }
 0x319   : > { %3589 = vrot.lane.b32.xlu1 %v11140_v40, %s19417_s23  ;;  %v2700_v18 = vpop.permute.xlu0 %2699 }
 0x31a   : > { %3603 = vrot.lane.b32.xlu0 %v11141_v2, %s19417_s23  ;;  %v2843_v30 = vsel %vm2767_vm6, %v2698_v62, %v2700_v18  ;;  %v2844_v48 = vsel %vm2767_vm6, %v2700_v18, %v2702_v27  ;;  %v11157_v27 = vld [vmem:[#allocation2 + $0x188] sm:$0xff]  ;;  %v11158_v18 = vld [vmem:[#allocation2 + $0x1a0] sm:$0xff] }
 0x31b   : > { %3208 = vmatprep.subr.mxu0 %v2843_v30  ;;  %10525 = vmatprep.subr.mxu1 %v2844_v48  ;;  %v11159_v30 = vld [vmem:[#allocation2 + $0x198] sm:$0xff] }
 0x31c   : > { %3209 = vmatpush1.msra.mxu0 %v2842_v9  ;;  %10526 = vmatpush3.msra.mxu1 %v2844_v48 }
 0x31d   : > { %3593 = vrot.lane.b32.xlu1 %v11142_v55, %s19417_s23  ;;  %v2684_v36 = vpop.permute.xlu1 %2683 }
 0x31e   : > { %3591 = vrot.lane.b32.xlu0 %v11143_v49, %s19417_s23  ;;  %v2682_v38 = vpop.permute.xlu0 %2681  ;;  %v11161_v49 = vld [vmem:[#allocation2 + $0x180] sm:$0xff] }
 0x31f   : > { %v2836_v33 = vsel %vm2767_vm6, %v2682_v38, %v2684_v36  ;;  %v2835_v5 = vsel %vm2767_vm6, %v13119_v12, %v2682_v38 }
 0x320   : > { %3210 = vmatprep.subr.mxu0 %v2836_v33 }
 0x321   : > { %3587 = vrot.lane.b32.xlu1 %v11144_v35, %s19417_s23  ;;  %3211 = vmatpush1.msra.mxu0 %v2835_v5  ;;  %v11162_v35 = vld [vmem:[#allocation2 + $0x158] sm:$0xff] }
 0x322   : > { %3595 = vrot.lane.b32.xlu0 %v11145_v23, %s19417_s23  ;;  %v2666_v47 = vpop.permute.xlu1 %2665 }
 0x323   : > { %v2686_v21 = vpop.permute.xlu0 %2685  ;;  %v2828_v51 = vsel %vm2767_vm6, %v13154_v7, %v2666_v47 }
 0x324   : > { %v2837_v10 = vsel %vm2767_vm6, %v2684_v36, %v2686_v21  ;;  %v11163_v21 = vld [vmem:[#allocation2 + $0x150] sm:$0xff] }
 0x325   : > { %3575 = vrot.lane.b32.xlu1 %v11146_v52, %s19417_s23  ;;  %10527 = vmatprep.subr.mxu1 %v2837_v10  ;;  %v11164_v52 = vld [vmem:[#allocation2 + $0x140] sm:$0xff] }
 0x326   : > { %3573 = vrot.lane.b32.xlu0 %v11147_v16, %s19417_s23  ;;  %10528 = vmatpush3.msra.mxu1 %v2837_v10 }
 0x327   : > { %v2670_v12 = vpop.permute.xlu1 %2669 }
 0x328   : > { %v2668_v37 = vpop.permute.xlu0 %2667 }
 0x329   : > { %3579 = vrot.lane.b32.xlu1 %v11148_v61, %s19417_s23  ;;  %v2829_v0 = vsel %vm2767_vm6, %v2666_v47, %v2668_v37  ;;  %v2830_v31 = vsel %vm2767_vm6, %v2668_v37, %v2670_v12  ;;  %v11165_v12 = vld [vmem:[#allocation2 + $0x160] sm:$0xff] }
 0x32a   : > { %3577 = vrot.lane.b32.xlu0 %v11149_v28, %s19417_s23  ;;  %3212 = vmatprep.subr.mxu0 %v2829_v0  ;;  %v11167_v28 = vld [vmem:[#allocation2 + $0x108] sm:$0xff] }
 0x32b   : > { %10529 = vmatprep.subr.mxu1 %v2830_v31  ;;  %3213 = vmatpush1.msra.mxu0 %v2828_v51  ;;  %v2652_v19 = vpop.permute.xlu1 %2651 }
 0x32c   : > { %10530 = vmatpush3.msra.mxu1 %v2830_v31  ;;  %v2650_v20 = vpop.permute.xlu0 %2649 }
 0x32d   : > { %3557 = vrot.lane.b32.xlu1 %v11150_v26, %s19417_s23  ;;  %v2822_v24 = vsel %vm2767_vm6, %v2650_v20, %v2652_v19  ;;  %v2821_v42 = vsel %vm2767_vm6, %v13223_v13, %v2650_v20  ;;  %v11154_v13 = vld [vmem:[#allocation2 + $0x1c0] sm:$0xff] }
 0x32e   : > { %3571 = vrot.lane.b32.xlu0 %v11151_v56, %s19417_s23  ;;  %3214 = vmatprep.subr.mxu0 %v2822_v24  ;;  %v11168_v26 = vld [vmem:[#allocation2 + $0x120] sm:$0xff]  ;;  %v11169_v56 = vld [vmem:[#allocation2 + $0x118] sm:$0xff] }
 0x32f   : > { %3215 = vmatpush1.msra.mxu0 %v2821_v42  ;;  %v2634_v25 = vpop.permute.xlu1 %2633 }
 0x330   : > { %v2654_v7 = vpop.permute.xlu0 %2653  ;;  %v2814_v34 = vsel %vm2767_vm6, %v13259_v53, %v2634_v25 }
 0x331   : > { %3561 = vrot.lane.b32.xlu1 %v11152_v17, %s19417_s23  ;;  %v2823_v3 = vsel %vm2767_vm6, %v2652_v19, %v2654_v7  ;;  %v11170_v7 = vld [vmem:[#allocation2 + $0xc8] sm:$0xff] }
 0x332   : > { %3559 = vrot.lane.b32.xlu0 %v11153_v32, %s19417_s23  ;;  %10531 = vmatprep.subr.mxu1 %v2823_v3 }
 0x333   : > { %10532 = vmatpush3.msra.mxu1 %v2823_v3  ;;  %v2638_v57 = vpop.permute.xlu1 %2637  ;;  %v11171_v3 = vld [vmem:[#allocation2 + $0x100] sm:$0xff] }
 0x334   : > { %v2636_v41 = vpop.permute.xlu0 %2635 }
 0x335   : > { %3555 = vrot.lane.b32.xlu1 %v11154_v13, %s19417_s23  ;;  %v2815_v11 = vsel %vm2767_vm6, %v2634_v25, %v2636_v41  ;;  %v2816_v50 = vsel %vm2767_vm6, %v2636_v41, %v2638_v57 }
 0x336   : > { %3563 = vrot.lane.b32.xlu0 %v11155_v63, %s19417_s23  ;;  %3216 = vmatprep.subr.mxu0 %v2815_v11  ;;  %v11173_v11 = vld [vmem:[#allocation2 + $0xd0] sm:$0xff]  ;;  %v13766_v63 = vpop.f32.mrf.mxu0 }
 0x337   : > { %10533 = vmatprep.subr.mxu1 %v2816_v50  ;;  %3217 = vmatpush1.msra.mxu0 %v2814_v34  ;;  %v2620_v62 = vpop.permute.xlu1 %2619 }
 0x338   : > { %10534 = vmatpush3.msra.mxu1 %v2816_v50  ;;  %v2618_v54 = vpop.permute.xlu0 %2617 }
 0x339   : > { %3543 = vrot.lane.b32.xlu1 %v11156_v39, %s19417_s23  ;;  %v2808_v45 = vsel %vm2767_vm6, %v2618_v54, %v2620_v62  ;;  %v2807_v6 = vsel %vm2767_vm6, %v13328_v59, %v2618_v54  ;;  %v11160_v59 = vld [vmem:[#allocation2 + $0x148] sm:$0xff]  ;;  %v11174_v54 = vld [vmem:[#allocation2 + $0xc0] sm:$0xff] }
 0x33a   : > { %3541 = vrot.lane.b32.xlu0 %v11157_v27, %s19417_s23  ;;  %3218 = vmatprep.subr.mxu0 %v2808_v45  ;;  %v11175_v45 = vld [vmem:[#allocation2 + $0xe0] sm:$0xff] }
 0x33b   : > { %3219 = vmatpush1.msra.mxu0 %v2807_v6  ;;  %v2602_v40 = vpop.permute.xlu1 %2601 }
 0x33c   : > { %v2622_v53 = vpop.permute.xlu0 %2621  ;;  %v2800_v38 = vsel %vm2767_vm6, %v13371_v58, %v2602_v40 }
 0x33d   : > { %3547 = vrot.lane.b32.xlu1 %v11158_v18, %s19417_s23  ;;  %v2809_v2 = vsel %vm2767_vm6, %v2620_v62, %v2622_v53 }
 0x33e   : > { %3545 = vrot.lane.b32.xlu0 %v11159_v30, %s19417_s23  ;;  %10535 = vmatprep.subr.mxu1 %v2809_v2  ;;  %v11177_v30 = vld [vmem:[#allocation2 + $0x88] sm:$0xff] }
 0x33f   : > { %10536 = vmatpush3.msra.mxu1 %v2809_v2  ;;  %v2606_v48 = vpop.permute.xlu1 %2605 }
 0x340   : > { %v2604_v9 = vpop.permute.xlu0 %2603 }
 0x341   : > { %3525 = vrot.lane.b32.xlu1 %v11160_v59, %s19417_s23  ;;  %v2801_v55 = vsel %vm2767_vm6, %v2602_v40, %v2604_v9  ;;  %v2802_v36 = vsel %vm2767_vm6, %v2604_v9, %v2606_v48  ;;  %v11176_v40 = vld [vmem:[#allocation2 + $0x90] sm:$0xff] }
 0x342   : > { %3539 = vrot.lane.b32.xlu0 %v11161_v49, %s19417_s23  ;;  %3220 = vmatprep.subr.mxu0 %v2801_v55  ;;  %v11178_v55 = vld [vmem:[#allocation2 + $0xa0] sm:$0xff]  ;;  %v11179_v49 = vld [vmem:[#allocation2 + $0x98] sm:$0xff] }
 0x343   : > { %10537 = vmatprep.subr.mxu1 %v2802_v36  ;;  %3221 = vmatpush1.msra.mxu0 %v2800_v38  ;;  %v2588_v33 = vpop.permute.xlu1 %2587 }
 0x344   : > { %10538 = vmatpush3.msra.mxu1 %v2802_v36  ;;  %v2586_v5 = vpop.permute.xlu0 %2585 }
 0x345   : > { %3529 = vrot.lane.b32.xlu1 %v11162_v35, %s19417_s23  ;;  %v2794_v23 = vsel %vm2767_vm6, %v2586_v5, %v2588_v33  ;;  %v2793_v47 = vsel %vm2767_vm6, %v13469_v22, %v2586_v5  ;;  %v11166_v22 = vld [vmem:[#allocation2 + $0x110] sm:$0xff]  ;;  %v11180_v5 = vld [vmem:[#allocation2 + $0x48] sm:$0xff] }
 0x346   : > { %3527 = vrot.lane.b32.xlu0 %v11163_v21, %s19417_s23  ;;  %3222 = vmatprep.subr.mxu0 %v2794_v23 }
 0x347   : > { %3223 = vmatpush1.msra.mxu0 %v2793_v47  ;;  %v2570_v10 = vpop.permute.xlu1 %2569  ;;  %v11181_v47 = vld [vmem:[#allocation2 + $0x80] sm:$0xff] }
 0x348   : > { %v2590_v58 = vpop.permute.xlu0 %2589  ;;  %v2786_v51 = vsel %vm2767_vm6, %v13506_v43, %v2570_v10 }
 0x349   : > { %3523 = vrot.lane.b32.xlu1 %v11164_v52, %s19417_s23  ;;  %v2795_v16 = vsel %vm2767_vm6, %v2588_v33, %v2590_v58  ;;  %v11182_v52 = vld [vmem:[#allocation2 + $0x58] sm:$0xff] }
 0x34a   : > { %3531 = vrot.lane.b32.xlu0 %v11165_v12, %s19417_s23  ;;  %10539 = vmatprep.subr.mxu1 %v2795_v16 }
 0x34b   : > { %10540 = vmatpush3.msra.mxu1 %v2795_v16  ;;  %v2574_v37 = vpop.permute.xlu1 %2573 }
 0x34c   : > { %v2572_v61 = vpop.permute.xlu0 %2571 }
 0x34d   : > { %3511 = vrot.lane.b32.xlu1 %v11166_v22, %s19417_s23  ;;  %v2787_v0 = vsel %vm2767_vm6, %v2570_v10, %v2572_v61  ;;  %v2788_v31 = vsel %vm2767_vm6, %v2572_v61, %v2574_v37  ;;  %v11183_v37 = vld [vmem:[#allocation2 + $0x50] sm:$0xff] }
 0x34e   : > { %3509 = vrot.lane.b32.xlu0 %v11167_v28, %s19417_s23  ;;  %3224 = vmatprep.subr.mxu0 %v2787_v0 }
 0x34f   : > { %10541 = vmatprep.subr.mxu1 %v2788_v31  ;;  %3225 = vmatpush1.msra.mxu0 %v2786_v51  ;;  %v2556_v19 = vpop.permute.xlu1 %2555 }
 0x350   : > { %10542 = vmatpush3.msra.mxu1 %v2788_v31  ;;  %v2554_v20 = vpop.permute.xlu0 %2553  ;;  %v11184_v31 = vld [vmem:[#allocation2 + $0x40] sm:$0xff] }
 0x351   : > { %3515 = vrot.lane.b32.xlu1 %v11168_v26, %s19417_s23  ;;  %v2780_v24 = vsel %vm2767_vm6, %v2554_v20, %v2556_v19  ;;  %v2779_v42 = vsel %vm2767_vm6, %v13551_v44, %v2554_v20  ;;  %v11172_v44 = vld [vmem:[#allocation2 + $0xd8] sm:$0xff] }
 0x352   : > { %3513 = vrot.lane.b32.xlu0 %v11169_v56, %s19417_s23  ;;  %3226 = vmatprep.subr.mxu0 %v2780_v24 }
 0x353   : > { %3227 = vmatpush1.msra.mxu0 %v2779_v42  ;;  %v2538_v25 = vpop.permute.xlu1 %2537  ;;  %v11186_v42 = vld [vmem:[#allocation2 + $0x10] sm:$0xff] }
 0x354   : > { %v2558_v43 = vpop.permute.xlu0 %2557  ;;  %v2772_v50 = vsel %vm2767_vm6, %v13572_v29, %v2538_v25  ;;  %v13774_v29 = vpop.f32.mrf.mxu0 }
 0x355   : > { %3493 = vrot.lane.b32.xlu1 %v11170_v7, %s19417_s23  ;;  %v2781_v17 = vsel %vm2767_vm6, %v2556_v19, %v2558_v43  ;;  %19586 = vst [vmem:[#allocation9_spill] sm:$0xff] %v13774_v29  ;;  %v11185_v19 = vld [vmem:[#allocation2 + $0x60] sm:$0xff]  ;;  %v11187_v43 = vld [vmem:[#allocation2 + $0x8] sm:$0xff] }
 0x356   : > { %3507 = vrot.lane.b32.xlu0 %v11171_v3, %s19417_s23  ;;  %10543 = vmatprep.subr.mxu1 %v2781_v17 }
 0x357   : > { %10544 = vmatpush3.msra.mxu1 %v2781_v17  ;;  %v2542_v32 = vpop.permute.xlu1 %2541 }
 0x358   : > { %v2540_v57 = vpop.permute.xlu0 %2539 }
 0x359   : > { %3497 = vrot.lane.b32.xlu1 %v11172_v44, %s19417_s23  ;;  %v2773_v41 = vsel %vm2767_vm6, %v2538_v25, %v2540_v57  ;;  %v2774_v13 = vsel %vm2767_vm6, %v2540_v57, %v2542_v32  ;;  %v11188_v57 = vld [vmem:[#allocation2 + $0x20] sm:$0xff] }
 0x35a   : > { %3495 = vrot.lane.b32.xlu0 %v11173_v11, %s19417_s23  ;;  %3228 = vmatprep.subr.mxu0 %v2773_v41  ;;  %v11189_v41 = vld [vmem:[#allocation2 + $0x18] sm:$0xff] }
 0x35b   : > { %10545 = vmatprep.subr.mxu1 %v2774_v13  ;;  %3229 = vmatpush1.msra.mxu0 %v2772_v50  ;;  %v3672_v34 = vpop.permute.xlu1 %3671 }
 0x35c   : > { %10546 = vmatpush3.msra.mxu1 %v2774_v13  ;;  %v3670_v62 = vpop.permute.xlu0 %3669  ;;  %9922 = vmatmul.mubr.msk.f32.vlgmr.msra.gmra.mxu0 %vm1687_vm5, %v13580_v14  ;;  %v13782_v14 = vpop.f32.mrf.mxu0 }
 0x35d   : > { %3491 = vrot.lane.b32.xlu1 %v11174_v54, %s19417_s23  ;;  %v3783_v39 = vsel %vm3683_vm7, %v3670_v62, %v3672_v34  ;;  %10548 = vmatmul.mubr.msk.f32.vlgmr.msra.gmra.mxu1 %vm1687_vm5, %v13591_v15 }
 0x35e   : > { %3499 = vrot.lane.b32.xlu0 %v11175_v45, %s19417_s23  ;;  %3914 = vmatprep.subr.mxu0 %v3783_v39  ;;  %v13791_v2 = vpop.f32.mrf.mxu0  ;;  %v11191_v39 = vld [vmem:[#allocation2] sm:$0xff] }
 0x35f   : > { %v13777_v6 = vpop.permute.xlu1 %3675  ;;  %3268 = vmatprep.mubr.f32.mxu0 %v19541_v1  ;;  %10550 = vmatprep.mubr.msk.f32.mxu1 %vm1687_vm5, %v13602_v46  ;;  %19587 = vst [vmem:[#allocation10_spill] sm:$0xff] %v13791_v2 }
 0x360   : > { %v3674_v27 = vpop.permute.xlu0 %3673  ;;  %9923 = vmatmul.mubr.msk.f32.gmra.mxu0 %vm1687_vm5, %v13591_v15  ;;  %v13794_v9 = vpop.f32.mrf.mxu0 }
 0x361   : > { %3479 = vrot.lane.b32.xlu1 %v11176_v40, %s19417_s23  ;;  %v3785_v53 = vsel %vm3683_vm7, %v3674_v27, %v13777_v6  ;;  %v3784_v18 = vsel %vm3683_vm7, %v3672_v34, %v3674_v27  ;;  %3274 = vmatprep.mubr.f32.mxu0 %v19541_v1  ;;  %v11190_v34 = vld [vmem:[#allocation2 + $0x3a8] sm:$0xff] }
 0x362   : > { %3477 = vrot.lane.b32.xlu0 %v11177_v30, %s19417_s23  ;;  %4015 = vmatprep.subr.mxu1 %v3785_v53  ;;  %v13803_v36 = vpop.f32.mrf.mxu0 }
 0x363   : > { %4016 = vmatpush1.msra.mxu1 %v3784_v18  ;;  %v3654_v48 = vpop.permute.xlu1 %3653  ;;  %19588 = vst [vmem:[#allocation11_spill] sm:$0xff] %v13803_v36  ;;  %v11192_v18 = vld [vmem:[#allocation2 + $0x3b8] sm:$0xff] }
 0x364   : > { %v3668_v15 = vpop.permute.xlu0 %3667  ;;  %9924 = vmatmul.mubr.msk.f32.gmra.mxu0 %vm1687_vm5, %v13602_v46  ;;  %10551 = vmatmul.mubr.msk.f32.gmra.mxu1 %vm1687_vm5, %v13618_v8  ;;  %v13808_v46 = vpop.f32.mrf.mxu0 }
 0x365   : > { %v3782_v59 = vsel %vm3683_vm7, %v3668_v15, %v3670_v62  ;;  %3483 = vrot.lane.b32.xlu1 %v11178_v55, %s19417_s23  ;;  %3280 = vmatprep.mubr.f32.mxu0 %v19541_v1  ;;  %v11193_v15 = vld [vmem:[#allocation2 + $0x3b0] sm:$0xff] }
 0x366   : > { %3481 = vrot.lane.b32.xlu0 %v11179_v49, %s19417_s23  ;;  %3915 = vmatpush1.msra.mxu0 %v3782_v59  ;;  %v13817_v23 = vpop.f32.mrf.mxu0 }
 0x367   : > { %v3658_v38 = vpop.permute.xlu1 %3657  ;;  %10553 = vmatprep.mubr.msk.f32.mxu1 %vm1687_vm5, %v13639_v60  ;;  %19589 = vst [vmem:[#allocation8_spill] sm:$0xff] %v13817_v23  ;;  %v14131_v23 = vld [vmem:[#allocation2 + $0xb8] sm:$0xff] }
 0x368   : > { %v3656_v33 = vpop.permute.xlu0 %3655  ;;  %9925 = vmatmul.mubr.msk.f32.gmra.mxu0 %vm1687_vm5, %v13618_v8  ;;  %10554 = vmatmul.mubr.msk.f32.gmra.mxu1 %vm1687_vm5, %v13652_v4  ;;  %v13820_v10 = vpop.f32.mrf.mxu0 }
 0x369   : > { %3461 = vrot.lane.b32.xlu1 %v11180_v5, %s19417_s23  ;;  %v3776_v35 = vsel %vm3683_vm7, %v3654_v48, %v3656_v33  ;;  %3286 = vmatprep.mubr.f32.mxu0 %v19541_v1  ;;  %v3777_v61 = vsel %vm3683_vm7, %v3656_v33, %v3658_v38  ;;  %v11194_v33 = vld [vmem:[#allocation2 + $0x370] sm:$0xff] }
 0x36a   : > { %3475 = vrot.lane.b32.xlu0 %v11181_v47, %s19417_s23  ;;  %3916 = vmatprep.subr.mxu0 %v3776_v35  ;;  %v13831_v12 = vpop.f32.mrf.mxu0  ;;  %v11195_v47 = vld [vmem:[#allocation2 + $0x368] sm:$0xff] }
 0x36b   : > { %v3652_v21 = vpop.permute.xlu1 %3651  ;;  %4077 = vmatprep.mubr.f32.mxu1 %v19541_v1  ;;  %19590 = vst [vmem:[#allocation14_spill] sm:$0xff] %v13831_v12 }
 0x36c   : > { %v3775_v8 = vsel %vm3683_vm7, %v3652_v21, %v3654_v48  ;;  %v13824_v58 = vpop.permute.xlu0 %3659  ;;  %9926 = vmatmul.mubr.msk.f32.gmra.mxu0 %vm1687_vm5, %v13639_v60  ;;  %v13836_v60 = vpop.f32.mrf.mxu0 }
 0x36d   : > { %3465 = vrot.lane.b32.xlu1 %v11182_v52, %s19417_s23  ;;  %3917 = vmatpush1.msra.mxu0 %v3775_v8  ;;  %v3778_v16 = vsel %vm3683_vm7, %v3658_v38, %v13824_v58 }
 0x36e   : > { %3463 = vrot.lane.b32.xlu0 %v11183_v37, %s19417_s23  ;;  %4017 = vmatprep.subr.mxu1 %v3778_v16  ;;  %v13842_v51 = vpop.f32.mrf.mxu0  ;;  %v11196_v16 = vld [vmem:[#allocation2 + $0x328] sm:$0xff] }
 0x36f   : > { %4018 = vmatpush1.msra.mxu1 %v3777_v61  ;;  %v3640_v22 = vpop.permute.xlu1 %3639  ;;  %3292 = vmatprep.mubr.f32.mxu0 %v19541_v1  ;;  %19591 = vst [vmem:[#allocation13_spill] sm:$0xff] %v13842_v51  ;;  %v14116_v51 = vld [vmem:[#allocation2 + $0xf8] sm:$0xff] }
 0x370   : > { %v3638_v0 = vpop.permute.xlu0 %3637  ;;  %9927 = vmatmul.mubr.msk.f32.gmra.mxu0 %vm1687_vm5, %v13652_v4  ;;  %v13848_v26 = vpop.f32.mrf.mxu0 }
 0x371   : > { %3459 = vrot.lane.b32.xlu1 %v11184_v31, %s19417_s23  ;;  %v3769_v28 = vsel %vm3683_vm7, %v3638_v0, %v3640_v22  ;;  %3976 = vmatprep.mubr.f32.mxu0 %v19541_v1 }
 0x372   : > { %3467 = vrot.lane.b32.xlu0 %v11185_v19, %s19417_s23  ;;  %3918 = vmatprep.subr.mxu0 %v3769_v28  ;;  %v13854_v25 = vpop.f32.mrf.mxu0 }
 0x373   : > { %v13846_v20 = vpop.permute.xlu1 %3643  ;;  %19592 = vst [vmem:[#allocation12_spill] sm:$0xff] %v13854_v25 }
 0x374   : > { %v3642_v24 = vpop.permute.xlu0 %3641  ;;  %v13857_v17 = vpop.f32.mrf.mxu0 }
 0x375   : > { %3447 = vrot.lane.b32.xlu1 %v11186_v42, %s19417_s23  ;;  %v3771_v4 = vsel %vm3683_vm7, %v3642_v24, %v13846_v20  ;;  %v3770_v56 = vsel %vm3683_vm7, %v3640_v22, %v3642_v24 }
 0x376   : > { %3445 = vrot.lane.b32.xlu0 %v11187_v43, %s19417_s23  ;;  %4019 = vmatprep.subr.mxu1 %v3771_v4  ;;  %v13861_v44 = vpop.f32.mrf.mxu0  ;;  %v11198_v4 = vld [vmem:[#allocation2 + $0x338] sm:$0xff]  ;;  %v11199_v43 = vld [vmem:[#allocation2 + $0x330] sm:$0xff] }
 0x377   : > { %4020 = vmatpush1.msra.mxu1 %v3770_v56  ;;  %v3622_v7 = vpop.permute.xlu1 %3621  ;;  %19593 = vst [vmem:[#allocation16_spill] sm:$0xff] %v13861_v44 }
 0x378   : > { %v3636_v3 = vpop.permute.xlu0 %3635  ;;  %v13864_v11 = vpop.f32.mrf.mxu0 }
 0x379   : > { %v3768_v32 = vsel %vm3683_vm7, %v3636_v3, %v3638_v0  ;;  %3451 = vrot.lane.b32.xlu1 %v11188_v57, %s19417_s23  ;;  %v11197_v0 = vld [vmem:[#allocation2 + $0x378] sm:$0xff] }
 0x37a   : > { %3449 = vrot.lane.b32.xlu0 %v11189_v41, %s19417_s23  ;;  %3919 = vmatpush1.msra.mxu0 %v3768_v32  ;;  %v13868_v54 = vpop.f32.mrf.mxu0 }
 0x37b   : > { %v3626_v13 = vpop.permute.xlu1 %3625  ;;  %19594 = vst [vmem:[#allocation15_spill] sm:$0xff] %v13868_v54 }
 0x37c   : > { %v3624_v50 = vpop.permute.xlu0 %3623  ;;  %v13871_v27 = vpop.f32.mrf.mxu0 }
 0x37d   : > { %3677 = vrot.lane.b32.xlu1 %v11190_v34, %s19417_s23  ;;  %v3762_v62 = vsel %vm3683_vm7, %v3622_v7, %v3624_v50  ;;  %v3763_v59 = vsel %vm3683_vm7, %v3624_v50, %v3626_v13 }
 0x37e   : > { %3443 = vrot.lane.b32.xlu0 %v11191_v39, %s19417_s23  ;;  %3920 = vmatprep.subr.mxu0 %v3762_v62  ;;  %v13879_v48 = vpop.f32.mrf.mxu0  ;;  %v11201_v62 = vld [vmem:[#allocation2 + $0x2e8] sm:$0xff] }
 0x37f   : > { %v3620_v45 = vpop.permute.xlu1 %3619  ;;  %19595 = vst [vmem:[#allocation23_spill] sm:$0xff] %v13879_v48 }
 0x380   : > { %v3761_v40 = vsel %vm3683_vm7, %v3620_v45, %v3622_v7  ;;  %v13874_v53 = vpop.permute.xlu0 %3627  ;;  %v13883_v49 = vpop.f32.mrf.mxu0 }
 0x381   : > { %3681 = vrot.lane.b32.xlu1 %v11192_v18, %s19417_s23  ;;  %3921 = vmatpush1.msra.mxu0 %v3761_v40  ;;  %v3764_v30 = vsel %vm3683_vm7, %v3626_v13, %v13874_v53  ;;  %v13909_v7 = vpop.f32.mrf.mxu1  ;;  %v11200_v13 = vld [vmem:[#allocation2 + $0x2f0] sm:$0xff] }
 0x382   : > { %3679 = vrot.lane.b32.xlu0 %v11193_v15, %s19417_s23  ;;  %4021 = vmatprep.subr.mxu1 %v3764_v30  ;;  %v13887_v35 = vpop.f32.mrf.mxu0 }
 0x383   : > { %4022 = vmatpush1.msra.mxu1 %v3763_v59  ;;  %v3608_v55 = vpop.permute.xlu1 %3607  ;;  %19596 = vst [vmem:[#allocation18_spill] sm:$0xff] %v13887_v35  ;;  %v11202_v59 = vld [vmem:[#allocation2 + $0x2a8] sm:$0xff] }
 0x384   : > { %v3606_v38 = vpop.permute.xlu0 %3605  ;;  %v13892_v8 = vpop.f32.mrf.mxu0  ;;  %v11214_v35 = vld [vmem:[#allocation2 + $0x1a8] sm:$0xff] }
 0x385   : > { %3663 = vrot.lane.b32.xlu1 %v11194_v33, %s19417_s23  ;;  %v3755_v5 = vsel %vm3683_vm7, %v3606_v38, %v3608_v55  ;;  %v11203_v33 = vld [vmem:[#allocation2 + $0x2f8] sm:$0xff] }
 0x386   : > { %3661 = vrot.lane.b32.xlu0 %v11195_v47, %s19417_s23  ;;  %3922 = vmatprep.subr.mxu0 %v3755_v5  ;;  %v13898_v22 = vpop.f32.mrf.mxu0 }
 0x387   : > { %v13890_v21 = vpop.permute.xlu1 %3611  ;;  %19597 = vst [vmem:[#allocation20_spill] sm:$0xff] %v13898_v22  ;;  %v11213_v22 = vld [vmem:[#allocation2 + $0x1e8] sm:$0xff] }
 0x388   : > { %v3610_v52 = vpop.permute.xlu0 %3609  ;;  %v2188_v28 = vpop.f32.mrf.mxu0 }
 0x389   : > { %3645 = vrot.lane.b32.xlu1 %v11196_v16, %s19417_s23  ;;  %v3757_v37 = vsel %vm3683_vm7, %v3610_v52, %v13890_v21  ;;  %v3756_v61 = vsel %vm3683_vm7, %v3608_v55, %v3610_v52  ;;  %v13902_v24 = vadd.f32 %v2188_v28, %v13766_v63  ;;  %v13914_v63 = vpop.f32.mrf.mxu1 }
 0x38a   : > { %3665 = vrot.lane.b32.xlu0 %v11197_v0, %s19417_s23  ;;  %4023 = vmatprep.subr.mxu1 %v3757_v37  ;;  %v13906_v56 = vpop.f32.mrf.mxu0  ;;  %19599 = vst [vmem:[#allocation21_spill] sm:$0xff] %v13914_v63  ;;  %v11204_v0 = vld [vmem:[#allocation2 + $0x2b8] sm:$0xff] }
 0x38b   : > { %4024 = vmatpush1.msra.mxu1 %v3756_v61  ;;  %v3590_v31 = vpop.permute.xlu1 %3589  ;;  %19598 = vst [vmem:[#allocation19_spill] sm:$0xff] %v13906_v56  ;;  %v13921_v39 = vpop.f32.mrf.mxu1 }
 0x38c   : > { %v3604_v19 = vpop.permute.xlu0 %3603  ;;  %v2194_v32 = vpop.f32.mrf.mxu0 }
 0x38d   : > { %v3754_v42 = vsel %vm3683_vm7, %v3604_v19, %v3606_v38  ;;  %3649 = vrot.lane.b32.xlu1 %v11198_v4, %s19417_s23  ;;  %v13912_v41 = vadd.f32 %v2194_v32, %v13782_v14  ;;  %v13929_v15 = vpop.f32.mrf.mxu1  ;;  %v11205_v19 = vld [vmem:[#allocation2 + $0x2b0] sm:$0xff] }
 0x38e   : > { %3647 = vrot.lane.b32.xlu0 %v11199_v43, %s19417_s23  ;;  %3923 = vmatpush1.msra.mxu0 %v3754_v42  ;;  %v13918_v34 = vpop.f32.mrf.mxu0  ;;  %19601 = vst [vmem:[#allocation24_spill] sm:$0xff] %v13929_v15 }
 0x38f   : > { %v3594_v3 = vpop.permute.xlu1 %3593  ;;  %19600 = vst [vmem:[#allocation22_spill] sm:$0xff] %v13918_v34  ;;  %v13938_v47 = vpop.f32.mrf.mxu1 }
 0x390   : > { %v3592_v57 = vpop.permute.xlu0 %3591  ;;  %v2200_v40 = vpop.f32.mrf.mxu0 }
 0x391   : > { %3631 = vrot.lane.b32.xlu1 %v11200_v13, %s19417_s23  ;;  %v3748_v50 = vsel %vm3683_vm7, %v3590_v31, %v3592_v57  ;;  %v13927_v30 = vadd.f32 %v2200_v40, %v13794_v9  ;;  %v3749_v5 = vsel %vm3683_vm7, %v3592_v57, %v3594_v3  ;;  %v13943_v61 = vpop.f32.mrf.mxu1  ;;  %v11206_v57 = vld [vmem:[#allocation2 + $0x270] sm:$0xff] }
 0x392   : > { %3629 = vrot.lane.b32.xlu0 %v11201_v62, %s19417_s23  ;;  %3924 = vmatprep.subr.mxu0 %v3748_v50  ;;  %v13934_v38 = vpop.f32.mrf.mxu0  ;;  %19603 = vst [vmem:[#allocation17_spill] sm:$0xff] %v13943_v61 }
 0x393   : > { %v3588_v45 = vpop.permute.xlu1 %3587  ;;  %19602 = vst [vmem:[#allocation25_spill] sm:$0xff] %v13934_v38  ;;  %v13950_v42 = vpop.f32.mrf.mxu1 }
 0x394   : > { %v3747_v14 = vsel %vm3683_vm7, %v3588_v45, %v3590_v31  ;;  %v13924_v18 = vpop.permute.xlu0 %3595  ;;  %v2206_v52 = vpop.f32.mrf.mxu0  ;;  %v11207_v45 = vld [vmem:[#allocation2 + $0x268] sm:$0xff] }
 0x395   : > { %3613 = vrot.lane.b32.xlu1 %v11202_v59, %s19417_s23  ;;  %3925 = vmatpush1.msra.mxu0 %v3747_v14  ;;  %v3750_v55 = vsel %vm3683_vm7, %v3594_v3, %v13924_v18  ;;  %v13941_v37 = vadd.f32 %v2206_v52, %v13808_v46  ;;  %v13957_v32 = vpop.f32.mrf.mxu1 }
 0x396   : > { %3633 = vrot.lane.b32.xlu0 %v11203_v33, %s19417_s23  ;;  %4025 = vmatprep.subr.mxu1 %v3750_v55  ;;  %v13947_v28 = vpop.f32.mrf.mxu0  ;;  %19605 = vst [vmem:[#allocation27_spill] sm:$0xff] %v13957_v32  ;;  %v14075_v32 = vld [vmem:[#allocation2 + $0x138] sm:$0xff] }
 0x397   : > { %4026 = vmatpush1.msra.mxu1 %v3749_v5  ;;  %v3576_v9 = vpop.permute.xlu1 %3575  ;;  %19604 = vst [vmem:[#allocation26_spill] sm:$0xff] %v13947_v28  ;;  %v13966_v40 = vpop.f32.mrf.mxu1 }
 0x398   : > { %v3574_v16 = vpop.permute.xlu0 %3573  ;;  %v2212_v43 = vpop.f32.mrf.mxu0 }
 0x399   : > { %3617 = vrot.lane.b32.xlu1 %v11204_v0, %s19417_s23  ;;  %v3741_v31 = vsel %vm3683_vm7, %v3574_v16, %v3576_v9  ;;  %v13955_v3 = vadd.f32 %v2212_v43, %v13820_v10  ;;  %v13971_v33 = vpop.f32.mrf.mxu1  ;;  %v11209_v0 = vld [vmem:[#allocation2 + $0x278] sm:$0xff] }
 0x39a   : > { %3615 = vrot.lane.b32.xlu0 %v11205_v19, %s19417_s23  ;;  %3926 = vmatprep.subr.mxu0 %v3741_v31  ;;  %v13963_v62 = vpop.f32.mrf.mxu0  ;;  %19607 = vst [vmem:[#allocation29_spill] sm:$0xff] %v13971_v33 }
 0x39b   : > { %v13952_v4 = vpop.permute.xlu1 %3579  ;;  %19606 = vst [vmem:[#allocation28_spill] sm:$0xff] %v13963_v62  ;;  %v13978_v31 = vpop.f32.mrf.mxu1 }
 0x39c   : > { %v3578_v46 = vpop.permute.xlu0 %3577  ;;  %v2218_v14 = vpop.f32.mrf.mxu0 }
 0x39d   : > { %3599 = vrot.lane.b32.xlu1 %v11206_v57, %s19417_s23  ;;  %v3743_v13 = vsel %vm3683_vm7, %v3578_v46, %v13952_v4  ;;  %v3742_v50 = vsel %vm3683_vm7, %v3576_v9, %v3578_v46  ;;  %v13969_v55 = vadd.f32 %v2218_v14, %v13836_v60  ;;  %v11208_v9 = vld [vmem:[#allocation2 + $0x228] sm:$0xff]  ;;  %v13983_v57 = vpop.f32.mrf.mxu1 }
 0x39e   : > { %3597 = vrot.lane.b32.xlu0 %v11207_v45, %s19417_s23  ;;  %4027 = vmatprep.subr.mxu1 %v3743_v13  ;;  %v13975_v52 = vpop.f32.mrf.mxu0  ;;  %19609 = vst [vmem:[#allocation31_spill] sm:$0xff] %v13983_v57  ;;  %v11211_v45 = vld [vmem:[#allocation2 + $0x230] sm:$0xff] }
 0x39f   : > { %4028 = vmatpush1.msra.mxu1 %v3742_v50  ;;  %v3558_v10 = vpop.permute.xlu1 %3557  ;;  %19608 = vst [vmem:[#allocation30_spill] sm:$0xff] %v13975_v52  ;;  %v13990_v14 = vpop.f32.mrf.mxu1 }
 0x3a0   : > { %v3572_v59 = vpop.permute.xlu0 %3571  ;;  %v2390_v43 = vpop.f32.mrf.mxu0 }
 0x3a1   : > { %v3740_v5 = vsel %vm3683_vm7, %v3572_v59, %v3574_v16  ;;  %3581 = vrot.lane.b32.xlu1 %v11208_v9, %s19417_s23  ;;  %v13981_v60 = vadd.f32 %v2390_v43, %v13848_v26  ;;  %v11210_v16 = vld [vmem:[#allocation2 + $0x238] sm:$0xff]  ;;  %v13998_v43 = vpop.f32.mrf.mxu1 }
 0x3a2   : > { %3601 = vrot.lane.b32.xlu0 %v11209_v0, %s19417_s23  ;;  %3927 = vmatpush1.msra.mxu0 %v3740_v5  ;;  %v13987_v50 = vpop.f32.mrf.mxu0  ;;  %19611 = vst [vmem:[#allocation33_spill] sm:$0xff] %v13998_v43 }
 0x3a3   : > { %v3562_v19 = vpop.permute.xlu1 %3561  ;;  %19610 = vst [vmem:[#allocation32_spill] sm:$0xff] %v13987_v50  ;;  %v14096_v50 = vld [vmem:[#allocation2 + $0xe8] sm:$0xff] }
 0x3a4   : > { %v3560_v46 = vpop.permute.xlu0 %3559  ;;  %v2396_v5 = vpop.f32.mrf.mxu0 }
 0x3a5   : > { %3585 = vrot.lane.b32.xlu1 %v11210_v16, %s19417_s23  ;;  %v3734_v13 = vsel %vm3683_vm7, %v3558_v10, %v3560_v46  ;;  %v13996_v0 = vadd.f32 %v2396_v5, %v13857_v17  ;;  %v11212_v16 = vld [vmem:[#allocation2 + $0x1f0] sm:$0xff] }
 0x3a6   : > { %3583 = vrot.lane.b32.xlu0 %v11211_v45, %s19417_s23  ;;  %3928 = vmatprep.subr.mxu0 %v3734_v13  ;;  %v14003_v45 = vpop.f32.mrf.mxu0 }
 0x3a7   : > { %v3556_v59 = vpop.permute.xlu1 %3555  ;;  %19612 = vst [vmem:[#allocation34_spill] sm:$0xff] %v14003_v45 }
 0x3a8   : > { %v3733_v26 = vsel %vm3683_vm7, %v3556_v59, %v3558_v10  ;;  %v13993_v9 = vpop.permute.xlu0 %3563  ;;  %v3735_v10 = vsel %vm3683_vm7, %v3560_v46, %v3562_v19  ;;  %v14007_v59 = vpop.f32.mrf.mxu1 }
 0x3a9   : > { %3567 = vrot.lane.b32.xlu1 %v11212_v16, %s19417_s23  ;;  %3929 = vmatpush1.msra.mxu0 %v3733_v26  ;;  %v3736_v13 = vsel %vm3683_vm7, %v3562_v19, %v13993_v9  ;;  %v2402_v5 = vpop.f32.mrf.mxu0 }
 0x3aa   : > { %3565 = vrot.lane.b32.xlu0 %v11213_v22, %s19417_s23  ;;  %4029 = vmatprep.subr.mxu1 %v3736_v13  ;;  %v14010_v16 = vadd.f32 %v2402_v5, %v13864_v11  ;;  %v14012_v26 = vpop.f32.mrf.mxu1  ;;  %v11215_v13 = vld [vmem:[#allocation2 + $0x1f8] sm:$0xff] }
 0x3ab   : > { %4030 = vmatpush1.msra.mxu1 %v3735_v10  ;;  %v3544_v17 = vpop.permute.xlu1 %3543  ;;  %19613 = vst [vmem:[#allocation35_spill] sm:$0xff] %v14012_v26  ;;  %v14016_v22 = vpop.f32.mrf.mxu0 }
 0x3ac   : > { %v3542_v43 = vpop.permute.xlu0 %3541  ;;  %19614 = vst [vmem:[#allocation36_spill] sm:$0xff] %v14016_v22  ;;  %v14019_v19 = vpop.f32.mrf.mxu1  ;;  %v11217_v22 = vld [vmem:[#allocation2 + $0x1b0] sm:$0xff] }
 0x3ad   : > { %3549 = vrot.lane.b32.xlu1 %v11214_v35, %s19417_s23  ;;  %v3727_v57 = vsel %vm3683_vm7, %v3542_v43, %v3544_v17  ;;  %v2408_v10 = vpop.f32.mrf.mxu0  ;;  %v11216_v35 = vld [vmem:[#allocation2 + $0x1b8] sm:$0xff] }
 0x3ae   : > { %3569 = vrot.lane.b32.xlu0 %v11215_v13, %s19417_s23  ;;  %3930 = vmatprep.subr.mxu0 %v3727_v57  ;;  %v14024_v5 = vadd.f32 %v2408_v10, %v13871_v27  ;;  %v14026_v26 = vpop.f32.mrf.mxu1 }
 0x3af   : > { %v14021_v46 = vpop.permute.xlu1 %3547  ;;  %19615 = vst [vmem:[#allocation37_spill] sm:$0xff] %v14026_v26  ;;  %v14032_v57 = vpop.f32.mrf.mxu0 }
 0x3b0   : > { %v3546_v11 = vpop.permute.xlu0 %3545  ;;  %19616 = vst [vmem:[#allocation38_spill] sm:$0xff] %v14032_v57  ;;  %v2289_v54 = vpop.f32.mrf.mxu1 }
 0x3b1   : > { %3553 = vrot.lane.b32.xlu1 %v11216_v35, %s19417_s23  ;;  %v3729_v48 = vsel %vm3683_vm7, %v3546_v11, %v14021_v46  ;;  %v3728_v13 = vsel %vm3683_vm7, %v3544_v17, %v3546_v11  ;;  %v14036_v10 = vadd.f32 %v2289_v54, %v13909_v7  ;;  %v2414_v26 = vpop.f32.mrf.mxu0  ;;  %v11218_v11 = vld [vmem:[#allocation2 + $0x170] sm:$0xff] }
 0x3b2   : > { %3551 = vrot.lane.b32.xlu0 %v11217_v22, %s19417_s23  ;;  %4031 = vmatprep.subr.mxu1 %v3729_v48  ;;  %v14039_v35 = vadd.f32 %v2414_v26, %v13883_v49  ;;  %v14041_v44 = vpop.f32.mrf.mxu1  ;;  %v11219_v48 = vld [vmem:[#allocation2 + $0x168] sm:$0xff] }
 0x3b3   : > { %4032 = vmatpush1.msra.mxu1 %v3728_v13  ;;  %v3526_v27 = vpop.permute.xlu1 %3525  ;;  %19617 = vst [vmem:[#allocation39_spill] sm:$0xff] %v14041_v44  ;;  %v14045_v22 = vpop.f32.mrf.mxu0 }
 0x3b4   : > { %v3540_v45 = vpop.permute.xlu0 %3539  ;;  %19618 = vst [vmem:[#allocation40_spill] sm:$0xff] %v14045_v22  ;;  %v2295_v54 = vpop.f32.mrf.mxu1 }
 0x3b5   : > { %v3726_v17 = vsel %vm3683_vm7, %v3540_v45, %v3542_v43  ;;  %3535 = vrot.lane.b32.xlu1 %v11218_v11, %s19417_s23  ;;  %v14049_v13 = vadd.f32 %v2295_v54, %v13921_v39  ;;  %v2420_v49 = vpop.f32.mrf.mxu0  ;;  %v11220_v45 = vld [vmem:[#allocation2 + $0x128] sm:$0xff] }
 0x3b6   : > { %3533 = vrot.lane.b32.xlu0 %v11219_v48, %s19417_s23  ;;  %3931 = vmatpush1.msra.mxu0 %v3726_v17  ;;  %v14052_v57 = vadd.f32 %v2420_v49, %v13892_v8  ;;  %v14054_v43 = vpop.f32.mrf.mxu1  ;;  %v14060_v17 = vld [vmem:[#allocation2 + $0x178] sm:$0xff] }
 0x3b7   : > { %v3530_v7 = vpop.permute.xlu1 %3529  ;;  %19619 = vst [vmem:[#allocation41_spill] sm:$0xff] %v14054_v43  ;;  %v14058_v22 = vpop.f32.mrf.mxu0 }
 0x3b8   : > { %v3528_v26 = vpop.permute.xlu0 %3527  ;;  %19620 = vst [vmem:[#allocation42_spill] sm:$0xff] %v14058_v22  ;;  %v2301_v39 = vpop.f32.mrf.mxu1 }
 0x3b9   : > { %3517 = vrot.lane.b32.xlu1 %v11220_v45, %s19417_s23  ;;  %v3720_v11 = vsel %vm3683_vm7, %v3526_v27, %v3528_v26  ;;  %v14065_v8 = vadd.f32 %v2301_v39, %v13938_v47  ;;  %v3062_v54 = vpop.f32.mrf.mxu0 }
 0x3ba   : > { %3537 = vrot.lane.b32.xlu0 %v14060_v17, %s19417_s23  ;;  %3932 = vmatprep.subr.mxu0 %v3720_v11  ;;  %v14071_v45 = vadd.f32 %v3062_v54, %v13902_v24  ;;  %v14073_v22 = vpop.f32.mrf.mxu1  ;;  %v14081_v11 = vld [vmem:[#allocation2 + $0x130] sm:$0xff]  ;;  %v3721_v24 = vsel %vm3683_vm7, %v3528_v26, %v3530_v7 }
 0x3bb   : > { %v3524_v48 = vpop.permute.xlu1 %3523  ;;  %19622 = vst [vmem:[#allocation44_spill] sm:$0xff] %v14073_v22 }
 0x3bc   : > { %v3719_v49 = vsel %vm3683_vm7, %v3524_v48, %v3526_v27  ;;  %v14068_v33 = vpop.permute.xlu0 %3531  ;;  %19621 = vst [vmem:[#allocation43_spill] sm:$0xff] %v14071_v45  ;;  %v2307_v27 = vpop.f32.mrf.mxu1 }
 0x3bd   : > { %3521 = vrot.lane.b32.xlu1 %v14075_v32, %s19417_s23  ;;  %3933 = vmatpush1.msra.mxu0 %v3719_v49  ;;  %v3722_v47 = vsel %vm3683_vm7, %v3530_v7, %v14068_v33  ;;  %v14087_v48 = vadd.f32 %v2307_v27, %v13950_v42  ;;  %v14091_v49 = vld [vmem:[#allocation2 + $0xf0] sm:$0xff]  ;;  %v14102_v42 = vpop.f32.mrf.mxu0 }
 0x3be   : > { %3519 = vrot.lane.b32.xlu0 %v14081_v11, %s19417_s23  ;;  %4033 = vmatprep.subr.mxu1 %v3722_v47  ;;  %v14089_v22 = vpop.f32.mrf.mxu1  ;;  %19624 = vst [vmem:[#allocation46_spill] sm:$0xff] %v14102_v42 }
 0x3bf   : > { %4034 = vmatpush1.msra.mxu1 %v3721_v24  ;;  %v3512_v39 = vpop.permute.xlu1 %3511  ;;  %19623 = vst [vmem:[#allocation45_spill] sm:$0xff] %v14089_v22  ;;  %v14109_v22 = vld [vmem:[#allocation2 + $0xa8] sm:$0xff]  ;;  %v3068_v52 = vpop.f32.mrf.mxu0 }
 0x3c0   : > { %v3510_v54 = vpop.permute.xlu0 %3509  ;;  %v2313_v7 = vpop.f32.mrf.mxu1 }
 0x3c1   : > { %3503 = vrot.lane.b32.xlu1 %v14091_v49, %s19417_s23  ;;  %v3713_v61 = vsel %vm3683_vm7, %v3510_v54, %v3512_v39  ;;  %v14105_v47 = vadd.f32 %v2313_v7, %v13966_v40  ;;  %v14121_v40 = vadd.f32 %v3068_v52, %v13912_v41  ;;  %v14126_v12 = vpop.f32.mrf.mxu0  ;;  %v14135_v41 = vld [vmem:[#allocation2 + $0xb0] sm:$0xff] }
 0x3c2   : > { %3501 = vrot.lane.b32.xlu0 %v14096_v50, %s19417_s23  ;;  %3934 = vmatprep.subr.mxu0 %v3713_v61  ;;  %v14107_v27 = vpop.f32.mrf.mxu1  ;;  %19626 = vst [vmem:[#allocation48_spill] sm:$0xff] %v14126_v12  ;;  %v14169_v12 = vld [vmem:[#allocation2 + $0x28] sm:$0xff] }
 0x3c3   : > { %v14100_v26 = vpop.permute.xlu1 %3515  ;;  %19625 = vst [vmem:[#allocation47_spill] sm:$0xff] %v14107_v27 }
 0x3c4   : > { %v3514_v24 = vpop.permute.xlu0 %3513  ;;  %v2319_v7 = vpop.f32.mrf.mxu1 }
 0x3c5   : > { %3485 = vrot.lane.b32.xlu1 %v14109_v22, %s19417_s23  ;;  %v3715_v25 = vsel %vm3683_vm7, %v3514_v24, %v14100_v26  ;;  %v3714_v61 = vsel %vm3683_vm7, %v3512_v39, %v3514_v24  ;;  %v14124_v62 = vadd.f32 %v2319_v7, %v13978_v31 }
 0x3c6   : > { %3505 = vrot.lane.b32.xlu0 %v14116_v51, %s19417_s23  ;;  %4035 = vmatprep.subr.mxu1 %v3715_v25  ;;  %v14128_v39 = vpop.f32.mrf.mxu1  ;;  %v3074_v25 = vpop.f32.mrf.mxu0 }
 0x3c7   : > { %4036 = vmatpush1.msra.mxu1 %v3714_v61  ;;  %v3494_v27 = vpop.permute.xlu1 %3493  ;;  %19627 = vst [vmem:[#allocation49_spill] sm:$0xff] %v14128_v39  ;;  %v14140_v52 = vadd.f32 %v3074_v25, %v13927_v30  ;;  %v14147_v39 = vld [vmem:[#allocation2 + $0x70] sm:$0xff]  ;;  %v14154_v30 = vld [vmem:[#allocation2 + $0x68] sm:$0xff] }
 0x3c8   : > { %v3508_v28 = vpop.permute.xlu0 %3507  ;;  %v10510_v31 = vpop.f32.mrf.mxu1 }
 0x3c9   : > { %v3712_v24 = vsel %vm3683_vm7, %v3508_v28, %v3510_v54  ;;  %3489 = vrot.lane.b32.xlu1 %v14131_v23, %s19417_s23  ;;  %v14143_v7 = vadd.f32 %v10510_v31, %v13990_v14  ;;  %v14145_v28 = vpop.f32.mrf.mxu0 }
 0x3ca   : > { %3487 = vrot.lane.b32.xlu0 %v14135_v41, %s19417_s23  ;;  %3935 = vmatpush1.msra.mxu0 %v3712_v24  ;;  %19628 = vst [vmem:[#allocation50_spill] sm:$0xff] %v14145_v28  ;;  %v14152_v36 = vpop.f32.mrf.mxu1 }
 0x3cb   : > { %v3498_v61 = vpop.permute.xlu1 %3497  ;;  %19629 = vst [vmem:[#allocation51_spill] sm:$0xff] %v14152_v36  ;;  %v3080_v24 = vpop.f32.mrf.mxu0 }
 0x3cc   : > { %v3496_v54 = vpop.permute.xlu0 %3495  ;;  %v14159_v14 = vadd.f32 %v3080_v24, %v13941_v37  ;;  %v10513_v31 = vpop.f32.mrf.mxu1  ;;  %v14175_v37 = vld [vmem:[#allocation2 + $0x78] sm:$0xff] }
 0x3cd   : > { %3471 = vrot.lane.b32.xlu1 %v14147_v39, %s19417_s23  ;;  %v3706_v38 = vsel %vm3683_vm7, %v3494_v27, %v3496_v54  ;;  %v14165_v15 = vadd.f32 %v10513_v31, %v14007_v59  ;;  %v14167_v36 = vpop.f32.mrf.mxu0  ;;  %v3707_v59 = vsel %vm3683_vm7, %v3496_v54, %v3498_v61 }
 0x3ce   : > { %3469 = vrot.lane.b32.xlu0 %v14154_v30, %s19417_s23  ;;  %3936 = vmatprep.subr.mxu0 %v3706_v38  ;;  %19630 = vst [vmem:[#allocation52_spill] sm:$0xff] %v14167_v36  ;;  %v14180_v24 = vpop.f32.mrf.mxu1  ;;  %v14182_v36 = vld [vmem:[#allocation2 + $0x38] sm:$0xff] }
 0x3cf   : > { %v3492_v25 = vpop.permute.xlu1 %3491  ;;  %19631 = vst [vmem:[#allocation53_spill] sm:$0xff] %v14180_v24  ;;  %v3086_v31 = vpop.f32.mrf.mxu0 }
 0x3d0   : > { %v3705_v28 = vsel %vm3683_vm7, %v3492_v25, %v3494_v27  ;;  %v14162_v43 = vpop.permute.xlu0 %3499  ;;  %v14188_v34 = vadd.f32 %v3086_v31, %v13955_v3  ;;  %v10516_v2 = vpop.f32.mrf.mxu1 }
 0x3d1   : > { %3453 = vrot.lane.b32.xlu1 %v14169_v12, %s19417_s23  ;;  %3937 = vmatpush1.msra.mxu0 %v3705_v28  ;;  %v3708_v38 = vsel %vm3683_vm7, %v3498_v61, %v14162_v43  ;;  %v14195_v61 = vadd.f32 %v10516_v2, %v14019_v19  ;;  %v14197_v54 = vpop.f32.mrf.mxu0 }
 0x3d2   : > { %3473 = vrot.lane.b32.xlu0 %v14175_v37, %s19417_s23  ;;  %4037 = vmatprep.subr.mxu1 %v3708_v38  ;;  %v14190_v38 = vld [vmem:[#allocation2 + $0x30] sm:$0xff]  ;;  %19632 = vst [vmem:[#allocation54_spill] sm:$0xff] %v14197_v54  ;;  %v14204_v31 = vpop.f32.mrf.mxu1 }
 0x3d3   : > { %4038 = vmatpush1.msra.mxu1 %v3707_v59  ;;  %v3480_v27 = vpop.permute.xlu1 %3479  ;;  %19633 = vst [vmem:[#allocation55_spill] sm:$0xff] %v14204_v31  ;;  %v3092_v42 = vpop.f32.mrf.mxu0 }
 0x3d4   : > { %v3478_v25 = vpop.permute.xlu0 %3477  ;;  %v14207_v44 = vadd.f32 %v3092_v42, %v13969_v55 }
 0x3d5   : > { %3457 = vrot.lane.b32.xlu1 %v14182_v36, %s19417_s23  ;;  %v3699_v28 = vsel %vm3683_vm7, %v3478_v25, %v3480_v27 }
 0x3d6   : > { %3455 = vrot.lane.b32.xlu0 %v14190_v38, %s19417_s23  ;;  %3938 = vmatprep.subr.mxu0 %v3699_v28  ;;  %v3163_v28 = vpop.f32.mrf.mxu1  ;;  %s19756_s23 = smov 96  }
 0x3d7   : > { %v14199_v59 = vpop.permute.xlu1 %3483  ;;  %v14211_v63 = vadd.f32 %v3163_v28, %v14036_v10 }
 0x3d8   : > { %v3482_v24 = vpop.permute.xlu0 %3481  ;;  %v14220_v10 = vpop.f32.mrf.mxu1 }
 0x3d9   : > { %v3701_v45 = vsel %vm3683_vm7, %v3482_v24, %v14199_v59  ;;  %v3700_v3 = vsel %vm3683_vm7, %v3480_v27, %v3482_v24  ;;  %19634 = vst [vmem:[#allocation56_spill] sm:$0xff] %v14211_v63 }
 0x3da   : > { %4039 = vmatprep.subr.mxu1 %v3701_v45 }
 0x3db   : > { %4040 = vmatpush1.msra.mxu1 %v3700_v3  ;;  %v3462_v2 = vpop.permute.xlu1 %3461 }
 0x3dc   : > { %v3476_v19 = vpop.permute.xlu0 %3475 }
 0x3dd   : > { %v3698_v54 = vsel %vm3683_vm7, %v3476_v19, %v3478_v25  ;;  %v3169_v19 = vpop.f32.mrf.mxu1 }
 0x3de   : > { %3939 = vmatpush1.msra.mxu0 %v3698_v54 }
 0x3df   : > { %v3466_v56 = vpop.permute.xlu1 %3465 }
 0x3e0   : > { %v3464_v29 = vpop.permute.xlu0 %3463 }
 0x3e1   : > { %v3692_v27 = vsel %vm3683_vm7, %v3462_v2, %v3464_v29  ;;  %v3693_v25 = vsel %vm3683_vm7, %v3464_v29, %v3466_v56 }
 0x3e2   : > { %3940 = vmatprep.subr.mxu0 %v3692_v27  ;;  %v14224_v27 = vadd.f32 %v3169_v19, %v14049_v13 }
 0x3e3   : > { %v3460_v24 = vpop.permute.xlu1 %3459 }
 0x3e4   : > { %v3691_v45 = vsel %vm3683_vm7, %v3460_v24, %v3462_v2  ;;  %v14215_v55 = vpop.permute.xlu0 %3467  ;;  %19635 = vst [vmem:[#allocation57_spill] sm:$0xff] %v14224_v27  ;;  %v14226_v2 = vpop.f32.mrf.mxu1 }
 0x3e5   : > { %3941 = vmatpush1.msra.mxu0 %v3691_v45  ;;  %v3694_v42 = vsel %vm3683_vm7, %v3466_v56, %v14215_v55  ;;  %19636 = vst [vmem:[#allocation58_spill] sm:$0xff] %v14226_v2 }
 0x3e6   : > { %4041 = vmatprep.subr.mxu1 %v3694_v42  ;;  %v3175_v42 = vpop.f32.mrf.mxu1 }
 0x3e7   : > { %4042 = vmatpush1.msra.mxu1 %v3693_v25  ;;  %v3448_v54 = vpop.permute.xlu1 %3447  ;;  %v14236_v25 = vld [vmem:[%s19530_s1 + $0x90] sm:$0xff]  ;;  %v14239_v13 = vadd.f32 %v3175_v42, %v14065_v8 }
 0x3e8   : > { %v3446_v3 = vpop.permute.xlu0 %3445  ;;  %v14241_v19 = vpop.f32.mrf.mxu1 }
 0x3e9   : > { %v3685_v28 = vsel %vm3683_vm7, %v3446_v3, %v3448_v54  ;;  %19637 = vst [vmem:[#allocation59_spill] sm:$0xff] %v14241_v19 }
 0x3ea   : > { %3942 = vmatprep.subr.mxu0 %v3685_v28  ;;  %v3181_v2 = vpop.f32.mrf.mxu1 }
 0x3eb   : > { %v14228_v24 = vpop.permute.xlu1 %3451  ;;  %v14253_v8 = vadd.f32 %v3181_v2, %v14087_v48  ;;  %v14268_v48 = vld [vmem:[%s19530_s1 + $0xa0] sm:$0xff] }
 0x3ec   : > { %v3450_v45 = vpop.permute.xlu0 %3449 }
 0x3ed   : > { %v3687_v29 = vsel %vm3683_vm7, %v3450_v45, %v14228_v24  ;;  %v3686_v56 = vsel %vm3683_vm7, %v3448_v54, %v3450_v45  ;;  %v14250_v45 = vld [vmem:[%s19530_s1 + $0x98] sm:$0xff] }
 0x3ee   : > { %4043 = vmatprep.subr.mxu1 %v3687_v29 }
 0x3ef   : > { %4044 = vmatpush1.msra.mxu1 %v3686_v56  ;;  %v3678_v28 = vpop.permute.xlu1 %3677 }
 0x3f0   : > { %9946 = vmatmul.mubr.msk.f32.vlgmr.msra.gmra.mxu1 %vm1687_vm5, %v14236_v25  ;;  %v3444_v31 = vpop.permute.xlu0 %3443 }
 0x3f1   : > { %v3684_v54 = vsel %vm3683_vm7, %v3444_v31, %v3446_v3  ;;  %4083 = vmatprep.mubr.f32.mxu1 %v19541_v1  ;;  %v14260_v31 = vpop.f32.mrf.mxu1 }
 0x3f2   : > { %3943 = vmatpush1.msra.mxu0 %v3684_v54  ;;  %19638 = vst [vmem:[#allocation60_spill] sm:$0xff] %v14260_v31  ;;  %v3786_v54 = vsel %vm3683_vm7, %v13777_v6, %v3678_v28  ;;  %v14287_v6 = vld [vmem:[%s19530_s1 + $0xa8] sm:$0xff] }
 0x3f3   : > { %9940 = vmatmul.mubr.msk.f32.vlgmr.msra.gmra.mxu0 %vm1687_vm5, %v14236_v25  ;;  %v3682_v42 = vpop.permute.xlu1 %3681  ;;  %v3187_v2 = vpop.f32.mrf.mxu1 }
 0x3f4   : > { %9947 = vmatmul.mubr.msk.f32.gmra.mxu1 %vm1687_vm5, %v14250_v45  ;;  %v3680_v29 = vpop.permute.xlu0 %3679  ;;  %3982 = vmatprep.mubr.f32.mxu0 %v19541_v1 }
 0x3f5   : > { %v3787_v3 = vsel %vm3683_vm7, %v3678_v28, %v3680_v29  ;;  %v3788_v56 = vsel %vm3683_vm7, %v3680_v29, %v3682_v42  ;;  %4089 = vmatprep.mubr.f32.mxu1 %v19541_v1  ;;  %v14275_v42 = vadd.f32 %v3187_v2, %v14105_v47  ;;  %v14289_v47 = vpop.f32.mrf.mxu1 }
 0x3f6   : > { %4116 = vmatprep.subr.mxu0 %v3787_v3  ;;  %10556 = vmatprep.subr.mxu1 %v3788_v56  ;;  %19639 = vst [vmem:[#allocation61_spill] sm:$0xff] %v14289_v47 }
 0x3f7   : > { %9941 = vmatmul.mubr.msk.f32.gmra.mxu0 %vm1687_vm5, %v14250_v45  ;;  %10557 = vmatpush3.msra.mxu1 %v3788_v56  ;;  %v3664_v31 = vpop.permute.xlu1 %3663  ;;  %v3193_v2 = vpop.f32.mrf.mxu1 }
 0x3f8   : > { %4117 = vmatpush1.msra.mxu0 %v3786_v54  ;;  %9948 = vmatmul.mubr.msk.f32.gmra.mxu1 %vm1687_vm5, %v14268_v48  ;;  %v3662_v29 = vpop.permute.xlu0 %3661  ;;  %v14301_v54 = vld [vmem:[%s19530_s1 + $0xb0] sm:$0xff] }
 0x3f9   : > { %3988 = vmatprep.mubr.f32.mxu0 %v19541_v1  ;;  %v3780_v3 = vsel %vm3683_vm7, %v3662_v29, %v3664_v31  ;;  %4095 = vmatprep.mubr.f32.mxu1 %v19541_v1  ;;  %v3779_v19 = vsel %vm3683_vm7, %v13824_v58, %v3662_v29  ;;  %v14304_v29 = vadd.f32 %v3193_v2, %v14124_v62  ;;  %v14317_v62 = vld [vmem:[%s19530_s1 + $0xb8] sm:$0xff] }
 0x3fa   : > { %4118 = vmatprep.subr.mxu0 %v3780_v3 }
 0x3fb   : > { %9942 = vmatmul.mubr.msk.f32.gmra.mxu0 %vm1687_vm5, %v14268_v48  ;;  %v3646_v28 = vpop.permute.xlu1 %3645 }
 0x3fc   : > { %4119 = vmatpush1.msra.mxu0 %v3779_v19  ;;  %9949 = vmatmul.mubr.msk.f32.gmra.mxu1 %vm1687_vm5, %v14287_v6  ;;  %v3666_v56 = vpop.permute.xlu0 %3665  ;;  %v3772_v2 = vsel %vm3683_vm7, %v13846_v20, %v3646_v28 }
 0x3fd   : > { %3994 = vmatprep.mubr.f32.mxu0 %v19541_v1  ;;  %v3781_v58 = vsel %vm3683_vm7, %v3664_v31, %v3666_v56  ;;  %4101 = vmatprep.mubr.f32.mxu1 %v19541_v1 }
 0x3fe   : > { %10558 = vmatprep.subr.mxu1 %v3781_v58 }
 0x3ff   : > { %9943 = vmatmul.mubr.msk.f32.gmra.mxu0 %vm1687_vm5, %v14287_v6  ;;  %10559 = vmatpush3.msra.mxu1 %v3781_v58  ;;  %v3650_v19 = vpop.permute.xlu1 %3649 }
 0x400   : > { %9950 = vmatmul.mubr.msk.f32.gmra.mxu1 %vm1687_vm5, %v14301_v54  ;;  %v3648_v31 = vpop.permute.xlu0 %3647  ;;  %4000 = vmatprep.mubr.f32.mxu0 %v19541_v1 }
 0x401   : > { %v3773_v3 = vsel %vm3683_vm7, %v3646_v28, %v3648_v31  ;;  %v3774_v56 = vsel %vm3683_vm7, %v3648_v31, %v3650_v19  ;;  %4107 = vmatprep.mubr.f32.mxu1 %v19541_v1 }
 0x402   : > { %4120 = vmatprep.subr.mxu0 %v3773_v3  ;;  %10560 = vmatprep.subr.mxu1 %v3774_v56 }
 0x403   : > { %9944 = vmatmul.mubr.msk.f32.gmra.mxu0 %vm1687_vm5, %v14301_v54  ;;  %10561 = vmatpush3.msra.mxu1 %v3774_v56  ;;  %v3632_v58 = vpop.permute.xlu1 %3631 }
 0x404   : > { %4121 = vmatpush1.msra.mxu0 %v3772_v2  ;;  %9951 = vmatmul.mubr.msk.f32.gmra.mxu1 %vm1687_vm5, %v14317_v62  ;;  %v3630_v19 = vpop.permute.xlu0 %3629 }
 0x405   : > { %4006 = vmatprep.mubr.f32.mxu0 %v19541_v1  ;;  %v3766_v31 = vsel %vm3683_vm7, %v3630_v19, %v3632_v58  ;;  %v3765_v3 = vsel %vm3683_vm7, %v13874_v53, %v3630_v19  ;;  %10586 = vmatprep.mubr.msk.f32.mxu1 %vm1687_vm5, %v14236_v25 }
 0x406   : > { %4122 = vmatprep.subr.mxu0 %v3766_v31 }
 0x407   : > { %9945 = vmatmul.mubr.msk.f32.gmra.mxu0 %vm1687_vm5, %v14317_v62  ;;  %v3614_v20 = vpop.permute.xlu1 %3613 }
 0x408   : > { %4123 = vmatpush1.msra.mxu0 %v3765_v3  ;;  %v3634_v28 = vpop.permute.xlu0 %3633  ;;  %4178 = vmatprep.mubr.f32.mxu0 %v19541_v1  ;;  %v3758_v31 = vsel %vm3683_vm7, %v13890_v21, %v3614_v20  ;;  %v14343_v21 = vpop.f32.mrf.mxu0 }
 0x409   : > { %v3767_v56 = vsel %vm3683_vm7, %v3632_v58, %v3634_v28 }
 0x40a   : > { %10562 = vmatprep.subr.mxu1 %v3767_v56 }
 0x40b   : > { %10563 = vmatpush3.msra.mxu1 %v3767_v56  ;;  %v3618_v2 = vpop.permute.xlu1 %3617 }
 0x40c   : > { %v3616_v47 = vpop.permute.xlu0 %3615 }
 0x40d   : > { %v3759_v53 = vsel %vm3683_vm7, %v3614_v20, %v3616_v47  ;;  %v3760_v19 = vsel %vm3683_vm7, %v3616_v47, %v3618_v2 }
 0x40e   : > { %4124 = vmatprep.subr.mxu0 %v3759_v53  ;;  %10564 = vmatprep.subr.mxu1 %v3760_v19 }
 0x40f   : > { %4125 = vmatpush1.msra.mxu0 %v3758_v31  ;;  %10565 = vmatpush3.msra.mxu1 %v3760_v19  ;;  %v3600_v3 = vpop.permute.xlu1 %3599  ;;  %v14347_v31 = vpop.f32.mrf.mxu1 }
 0x410   : > { %v3598_v27 = vpop.permute.xlu0 %3597  ;;  %19640 = vst [vmem:[#allocation62_spill] sm:$0xff] %v14347_v31 }
 0x411   : > { %v3752_v63 = vsel %vm3683_vm7, %v3598_v27, %v3600_v3  ;;  %v3751_v58 = vsel %vm3683_vm7, %v13924_v18, %v3598_v27 }
 0x412   : > { %4126 = vmatprep.subr.mxu0 %v3752_v63 }
 0x413   : > { %4127 = vmatpush1.msra.mxu0 %v3751_v58  ;;  %v3582_v28 = vpop.permute.xlu1 %3581 }
 0x414   : > { %v3602_v56 = vpop.permute.xlu0 %3601  ;;  %v3744_v63 = vsel %vm3683_vm7, %v13952_v4, %v3582_v28 }
 0x415   : > { %v3753_v47 = vsel %vm3683_vm7, %v3600_v3, %v3602_v56 }
 0x416   : > { %10566 = vmatprep.subr.mxu1 %v3753_v47 }
 0x417   : > { %10567 = vmatpush3.msra.mxu1 %v3753_v47  ;;  %v3586_v2 = vpop.permute.xlu1 %3585 }
 0x418   : > { %v3584_v53 = vpop.permute.xlu0 %3583 }
 0x419   : > { %v3745_v20 = vsel %vm3683_vm7, %v3582_v28, %v3584_v53  ;;  %v3746_v19 = vsel %vm3683_vm7, %v3584_v53, %v3586_v2 }
 0x41a   : > { %4128 = vmatprep.subr.mxu0 %v3745_v20  ;;  %10568 = vmatprep.subr.mxu1 %v3746_v19 }
 0x41b   : > { %4129 = vmatpush1.msra.mxu0 %v3744_v63  ;;  %10569 = vmatpush3.msra.mxu1 %v3746_v19  ;;  %v3568_v18 = vpop.permute.xlu1 %3567 }
 0x41c   : > { %v3566_v27 = vpop.permute.xlu0 %3565  ;;  %v3264_v3 = vpop.f32.mrf.mxu0 }
 0x41d   : > { %v3738_v58 = vsel %vm3683_vm7, %v3566_v27, %v3568_v18  ;;  %v3737_v56 = vsel %vm3683_vm7, %v13993_v9, %v3566_v27  ;;  %v14355_v47 = vadd.f32 %v3264_v3, %v13981_v60  ;;  %v10549_v2 = vpop.f32.mrf.mxu1 }
 0x41e   : > { %4130 = vmatprep.subr.mxu0 %v3738_v58  ;;  %v14357_v53 = vpop.f32.mrf.mxu0  ;;  %v14360_v20 = vadd.f32 %v10549_v2, %v14143_v7 }
 0x41f   : > { %4131 = vmatpush1.msra.mxu0 %v3737_v56  ;;  %v3550_v4 = vpop.permute.xlu1 %3549  ;;  %v14368_v27 = vpop.f32.mrf.mxu1 }
 0x420   : > { %v3570_v28 = vpop.permute.xlu0 %3569  ;;  %v3270_v19 = vpop.f32.mrf.mxu0  ;;  %19641 = vst [vmem:[#allocation63_spill] sm:$0xff] %v14368_v27 }
 0x421   : > { %v3739_v63 = vsel %vm3683_vm7, %v3568_v18, %v3570_v28  ;;  %v14364_v31 = vadd.f32 %v3270_v19, %v13996_v0  ;;  %v3730_v0 = vsel %vm3683_vm7, %v14021_v46, %v3550_v4 }
 0x422   : > { %10570 = vmatprep.subr.mxu1 %v3739_v63  ;;  %v14366_v9 = vpop.f32.mrf.mxu0 }
 0x423   : > { %10571 = vmatpush3.msra.mxu1 %v3739_v63  ;;  %v3554_v60 = vpop.permute.xlu1 %3553 }
 0x424   : > { %v3552_v3 = vpop.permute.xlu0 %3551  ;;  %v3276_v58 = vpop.f32.mrf.mxu0 }
 0x425   : > { %v3731_v7 = vsel %vm3683_vm7, %v3550_v4, %v3552_v3  ;;  %v3732_v56 = vsel %vm3683_vm7, %v3552_v3, %v3554_v60  ;;  %v14373_v2 = vadd.f32 %v3276_v58, %v14010_v16  ;;  %v10552_v18 = vpop.f32.mrf.mxu1 }
 0x426   : > { %4132 = vmatprep.subr.mxu0 %v3731_v7  ;;  %10572 = vmatprep.subr.mxu1 %v3732_v56  ;;  %v14377_v28 = vpop.f32.mrf.mxu0  ;;  %v14380_v19 = vadd.f32 %v10552_v18, %v14165_v15 }
 0x427   : > { %19642 = vst [vmem:[#allocation64_spill] sm:$0xff] %v14377_v28  ;;  %4133 = vmatpush1.msra.mxu0 %v3730_v0  ;;  %10573 = vmatpush3.msra.mxu1 %v3732_v56  ;;  %v3536_v63 = vpop.permute.xlu1 %3535  ;;  %v14382_v27 = vpop.f32.mrf.mxu1 }
 0x428   : > { %19643 = vst [vmem:[#allocation65_spill] sm:$0xff] %v14382_v27  ;;  %v3534_v60 = vpop.permute.xlu0 %3533  ;;  %v3282_v3 = vpop.f32.mrf.mxu0 }
 0x429   : > { %v3724_v16 = vsel %vm3683_vm7, %v3534_v60, %v3536_v63  ;;  %v3723_v58 = vsel %vm3683_vm7, %v14068_v33, %v3534_v60  ;;  %v14388_v7 = vadd.f32 %v3282_v3, %v14024_v5  ;;  %v10555_v46 = vpop.f32.mrf.mxu1 }
 0x42a   : > { %4134 = vmatprep.subr.mxu0 %v3724_v16  ;;  %v14390_v4 = vpop.f32.mrf.mxu0  ;;  %v14393_v15 = vadd.f32 %v10555_v46, %v14195_v61 }
 0x42b   : > { %4135 = vmatpush1.msra.mxu0 %v3723_v58  ;;  %v3518_v56 = vpop.permute.xlu1 %3517 }
 0x42c   : > { %v3538_v18 = vpop.permute.xlu0 %3537  ;;  %v3288_v0 = vpop.f32.mrf.mxu0 }
 0x42d   : > { %v3725_v27 = vsel %vm3683_vm7, %v3536_v63, %v3538_v18  ;;  %v14397_v28 = vadd.f32 %v3288_v0, %v14039_v35  ;;  %v3716_v35 = vsel %vm3683_vm7, %v14100_v26, %v3518_v56  ;;  %v4817_v63 = vld [vmem:[%s19644_s2] sm:$0xff]  ;;  %v11429_v18 = vmov 0   ;;  %v4818_v26 = vld [vmem:[%s19644_s2 + $0x8] sm:$0xff] }
 0x42e   : > { %10574 = vmatprep.subr.mxu1 %v3725_v27  ;;  %v14399_v33 = vpop.f32.mrf.mxu0  ;;  %10744 = vset.pattern.permute.xlu0 %v11429_v18 }
 0x42f   : > { %10575 = vmatpush3.msra.mxu1 %v3725_v27  ;;  %v3522_v5 = vpop.permute.xlu1 %3521  ;;  %10745 = vset.pattern.permute.xlu1 %v11429_v18 }
 0x430   : > { %v3520_v60 = vpop.permute.xlu0 %3519  ;;  %v3294_v3 = vpop.f32.mrf.mxu0  ;;  %4825 = vperm.xlu0 %10744, %v4817_v63   ;;  %4830 = vperm.xlu1 %10745, %v4818_v26   ;;  %v4820_v63 = vld [vmem:[%s19644_s2 + $0x18] sm:$0xff]  ;;  %v4821_v26 = vld [vmem:[%s19644_s2 + $0x20] sm:$0xff] }
 0x431   : > { %v3717_v16 = vsel %vm3683_vm7, %v3518_v56, %v3520_v60  ;;  %v3718_v61 = vsel %vm3683_vm7, %v3520_v60, %v3522_v5  ;;  %v14404_v58 = vadd.f32 %v3294_v3, %v14052_v57  ;;  %v4819_v3 = vld [vmem:[%s19644_s2 + $0x10] sm:$0xff] }
 0x432   : > { %4136 = vmatprep.subr.mxu0 %v3717_v16  ;;  %10576 = vmatprep.subr.mxu1 %v3718_v61 }
 0x433   : > { %4137 = vmatpush1.msra.mxu0 %v3716_v35  ;;  %10577 = vmatpush3.msra.mxu1 %v3718_v61  ;;  %v3504_v27 = vpop.permute.xlu1 %3503 }
 0x434   : > { %v3502_v46 = vpop.permute.xlu0 %3501  ;;  %4835 = vperm.xlu1 %10745, %v4819_v3   ;;  %4840 = vperm.xlu0 %10744, %v4820_v63   ;;  %v11237_v63 = vld [vmem:[#allocation2 + $0x3a0] sm:$0xff] }
 0x435   : > { %v3710_v0 = vsel %vm3683_vm7, %v3502_v46, %v3504_v27  ;;  %v3709_v57 = vsel %vm3683_vm7, %v14162_v43, %v3502_v46 }
 0x436   : > { %4138 = vmatprep.subr.mxu0 %v3710_v0 }
 0x437   : > { %4139 = vmatpush1.msra.mxu0 %v3709_v57  ;;  %v3486_v56 = vpop.permute.xlu1 %3485 }
 0x438   : > { %v3506_v5 = vpop.permute.xlu0 %3505  ;;  %4845 = vperm.xlu1 %10745, %v4821_v26   ;;  %v11245_v26 = vld [vmem:[#allocation2 + $0x320] sm:$0xff] }
 0x439   : > { %v3711_v60 = vsel %vm3683_vm7, %v3504_v27, %v3506_v5  ;;  %v3702_v27 = vsel %vm3683_vm7, %v14199_v59, %v3486_v56 }
 0x43a   : > { %10578 = vmatprep.subr.mxu1 %v3711_v60 }
 0x43b   : > { %10579 = vmatpush3.msra.mxu1 %v3711_v60  ;;  %v3490_v43 = vpop.permute.xlu1 %3489 }
 0x43c   : > { %v3488_v16 = vpop.permute.xlu0 %3487 }
 0x43d   : > { %v3703_v61 = vsel %vm3683_vm7, %v3486_v56, %v3488_v16  ;;  %v3704_v35 = vsel %vm3683_vm7, %v3488_v16, %v3490_v43  ;;  %v4822_v56 = vld [vmem:[%s19644_s2 + $0x28] sm:$0xff]  ;;  %s19828_s2 = smov 125  }
 0x43e   : > { %4140 = vmatprep.subr.mxu0 %v3703_v61  ;;  %10580 = vmatprep.subr.mxu1 %v3704_v35 }
 0x43f   : > { %4141 = vmatpush1.msra.mxu0 %v3702_v27  ;;  %10581 = vmatpush3.msra.mxu1 %v3704_v35  ;;  %v3472_v46 = vpop.permute.xlu1 %3471  ;;  %v11236_v35 = vld [vmem:[#allocation2 + $0x390] sm:$0xff]  ;;  %v11238_v27 = vld [vmem:[#allocation2 + $0x388] sm:$0xff] }
 0x440   : > { %v3470_v18 = vpop.permute.xlu0 %3469  ;;  %4850 = vperm.xlu0 %10744, %v4822_v56   ;;  %v11249_v56 = vld [vmem:[#allocation2 + $0x2e0] sm:$0xff] }
 0x441   : > { %v3696_v0 = vsel %vm3683_vm7, %v3470_v18, %v3472_v46  ;;  %v3695_v57 = vsel %vm3683_vm7, %v14215_v55, %v3470_v18  ;;  %v11240_v18 = vld [vmem:[#allocation2 + $0x350] sm:$0xff] }
 0x442   : > { %4142 = vmatprep.subr.mxu0 %v3696_v0  ;;  %v11241_v0 = vld [vmem:[#allocation2 + $0x360] sm:$0xff] }
 0x443   : > { %4143 = vmatpush1.msra.mxu0 %v3695_v57  ;;  %v3454_v5 = vpop.permute.xlu1 %3453  ;;  %v11244_v57 = vld [vmem:[#allocation2 + $0x310] sm:$0xff] }
 0x444   : > { %v3474_v60 = vpop.permute.xlu0 %3473  ;;  %v3688_v61 = vsel %vm3683_vm7, %v14228_v24, %v3454_v5  ;;  %v11242_v24 = vld [vmem:[#allocation2 + $0x348] sm:$0xff] }
 0x445   : > { %v3697_v59 = vsel %vm3683_vm7, %v3472_v46, %v3474_v60  ;;  %v11239_v46 = vld [vmem:[#allocation2 + $0x398] sm:$0xff] }
 0x446   : > { %10582 = vmatprep.subr.mxu1 %v3697_v59  ;;  %v11247_v60 = vld [vmem:[#allocation2 + $0x318] sm:$0xff] }
 0x447   : > { %10583 = vmatpush3.msra.mxu1 %v3697_v59  ;;  %v3458_v3 = vpop.permute.xlu1 %3457  ;;  %v11248_v59 = vld [vmem:[#allocation2 + $0x2d0] sm:$0xff] }
 0x448   : > { %v3456_v55 = vpop.permute.xlu0 %3455 }
 0x449   : > { %v3689_v43 = vsel %vm3683_vm7, %v3454_v5, %v3456_v55  ;;  %v3690_v16 = vsel %vm3683_vm7, %v3456_v55, %v3458_v3  ;;  %v11246_v5 = vld [vmem:[#allocation2 + $0x308] sm:$0xff]  ;;  %v11251_v3 = vld [vmem:[#allocation2 + $0x2d8] sm:$0xff]  ;;  %v11252_v55 = vld [vmem:[#allocation2 + $0x290] sm:$0xff] }
 0x44a   : > { %4144 = vmatprep.subr.mxu0 %v3689_v43  ;;  %10584 = vmatprep.subr.mxu1 %v3690_v16  ;;  %v11253_v43 = vld [vmem:[#allocation2 + $0x2a0] sm:$0xff] }
 0x44b   : > { %4145 = vmatpush1.msra.mxu0 %v3688_v61  ;;  %10585 = vmatpush3.msra.mxu1 %v3690_v16  ;;  %v11254_v16 = vld [vmem:[#allocation2 + $0x288] sm:$0xff]  ;;  %v11255_v61 = vld [vmem:[#allocation2 + $0x298] sm:$0xff] }
 0x44c   : > { %9952 = vmatmul.mubr.msk.f32.vlgmr.msra.gmra.mxu0 %vm1687_vm5, %v14236_v25  ;;  %10587 = vmatmul.mubr.msk.f32.vlgmr.msra.gmra.mxu1 %vm1687_vm5, %v14250_v45  ;;  %v11243_v25 = vld [vmem:[#allocation2 + $0x358] sm:$0xff] }
 0x44d   : > { %4379 = vmatprep.subr.mxu0 %v11236_v35  ;;  %4480 = vmatprep.subr.mxu1 %v11237_v63  ;;  %v11256_v35 = vld [vmem:[#allocation2 + $0x250] sm:$0xff]  ;;  %v11257_v63 = vld [vmem:[#allocation2 + $0x260] sm:$0xff] }
 0x44e   : > { %4380 = vmatpush1.msra.mxu0 %v11238_v27  ;;  %4481 = vmatpush1.msra.mxu1 %v11239_v46  ;;  %v11258_v27 = vld [vmem:[#allocation2 + $0x248] sm:$0xff]  ;;  %v11260_v46 = vld [vmem:[#allocation2 + $0x210] sm:$0xff] }
 0x44f   : > { %4381 = vmatprep.subr.mxu0 %v11240_v18  ;;  %4482 = vmatprep.subr.mxu1 %v11241_v0  ;;  %v11261_v18 = vld [vmem:[#allocation2 + $0x220] sm:$0xff]  ;;  %v11262_v0 = vld [vmem:[#allocation2 + $0x208] sm:$0xff] }
 0x450   : > { %4184 = vmatprep.mubr.f32.mxu0 %v19541_v1  ;;  %10589 = vmatprep.mubr.msk.f32.mxu1 %vm1687_vm5, %v14268_v48 }
 0x451   : > { %4382 = vmatpush1.msra.mxu0 %v11242_v24  ;;  %4483 = vmatpush1.msra.mxu1 %v11243_v25  ;;  %v11263_v24 = vld [vmem:[#allocation2 + $0x218] sm:$0xff]  ;;  %v11264_v25 = vld [vmem:[#allocation2 + $0x1d0] sm:$0xff] }
 0x452   : > { %9953 = vmatmul.mubr.msk.f32.gmra.mxu0 %vm1687_vm5, %v14250_v45  ;;  %10590 = vmatmul.mubr.msk.f32.gmra.mxu1 %vm1687_vm5, %v14287_v6  ;;  %v11250_v45 = vld [vmem:[#allocation2 + $0x2c8] sm:$0xff] }
 0x453   : > { %4383 = vmatprep.subr.mxu0 %v11244_v57  ;;  %4484 = vmatprep.subr.mxu1 %v11245_v26  ;;  %v11265_v57 = vld [vmem:[#allocation2 + $0x1e0] sm:$0xff]  ;;  %v11266_v26 = vld [vmem:[#allocation2 + $0x1c8] sm:$0xff] }
 0x454   : > { %4384 = vmatpush1.msra.mxu0 %v11246_v5  ;;  %4485 = vmatpush1.msra.mxu1 %v11247_v60  ;;  %v11267_v5 = vld [vmem:[#allocation2 + $0x1d8] sm:$0xff]  ;;  %v11269_v60 = vld [vmem:[#allocation2 + $0x1a0] sm:$0xff] }
 0x455   : > { %4385 = vmatprep.subr.mxu0 %v11248_v59  ;;  %4486 = vmatprep.subr.mxu1 %v11249_v56  ;;  %v11270_v59 = vld [vmem:[#allocation2 + $0x188] sm:$0xff]  ;;  %v11271_v56 = vld [vmem:[#allocation2 + $0x198] sm:$0xff] }
 0x456   : > { %4190 = vmatprep.mubr.f32.mxu0 %v19541_v1  ;;  %10592 = vmatprep.mubr.msk.f32.mxu1 %vm1687_vm5, %v14301_v54 }
 0x457   : > { %4386 = vmatpush1.msra.mxu0 %v11250_v45  ;;  %4487 = vmatpush1.msra.mxu1 %v11251_v3  ;;  %v11272_v45 = vld [vmem:[#allocation2 + $0x150] sm:$0xff]  ;;  %v11273_v3 = vld [vmem:[#allocation2 + $0x160] sm:$0xff] }
 0x458   : > { %9954 = vmatmul.mubr.msk.f32.gmra.mxu0 %vm1687_vm5, %v14268_v48  ;;  %10593 = vmatmul.mubr.msk.f32.gmra.mxu1 %vm1687_vm5, %v14317_v62  ;;  %v11259_v48 = vld [vmem:[#allocation2 + $0x258] sm:$0xff] }
 0x459   : > { %4387 = vmatprep.subr.mxu0 %v11252_v55  ;;  %4488 = vmatprep.subr.mxu1 %v11253_v43  ;;  %v11274_v55 = vld [vmem:[#allocation2 + $0x148] sm:$0xff]  ;;  %v11275_v43 = vld [vmem:[#allocation2 + $0x158] sm:$0xff] }
 0x45a   : > { %4388 = vmatpush1.msra.mxu0 %v11254_v16  ;;  %4489 = vmatpush1.msra.mxu1 %v11255_v61  ;;  %v11277_v16 = vld [vmem:[#allocation2 + $0x120] sm:$0xff]  ;;  %v11278_v61 = vld [vmem:[#allocation2 + $0x108] sm:$0xff] }
 0x45b   : > { %4389 = vmatprep.subr.mxu0 %v11256_v35  ;;  %4490 = vmatprep.subr.mxu1 %v11257_v63  ;;  %v11279_v35 = vld [vmem:[#allocation2 + $0x118] sm:$0xff]  ;;  %v11280_v63 = vld [vmem:[#allocation2 + $0xd0] sm:$0xff] }
 0x45c   : > { %4196 = vmatprep.mubr.f32.mxu0 %v19541_v1  ;;  %4390 = vmatpush1.msra.mxu0 %v11258_v27  ;;  %v11281_v27 = vld [vmem:[#allocation2 + $0xe0] sm:$0xff] }
 0x45d   : > { %4491 = vmatpush1.msra.mxu1 %v11259_v48  ;;  %9955 = vmatmul.mubr.msk.f32.gmra.mxu0 %vm1687_vm5, %v14287_v6  ;;  %v11268_v6 = vld [vmem:[#allocation2 + $0x190] sm:$0xff]  ;;  %v11282_v48 = vld [vmem:[#allocation2 + $0xc8] sm:$0xff] }
 0x45e   : > { %4391 = vmatprep.subr.mxu0 %v11260_v46  ;;  %4492 = vmatprep.subr.mxu1 %v11261_v18  ;;  %v11283_v46 = vld [vmem:[#allocation2 + $0xd8] sm:$0xff]  ;;  %v11284_v18 = vld [vmem:[#allocation2 + $0x90] sm:$0xff] }
 0x45f   : > { %4392 = vmatpush1.msra.mxu0 %v11262_v0  ;;  %4493 = vmatpush1.msra.mxu1 %v11263_v24  ;;  %v11285_v0 = vld [vmem:[#allocation2 + $0xa0] sm:$0xff]  ;;  %v11287_v24 = vld [vmem:[#allocation2 + $0x98] sm:$0xff] }
 0x460   : > { %4393 = vmatprep.subr.mxu0 %v11264_v25  ;;  %4494 = vmatprep.subr.mxu1 %v11265_v57  ;;  %v11288_v25 = vld [vmem:[#allocation2 + $0x50] sm:$0xff]  ;;  %v11289_v57 = vld [vmem:[#allocation2 + $0x60] sm:$0xff] }
 0x461   : > { %4202 = vmatprep.mubr.f32.mxu0 %v19541_v1  ;;  %4394 = vmatpush1.msra.mxu0 %v11266_v26  ;;  %v11290_v26 = vld [vmem:[#allocation2 + $0x48] sm:$0xff] }
 0x462   : > { %4495 = vmatpush1.msra.mxu1 %v11267_v5  ;;  %9956 = vmatmul.mubr.msk.f32.gmra.mxu0 %vm1687_vm5, %v14301_v54  ;;  %v11276_v54 = vld [vmem:[#allocation2 + $0x110] sm:$0xff]  ;;  %v11291_v5 = vld [vmem:[#allocation2 + $0x58] sm:$0xff] }
 0x463   : > { %4395 = vmatprep.subr.mxu0 %v11268_v6  ;;  %4496 = vmatprep.subr.mxu1 %v11269_v60  ;;  %v11292_v6 = vld [vmem:[#allocation2 + $0x10] sm:$0xff]  ;;  %v11293_v60 = vld [vmem:[#allocation2 + $0x20] sm:$0xff] }
 0x464   : > { %4396 = vmatpush1.msra.mxu0 %v11270_v59  ;;  %4497 = vmatpush1.msra.mxu1 %v11271_v56  ;;  %v14472_v59 = vld [vmem:[%s19530_s1 + $0xc0] sm:$0xff]  ;;  %v11294_v56 = vld [vmem:[#allocation2 + $0x8] sm:$0xff] }
 0x465   : > { %4397 = vmatprep.subr.mxu0 %v11272_v45  ;;  %4498 = vmatprep.subr.mxu1 %v11273_v3  ;;  %v11295_v45 = vld [vmem:[#allocation2 + $0x18] sm:$0xff]  ;;  %v11296_v3 = vld [vmem:[#allocation2 + $0x3b0] sm:$0xff] }
 0x466   : > { %4208 = vmatprep.mubr.f32.mxu0 %v19541_v1  ;;  %4398 = vmatpush1.msra.mxu0 %v11274_v55  ;;  %v11297_v55 = vld [vmem:[#allocation2 + $0x3b8] sm:$0xff] }
 0x467   : > { %4499 = vmatpush1.msra.mxu1 %v11275_v43  ;;  %9957 = vmatmul.mubr.msk.f32.gmra.mxu0 %vm1687_vm5, %v14317_v62  ;;  %v11286_v62 = vld [vmem:[#allocation2 + $0x88] sm:$0xff] }
 0x468   : > { %4399 = vmatprep.subr.mxu0 %v11276_v54  ;;  %4500 = vmatprep.subr.mxu1 %v11277_v16  ;;  %v11298_v43 = vld [vmem:[#allocation2 + $0x3a8] sm:$0xff]  ;;  %v11299_v54 = vld [vmem:[#allocation2 + $0x370] sm:$0xff]  ;;  %v11300_v16 = vld [vmem:[#allocation2 + $0x378] sm:$0xff] }
 0x469   : > { %4400 = vmatpush1.msra.mxu0 %v11278_v61  ;;  %4501 = vmatpush1.msra.mxu1 %v11279_v35  ;;  %v14483_v61 = vld [vmem:[%s19530_s1 + $0xc8] sm:$0xff] }
 0x46a   : > { %4401 = vmatprep.subr.mxu0 %v11280_v63  ;;  %4502 = vmatprep.subr.mxu1 %v11281_v27  ;;  %v11301_v35 = vld [vmem:[#allocation2 + $0x368] sm:$0xff]  ;;  %v11302_v63 = vld [vmem:[#allocation2 + $0x330] sm:$0xff]  ;;  %v11303_v27 = vld [vmem:[#allocation2 + $0x338] sm:$0xff] }
 0x46b   : > { %4402 = vmatpush1.msra.mxu0 %v11282_v48  ;;  %4503 = vmatpush1.msra.mxu1 %v11283_v46  ;;  %v11304_v48 = vld [vmem:[#allocation2 + $0x328] sm:$0xff]  ;;  %v11305_v46 = vld [vmem:[#allocation2 + $0x2f0] sm:$0xff] }
 0x46c   : > { %4403 = vmatprep.subr.mxu0 %v11284_v18  ;;  %4504 = vmatprep.subr.mxu1 %v11285_v0  ;;  %v11306_v18 = vld [vmem:[#allocation2 + $0x2f8] sm:$0xff]  ;;  %v14494_v0 = vld [vmem:[%s19530_s1 + $0xd0] sm:$0xff] }
 0x46d   : > { %4404 = vmatpush1.msra.mxu0 %v11286_v62  ;;  %4505 = vmatpush1.msra.mxu1 %v11287_v24  ;;  %v11307_v62 = vld [vmem:[#allocation2 + $0x2e8] sm:$0xff]  ;;  %v11308_v24 = vld [vmem:[#allocation2 + $0x2b0] sm:$0xff] }
 0x46e   : > { %4405 = vmatprep.subr.mxu0 %v11288_v25  ;;  %4506 = vmatprep.subr.mxu1 %v11289_v57  ;;  %v11309_v25 = vld [vmem:[#allocation2 + $0x2b8] sm:$0xff]  ;;  %v11310_v57 = vld [vmem:[#allocation2 + $0x2a8] sm:$0xff] }
 0x46f   : > { %4406 = vmatpush1.msra.mxu0 %v11290_v26  ;;  %4507 = vmatpush1.msra.mxu1 %v11291_v5  ;;  %v11311_v26 = vld [vmem:[#allocation2 + $0x270] sm:$0xff]  ;;  %v11312_v5 = vld [vmem:[#allocation2 + $0x278] sm:$0xff] }
 0x470   : > { %4407 = vmatprep.subr.mxu0 %v11292_v6  ;;  %4508 = vmatprep.subr.mxu1 %v11293_v60  ;;  %v14505_v6 = vld [vmem:[%s19530_s1 + $0xd8] sm:$0xff]  ;;  %v11313_v60 = vld [vmem:[#allocation2 + $0x268] sm:$0xff] }
 0x471   : > { %4408 = vmatpush1.msra.mxu0 %v11294_v56  ;;  %4441 = vmatprep.mubr.f32.mxu0 %v19541_v1  ;;  %v11314_v56 = vld [vmem:[#allocation2 + $0x230] sm:$0xff] }
 0x472   : > { %4509 = vmatpush1.msra.mxu1 %v11295_v45  ;;  %4542 = vmatprep.mubr.f32.mxu1 %v19541_v1  ;;  %v11315_v45 = vld [vmem:[#allocation2 + $0x238] sm:$0xff] }
 0x473   : > { %9970 = vmatmul.mubr.msk.f32.vlgmr.msra.gmra.mxu0 %vm1687_vm5, %v14472_v59  ;;  %9976 = vmatmul.mubr.msk.f32.vlgmr.msra.gmra.mxu1 %vm1687_vm5, %v14472_v59 }
 0x474   : > { %4581 = vmatprep.subr.mxu0 %v11296_v3  ;;  %10595 = vmatprep.subr.mxu1 %v11297_v55  ;;  %v11316_v3 = vld [vmem:[#allocation2 + $0x228] sm:$0xff] }
 0x475   : > { %4582 = vmatpush1.msra.mxu0 %v11298_v43  ;;  %10596 = vmatpush3.msra.mxu1 %v11297_v55  ;;  %v11317_v55 = vld [vmem:[#allocation2 + $0x1f0] sm:$0xff]  ;;  %v11318_v43 = vld [vmem:[#allocation2 + $0x1f8] sm:$0xff] }
 0x476   : > { %4583 = vmatprep.subr.mxu0 %v11299_v54  ;;  %10597 = vmatprep.subr.mxu1 %v11300_v16  ;;  %v9968_v54 = vld [vmem:[%s19530_s1 + $0xe0] sm:$0xff] }
 0x477   : > { %4447 = vmatprep.mubr.f32.mxu0 %v19541_v1  ;;  %4548 = vmatprep.mubr.f32.mxu1 %v19541_v1 }
 0x478   : > { %4584 = vmatpush1.msra.mxu0 %v11301_v35  ;;  %10598 = vmatpush3.msra.mxu1 %v11300_v16  ;;  %v11319_v16 = vld [vmem:[#allocation2 + $0x1e8] sm:$0xff]  ;;  %v11320_v35 = vld [vmem:[#allocation2 + $0x1b0] sm:$0xff] }
 0x479   : > { %9971 = vmatmul.mubr.msk.f32.gmra.mxu0 %vm1687_vm5, %v14483_v61  ;;  %9977 = vmatmul.mubr.msk.f32.gmra.mxu1 %vm1687_vm5, %v14483_v61 }
 0x47a   : > { %4585 = vmatprep.subr.mxu0 %v11302_v63  ;;  %10599 = vmatprep.subr.mxu1 %v11303_v27  ;;  %v11321_v63 = vld [vmem:[#allocation2 + $0x1b8] sm:$0xff] }
 0x47b   : > { %4586 = vmatpush1.msra.mxu0 %v11304_v48  ;;  %10600 = vmatpush3.msra.mxu1 %v11303_v27  ;;  %v11322_v27 = vld [vmem:[#allocation2 + $0x1a8] sm:$0xff]  ;;  %v11323_v48 = vld [vmem:[#allocation2 + $0x170] sm:$0xff] }
 0x47c   : > { %4587 = vmatprep.subr.mxu0 %v11305_v46  ;;  %10601 = vmatprep.subr.mxu1 %v11306_v18  ;;  %v9969_v46 = vld [vmem:[%s19530_s1 + $0xe8] sm:$0xff]  ;;  %s19827_s1 = smov 124  }
 0x47d   : > { %4453 = vmatprep.mubr.f32.mxu0 %v19541_v1  ;;  %4554 = vmatprep.mubr.f32.mxu1 %v19541_v1 }
 0x47e   : > { %4588 = vmatpush1.msra.mxu0 %v11307_v62  ;;  %10602 = vmatpush3.msra.mxu1 %v11306_v18  ;;  %v11324_v18 = vld [vmem:[#allocation2 + $0x168] sm:$0xff] }
 0x47f   : > { %9972 = vmatmul.mubr.msk.f32.gmra.mxu0 %vm1687_vm5, %v14494_v0  ;;  %9978 = vmatmul.mubr.msk.f32.gmra.mxu1 %vm1687_vm5, %v14494_v0  ;;  %v11325_v62 = vld [vmem:[#allocation2 + $0x128] sm:$0xff] }
 0x480   : > { %4589 = vmatprep.subr.mxu0 %v11308_v24  ;;  %10603 = vmatprep.subr.mxu1 %v11309_v25 }
 0x481   : > { %4590 = vmatpush1.msra.mxu0 %v11310_v57  ;;  %10604 = vmatpush3.msra.mxu1 %v11309_v25 }
 0x482   : > { %4591 = vmatprep.subr.mxu0 %v11311_v26  ;;  %10605 = vmatprep.subr.mxu1 %v11312_v5 }
 0x483   : > { %4459 = vmatprep.mubr.f32.mxu0 %v19541_v1  ;;  %4560 = vmatprep.mubr.f32.mxu1 %v19541_v1 }
 0x484   : > { %4592 = vmatpush1.msra.mxu0 %v11313_v60  ;;  %10606 = vmatpush3.msra.mxu1 %v11312_v5 }
 0x485   : > { %9973 = vmatmul.mubr.msk.f32.gmra.mxu0 %vm1687_vm5, %v14505_v6  ;;  %9979 = vmatmul.mubr.msk.f32.gmra.mxu1 %vm1687_vm5, %v14505_v6 }
 0x486   : > { %4593 = vmatprep.subr.mxu0 %v11314_v56  ;;  %10607 = vmatprep.subr.mxu1 %v11315_v45 }
 0x487   : > { %4594 = vmatpush1.msra.mxu0 %v11316_v3  ;;  %10608 = vmatpush3.msra.mxu1 %v11315_v45 }
 0x488   : > { %4595 = vmatprep.subr.mxu0 %v11317_v55  ;;  %10609 = vmatprep.subr.mxu1 %v11318_v43 }
 0x489   : > { %4465 = vmatprep.mubr.f32.mxu0 %v19541_v1  ;;  %4566 = vmatprep.mubr.f32.mxu1 %v19541_v1 }
 0x48a   : > { %4596 = vmatpush1.msra.mxu0 %v11319_v16  ;;  %10610 = vmatpush3.msra.mxu1 %v11318_v43 }
 0x48b   : > { %9974 = vmatmul.mubr.msk.f32.gmra.mxu0 %vm1687_vm5, %v9968_v54  ;;  %9980 = vmatmul.mubr.msk.f32.gmra.mxu1 %vm1687_vm5, %v9968_v54 }
 0x48c   : > { %4597 = vmatprep.subr.mxu0 %v11320_v35  ;;  %10611 = vmatprep.subr.mxu1 %v11321_v63 }
 0x48d   : > { %4598 = vmatpush1.msra.mxu0 %v11322_v27  ;;  %10612 = vmatpush3.msra.mxu1 %v11321_v63 }
 0x48e   : > { %4599 = vmatprep.subr.mxu0 %v11323_v48  ;;  %10613 = vmatprep.subr.mxu1 %v14060_v17 }
 0x48f   : > { %4471 = vmatprep.mubr.f32.mxu0 %v19541_v1  ;;  %4572 = vmatprep.mubr.f32.mxu1 %v19541_v1 }
 0x490   : > { %4600 = vmatpush1.msra.mxu0 %v11324_v18  ;;  %10614 = vmatpush3.msra.mxu1 %v14060_v17 }
 0x491   : > { %9975 = vmatmul.mubr.msk.f32.gmra.mxu0 %vm1687_vm5, %v9969_v46  ;;  %9981 = vmatmul.mubr.msk.f32.gmra.mxu1 %vm1687_vm5, %v9969_v46 }
 0x492   : > { %4601 = vmatprep.subr.mxu0 %v14081_v11  ;;  %10615 = vmatprep.subr.mxu1 %v14075_v32 }
 0x493   : > { %4602 = vmatpush1.msra.mxu0 %v11325_v62  ;;  %10616 = vmatpush3.msra.mxu1 %v14075_v32 }
 0x494   : > { %4603 = vmatprep.subr.mxu0 %v14091_v49  ;;  %10617 = vmatprep.subr.mxu1 %v14116_v51 }
 0x495   : > { %4604 = vmatpush1.msra.mxu0 %v14096_v50  ;;  %10618 = vmatpush3.msra.mxu1 %v14116_v51 }
 0x496   : > { %4605 = vmatprep.subr.mxu0 %v14135_v41  ;;  %10619 = vmatprep.subr.mxu1 %v14131_v23 }
 0x497   : > { %4606 = vmatpush1.msra.mxu0 %v14109_v22  ;;  %10620 = vmatpush3.msra.mxu1 %v14131_v23 }
 0x498   : > { %4607 = vmatprep.subr.mxu0 %v14147_v39  ;;  %10621 = vmatprep.subr.mxu1 %v14175_v37 }
 0x499   : > { %4608 = vmatpush1.msra.mxu0 %v14154_v30  ;;  %10622 = vmatpush3.msra.mxu1 %v14175_v37 }
 0x49a   : > { %4609 = vmatprep.subr.mxu0 %v14190_v38  ;;  %10623 = vmatprep.subr.mxu1 %v14182_v36 }
 0x49b   : > { %4610 = vmatpush1.msra.mxu0 %v14169_v12  ;;  %4643 = vmatprep.mubr.f32.mxu0 %v19541_v1  ;;  %v14577_v12 = vpop.f32.mrf.mxu0 }
 0x49c   : > { %10624 = vmatpush3.msra.mxu1 %v14182_v36  ;;  %10625 = vmatprep.mubr.msk.f32.mxu1 %vm1687_vm5, %v14472_v59  ;;  %v14572_v36 = vpop.f32.mrf.mxu1 }
 0x49d   : > { %9982 = vmatmul.mubr.msk.f32.vlgmr.msra.gmra.mxu0 %vm1687_vm5, %v14472_v59  ;;  %10626 = vmatmul.mubr.msk.f32.vlgmr.msra.gmra.mxu1 %vm1687_vm5, %v14483_v61  ;;  %19645 = vst [vmem:[#allocation66_spill] sm:$0xff] %v14572_v36 }
 0x49e   : > { %4649 = vmatprep.mubr.f32.mxu0 %v19541_v1  ;;  %10628 = vmatprep.mubr.msk.f32.mxu1 %vm1687_vm5, %v14494_v0 }
 0x4a1   : > { %9983 = vmatmul.mubr.msk.f32.gmra.mxu0 %vm1687_vm5, %v14483_v61  ;;  %10629 = vmatmul.mubr.msk.f32.gmra.mxu1 %vm1687_vm5, %v14505_v6 }
 0x4a2   : > { %4655 = vmatprep.mubr.f32.mxu0 %v19541_v1  ;;  %10631 = vmatprep.mubr.msk.f32.mxu1 %vm1687_vm5, %v9968_v54 }
 0x4a5   : > { %9984 = vmatmul.mubr.msk.f32.gmra.mxu0 %vm1687_vm5, %v14494_v0  ;;  %10632 = vmatmul.mubr.msk.f32.gmra.mxu1 %vm1687_vm5, %v9969_v46 }
 0x4a6   : > { %4661 = vmatprep.mubr.f32.mxu0 %v19541_v1 }
 0x4a9   : > { %9985 = vmatmul.mubr.msk.f32.gmra.mxu0 %vm1687_vm5, %v14505_v6 }
 0x4aa   : > { %4667 = vmatprep.mubr.f32.mxu0 %v19541_v1 }
 0x4ad   : > { %9986 = vmatmul.mubr.msk.f32.gmra.mxu0 %vm1687_vm5, %v9968_v54 }
 0x4ae   : > { %4673 = vmatprep.mubr.f32.mxu0 %v19541_v1  ;;  %v19669_v1 = vld [vmem:[#allocation43_spill] sm:$0xff] }
 0x4b0   : > { %v14575_v23 = vpop.f32.mrf.mxu1 }
 0x4b1   : > { %9987 = vmatmul.mubr.msk.f32.gmra.mxu0 %vm1687_vm5, %v9969_v46 }
 0x4b2   : > { %v14580_v51 = vpop.f32.mrf.mxu1 }
 0x4b3   : > { %v14582_v32 = vpop.f32.mrf.mxu0 }
 0x4b4   : > { %v14584_v50 = vpop.f32.mrf.mxu1 }
 0x4b5   : > { %v14586_v22 = vpop.f32.mrf.mxu0 }
 0x4b6   : > { %v14588_v17 = vpop.f32.mrf.mxu1 }
 0x4b7   : > { %v3984_v11 = vpop.f32.mrf.mxu0 }
 0x4b8   : > { %v14591_v49 = vadd.f32 %v3984_v11, %v14121_v40  ;;  %v4091_v39 = vpop.f32.mrf.mxu1 }
 0x4b9   : > { %v14594_v41 = vadd.f32 %v4091_v39, %v14239_v13  ;;  %v14596_v30 = vpop.f32.mrf.mxu0 }
 0x4ba   : > { %v14598_v37 = vpop.f32.mrf.mxu1 }
 0x4bb   : > { %v3990_v38 = vpop.f32.mrf.mxu0 }
 0x4bc   : > { %v14601_v59 = vadd.f32 %v3990_v38, %v14140_v52  ;;  %v4097_v61 = vpop.f32.mrf.mxu1 }
 0x4bd   : > { %v14604_v0 = vadd.f32 %v4097_v61, %v14253_v8  ;;  %v14606_v24 = vpop.f32.mrf.mxu0 }
 0x4be   : > { %v14608_v40 = vpop.f32.mrf.mxu1 }
 0x4bf   : > { %v3996_v25 = vpop.f32.mrf.mxu0 }
 0x4c0   : > { %v14611_v13 = vadd.f32 %v3996_v25, %v14159_v14  ;;  %v4103_v57 = vpop.f32.mrf.mxu1 }
 0x4c1   : > { %v14614_v26 = vadd.f32 %v4103_v57, %v14275_v42  ;;  %v14616_v5 = vpop.f32.mrf.mxu0 }
 0x4c2   : > { %v14618_v52 = vpop.f32.mrf.mxu1 }
 0x4c3   : > { %19646 = vst [vmem:[#allocation67_spill] sm:$0xff] %v14614_v26  ;;  %v4002_v6 = vpop.f32.mrf.mxu0  ;;  %v19706_v26 = vld [vmem:[#allocation36_spill] sm:$0xff] }
 0x4c4   : > { %v14621_v8 = vadd.f32 %v4002_v6, %v14188_v34  ;;  %v4109_v60 = vpop.f32.mrf.mxu1 }
 0x4c5   : > { %v14624_v56 = vadd.f32 %v4109_v60, %v14304_v29  ;;  %v14626_v45 = vpop.f32.mrf.mxu0  ;;  %v19662_v60 = vld [vmem:[#allocation19_spill] sm:$0xff] }
 0x4c6   : > { %19647 = vst [vmem:[#allocation68_spill] sm:$0xff] %v14621_v8  ;;  %v14631_v42 = vpop.f32.mrf.mxu1  ;;  %v19710_v8 = vld [vmem:[#allocation49_spill] sm:$0xff] }
 0x4c7   : > { %19648 = vst [vmem:[#allocation69_spill] sm:$0xff] %v14624_v56  ;;  %v4008_v14 = vpop.f32.mrf.mxu0  ;;  %19650 = vst [vmem:[#allocation71_spill] sm:$0xff] %v14631_v42  ;;  %v19698_v56 = vld [vmem:[#allocation27_spill] sm:$0xff] }
 0x4c8   : > { %v14629_v3 = vadd.f32 %v4008_v14, %v14207_v44 }
 0x4c9   : > { %v14633_v55 = vpop.f32.mrf.mxu0 }
 0x4ca   : > { %19649 = vst [vmem:[#allocation70_spill] sm:$0xff] %v14629_v3  ;;  %19651 = vst [vmem:[#allocation72_spill] sm:$0xff] %v14633_v55  ;;  %v19704_v55 = vld [vmem:[#allocation34_spill] sm:$0xff] }
 0x50c   : > { %v4180_v43 = vpop.f32.mrf.mxu0  ;;  %v10588_v54 = vpop.f32.mrf.mxu1 }
 0x50d   : > { %v14636_v16 = vadd.f32 %v4180_v43, %v14355_v47  ;;  %v14639_v34 = vadd.f32 %v10588_v54, %v14360_v20  ;;  %v19663_v43 = vld [vmem:[#allocation21_spill] sm:$0xff]  ;;  %v19664_v54 = vld [vmem:[#allocation39_spill] sm:$0xff] }
 0x50e   : > { %v14641_v29 = vpop.f32.mrf.mxu0  ;;  %v14643_v35 = vpop.f32.mrf.mxu1 }
 0x50f   : > { %19652 = vst [vmem:[#allocation73_spill] sm:$0xff] %v14639_v34  ;;  %19653 = vst [vmem:[#allocation74_spill] sm:$0xff] %v14643_v35  ;;  %v19694_v35 = vld [vmem:[#allocation12_spill] sm:$0xff] }
 0x512   : > { %v4186_v63 = vpop.f32.mrf.mxu0  ;;  %v10591_v27 = vpop.f32.mrf.mxu1 }
 0x513   : > { %v14646_v44 = vadd.f32 %v4186_v63, %v14364_v31  ;;  %v14649_v48 = vadd.f32 %v10591_v27, %v14380_v19  ;;  %v2292_v63 = vadd.f32 %v19664_v54, %v19663_v43 }
 0x514   : > { %v14651_v46 = vpop.f32.mrf.mxu0  ;;  %v14653_v18 = vpop.f32.mrf.mxu1 }
 0x515   : > { %19654 = vst [vmem:[#allocation75_spill] sm:$0xff] %v14649_v48  ;;  %19655 = vst [vmem:[#allocation76_spill] sm:$0xff] %v14653_v18 }
 0x518   : > { %v4192_v47 = vpop.f32.mrf.mxu0  ;;  %v10594_v62 = vpop.f32.mrf.mxu1 }
 0x519   : > { %v14656_v20 = vadd.f32 %v4192_v47, %v14373_v2  ;;  %v14659_v11 = vadd.f32 %v10594_v62, %v14393_v15  ;;  %v19661_v15 = vld [vmem:[#allocation9_spill] sm:$0xff]  ;;  %v19667_v47 = vld [vmem:[#allocation46_spill] sm:$0xff] }
 0x51a   : > { %v14661_v39 = vpop.f32.mrf.mxu0  ;;  %v2191_v14 = vadd.f32 %v19662_v60, %v19661_v15 }
 0x51b   : > { %19656 = vst [vmem:[#allocation77_spill] sm:$0xff] %v14659_v11  ;;  %v19671_v11 = vld [vmem:[#allocation22_spill] sm:$0xff] }
 0x51c   : > { %v3395_v62 = vadd.f32 %v19667_v47, %v2191_v14  ;;  %v14694_v14 = vpop.permute.xlu0 %4825 }
 0x51d   : > { %v4198_v38 = vpop.f32.mrf.mxu0 }
 0x51e   : > { %v14664_v31 = vadd.f32 %v4198_v38, %v14388_v7  ;;  %v14680_v7 = vpop.f32.mrf.mxu1  ;;  %v19668_v38 = vld [vmem:[#allocation56_spill] sm:$0xff]  ;;  %v4311_v54 = vadd.f32 %v14586_v22, %v3395_v62  ;;  %v14705_v22 = vpop.permute.xlu1 %4830 }
 0x51f   : > { %v14666_v19 = vpop.f32.mrf.mxu0  ;;  %19665 = vst [vmem:[#allocation9_spill] sm:$0xff] %v14680_v7 }
 0x520   : > { %19657 = vst [vmem:[#allocation78_spill] sm:$0xff] %v14664_v31  ;;  %v19713_v31 = vld [vmem:[#allocation20_spill] sm:$0xff] }
 0x522   : > { %v4204_v61 = vpop.f32.mrf.mxu0 }
 0x523   : > { %v14669_v25 = vadd.f32 %v4204_v61, %v14397_v28  ;;  %v3397_v28 = vadd.f32 %v14220_v10, %v2292_v63  ;;  %v4312_v61 = vadd.f32 %v14575_v23, %v19668_v38 }
 0x524   : > { %v14671_v57 = vpop.f32.mrf.mxu0 }
 0x525   : > { %19658 = vst [vmem:[#allocation79_spill] sm:$0xff] %v14669_v25  ;;  %19659 = vst [vmem:[#allocation80_spill] sm:$0xff] %v14671_v57  ;;  %v4313_v43 = vadd.f32 %v14580_v51, %v3397_v28  ;;  %v19696_v25 = vld [vmem:[#allocation17_spill] sm:$0xff]  ;;  %v19702_v57 = vld [vmem:[#allocation58_spill] sm:$0xff] }
 0x527   : > { %v4210_v6 = vpop.f32.mrf.mxu0 }
 0x528   : > { %v14674_v2 = vadd.f32 %v4210_v6, %v14404_v58  ;;  %v4310_v58 = vadd.f32 %v14582_v32, %v19669_v1  ;;  %v19670_v6 = vld [vmem:[#allocation10_spill] sm:$0xff]  ;;  %v19674_v32 = vld [vmem:[#allocation48_spill] sm:$0xff] }
 0x529   : > { %v14682_v27 = vpop.f32.mrf.mxu0  ;;  %v2197_v15 = vadd.f32 %v19671_v11, %v19670_v6  ;;  %v19675_v6 = vld [vmem:[#allocation57_spill] sm:$0xff] }
 0x52a   : > { %19660 = vst [vmem:[#allocation81_spill] sm:$0xff] %v14674_v2  ;;  %19666 = vst [vmem:[#allocation19_spill] sm:$0xff] %v14682_v27  ;;  %v4319_v51 = vadd.f32 %v14584_v50, %v19675_v6  ;;  %v19695_v2 = vld [vmem:[#allocation32_spill] sm:$0xff]  ;;  %v19699_v27 = vld [vmem:[#allocation45_spill] sm:$0xff] }
 0x52b   : > { %v3402_v11 = vadd.f32 %v19674_v32, %v2197_v15  ;;  %v2393_v3 = vadd.f32 %v19695_v2, %v19694_v35  ;;  %v19709_v2 = vld [vmem:[#allocation31_spill] sm:$0xff] }
 0x533   : > { %v4443_v60 = vpop.f32.mrf.mxu0  ;;  %v4544_v48 = vpop.f32.mrf.mxu1 }
 0x534   : > { %v4775_v34 = vadd.f32 %v4443_v60, %v4310_v58  ;;  %v4777_v7 = vadd.f32 %v4544_v48, %v4312_v61  ;;  %v4318_v61 = vadd.f32 %v14596_v30, %v3402_v11 }
 0x535   : > { %v4445_v10 = vpop.f32.mrf.mxu0  ;;  %v4546_v63 = vpop.f32.mrf.mxu1 }
 0x536   : > { %v4776_v47 = vadd.f32 %v4445_v10, %v4311_v54  ;;  %v4778_v23 = vadd.f32 %v4546_v63, %v4313_v43  ;;  %v14697_v38 = vadd.f32 %v14694_v14, %v4777_v7  ;;  %v14700_v1 = vadd.f32 %v14694_v14, %v4775_v34 }
 0x538   : > { %19672 = vst [vmem:[#allocation21_spill] sm:$0xff] %v14697_v38  ;;  %19673 = vst [vmem:[#allocation39_spill] sm:$0xff] %v14700_v1  ;;  %v14708_v48 = vadd.f32 %v14694_v14, %v4776_v47  ;;  %v14711_v62 = vadd.f32 %v14694_v14, %v4778_v23  ;;  %v19422_v50 = vmax.f32 %v14697_v38, 0.0  ;;  %v19421_v43 = vmax.f32 %v14700_v1, 0.0  ;;  %v19691_v1 = vld [vmem:[#allocation28_spill] sm:$0xff]  ;;  %v19692_v38 = vld [vmem:[#allocation13_spill] sm:$0xff] }
 0x539   : > { %v14713_v28 = vpop.f32.mrf.mxu0  ;;  %v4550_v7 = vpop.f32.mrf.mxu1 }
 0x53a   : > { %19676 = vst [vmem:[#allocation46_spill] sm:$0xff] %v14708_v48  ;;  %19677 = vst [vmem:[#allocation56_spill] sm:$0xff] %v14711_v62  ;;  %v4784_v34 = vadd.f32 %v4550_v7, %v4319_v51  ;;  %v19423_v58 = vmax.f32 %v14708_v48, 0.0  ;;  %v19420_v15 = vmax.f32 %v14711_v62, 0.0  ;;  %v19693_v48 = vld [vmem:[#allocation30_spill] sm:$0xff] }
 0x53b   : > { %v4451_v60 = vpop.f32.mrf.mxu0  ;;  %v2221_v18 = vadd.f32 %v19693_v48, %v19692_v38  ;;  %v19707_v48 = vld [vmem:[#allocation23_spill] sm:$0xff] }
 0x53c   : > { %v4783_v54 = vadd.f32 %v4451_v60, %v4318_v61  ;;  %v14721_v10 = vadd.f32 %v14705_v22, %v4784_v34  ;;  %v10746_v63 = vpack.i.bf16 %v19422_v50, %v19423_v58  ;;  %v10751_v30 = vpack.i.bf16 %v19421_v43, %v19420_v15  ;;  %v4552_v60 = vpop.f32.mrf.mxu1  ;;  %v19685_v50 = vld [vmem:[#allocation11_spill] sm:$0xff]  ;;  %v19686_v58 = vld [vmem:[#allocation25_spill] sm:$0xff] }
 0x53e   : > { %19678 = vst [vmem:[#allocation43_spill] sm:$0xff] %v14721_v10  ;;  %v14732_v47 = vadd.f32 %v14705_v22, %v4783_v54  ;;  %10747 = vrot.lane.b32.xlu1 %v10746_v63, %s19445_s20  ;;  %10752 = vrot.lane.b32.xlu0 %v10751_v30, %s19445_s20  ;;  %v19425_v11 = vmax.f32 %v14721_v10, 0.0  ;;  %v19683_v63 = vld [vmem:[#allocation24_spill] sm:$0xff]  ;;  %v19684_v30 = vld [vmem:[#allocation41_spill] sm:$0xff]  ;;  %v2203_v10 = vadd.f32 %v19686_v58, %v19685_v50 }
 0x53f   : > { %v14734_v23 = vpop.f32.mrf.mxu0  ;;  %v2298_v15 = vadd.f32 %v19684_v30, %v19683_v63  ;;  %v4556_v43 = vpop.f32.mrf.mxu1  ;;  %v19697_v63 = vld [vmem:[#allocation44_spill] sm:$0xff]  ;;  %v2310_v58 = vadd.f32 %v19699_v27, %v19698_v56  ;;  %v19700_v50 = vld [vmem:[#allocation29_spill] sm:$0xff] }
 0x540   : > { %19679 = vst [vmem:[#allocation10_spill] sm:$0xff] %v14732_v47  ;;  %v19426_v32 = vmax.f32 %v14732_v47, 0.0  ;;  %v19690_v47 = vld [vmem:[#allocation14_spill] sm:$0xff]  ;;  %v2304_v30 = vadd.f32 %v19697_v63, %v19696_v25  ;;  %v2322_v25 = vadd.f32 %v19710_v8, %v19709_v2  ;;  %v19712_v56 = vld [vmem:[#allocation40_spill] sm:$0xff]  ;;  %v14795_v8 = vadd.f32 %v14343_v21, %v2221_v18 }
 0x541   : > { %v4457_v51 = vpop.f32.mrf.mxu0  ;;  %v2215_v36 = vadd.f32 %v19691_v1, %v19690_v47  ;;  %v19705_v47 = vld [vmem:[#allocation15_spill] sm:$0xff]  ;;  %v4558_v63 = vpop.f32.mrf.mxu1  ;;  %v19723_v18 = vld [vmem:[#allocation64_spill] sm:$0xff] }
 0x542   : > { %v10761_v6 = vpack.i.bf16 %v19425_v11, %v19426_v32  ;;  %v19688_v32 = vld [vmem:[#allocation8_spill] sm:$0xff]  ;;  %v2405_v38 = vadd.f32 %v19706_v26, %v19705_v47 }
 0x543   : > { %v19717_v26 = vld [vmem:[#allocation52_spill] sm:$0xff] }
 0x544   : > { %10762 = vrot.lane.b32.xlu0 %v10761_v6, %s19445_s20  ;;  %v19689_v6 = vld [vmem:[#allocation26_spill] sm:$0xff] }
 0x545   : > { %v14745_v7 = vpop.f32.mrf.mxu0  ;;  %v2209_v62 = vadd.f32 %v19689_v6, %v19688_v32  ;;  %v3404_v32 = vadd.f32 %v19702_v57, %v2298_v15  ;;  %v19703_v6 = vld [vmem:[#allocation16_spill] sm:$0xff]  ;;  %v19715_v57 = vld [vmem:[#allocation50_spill] sm:$0xff] }
 0x546   : > { %19680 = vst [vmem:[#allocation22_spill] sm:$0xff] %v14745_v7  ;;  %v2399_v1 = vadd.f32 %v19704_v55, %v19703_v6  ;;  %v3409_v15 = vadd.f32 %v19715_v57, %v2203_v10  ;;  %v19718_v7 = vld [vmem:[#allocation54_spill] sm:$0xff] }
 0x547   : > { %v14747_v61 = vpop.f32.mrf.mxu0  ;;  %v4320_v55 = vadd.f32 %v14588_v17, %v3404_v32  ;;  %v3416_v47 = vadd.f32 %v19717_v26, %v2209_v62 }
 0x548   : > { %v3406_v32 = vadd.f32 %v14366_v9, %v2399_v1 }
 0x549   : > { %v4785_v57 = vadd.f32 %v4552_v60, %v4320_v55 }
 0x54b   : > { %v14749_v34 = vpop.f32.mrf.mxu0 }
 0x54c   : > { %19681 = vst [vmem:[#allocation48_spill] sm:$0xff] %v14749_v34  ;;  %v19708_v34 = vld [vmem:[#allocation38_spill] sm:$0xff] }
 0x54d   : > { %v14751_v54 = vpop.f32.mrf.mxu0  ;;  %v2411_v35 = vadd.f32 %v19708_v34, %v19707_v48  ;;  %v14792_v34 = vadd.f32 %v19718_v7, %v2215_v36  ;;  %v3399_v48 = vadd.f32 %v14357_v53, %v2393_v3  ;;  %v4562_v7 = vpop.f32.mrf.mxu1  ;;  %v3413_v53 = vadd.f32 %v19723_v18, %v2405_v38 }
 0x54e   : > { %19682 = vst [vmem:[#allocation57_spill] sm:$0xff] %v14751_v54  ;;  %v19711_v54 = vld [vmem:[#allocation18_spill] sm:$0xff]  ;;  %v14825_v38 = vadd.f32 %v14705_v22, %v4785_v57 }
 0x54f   : > { %v2417_v27 = vadd.f32 %v19712_v56, %v19711_v54  ;;  %v19719_v54 = vld [vmem:[#allocation59_spill] sm:$0xff]  ;;  %v19720_v56 = vld [vmem:[#allocation60_spill] sm:$0xff]  ;;  %v4315_v36 = vadd.f32 %v14641_v29, %v3399_v48  ;;  %v3420_v3 = vadd.f32 %v14390_v4, %v2411_v35 }
 0x550   : > { %v3411_v2 = vadd.f32 %v19719_v54, %v2304_v30  ;;  %v19468_v26 = vmax.f32 %v14825_v38, 0.0 }
 0x551   : > { %v14757_v11 = vpop.f32.mrf.mxu0  ;;  %v14810_v30 = vadd.f32 %v14399_v33, %v2417_v27  ;;  %v4332_v33 = vadd.f32 %v14616_v5, %v3416_v47 }
 0x552   : > { %19687 = vst [vmem:[#allocation24_spill] sm:$0xff] %v14757_v11  ;;  %v19701_v11 = vld [vmem:[#allocation47_spill] sm:$0xff]  ;;  %v4327_v9 = vadd.f32 %v14598_v37, %v3411_v2  ;;  %v4798_v2 = vadd.f32 %v4562_v7, %v14604_v0 }
 0x553   : > { %v2316_v42 = vadd.f32 %v19701_v11, %v19700_v50  ;;  %v19714_v11 = vld [vmem:[#allocation42_spill] sm:$0xff]  ;;  %v14788_v6 = vpop.f32.mrf.mxu0 }
 0x554   : > { %v2423_v50 = vadd.f32 %v19714_v11, %v19713_v31  ;;  %19716 = vst [vmem:[#allocation41_spill] sm:$0xff] %v14788_v6  ;;  %v3418_v31 = vadd.f32 %v19720_v56, %v2310_v58  ;;  %v19721_v11 = vld [vmem:[#allocation61_spill] sm:$0xff]  ;;  %v19722_v6 = vld [vmem:[#allocation62_spill] sm:$0xff]  ;;  %v4325_v58 = vadd.f32 %v14606_v24, %v3409_v15  ;;  %v4792_v35 = vadd.f32 %v4558_v63, %v4327_v9  ;;  %v4564_v24 = vpop.f32.mrf.mxu1 }
 0x555   : > { %v3425_v10 = vadd.f32 %v19721_v11, %v2316_v42  ;;  %v14803_v62 = vadd.f32 %v19722_v6, %v2322_v25  ;;  %v4782_v42 = vadd.f32 %v14713_v28, %v14591_v49  ;;  %v4322_v28 = vadd.f32 %v14651_v46, %v3406_v32  ;;  %v14839_v46 = vpop.permute.xlu1 %4835  ;;  %v19724_v9 = vld [vmem:[#allocation22_spill] sm:$0xff] }
 0x556   : > { %v4334_v4 = vadd.f32 %v14608_v40, %v3418_v31  ;;  %v4790_v37 = vadd.f32 %v4457_v51, %v4325_v58  ;;  %v4791_v40 = vadd.f32 %v4556_v43, %v14594_v41  ;;  %v4329_v6 = vadd.f32 %v14661_v39, %v3413_v53  ;;  %v14870_v31 = vpop.permute.xlu0 %4840 }
 0x557   : > { %v14832_v27 = vadd.f32 %v14705_v22, %v4782_v42  ;;  %v4341_v15 = vadd.f32 %v14618_v52, %v3425_v10  ;;  %v14853_v52 = vadd.f32 %v14839_v46, %v4792_v35  ;;  %v4336_v32 = vadd.f32 %v14666_v19, %v3420_v3 }
 0x558   : > { %v14850_v43 = vadd.f32 %v14839_v46, %v4790_v37  ;;  %v14864_v48 = vadd.f32 %v14839_v46, %v4791_v40  ;;  %v4799_v0 = vadd.f32 %v4564_v24, %v4334_v4  ;;  %v4339_v42 = vadd.f32 %v14626_v45, %v14792_v34  ;;  %v19726_v45 = vld [vmem:[#allocation57_spill] sm:$0xff] }
 0x559   : > { %v19464_v53 = vmax.f32 %v14853_v52, 0.0  ;;  %v4796_v58 = vadd.f32 %v19724_v9, %v14611_v13  ;;  %v14899_v4 = vadd.f32 %v14870_v31, %v4798_v2  ;;  %v19729_v2 = vld [vmem:[#allocation67_spill] sm:$0xff] }
 0x55a   : > { %v19461_v18 = vmax.f32 %v14850_v43, 0.0  ;;  %v4804_v34 = vadd.f32 %v19726_v45, %v4339_v42  ;;  %v14911_v40 = vadd.f32 %v14870_v31, %v4799_v0 }
 0x55d   : > { %v4645_v17 = vpop.f32.mrf.mxu0 }
 0x55e   : > { %v4779_v21 = vadd.f32 %v4645_v17, %v14636_v16  ;;  %v14820_v16 = vadd.f32 %v14577_v12, %v2423_v50  ;;  %v4789_v12 = vadd.f32 %v14734_v23, %v14601_v59  ;;  %v4797_v59 = vadd.f32 %v14747_v61, %v4332_v33  ;;  %v4568_v23 = vpop.f32.mrf.mxu1 }
 0x55f   : > { %v4647_v60 = vpop.f32.mrf.mxu0  ;;  %v19466_v61 = vmax.f32 %v14832_v27, 0.0 }
 0x560   : > { %v14817_v29 = vadd.f32 %v14694_v14, %v4779_v21  ;;  %v4780_v1 = vadd.f32 %v4647_v60, %v4315_v36  ;;  %v14867_v54 = vadd.f32 %v14839_v46, %v4789_v12  ;;  %v14882_v21 = vadd.f32 %v14870_v31, %v4797_v59  ;;  %v19727_v59 = vld [vmem:[#allocation68_spill] sm:$0xff] }
 0x561   : > { %v4651_v49 = vpop.f32.mrf.mxu0  ;;  %v10766_v36 = vpack.i.bf16 %v19466_v61, %v19468_v26  ;;  %v19460_v60 = vmax.f32 %v14864_v48, 0.0  ;;  %v5487_v26 = vld [vmem:[%s19371_s5 + $0x1d0] sm:$0xff] }
 0x562   : > { %v14829_v25 = vadd.f32 %v14694_v14, %v4780_v1  ;;  %v4786_v5 = vadd.f32 %v4651_v49, %v14646_v44  ;;  %v4899_v51 = vmax.f32 %v14817_v29, 0.0  ;;  %v19465_v33 = vmax.f32 %v14867_v54, 0.0 }
 0x563   : > { %v4653_v50 = vpop.f32.mrf.mxu0  ;;  %v19436_v12 = vmax.f32 %v14882_v21, 0.0 }
 0x564   : > { %v19434_v63 = vmax.f32 %v14829_v25, 0.0  ;;  %v4787_v55 = vadd.f32 %v4653_v50, %v4322_v28  ;;  %v14847_v41 = vadd.f32 %v14705_v22, %v4786_v5  ;;  %v19725_v28 = vld [vmem:[#allocation78_spill] sm:$0xff]  ;;  %v10776_v5 = vpack.i.bf16 %v19460_v60, %v19461_v18  ;;  %v5491_v60 = vld [vmem:[%s19371_s5 + $0x1f0] sm:$0xff] }
 0x565   : > { %v4657_v44 = vpop.f32.mrf.mxu0  ;;  %v10781_v50 = vpack.i.bf16 %v19465_v33, %v19464_v53  ;;  %v19752_v33 = vld [vmem:[#allocation21_spill] sm:$0xff] }
 0x566   : > { %v10756_v39 = vpack.i.bf16 %v19434_v63, %v4899_v51  ;;  %v14860_v47 = vadd.f32 %v14705_v22, %v4787_v55  ;;  %v19467_v11 = vmax.f32 %v14847_v41, 0.0  ;;  %v4793_v57 = vadd.f32 %v4657_v44, %v14656_v20  ;;  %v4570_v20 = vpop.f32.mrf.mxu1  ;;  %v19728_v44 = vld [vmem:[#allocation48_spill] sm:$0xff] }
 0x567   : > { %v4659_v56 = vpop.f32.mrf.mxu0  ;;  %v4806_v24 = vadd.f32 %v4570_v20, %v4341_v15  ;;  %v19753_v61 = vmax.f32 %v19752_v33, 0.0  ;;  %v5485_v33 = vld [vmem:[%s19371_s5 + $0x1c0] sm:$0xff] }
 0x568   : > { %v19433_v10 = vmax.f32 %v14860_v47, 0.0  ;;  %v4794_v17 = vadd.f32 %v4659_v56, %v4329_v6  ;;  %10757 = vrot.lane.b32.xlu1 %v10756_v39, %s19445_s20  ;;  %v14903_v49 = vadd.f32 %v14839_v46, %v4793_v57  ;;  %v4574_v55 = vpop.f32.mrf.mxu1  ;;  %v4803_v39 = vadd.f32 %v19728_v44, %v19727_v59 }
 0x569   : > { %v4663_v7 = vpop.f32.mrf.mxu0  ;;  %v4805_v56 = vadd.f32 %v4568_v23, %v19729_v2 }
 0x56a   : > { %v10771_v19 = vpack.i.bf16 %v19433_v10, %v19467_v11  ;;  %v14891_v3 = vadd.f32 %v14839_v46, %v4794_v17  ;;  %v4800_v37 = vadd.f32 %v4663_v7, %v19725_v28  ;;  %v19462_v17 = vmax.f32 %v14899_v4, 0.0  ;;  %v19731_v7 = vld [vmem:[#allocation80_spill] sm:$0xff]  ;;  %v19732_v28 = vld [vmem:[#allocation41_spill] sm:$0xff] }
 0x56b   : > { %v4665_v1 = vpop.f32.mrf.mxu0  ;;  %v4343_v20 = vadd.f32 %v19731_v7, %v14810_v30  ;;  %v19457_v42 = vmax.f32 %v14903_v49, 0.0 }
 0x56c   : > { %v4801_v35 = vadd.f32 %v4665_v1, %v4336_v32  ;;  %10767 = vrot.lane.b32.xlu1 %v10766_v36, %s19445_s20  ;;  %10772 = vrot.lane.b32.xlu0 %v10771_v19, %s19445_s20  ;;  %v19432_v6 = vmax.f32 %v14891_v3, 0.0  ;;  %v14930_v32 = vadd.f32 %v14870_v31, %v4796_v58  ;;  %v19730_v36 = vld [vmem:[#allocation72_spill] sm:$0xff]  ;;  %v14936_v19 = vpop.permute.xlu1 %4845  ;;  %v14940_v9 = vadd.f32 %v14870_v31, %v4800_v37 }
 0x56d   : > { %v4669_v13 = vpop.f32.mrf.mxu0  ;;  %v4346_v0 = vadd.f32 %v19730_v36, %v14795_v8  ;;  %v14945_v23 = vadd.f32 %v14936_v19, %v4804_v34  ;;  %v14948_v58 = vadd.f32 %v14936_v19, %v4806_v24  ;;  %v10791_v30 = vpack.i.bf16 %v19462_v17, %v19436_v12 }
 0x56e   : > { %v14923_v15 = vadd.f32 %v14870_v31, %v4801_v35  ;;  %v19435_v1 = vmax.f32 %v14911_v40, 0.0  ;;  %v4576_v35 = vpop.f32.mrf.mxu1  ;;  %v10786_v45 = vpack.i.bf16 %v19432_v6, %v19457_v42  ;;  %v14964_v59 = vadd.f32 %v14936_v19, %v4805_v56 }
 0x56f   : > { %v4671_v57 = vpop.f32.mrf.mxu0  ;;  %v4811_v37 = vadd.f32 %v19732_v28, %v4346_v0  ;;  %v14967_v44 = vadd.f32 %v14936_v19, %v4803_v39  ;;  %v19463_v36 = vmax.f32 %v14930_v32, 0.0  ;;  %v19734_v0 = vld [vmem:[#allocation19_spill] sm:$0xff]  ;;  %v19735_v28 = vld [vmem:[#allocation69_spill] sm:$0xff]  ;;  %v19454_v10 = vmax.f32 %v14940_v9, 0.0 }
 0x570   : > { %10777 = vrot.lane.b32.xlu1 %v10776_v5, %s19445_s20  ;;  %10782 = vrot.lane.b32.xlu0 %v10781_v50, %s19445_s20  ;;  %v19447_v34 = vmax.f32 %v14923_v15, 0.0  ;;  %v4808_v24 = vadd.f32 %v4671_v57, %v4343_v20  ;;  %v19733_v5 = vld [vmem:[#allocation71_spill] sm:$0xff]  ;;  %v4350_v7 = vadd.f32 %v19734_v0, %v14820_v16  ;;  %v4812_v6 = vadd.f32 %v4574_v55, %v19735_v28  ;;  %v19737_v0 = vld [vmem:[#allocation70_spill] sm:$0xff]  ;;  %v19738_v28 = vld [vmem:[#allocation24_spill] sm:$0xff] }
 0x571   : > { %v4675_v8 = vpop.f32.mrf.mxu0  ;;  %v4348_v50 = vadd.f32 %v19733_v5, %v14803_v62  ;;  %v19736_v57 = vld [vmem:[#allocation79_spill] sm:$0xff]  ;;  %v19459_v62 = vmax.f32 %v14945_v23, 0.0  ;;  %v19451_v39 = vmax.f32 %v14948_v58, 0.0  ;;  %v14979_v5 = vpop.permute.xlu0 %4850  ;;  %v10796_v16 = vpack.i.bf16 %v19463_v36, %v19435_v1  ;;  %v19739_v1 = vld [vmem:[#allocation81_spill] sm:$0xff] }
 0x572   : > { %v4807_v20 = vadd.f32 %v4669_v13, %v19736_v57  ;;  %v10801_v13 = vpack.i.bf16 %v19447_v34, %v19454_v10  ;;  %v14990_v55 = vadd.f32 %v14936_v19, %v4808_v24  ;;  %v4810_v57 = vadd.f32 %v19738_v28, %v19737_v0  ;;  %v5457_v34 = vld [vmem:[%s19371_s5 + $0xe0] sm:$0xff] }
 0x573   : > { %v4677_v2 = vpop.f32.mrf.mxu0  ;;  %v4813_v56 = vadd.f32 %v4576_v35, %v4348_v50  ;;  %v19458_v35 = vmax.f32 %v14964_v59, 0.0  ;;  %v19450_v50 = vmax.f32 %v14967_v44, 0.0  ;;  %v4814_v12 = vadd.f32 %v4675_v8, %v19739_v1 }
 0x574   : > { %10787 = vrot.lane.b32.xlu1 %v10786_v45, %s19445_s20  ;;  %10792 = vrot.lane.b32.xlu0 %v10791_v30, %s19445_s20  ;;  %v4815_v30 = vadd.f32 %v4677_v2, %v4350_v7  ;;  %v14993_v45 = vadd.f32 %v14979_v5, %v4811_v37  ;;  %v15000_v63 = vadd.f32 %v14936_v19, %v4807_v20  ;;  %v19437_v7 = vmax.f32 %v14990_v55, 0.0 }
 0x575   : > { %v15006_v24 = vadd.f32 %v14979_v5, %v4812_v6  ;;  %v10806_v37 = vpack.i.bf16 %v19458_v35, %v19459_v62  ;;  %v10811_v2 = vpack.i.bf16 %v19450_v50, %v19451_v39  ;;  %v15022_v6 = vadd.f32 %v14979_v5, %v4813_v56  ;;  %v5519_v50 = vld [vmem:[%s19371_s5 + $0x2d0] sm:$0xff]  ;;  %v5516_v39 = vld [vmem:[%s19371_s5 + $0x2b8] sm:$0xff] }
 0x576   : > { %v15018_v8 = vadd.f32 %v14979_v5, %v4815_v30  ;;  %v19455_v1 = vmax.f32 %v14993_v45, 0.0  ;;  %v19456_v20 = vmax.f32 %v15000_v63, 0.0  ;;  %v15032_v0 = vadd.f32 %v14979_v5, %v4810_v57 }
 0x577   : > { %v19453_v28 = vmax.f32 %v15022_v6, 0.0 }
 0x578   : > { %10802 = vrot.lane.b32.xlu0 %v10801_v13, %s19445_s20  ;;  %10797 = vrot.lane.b32.xlu1 %v10796_v16, %s19445_s20  ;;  %v15026_v16 = vadd.f32 %v14979_v5, %v4814_v12  ;;  %v19448_v13 = vmax.f32 %v15006_v24, 0.0  ;;  %v10816_v56 = vpack.i.bf16 %v19437_v7, %v19456_v20  ;;  %v19442_v30 = vmax.f32 %v15018_v8, 0.0 }
 0x579   : > { %v19449_v57 = vmax.f32 %v15032_v0, 0.0 }
 0x57a   : > { %v10821_v12 = vpack.i.bf16 %v19448_v13, %v19455_v1  ;;  %v5522_v13 = vld [vmem:[%s19371_s5 + $0x2e8] sm:$0xff] }
 0x57b   : > { %v10826_v7 = vpack.i.bf16 %v19449_v57, %v19453_v28  ;;  %v5455_v57 = vld [vmem:[%s19371_s5 + $0xd0] sm:$0xff]  ;;  %v19744_v1 = vld [vmem:[#allocation63_spill] sm:$0xff] }
 0x57c   : > { %10812 = vrot.lane.b32.xlu0 %v10811_v2, %s19445_s20  ;;  %10807 = vrot.lane.b32.xlu1 %v10806_v37, %s19445_s20  ;;  %v19452_v37 = vmax.f32 %v15026_v16, 0.0 }
 0x57e   : > { %v10831_v2 = vpack.i.bf16 %v19442_v30, %v19452_v37  ;;  %v5524_v30 = vld [vmem:[%s19371_s5 + $0x2f8] sm:$0xff]  ;;  %v19741_v37 = vld [vmem:[#allocation51_spill] sm:$0xff] }
 0x57f   : > { %5772 = vmatprep.subr.mxu1 %v5524_v30  ;;  %v5456_v30 = vld [vmem:[%s19371_s5 + $0xd8] sm:$0xff] }
 0x580   : > { %10817 = vrot.lane.b32.xlu1 %v10816_v56, %s19445_s20  ;;  %10822 = vrot.lane.b32.xlu0 %v10821_v12, %s19445_s20  ;;  %v5460_v56 = vld [vmem:[%s19371_s5 + $0xf8] sm:$0xff]  ;;  %v5459_v12 = vld [vmem:[%s19371_s5 + $0xf0] sm:$0xff] }
 0x581   : > { %5671 = vmatprep.subr.mxu0 %v5460_v56  ;;  %v5521_v56 = vld [vmem:[%s19371_s5 + $0x2e0] sm:$0xff] }
 0x582   : > { %5672 = vmatpush1.msra.mxu0 %v5459_v12  ;;  %v5520_v12 = vld [vmem:[%s19371_s5 + $0x2d8] sm:$0xff] }
 0x584   : > { %10832 = vrot.lane.b32.xlu0 %v10831_v2, %s19445_s20  ;;  %10827 = vrot.lane.b32.xlu1 %v10826_v7, %s19445_s20  ;;  %v5458_v2 = vld [vmem:[%s19371_s5 + $0xe8] sm:$0xff]  ;;  %v5523_v7 = vld [vmem:[%s19371_s5 + $0x2f0] sm:$0xff]  ;;  %s11430_s20 = smov 112  }
 0x585   : > { %5773 = vmatpush1.msra.mxu1 %v5523_v7  ;;  %5673 = vmatprep.subr.mxu0 %v5458_v2  ;;  %v5454_v7 = vld [vmem:[%s19371_s5 + $0xc8] sm:$0xff]  ;;  %v5453_v2 = vld [vmem:[%s19371_s5 + $0xc0] sm:$0xff] }
 0x586   : > { %5774 = vmatprep.subr.mxu1 %v5522_v13  ;;  %5674 = vmatpush1.msra.mxu0 %v5457_v34  ;;  %v5518_v13 = vld [vmem:[%s19371_s5 + $0x2c8] sm:$0xff]  ;;  %v5517_v34 = vld [vmem:[%s19371_s5 + $0x2c0] sm:$0xff] }
 0x587   : > { %5775 = vmatpush1.msra.mxu1 %v5521_v56  ;;  %5675 = vmatprep.subr.mxu0 %v5456_v30  ;;  %v5452_v56 = vld [vmem:[%s19371_s5 + $0xb8] sm:$0xff]  ;;  %v5451_v30 = vld [vmem:[%s19371_s5 + $0xb0] sm:$0xff] }
 0x588   : > { %5776 = vmatprep.subr.mxu1 %v5520_v12  ;;  %5676 = vmatpush1.msra.mxu0 %v5455_v57  ;;  %v5515_v12 = vld [vmem:[%s19371_s5 + $0x2b0] sm:$0xff]  ;;  %v5514_v57 = vld [vmem:[%s19371_s5 + $0x2a8] sm:$0xff] }
 0x589   : > { %5777 = vmatpush1.msra.mxu1 %v5519_v50  ;;  %5677 = vmatprep.subr.mxu0 %v5454_v7  ;;  %v5450_v50 = vld [vmem:[%s19371_s5 + $0xa8] sm:$0xff]  ;;  %v5449_v7 = vld [vmem:[%s19371_s5 + $0xa0] sm:$0xff] }
 0x58a   : > { %5778 = vmatprep.subr.mxu1 %v5518_v13  ;;  %5678 = vmatpush1.msra.mxu0 %v5453_v2  ;;  %v5513_v13 = vld [vmem:[%s19371_s5 + $0x2a0] sm:$0xff]  ;;  %v5448_v2 = vld [vmem:[%s19371_s5 + $0x98] sm:$0xff] }
 0x58b   : > { %5779 = vmatpush1.msra.mxu1 %v5517_v34  ;;  %5679 = vmatprep.subr.mxu0 %v5452_v56  ;;  %v5512_v34 = vld [vmem:[%s19371_s5 + $0x298] sm:$0xff]  ;;  %v5511_v56 = vld [vmem:[%s19371_s5 + $0x290] sm:$0xff] }
 0x58c   : > { %5780 = vmatprep.subr.mxu1 %v5516_v39  ;;  %5680 = vmatpush1.msra.mxu0 %v5451_v30  ;;  %v5447_v39 = vld [vmem:[%s19371_s5 + $0x90] sm:$0xff]  ;;  %v5446_v30 = vld [vmem:[%s19371_s5 + $0x88] sm:$0xff] }
 0x58d   : > { %5781 = vmatpush1.msra.mxu1 %v5515_v12  ;;  %5681 = vmatprep.subr.mxu0 %v5450_v50  ;;  %v5510_v12 = vld [vmem:[%s19371_s5 + $0x288] sm:$0xff]  ;;  %v5445_v50 = vld [vmem:[%s19371_s5 + $0x80] sm:$0xff] }
 0x58e   : > { %5782 = vmatprep.subr.mxu1 %v5514_v57  ;;  %5682 = vmatpush1.msra.mxu0 %v5449_v7  ;;  %v5509_v57 = vld [vmem:[%s19371_s5 + $0x280] sm:$0xff]  ;;  %v5444_v7 = vld [vmem:[%s19371_s5 + $0x78] sm:$0xff] }
 0x58f   : > { %5783 = vmatpush1.msra.mxu1 %v5513_v13  ;;  %5683 = vmatprep.subr.mxu0 %v5448_v2  ;;  %v5508_v13 = vld [vmem:[%s19371_s5 + $0x278] sm:$0xff]  ;;  %v5443_v2 = vld [vmem:[%s19371_s5 + $0x70] sm:$0xff] }
 0x590   : > { %5784 = vmatprep.subr.mxu1 %v5512_v34  ;;  %5684 = vmatpush1.msra.mxu0 %v5447_v39  ;;  %v5507_v34 = vld [vmem:[%s19371_s5 + $0x270] sm:$0xff]  ;;  %v5442_v39 = vld [vmem:[%s19371_s5 + $0x68] sm:$0xff] }
 0x591   : > { %5785 = vmatpush1.msra.mxu1 %v5511_v56  ;;  %5685 = vmatprep.subr.mxu0 %v5446_v30  ;;  %v5506_v56 = vld [vmem:[%s19371_s5 + $0x268] sm:$0xff]  ;;  %v5441_v30 = vld [vmem:[%s19371_s5 + $0x60] sm:$0xff] }
 0x592   : > { %5786 = vmatprep.subr.mxu1 %v5510_v12  ;;  %5686 = vmatpush1.msra.mxu0 %v5445_v50  ;;  %v5505_v12 = vld [vmem:[%s19371_s5 + $0x260] sm:$0xff]  ;;  %v5440_v50 = vld [vmem:[%s19371_s5 + $0x58] sm:$0xff] }
 0x593   : > { %5787 = vmatpush1.msra.mxu1 %v5509_v57  ;;  %5687 = vmatprep.subr.mxu0 %v5444_v7  ;;  %v5504_v57 = vld [vmem:[%s19371_s5 + $0x258] sm:$0xff]  ;;  %v5439_v7 = vld [vmem:[%s19371_s5 + $0x50] sm:$0xff] }
 0x594   : > { %5788 = vmatprep.subr.mxu1 %v5508_v13  ;;  %5688 = vmatpush1.msra.mxu0 %v5443_v2  ;;  %v5503_v13 = vld [vmem:[%s19371_s5 + $0x250] sm:$0xff]  ;;  %v5438_v2 = vld [vmem:[%s19371_s5 + $0x48] sm:$0xff] }
 0x595   : > { %5789 = vmatpush1.msra.mxu1 %v5507_v34  ;;  %5689 = vmatprep.subr.mxu0 %v5442_v39  ;;  %v5502_v34 = vld [vmem:[%s19371_s5 + $0x248] sm:$0xff]  ;;  %v5437_v39 = vld [vmem:[%s19371_s5 + $0x40] sm:$0xff] }
 0x596   : > { %5790 = vmatprep.subr.mxu1 %v5506_v56  ;;  %5690 = vmatpush1.msra.mxu0 %v5441_v30  ;;  %v5501_v56 = vld [vmem:[%s19371_s5 + $0x240] sm:$0xff]  ;;  %v5436_v30 = vld [vmem:[%s19371_s5 + $0x38] sm:$0xff] }
 0x597   : > { %5791 = vmatpush1.msra.mxu1 %v5505_v12  ;;  %5691 = vmatprep.subr.mxu0 %v5440_v50  ;;  %v5500_v12 = vld [vmem:[%s19371_s5 + $0x238] sm:$0xff]  ;;  %v5435_v50 = vld [vmem:[%s19371_s5 + $0x30] sm:$0xff] }
 0x598   : > { %5792 = vmatprep.subr.mxu1 %v5504_v57  ;;  %5692 = vmatpush1.msra.mxu0 %v5439_v7  ;;  %v5499_v57 = vld [vmem:[%s19371_s5 + $0x230] sm:$0xff]  ;;  %v5434_v7 = vld [vmem:[%s19371_s5 + $0x28] sm:$0xff] }
 0x599   : > { %5793 = vmatpush1.msra.mxu1 %v5503_v13  ;;  %5693 = vmatprep.subr.mxu0 %v5438_v2  ;;  %v5498_v13 = vld [vmem:[%s19371_s5 + $0x228] sm:$0xff]  ;;  %v5433_v2 = vld [vmem:[%s19371_s5 + $0x20] sm:$0xff] }
 0x59a   : > { %5794 = vmatprep.subr.mxu1 %v5502_v34  ;;  %5694 = vmatpush1.msra.mxu0 %v5437_v39  ;;  %v5497_v34 = vld [vmem:[%s19371_s5 + $0x220] sm:$0xff]  ;;  %v5432_v39 = vld [vmem:[%s19371_s5 + $0x18] sm:$0xff] }
 0x59b   : > { %5795 = vmatpush1.msra.mxu1 %v5501_v56  ;;  %5695 = vmatprep.subr.mxu0 %v5436_v30  ;;  %v15229_v56 = vpop.f32.mrf.mxu1 }
 0x59c   : > { %5796 = vmatprep.subr.mxu1 %v5500_v12  ;;  %5696 = vmatpush1.msra.mxu0 %v5435_v50  ;;  %v19740_v12 = vld [vmem:[#allocation33_spill] sm:$0xff]  ;;  %v5431_v50 = vld [vmem:[%s19371_s5 + $0x10] sm:$0xff] }
 0x59d   : > { %5797 = vmatpush1.msra.mxu1 %v5499_v57  ;;  %5697 = vmatprep.subr.mxu0 %v5434_v7  ;;  %v4746_v30 = vpop.f32.mrf.mxu1  ;;  %v2492_v28 = vadd.f32 %v19741_v37, %v19740_v12  ;;  %v5496_v57 = vld [vmem:[%s19371_s5 + $0x218] sm:$0xff]  ;;  %v5430_v7 = vld [vmem:[%s19371_s5 + $0x8] sm:$0xff]  ;;  %v5495_v37 = vld [vmem:[%s19371_s5 + $0x210] sm:$0xff] }
 0x59e   : > { %5798 = vmatprep.subr.mxu1 %v5498_v13  ;;  %5698 = vmatpush1.msra.mxu0 %v5433_v2  ;;  %v5429_v13 = vld [vmem:[%s19371_s5] sm:$0xff]  ;;  %v5494_v2 = vld [vmem:[%s19371_s5 + $0x208] sm:$0xff] }
 0x59f   : > { %5799 = vmatpush1.msra.mxu1 %v5497_v34  ;;  %5699 = vmatprep.subr.mxu0 %v5432_v39  ;;  %v15233_v10 = vpop.f32.mrf.mxu1  ;;  %v5492_v34 = vld [vmem:[%s19371_s5 + $0x1f8] sm:$0xff]  ;;  %v5493_v39 = vld [vmem:[%s19371_s5 + $0x200] sm:$0xff]  ;;  %v19742_v12 = vld [vmem:[#allocation35_spill] sm:$0xff]  ;;  %v3400_v20 = vadd.f32 %v19744_v1, %v2492_v28 }
 0x5a0   : > { %5700 = vmatpush1.msra.mxu0 %v5431_v50  ;;  %5800 = vmatprep.subr.mxu1 %v5496_v57  ;;  %v19743_v50 = vld [vmem:[#allocation53_spill] sm:$0xff]  ;;  %v5490_v1 = vld [vmem:[%s19371_s5 + $0x1e8] sm:$0xff] }
 0x5a1   : > { %5701 = vmatprep.subr.mxu0 %v5430_v7  ;;  %5801 = vmatpush1.msra.mxu1 %v5495_v37  ;;  %v2502_v57 = vadd.f32 %v19743_v50, %v19742_v12  ;;  %v4756_v42 = vpop.f32.mrf.mxu1  ;;  %v19745_v7 = vld [vmem:[#allocation74_spill] sm:$0xff]  ;;  %v5556_v12 = vld [vmem:[%s19371_s5 + $0x3f8] sm:$0xff]  ;;  %v5555_v50 = vld [vmem:[%s19371_s5 + $0x3f0] sm:$0xff] }
 0x5a2   : > { %5702 = vmatpush1.msra.mxu0 %v5429_v13  ;;  %5802 = vmatprep.subr.mxu1 %v5494_v2  ;;  %v4316_v37 = vadd.f32 %v19745_v7, %v3400_v20  ;;  %v19746_v28 = vld [vmem:[#allocation37_spill] sm:$0xff]  ;;  %v19747_v13 = vld [vmem:[#allocation55_spill] sm:$0xff]  ;;  %v5489_v7 = vld [vmem:[%s19371_s5 + $0x1e0] sm:$0xff] }
 0x5a3   : > { %5703 = vmatprep.subr.mxu0 %v5492_v34  ;;  %5803 = vmatpush1.msra.mxu1 %v5493_v39  ;;  %v2512_v2 = vadd.f32 %v19747_v13, %v19746_v28  ;;  %v5554_v28 = vld [vmem:[%s19371_s5 + $0x3e8] sm:$0xff]  ;;  %v19748_v13 = vld [vmem:[#allocation65_spill] sm:$0xff]  ;;  %v15297_v36 = vpop.f32.mrf.mxu1 }
 0x5a4   : > { %5704 = vmatpush2.msra.mxu0 %v5491_v60  ;;  %5804 = vmatprep.subr.mxu1 %v5556_v12  ;;  %v3414_v18 = vadd.f32 %v19748_v13, %v2502_v57  ;;  %v4781_v17 = vadd.f32 %v4746_v30, %v4316_v37  ;;  %v5488_v60 = vld [vmem:[%s19371_s5 + $0x1d8] sm:$0xff]  ;;  %v5553_v12 = vld [vmem:[%s19371_s5 + $0x3e0] sm:$0xff]  ;;  %v19749_v57 = vld [vmem:[#allocation76_spill] sm:$0xff] }
 0x5a5   : > { %5705 = vmatprep.subr.mxu0 %v5490_v1  ;;  %5805 = vmatpush2.msra.mxu1 %v5555_v50  ;;  %v19750_v1 = vld [vmem:[#allocation46_spill] sm:$0xff] }
 0x5a6   : > { %5706 = vmatpush2.msra.mxu0 %v5489_v7  ;;  %5806 = vmatprep.subr.mxu1 %v5554_v28  ;;  %v4330_v37 = vadd.f32 %v19749_v57, %v3414_v18  ;;  %v19751_v50 = vmax.f32 %v19750_v1, 0.0  ;;  %v5486_v18 = vld [vmem:[%s19371_s5 + $0x1c8] sm:$0xff]  ;;  %v4766_v57 = vpop.f32.mrf.mxu1  ;;  %v19755_v1 = vld [vmem:[#allocation9_spill] sm:$0xff] }
 0x5a7   : > { %5707 = vmatprep.subr.mxu0 %v5488_v60  ;;  %5807 = vmatpush2.msra.mxu1 %v5553_v12  ;;  %v5550_v28 = vld [vmem:[%s19371_s5 + $0x3c8] sm:$0xff]  ;;  %v15334_v60 = vadd.f32 %v14694_v14, %v4781_v17  ;;  %v5483_v17 = vld [vmem:[%s19371_s5 + $0x1b0] sm:$0xff] }
 0x5a8   : > { %5708 = vmatpush2.msra.mxu0 %v5487_v26  ;;  %v4795_v12 = vadd.f32 %v4756_v42, %v4330_v37  ;;  %v5548_v42 = vld [vmem:[%s19371_s5 + $0x3b8] sm:$0xff]  ;;  %v5482_v37 = vld [vmem:[%s19371_s5 + $0x1a8] sm:$0xff] }
 0x5a9   : > { %5709 = vmatprep.subr.mxu0 %v5486_v18  ;;  %v5546_v18 = vld [vmem:[%s19371_s5 + $0x3a8] sm:$0xff] }
 0x5aa   : > { %5710 = vmatpush2.msra.mxu0 %v5485_v33  ;;  %v5480_v33 = vld [vmem:[%s19371_s5 + $0x198] sm:$0xff] }
 0x5b0   : > { %v15263_v35 = vpop.permute.xlu1 %10747  ;;  %v15265_v62 = vpop.permute.xlu0 %10752 }
 0x5b1   : > { %v10750_v20 = vunpack.i.h.bf16 %v15263_v35  ;;  %v10749_v34 = vunpack.i.l.bf16 %v15263_v35  ;;  %v10754_v39 = vunpack.i.l.bf16 %v15265_v62 }
 0x5b3   : > { %v5064_v53 = vsel %vm560_vm3, %v10749_v34, %v10750_v20  ;;  %v5065_v30 = vsel %vm560_vm3, %v10750_v20, %v10754_v39  ;;  %v5552_v20 = vld [vmem:[%s19371_s5 + $0x3d8] sm:$0xff] }
 0x5b4   : > { %v15308_v13 = vmax.f32 %v19751_v50, %v5064_v53  ;;  %v15312_v11 = vmax.f32 %v19753_v61, %v5065_v30  ;;  %v19754_v53 = vld [vmem:[#allocation66_spill] sm:$0xff]  ;;  %5808 = vmatprep.subr.mxu1 %v5552_v20  ;;  %v5551_v61 = vld [vmem:[%s19371_s5 + $0x3d0] sm:$0xff] }
 0x5b5   : > { %v3428_v7 = vadd.f32 %v19754_v53, %v2512_v2  ;;  %5809 = vmatpush2.msra.mxu1 %v5551_v61  ;;  %v5484_v2 = vld [vmem:[%s19371_s5 + $0x1b8] sm:$0xff]  ;;  %v5549_v30 = vld [vmem:[%s19371_s5 + $0x3c0] sm:$0xff]  ;;  %v5547_v50 = vld [vmem:[%s19371_s5 + $0x3b0] sm:$0xff]  ;;  %v19471_v53 = vmax.f32 %v15334_v60, 0.0 }
 0x5b6   : > { %v10836_v26 = vpack.i.bf16 %v15312_v11, %v15308_v13  ;;  %5810 = vmatprep.subr.mxu1 %v5550_v28  ;;  %5711 = vmatprep.subr.mxu0 %v5484_v2  ;;  %v5481_v20 = vld [vmem:[%s19371_s5 + $0x1a0] sm:$0xff]  ;;  %v5543_v2 = vld [vmem:[%s19371_s5 + $0x390] sm:$0xff] }
 0x5b7   : > { %v4344_v14 = vadd.f32 %v19755_v1, %v3428_v7  ;;  %5811 = vmatpush2.msra.mxu1 %v5549_v30  ;;  %5712 = vmatpush2.msra.mxu0 %v5483_v17  ;;  %v15366_v7 = vadd.f32 %v14839_v46, %v4795_v12  ;;  %v5545_v28 = vld [vmem:[%s19371_s5 + $0x3a0] sm:$0xff]  ;;  %v5544_v46 = vld [vmem:[%s19371_s5 + $0x398] sm:$0xff]  ;;  %v5478_v12 = vld [vmem:[%s19371_s5 + $0x188] sm:$0xff] }
 0x5b8   : > { %10837 = vrot.lane.b32.xlu1 %v10836_v26, %s19756_s23  ;;  %5812 = vmatprep.subr.mxu1 %v5548_v42  ;;  %v5479_v26 = vld [vmem:[%s19371_s5 + $0x190] sm:$0xff]  ;;  %v5477_v30 = vld [vmem:[%s19371_s5 + $0x180] sm:$0xff]  ;;  %v5476_v17 = vld [vmem:[%s19371_s5 + $0x178] sm:$0xff] }
 0x5b9   : > { %v4809_v61 = vadd.f32 %v4766_v57, %v4344_v14  ;;  %5713 = vmatprep.subr.mxu0 %v5482_v37  ;;  %5813 = vmatpush2.msra.mxu1 %v5547_v50  ;;  %v19470_v57 = vmax.f32 %v15366_v7, 0.0  ;;  %v5542_v14 = vld [vmem:[%s19371_s5 + $0x388] sm:$0xff]  ;;  %v5541_v42 = vld [vmem:[%s19371_s5 + $0x380] sm:$0xff]  ;;  %v5540_v37 = vld [vmem:[%s19371_s5 + $0x378] sm:$0xff] }
 0x5ba   : > { %5714 = vmatpush2.msra.mxu0 %v5481_v20  ;;  %5814 = vmatprep.subr.mxu1 %v5546_v18  ;;  %v5474_v50 = vld [vmem:[%s19371_s5 + $0x168] sm:$0xff]  ;;  %v5539_v20 = vld [vmem:[%s19371_s5 + $0x370] sm:$0xff] }
 0x5bb   : > { %5715 = vmatprep.subr.mxu0 %v5480_v33  ;;  %5815 = vmatpush2.msra.mxu1 %v5545_v28  ;;  %v15394_v1 = vadd.f32 %v14936_v19, %v4809_v61  ;;  %v5475_v19 = vld [vmem:[%s19371_s5 + $0x170] sm:$0xff]  ;;  %v5473_v61 = vld [vmem:[%s19371_s5 + $0x160] sm:$0xff]  ;;  %v5538_v33 = vld [vmem:[%s19371_s5 + $0x368] sm:$0xff] }
 0x5bc   : > { %4991 = vrot.lane.b32.xlu1 %v19471_v53, %s19757_s15  ;;  %5716 = vmatpush2.msra.mxu0 %v5479_v26  ;;  %v5472_v28 = vld [vmem:[%s19371_s5 + $0x158] sm:$0xff]  ;;  %v5537_v26 = vld [vmem:[%s19371_s5 + $0x360] sm:$0xff] }
 0x5bd   : > { %5816 = vmatprep.subr.mxu1 %v5544_v46  ;;  %5717 = vmatprep.subr.mxu0 %v5478_v12  ;;  %v19469_v18 = vmax.f32 %v15394_v1, 0.0  ;;  %v5471_v46 = vld [vmem:[%s19371_s5 + $0x150] sm:$0xff]  ;;  %v5536_v12 = vld [vmem:[%s19371_s5 + $0x358] sm:$0xff] }
 0x5be   : > { %5817 = vmatpush2.msra.mxu1 %v5543_v2  ;;  %5718 = vmatpush2.msra.mxu0 %v5477_v30  ;;  %v5470_v2 = vld [vmem:[%s19371_s5 + $0x148] sm:$0xff]  ;;  %v5535_v30 = vld [vmem:[%s19371_s5 + $0x350] sm:$0xff] }
 0x5bf   : > { %5818 = vmatprep.subr.mxu1 %v5542_v14  ;;  %5719 = vmatprep.subr.mxu0 %v5476_v17  ;;  %v5469_v14 = vld [vmem:[%s19371_s5 + $0x140] sm:$0xff]  ;;  %v5534_v17 = vld [vmem:[%s19371_s5 + $0x348] sm:$0xff] }
 0x5c0   : > { %5019 = vrot.lane.b32.xlu1 %v19470_v57, %s19757_s15  ;;  %5819 = vmatpush2.msra.mxu1 %v5541_v42  ;;  %v5468_v42 = vld [vmem:[%s19371_s5 + $0x138] sm:$0xff] }
 0x5c1   : > { %5720 = vmatpush2.msra.mxu0 %v5475_v19  ;;  %5820 = vmatprep.subr.mxu1 %v5540_v37  ;;  %v5533_v19 = vld [vmem:[%s19371_s5 + $0x340] sm:$0xff]  ;;  %v5467_v37 = vld [vmem:[%s19371_s5 + $0x130] sm:$0xff] }
 0x5c2   : > { %5721 = vmatprep.subr.mxu0 %v5474_v50  ;;  %5821 = vmatpush2.msra.mxu1 %v5539_v20  ;;  %v5532_v50 = vld [vmem:[%s19371_s5 + $0x338] sm:$0xff]  ;;  %v5466_v20 = vld [vmem:[%s19371_s5 + $0x128] sm:$0xff] }
 0x5c3   : > { %5722 = vmatpush2.msra.mxu0 %v5473_v61  ;;  %5822 = vmatprep.subr.mxu1 %v5538_v33  ;;  %v5531_v61 = vld [vmem:[%s19371_s5 + $0x330] sm:$0xff]  ;;  %v15472_v33 = vpop.permute.xlu0 %10762 }
 0x5c4   : > { %5047 = vrot.lane.b32.xlu1 %v19469_v18, %s19757_s15  ;;  %5723 = vmatprep.subr.mxu0 %v5472_v28  ;;  %v5465_v28 = vld [vmem:[%s19371_s5 + $0x120] sm:$0xff] }
 0x5c5   : > { %5823 = vmatpush2.msra.mxu1 %v5537_v26  ;;  %5724 = vmatpush2.msra.mxu0 %v5471_v46  ;;  %v5530_v26 = vld [vmem:[%s19371_s5 + $0x328] sm:$0xff]  ;;  %v5464_v46 = vld [vmem:[%s19371_s5 + $0x118] sm:$0xff] }
 0x5c6   : > { %5824 = vmatprep.subr.mxu1 %v5536_v12  ;;  %5725 = vmatprep.subr.mxu0 %v5470_v2  ;;  %v5529_v12 = vld [vmem:[%s19371_s5 + $0x320] sm:$0xff]  ;;  %v10755_v2 = vunpack.i.h.bf16 %v15265_v62 }
 0x5c7   : > { %5825 = vmatpush2.msra.mxu1 %v5535_v30  ;;  %5726 = vmatpush2.msra.mxu0 %v5469_v14  ;;  %v10765_v30 = vunpack.i.h.bf16 %v15472_v33  ;;  %v10764_v14 = vunpack.i.l.bf16 %v15472_v33  ;;  %v5525_v33 = vld [vmem:[%s19371_s5 + $0x300] sm:$0xff] }
 0x5c8   : > { %5826 = vmatprep.subr.mxu1 %v5534_v17  ;;  %5727 = vmatprep.subr.mxu0 %v5468_v42  ;;  %v5463_v17 = vld [vmem:[%s19371_s5 + $0x110] sm:$0xff]  ;;  %v5528_v42 = vld [vmem:[%s19371_s5 + $0x318] sm:$0xff] }
 0x5c9   : > { %5827 = vmatpush2.msra.mxu1 %v5533_v19  ;;  %5728 = vmatpush2.msra.mxu0 %v5467_v37  ;;  %v5462_v19 = vld [vmem:[%s19371_s5 + $0x108] sm:$0xff]  ;;  %v5527_v37 = vld [vmem:[%s19371_s5 + $0x310] sm:$0xff] }
 0x5ca   : > { %5828 = vmatprep.subr.mxu1 %v5532_v50  ;;  %5729 = vmatprep.subr.mxu0 %v5466_v20  ;;  %v5461_v50 = vld [vmem:[%s19371_s5 + $0x100] sm:$0xff]  ;;  %v5526_v20 = vld [vmem:[%s19371_s5 + $0x308] sm:$0xff] }
 0x5cb   : > { %5829 = vmatpush2.msra.mxu1 %v5531_v61  ;;  %5730 = vmatpush2.msra.mxu0 %v5465_v28  ;;  %v5063_v28 = vsel %vm560_vm3, %v10755_v2, %v10749_v34 }
 0x5cc   : > { %5830 = vmatprep.subr.mxu1 %v5530_v26  ;;  %5731 = vmatprep.subr.mxu0 %v5464_v46  ;;  %v5070_v26 = vsel %vm560_vm3, %v10764_v14, %v10765_v30 }
 0x5cd   : > { %5831 = vmatpush2.msra.mxu1 %v5529_v12  ;;  %5732 = vmatpush2.msra.mxu0 %v5463_v17  ;;  %v19758_v17 = vld [vmem:[#allocation73_spill] sm:$0xff] }
 0x5ce   : > { %5832 = vmatprep.subr.mxu1 %v5528_v42  ;;  %5733 = vmatprep.subr.mxu0 %v5462_v19  ;;  %v4788_v42 = vadd.f32 %v15229_v56, %v19758_v17 }
 0x5cf   : > { %5833 = vmatpush2.msra.mxu1 %v5527_v37  ;;  %5734 = vmatpush2.msra.mxu0 %v5461_v50  ;;  %v19759_v37 = vld [vmem:[#allocation39_spill] sm:$0xff]  ;;  %v19761_v50 = vld [vmem:[#allocation10_spill] sm:$0xff] }
 0x5d0   : > { %5834 = vmatprep.subr.mxu1 %v5526_v20  ;;  %v19760_v34 = vmax.f32 %v19759_v37, 0.0  ;;  %v19762_v20 = vmax.f32 %v19761_v50, 0.0  ;;  %v15547_v37 = vadd.f32 %v14705_v22, %v4788_v42  ;;  %v19767_v50 = vmax.f32 %v14825_v38, 0.0  ;;  %v19770_v38 = vld [vmem:[#allocation77_spill] sm:$0xff] }
 0x5d1   : > { %5835 = vmatpush2.msra.mxu1 %v5525_v33  ;;  %v19763_v33 = vld [vmem:[#allocation56_spill] sm:$0xff]  ;;  %v19768_v42 = vmax.f32 %v14847_v41, 0.0 }
 0x5d2   : > { %v15528_v2 = vmax.f32 %v19760_v34, %v5063_v28  ;;  %v15532_v18 = vmax.f32 %v19762_v20, %v5070_v26  ;;  %v19764_v57 = vmax.f32 %v19763_v33, 0.0  ;;  %v19766_v26 = vld [vmem:[#allocation75_spill] sm:$0xff] }
 0x5d3   : > { %v4802_v34 = vadd.f32 %v15233_v10, %v19766_v26 }
 0x5da   : > { %v15507_v61 = vpop.permute.xlu1 %10757 }
 0x5db   : > { %v19472_v46 = vunpack.i.h.bf16 %v15507_v61  ;;  %v10759_v12 = vunpack.i.l.bf16 %v15507_v61 }
 0x5dd   : > { %v5066_v19 = vsel %vm560_vm3, %v10754_v39, %v10759_v12  ;;  %v5067_v35 = vsel %vm560_vm3, %v10759_v12, %v19472_v46 }
 0x5de   : > { %v15536_v53 = vmax.f32 %v19764_v57, %v5066_v19  ;;  %v15540_v62 = vmax.f32 %v4899_v51, %v5067_v35  ;;  %v10768_v56 = vpop.permute.xlu1 %10767  ;;  %v15542_v39 = vpop.permute.xlu0 %10772 }
 0x5df   : > { %v10769_v12 = vunpack.i.l.bf16 %v10768_v56  ;;  %v19475_v17 = vunpack.i.h.bf16 %v15542_v39  ;;  %v10774_v28 = vunpack.i.l.bf16 %v15542_v39  ;;  %v10770_v35 = vunpack.i.h.bf16 %v10768_v56 }
 0x5e0   : > { %19765 = vst [vmem:[#allocation11_spill] sm:$0xff] %v15540_v62  ;;  %v10841_v57 = vpack.i.bf16 %v15536_v53, %v15528_v2  ;;  %v10846_v29 = vpack.i.bf16 %v15532_v18, %v15540_v62  ;;  %v19474_v62 = vmax.f32 %v15547_v37, 0.0  ;;  %v15571_v56 = vadd.f32 %v14870_v31, %v4802_v34 }
 0x5e1   : > { %v5072_v51 = vsel %vm560_vm3, %v10769_v12, %v10774_v28  ;;  %v5073_v19 = vsel %vm560_vm3, %v10774_v28, %v19475_v17  ;;  %v4816_v28 = vadd.f32 %v15297_v36, %v19770_v38  ;;  %v19771_v38 = vmax.f32 %v14832_v27, 0.0 }
 0x5e2   : > { %v15561_v22 = vmax.f32 %v19767_v50, %v5072_v51  ;;  %v15565_v10 = vmax.f32 %v19768_v42, %v5073_v19  ;;  %v10778_v20 = vpop.permute.xlu1 %10777  ;;  %v10783_v33 = vpop.permute.xlu0 %10782  ;;  %10842 = vrot.lane.b32.xlu0 %v10841_v57, %s19756_s23  ;;  %10847 = vrot.lane.b32.xlu1 %v10846_v29, %s19756_s23  ;;  %v5069_v51 = vsel %vm560_vm3, %v10770_v35, %v10764_v14  ;;  %v19776_v27 = vmax.f32 %v15571_v56, 0.0 }
 0x5e3   : > { %v10779_v26 = vunpack.i.l.bf16 %v10778_v20  ;;  %v10785_v46 = vunpack.i.h.bf16 %v10783_v33  ;;  %v5071_v29 = vsel %vm560_vm3, %v10765_v30, %v10769_v12  ;;  %v10784_v34 = vunpack.i.l.bf16 %v10783_v33  ;;  %v19772_v30 = vld [vmem:[#allocation43_spill] sm:$0xff] }
 0x5e4   : > { %19769 = vst [vmem:[#allocation25_spill] sm:$0xff] %v15565_v10  ;;  %v10856_v41 = vpack.i.bf16 %v15565_v10, %v15561_v22  ;;  %v15589_v14 = vadd.f32 %v14979_v5, %v4816_v28  ;;  %v10780_v35 = vunpack.i.h.bf16 %v10778_v20  ;;  %v19773_v12 = vmax.f32 %v19772_v30, 0.0 }
 0x5e5   : > { %v5075_v31 = vsel %vm560_vm3, %v10785_v46, %v10779_v26  ;;  %v19774_v33 = vmax.f32 %v14867_v54, 0.0 }
 0x5e6   : > { %v15578_v19 = vpop.permute.xlu1 %10787  ;;  %v10793_v57 = vpop.permute.xlu0 %10792  ;;  %5005 = vrot.lane.b32.xlu0 %v19474_v62, %s19757_s15  ;;  %10857 = vrot.lane.b32.xlu1 %v10856_v41, %s19756_s23  ;;  %v15594_v62 = vmax.f32 %v19771_v38, %v5069_v51  ;;  %v15598_v46 = vmax.f32 %v19773_v12, %v5071_v29  ;;  %v19775_v41 = vmax.f32 %v14853_v52, 0.0  ;;  %v5076_v54 = vsel %vm560_vm3, %v10779_v26, %v10780_v35 }
 0x5e7   : > { %v10789_v50 = vunpack.i.l.bf16 %v15578_v19  ;;  %v15602_v17 = vmax.f32 %v19774_v33, %v5075_v31  ;;  %v10795_v28 = vunpack.i.h.bf16 %v10793_v57  ;;  %v10794_v51 = vunpack.i.l.bf16 %v10793_v57 }
 0x5e8   : > { %v19781_v31 = vmax.f32 %v15589_v14, 0.0 }
 0x5e9   : > { %v5078_v42 = vsel %vm560_vm3, %v10784_v34, %v10789_v50  ;;  %v5082_v10 = vsel %vm560_vm3, %v10794_v51, %v10795_v28 }
 0x5ea   : > { %v15606_v36 = vmax.f32 %v19775_v41, %v5078_v42  ;;  %v10798_v5 = vpop.permute.xlu1 %10797  ;;  %v15608_v20 = vpop.permute.xlu0 %10802  ;;  %5033 = vrot.lane.b32.xlu0 %v19776_v27, %s19757_s15  ;;  %v5077_v42 = vsel %vm560_vm3, %v10780_v35, %v10784_v34  ;;  %v19777_v41 = vmax.f32 %v14930_v32, 0.0  ;;  %v10851_v34 = vpack.i.bf16 %v15594_v62, %v15598_v46 }
 0x5eb   : > { %v10800_v38 = vunpack.i.h.bf16 %v10798_v5  ;;  %v10799_v29 = vunpack.i.l.bf16 %v10798_v5  ;;  %v19779_v5 = vmax.f32 %v14899_v4, 0.0  ;;  %v19782_v35 = vmax.f32 %v14850_v43, 0.0 }
 0x5ec   : > { %v10866_v52 = vpack.i.bf16 %v15606_v36, %v15602_v17  ;;  %v19783_v4 = vmax.f32 %v14864_v48, 0.0  ;;  %v19785_v48 = vmax.f32 %v14945_v23, 0.0  ;;  %v19788_v23 = vmax.f32 %v14903_v49, 0.0 }
 0x5ed   : > { %v5081_v12 = vsel %vm560_vm3, %v10800_v38, %v10794_v51  ;;  %v5083_v33 = vsel %vm560_vm3, %v10795_v28, %v10799_v29  ;;  %v15636_v38 = vmax.f32 %v19782_v35, %v5076_v54 }
 0x5ee   : > { %v15623_v57 = vmax.f32 %v19777_v41, %v5081_v12  ;;  %v15627_v27 = vmax.f32 %v19779_v5, %v5083_v33  ;;  %v10808_v26 = vpop.permute.xlu1 %10807  ;;  %v10813_v30 = vpop.permute.xlu0 %10812  ;;  %5061 = vrot.lane.b32.xlu0 %v19781_v31, %s19757_s15  ;;  %10867 = vrot.lane.b32.xlu1 %v10866_v52, %s19756_s23  ;;  %v15641_v33 = vmax.f32 %v19783_v4, %v5077_v42  ;;  %v19784_v5 = vunpack.i.h.bf16 %v15578_v19 }
 0x5ef   : > { %v10810_v32 = vunpack.i.h.bf16 %v10808_v26  ;;  %v10809_v12 = vunpack.i.l.bf16 %v10808_v26  ;;  %v10814_v41 = vunpack.i.l.bf16 %v10813_v30  ;;  %v10804_v26 = vunpack.i.l.bf16 %v15608_v20 }
 0x5f0   : > { %19778 = vst [vmem:[#allocation8_spill] sm:$0xff] %v15623_v57  ;;  %19780 = vst [vmem:[#allocation26_spill] sm:$0xff] %v15627_v27  ;;  %v5079_v31 = vsel %vm560_vm3, %v10789_v50, %v19784_v5  ;;  %v10876_v43 = vpack.i.bf16 %v15623_v57, %v15627_v27  ;;  %v19786_v4 = vmax.f32 %v14964_v59, 0.0  ;;  %v19789_v59 = vmax.f32 %v14882_v21, 0.0 }
 0x5f1   : > { %v5088_v35 = vsel %vm560_vm3, %v10809_v12, %v10810_v32  ;;  %v5089_v52 = vsel %vm560_vm3, %v10810_v32, %v10814_v41  ;;  %v15669_v32 = vmax.f32 %v19788_v23, %v5079_v31 }
 0x5f2   : > { %v15655_v42 = vmax.f32 %v19785_v48, %v5088_v35  ;;  %v15659_v50 = vmax.f32 %v19786_v4, %v5089_v52  ;;  %v15661_v28 = vpop.permute.xlu1 %10817  ;;  %v10823_v51 = vpop.permute.xlu0 %10822  ;;  %10852 = vrot.lane.b32.xlu0 %v10851_v34, %s19756_s23  ;;  %10877 = vrot.lane.b32.xlu1 %v10876_v43, %s19756_s23  ;;  %v15673_v35 = vmax.f32 %v19789_v59, %v5082_v10  ;;  %v19790_v4 = vunpack.i.h.bf16 %v15608_v20 }
 0x5f3   : > { %v19480_v5 = vunpack.i.h.bf16 %v15661_v28  ;;  %v10819_v54 = vunpack.i.l.bf16 %v15661_v28  ;;  %v10825_v27 = vunpack.i.h.bf16 %v10823_v51  ;;  %v10824_v57 = vunpack.i.l.bf16 %v10823_v51 }
 0x5f4   : > { %19787 = vst [vmem:[#allocation14_spill] sm:$0xff] %v15659_v50  ;;  %v10861_v52 = vpack.i.bf16 %v15641_v33, %v15636_v38  ;;  %v10886_v34 = vpack.i.bf16 %v15659_v50, %v15655_v42  ;;  %v5084_v48 = vsel %vm560_vm3, %v10799_v29, %v10804_v26  ;;  %v5085_v43 = vsel %vm560_vm3, %v10804_v26, %v19790_v4 }
 0x5f5   : > { %v5091_v49 = vsel %vm560_vm3, %v10819_v54, %v19480_v5  ;;  %v5094_v21 = vsel %vm560_vm3, %v10824_v57, %v10825_v27  ;;  %v19791_v10 = vmax.f32 %v15000_v63, 0.0  ;;  %v19792_v51 = vmax.f32 %v14993_v45, 0.0 }
 0x5f6   : > { %v10828_v59 = vpop.permute.xlu1 %10827  ;;  %v15695_v29 = vpop.permute.xlu0 %10832  ;;  %10862 = vrot.lane.b32.xlu0 %v10861_v52, %s19756_s23  ;;  %v10815_v26 = vunpack.i.h.bf16 %v10813_v30  ;;  %10887 = vrot.lane.b32.xlu1 %v10886_v34, %s19756_s23  ;;  %v19793_v63 = vmax.f32 %v14911_v40, 0.0  ;;  %v19794_v45 = vmax.f32 %v14940_v9, 0.0  ;;  %v5090_v52 = vsel %vm560_vm3, %v10814_v41, %v10819_v54 }
 0x5f7   : > { %v15689_v31 = vmax.f32 %v19791_v10, %v5091_v49  ;;  %v15693_v23 = vmax.f32 %v19792_v51, %v5094_v21  ;;  %v10829_v4 = vunpack.i.l.bf16 %v10828_v59  ;;  %v10834_v5 = vunpack.i.l.bf16 %v15695_v29 }
 0x5f8   : > { %v15703_v49 = vmax.f32 %v19793_v63, %v5084_v48  ;;  %v15707_v21 = vmax.f32 %v19794_v45, %v5085_v43  ;;  %v10871_v10 = vpack.i.bf16 %v15673_v35, %v15669_v32  ;;  %v10830_v51 = vunpack.i.h.bf16 %v10828_v59 }
 0x5f9   : > { %v10896_v30 = vpack.i.bf16 %v15693_v23, %v15689_v31  ;;  %v5096_v50 = vsel %vm560_vm3, %v10829_v4, %v10834_v5  ;;  %v19795_v34 = vunpack.i.h.bf16 %v15695_v29  ;;  %v19796_v48 = vmax.f32 %v15022_v6, 0.0 }
 0x5fa   : > { %v19797_v43 = vmax.f32 %v15026_v16, 0.0  ;;  %10872 = vrot.lane.b32.xlu0 %v10871_v10, %s19756_s23  ;;  %v5087_v45 = vsel %vm560_vm3, %v10815_v26, %v10809_v12  ;;  %v19798_v41 = vmax.f32 %v14948_v58, 0.0  ;;  %v5093_v16 = vsel %vm560_vm3, %v10830_v51, %v10824_v57  ;;  %v5588_v58 = vld [vmem:[%s19371_s5 + $0x4f8] sm:$0xff] }
 0x5fb   : > { %v5097_v40 = vsel %vm560_vm3, %v10834_v5, %v19795_v34  ;;  %v15720_v9 = vmax.f32 %v19796_v48, %v5096_v50  ;;  %10897 = vrot.lane.b32.xlu1 %v10896_v30, %s19756_s23  ;;  %v10881_v5 = vpack.i.bf16 %v15707_v21, %v15703_v49  ;;  %v5095_v50 = vsel %vm560_vm3, %v10825_v27, %v10829_v4  ;;  %v5644_v4 = vld [vmem:[%s19371_s5 + $0x6b8] sm:$0x7] }
 0x5fc   : > { %v15724_v63 = vmax.f32 %v19797_v43, %v5097_v40  ;;  %v15731_v54 = vmax.f32 %v19798_v41, %v5090_v52  ;;  %v19799_v59 = vmax.f32 %v14967_v44, 0.0  ;;  %v19800_v12 = vmax.f32 %v15032_v0, 0.0  ;;  %5873 = vmatprep.subr.mxu0 %v5588_v58  ;;  %9994 = vmatprep.subr.msk.mxu1 %vm5664_vm8, %v5644_v4 }
 0x5fd   : > { %v19801_v57 = vmax.f32 %v15006_v24, 0.0  ;;  %v19802_v48 = vmax.f32 %v15334_v60, 0.0 }
 0x5fe   : > { %v10906_v6 = vpack.i.bf16 %v15724_v63, %v15720_v9  ;;  %v15741_v10 = vmax.f32 %v19799_v59, %v5087_v45  ;;  %10882 = vrot.lane.b32.xlu0 %v10881_v5, %s19756_s23  ;;  %v15750_v26 = vmax.f32 %v19800_v12, %v5093_v16 }
 0x5ff   : > { %v15754_v27 = vmax.f32 %v19801_v57, %v5095_v50 }
 0x600   : > { %10907 = vrot.lane.b32.xlu1 %v10906_v6, %s19756_s23  ;;  %v10891_v44 = vpack.i.bf16 %v15731_v54, %v15741_v10 }
 0x601   : > { %v10901_v0 = vpack.i.bf16 %v15750_v26, %v15754_v27 }
 0x602   : > { %10892 = vrot.lane.b32.xlu0 %v10891_v44, %s19756_s23 }
 0x606   : > { %10902 = vrot.lane.b32.xlu0 %v10901_v0, %s19756_s23 }
 0x62a   : > { %v10838_v24 = vpop.permute.xlu1 %10837 }
 0x62b   : > { %v10840_v30 = vunpack.i.h.bf16 %v10838_v24  ;;  %v10839_v52 = vunpack.i.l.bf16 %v10838_v24  ;;  %v5587_v24 = vld [vmem:[%s19371_s5 + $0x4f0] sm:$0xff] }
 0x62d   : > { %v5310_v51 = vsel %vm1476_vm4, %v10839_v52, %v10840_v30 }
 0x62e   : > { %v4992_v34 = vpop.permute.xlu1 %4991  ;;  %v5388_v40 = vmax.f32 %v15308_v13, %v5310_v51  ;;  %v19803_v13 = vunpack.i.h.bf16 %v15507_v61  ;;  %v19804_v61 = vunpack.i.h.bf16 %v15542_v39 }
 0x62f   : > { %v15770_v43 = vmax.f32 %v19802_v48, %v4992_v34 }
 0x630   : > { %5735 = vmatprep.mubr.f32.mxu0 %v5388_v40  ;;  %v5068_v60 = vsel %vm560_vm3, %v19803_v13, %v4992_v34  ;;  %v19806_v40 = vmax.f32 %v14860_v47, 0.0 }
 0x631   : > { %5237 = vrot.lane.b32.xlu1 %v15770_v43, %s19756_s23 }
 0x632   : > { %v15774_v45 = vpop.permute.xlu1 %5019 }
 0x636   : > { %v15776_v41 = vpop.permute.xlu1 %5047 }
 0x654   : > { %v10843_v5 = vpop.permute.xlu0 %10842  ;;  %v15778_v50 = vpop.permute.xlu1 %10847 }
 0x655   : > { %v10845_v6 = vunpack.i.h.bf16 %v10843_v5  ;;  %v10844_v16 = vunpack.i.l.bf16 %v10843_v5  ;;  %v10849_v59 = vunpack.i.l.bf16 %v15778_v50 }
 0x657   : > { %v5309_v58 = vsel %vm1476_vm4, %v10844_v16, %v10839_v52  ;;  %v5311_v12 = vsel %vm1476_vm4, %v10840_v30, %v10845_v6  ;;  %v5312_v0 = vsel %vm1476_vm4, %v10845_v6, %v10849_v59  ;;  %v5643_v6 = vld [vmem:[%s19371_s5 + $0x6b0] sm:$0x7]  ;;  %v5584_v16 = vld [vmem:[%s19371_s5 + $0x4d8] sm:$0xff] }
 0x658   : > { %v5387_v57 = vmax.f32 %v15528_v2, %v5309_v58  ;;  %v5389_v44 = vmax.f32 %v15312_v11, %v5311_v12  ;;  %v5006_v4 = vpop.permute.xlu0 %5005  ;;  %v15797_v52 = vpop.permute.xlu1 %10857  ;;  %v5390_v30 = vmax.f32 %v15536_v53, %v5312_v0  ;;  %v5586_v11 = vld [vmem:[%s19371_s5 + $0x4e8] sm:$0xff]  ;;  %v19805_v2 = vmax.f32 %v14829_v25, 0.0  ;;  %v5585_v53 = vld [vmem:[%s19371_s5 + $0x4e0] sm:$0xff] }
 0x659   : > { %v5074_v51 = vsel %vm560_vm3, %v19804_v61, %v5006_v4  ;;  %v10860_v39 = vunpack.i.h.bf16 %v15797_v52  ;;  %v10859_v5 = vunpack.i.l.bf16 %v15797_v52  ;;  %v19807_v25 = vunpack.i.h.bf16 %v15578_v19  ;;  %v5583_v19 = vld [vmem:[%s19371_s5 + $0x4d0] sm:$0xff]  ;;  %v19825_v52 = vld [vmem:[#allocation25_spill] sm:$0xff] }
 0x65a   : > { %v15805_v34 = vmax.f32 %v19805_v2, %v5068_v60  ;;  %v15809_v48 = vmax.f32 %v19806_v40, %v5074_v51  ;;  %5736 = vmatmul.mubr.f32.vlgmr.msra.gmra.mxu0 %v5387_v57  ;;  %5836 = vmatprep.mubr.f32.mxu1 %v5390_v30  ;;  %v19808_v12 = vunpack.i.h.bf16 %v15608_v20  ;;  %v19809_v61 = vmax.f32 %v14891_v3, 0.0 }
 0x65b   : > { %v5080_v47 = vsel %vm560_vm3, %v19807_v25, %v15774_v45  ;;  %5874 = vmatpush1.msra.mxu0 %v5587_v24  ;;  %5837 = vmatmul.mubr.f32.vlgmr.msra.gmra.mxu1 %v5389_v44  ;;  %v5318_v58 = vsel %vm1476_vm4, %v10859_v5, %v10860_v39  ;;  %v5642_v44 = vld [vmem:[%s19371_s5 + $0x6a8] sm:$0xff]  ;;  %v19810_v20 = vmax.f32 %v14923_v15, 0.0  ;;  %v19811_v3 = vmax.f32 %v15547_v37, 0.0 }
 0x65c   : > { %v10911_v13 = vpack.i.bf16 %v15809_v48, %v15805_v34  ;;  %v5034_v60 = vpop.permute.xlu0 %5033  ;;  %5875 = vmatprep.subr.mxu0 %v5586_v11  ;;  %v5397_v0 = vmax.f32 %v15561_v22, %v5318_v58  ;;  %9995 = vmatpush1.msk.msra.mxu1 %vm5664_vm8, %v5643_v6  ;;  %v5582_v24 = vld [vmem:[%s19371_s5 + $0x4c8] sm:$0xff]  ;;  %v15849_v51 = vmax.f32 %v19809_v61, %v5080_v47  ;;  %v5641_v22 = vld [vmem:[%s19371_s5 + $0x6a0] sm:$0xff]  ;;  %v5580_v6 = vld [vmem:[%s19371_s5 + $0x4b8] sm:$0xff]  ;;  %v19812_v37 = vunpack.i.h.bf16 %v15661_v28 }
 0x65d   : > { %v5086_v57 = vsel %vm560_vm3, %v19808_v12, %v5034_v60  ;;  %5876 = vmatpush1.msra.mxu0 %v5585_v53  ;;  %v5581_v11 = vld [vmem:[%s19371_s5 + $0x4c0] sm:$0xff]  ;;  %v15864_v2 = vmax.f32 %v19811_v3, %v5006_v4  ;;  %5984 = vmatprep.subr.mxu1 %v5642_v44  ;;  %v5640_v53 = vld [vmem:[%s19371_s5 + $0x698] sm:$0xff]  ;;  %v19813_v25 = vunpack.i.h.bf16 %v15695_v29  ;;  %v5579_v58 = vld [vmem:[%s19371_s5 + $0x4b0] sm:$0xff]  ;;  %v19814_v28 = vmax.f32 %v15018_v8, 0.0 }
 0x65e   : > { %v15853_v30 = vmax.f32 %v19810_v20, %v5086_v57  ;;  %10912 = vrot.lane.b32.xlu0 %v10911_v13, %s19756_s23  ;;  %5877 = vmatprep.subr.mxu0 %v5584_v16  ;;  %v5092_v4 = vsel %vm560_vm3, %v19812_v37, %v15776_v41  ;;  %v5639_v13 = vld [vmem:[%s19371_s5 + $0x690] sm:$0xff]  ;;  %v5638_v29 = vld [vmem:[%s19371_s5 + $0x688] sm:$0xff]  ;;  %v19815_v8 = vmax.f32 %v15366_v7, 0.0  ;;  %v5577_v7 = vld [vmem:[%s19371_s5 + $0x4a0] sm:$0xff] }
 0x65f   : > { %5842 = vmatprep.mubr.f32.mxu1 %v5397_v0  ;;  %5878 = vmatpush1.msra.mxu0 %v5583_v19  ;;  %v5578_v12 = vld [vmem:[%s19371_s5 + $0x4a8] sm:$0xff]  ;;  %v19816_v0 = vmax.f32 %v14990_v55, 0.0  ;;  %v5635_v37 = vld [vmem:[%s19371_s5 + $0x670] sm:$0xff] }
 0x660   : > { %v10916_v15 = vpack.i.bf16 %v15853_v30, %v15849_v51  ;;  %v15868_v40 = vpop.permute.xlu0 %5061  ;;  %5879 = vmatprep.subr.mxu0 %v5582_v24  ;;  %v15884_v16 = vpop.permute.xlu1 %10867  ;;  %5985 = vmatpush1.msra.mxu1 %v5641_v22  ;;  %v15908_v57 = vmax.f32 %v19815_v8, %v15774_v45  ;;  %v19817_v24 = vmax.f32 %v15571_v56, 0.0  ;;  %v5637_v22 = vld [vmem:[%s19371_s5 + $0x680] sm:$0xff]  ;;  %v10850_v45 = vunpack.i.h.bf16 %v15778_v50  ;;  %v5636_v56 = vld [vmem:[%s19371_s5 + $0x678] sm:$0xff] }
 0x661   : > { %v5098_v47 = vsel %vm560_vm3, %v19813_v25, %v15868_v40  ;;  %5880 = vmatpush1.msra.mxu0 %v5581_v11  ;;  %5986 = vmatprep.subr.mxu1 %v5640_v53  ;;  %v15912_v44 = vmax.f32 %v19816_v0, %v5092_v4  ;;  %v5575_v4 = vld [vmem:[%s19371_s5 + $0x490] sm:$0xff] }
 0x662   : > { %v15894_v19 = vmax.f32 %v19814_v28, %v5098_v47  ;;  %5251 = vrot.lane.b32.xlu0 %v15864_v2, %s19756_s23  ;;  %10917 = vrot.lane.b32.xlu1 %v10916_v15, %s19756_s23  ;;  %v15916_v61 = vmax.f32 %v19817_v24, %v5034_v60  ;;  %v5576_v60 = vld [vmem:[%s19371_s5 + $0x498] sm:$0xff]  ;;  %v19818_v15 = vmax.f32 %v15394_v1, 0.0 }
 0x663   : > { %5881 = vmatprep.subr.mxu0 %v5580_v6  ;;  %5987 = vmatpush1.msra.mxu1 %v5639_v13 }
 0x664   : > { %v10853_v20 = vpop.permute.xlu0 %10852  ;;  %5882 = vmatpush1.msra.mxu0 %v5579_v58  ;;  %v15925_v3 = vpop.permute.xlu1 %10877  ;;  %5988 = vmatprep.subr.mxu1 %v5638_v29  ;;  %v15936_v53 = vmax.f32 %v19818_v15, %v15776_v41  ;;  %v10921_v6 = vpack.i.bf16 %v15894_v19, %v15912_v44  ;;  %v10869_v29 = vunpack.i.l.bf16 %v15884_v16  ;;  %v5573_v15 = vld [vmem:[%s19371_s5 + $0x480] sm:$0xff] }
 0x665   : > { %v10855_v55 = vunpack.i.h.bf16 %v10853_v20  ;;  %v10854_v11 = vunpack.i.l.bf16 %v10853_v20  ;;  %5883 = vmatprep.subr.mxu0 %v5578_v12  ;;  %5989 = vmatpush1.msra.mxu1 %v5637_v22  ;;  %v19819_v22 = vmax.f32 %v15589_v14, 0.0  ;;  %v10880_v14 = vunpack.i.h.bf16 %v15925_v3 }
 0x666   : > { %5265 = vrot.lane.b32.xlu0 %v15908_v57, %s19756_s23  ;;  %5279 = vrot.lane.b32.xlu1 %v15916_v61, %s19756_s23 }
 0x667   : > { %v5315_v1 = vsel %vm1476_vm4, %v10855_v55, %v10850_v45  ;;  %v5316_v41 = vsel %vm1476_vm4, %v10850_v45, %v10854_v11  ;;  %v5317_v25 = vsel %vm1476_vm4, %v10854_v11, %v10859_v5  ;;  %5884 = vmatpush1.msra.mxu0 %v5577_v7  ;;  %5990 = vmatprep.subr.mxu1 %v5636_v56  ;;  %v10870_v45 = vunpack.i.h.bf16 %v15884_v16 }
 0x668   : > { %v10863_v47 = vpop.permute.xlu0 %10862  ;;  %v5395_v13 = vmax.f32 %v15532_v18, %v5316_v41  ;;  %v5396_v58 = vmax.f32 %v15598_v46, %v5317_v25  ;;  %v5394_v28 = vmax.f32 %v15594_v62, %v5315_v1  ;;  %5885 = vmatprep.subr.mxu0 %v5576_v60  ;;  %v15959_v0 = vpop.permute.xlu1 %10887  ;;  %5991 = vmatpush1.msra.mxu1 %v5635_v37  ;;  %v5634_v18 = vld [vmem:[%s19371_s5 + $0x668] sm:$0xff]  ;;  %v5633_v60 = vld [vmem:[%s19371_s5 + $0x660] sm:$0xff]  ;;  %v5631_v1 = vld [vmem:[%s19371_s5 + $0x650] sm:$0xff] }
 0x669   : > { %v10865_v12 = vunpack.i.h.bf16 %v10863_v47  ;;  %v10864_v8 = vunpack.i.l.bf16 %v10863_v47  ;;  %5886 = vmatpush1.msra.mxu0 %v5575_v4  ;;  %v10890_v5 = vunpack.i.h.bf16 %v15959_v0  ;;  %v10889_v24 = vunpack.i.l.bf16 %v15959_v0  ;;  %v5574_v62 = vld [vmem:[%s19371_s5 + $0x488] sm:$0xff]  ;;  %5992 = vmatprep.subr.mxu1 %v5634_v18  ;;  %v5572_v4 = vld [vmem:[%s19371_s5 + $0x478] sm:$0xff] }
 0x66a   : > { %5293 = vrot.lane.b32.xlu1 %v15936_v53, %s19756_s23  ;;  %10922 = vrot.lane.b32.xlu0 %v10921_v6, %s19756_s23  ;;  %v15977_v7 = vmax.f32 %v19819_v22, %v15868_v40  ;;  %v10879_v40 = vunpack.i.l.bf16 %v15925_v3 }
 0x66b   : > { %v5321_v46 = vsel %vm1476_vm4, %v10869_v29, %v10864_v8  ;;  %5741 = vmatprep.mubr.f32.mxu0 %v5395_v13  ;;  %5843 = vmatmul.mubr.f32.gmra.mxu1 %v5396_v58  ;;  %v5322_v20 = vsel %vm1476_vm4, %v10864_v8, %v10865_v12  ;;  %v5334_v3 = vsel %vm1476_vm4, %v10889_v24, %v10890_v5  ;;  %v19820_v29 = vld [vmem:[#allocation8_spill] sm:$0xff] }
 0x66c   : > { %5742 = vmatmul.mubr.f32.gmra.mxu0 %v5394_v28  ;;  %v15980_v55 = vpop.permute.xlu0 %10872  ;;  %v5402_v11 = vmax.f32 %v15636_v38, %v5322_v20  ;;  %v5401_v56 = vmax.f32 %v15602_v17, %v5321_v46  ;;  %5887 = vmatprep.subr.mxu0 %v5574_v62  ;;  %v5632_v17 = vld [vmem:[%s19371_s5 + $0x658] sm:$0xff]  ;;  %v5323_v38 = vsel %vm1476_vm4, %v10865_v12, %v10870_v45  ;;  %v5571_v8 = vld [vmem:[%s19371_s5 + $0x470] sm:$0xff] }
 0x66d   : > { %v10875_v16 = vunpack.i.h.bf16 %v15980_v55  ;;  %v10874_v6 = vunpack.i.l.bf16 %v15980_v55  ;;  %v15994_v37 = vpop.permute.xlu1 %10897  ;;  %5993 = vmatpush1.msra.mxu1 %v5633_v60  ;;  %5888 = vmatpush1.msra.mxu0 %v5573_v15  ;;  %v5403_v20 = vmax.f32 %v15641_v33, %v5323_v38  ;;  %v5629_v60 = vld [vmem:[%s19371_s5 + $0x640] sm:$0xff] }
 0x66e   : > { %5307 = vrot.lane.b32.xlu0 %v15977_v7, %s19756_s23  ;;  %5747 = vmatprep.mubr.f32.mxu0 %v5402_v11  ;;  %v5416_v11 = vmax.f32 %v15655_v42, %v5334_v3  ;;  %v5569_v42 = vld [vmem:[%s19371_s5 + $0x460] sm:$0xff]  ;;  %v10899_v38 = vunpack.i.l.bf16 %v15994_v37 }
 0x66f   : > { %v5327_v41 = vsel %vm1476_vm4, %v10880_v14, %v10875_v16  ;;  %v5328_v25 = vsel %vm1476_vm4, %v10875_v16, %v10879_v40  ;;  %v5324_v47 = vsel %vm1476_vm4, %v10870_v45, %v10874_v6  ;;  %5994 = vmatprep.subr.mxu1 %v5632_v17  ;;  %5889 = vmatprep.subr.mxu0 %v5572_v4  ;;  %v5570_v45 = vld [vmem:[%s19371_s5 + $0x468] sm:$0xff]  ;;  %v19821_v16 = vld [vmem:[#allocation26_spill] sm:$0xff]  ;;  %v5628_v4 = vld [vmem:[%s19371_s5 + $0x638] sm:$0xff] }
 0x670   : > { %5748 = vmatmul.mubr.f32.gmra.mxu0 %v5401_v56  ;;  %v16018_v13 = vpop.permute.xlu0 %10882  ;;  %v5409_v58 = vmax.f32 %v15673_v35, %v5328_v25  ;;  %v5404_v28 = vmax.f32 %v15606_v36, %v5324_v47  ;;  %v5408_v12 = vmax.f32 %v19820_v29, %v5327_v41  ;;  %5995 = vmatpush1.msra.mxu1 %v5631_v1  ;;  %v5630_v36 = vld [vmem:[%s19371_s5 + $0x648] sm:$0xff]  ;;  %v5627_v41 = vld [vmem:[%s19371_s5 + $0x630] sm:$0xff] }
 0x671   : > { %v10885_v18 = vunpack.i.h.bf16 %v16018_v13  ;;  %v10884_v62 = vunpack.i.l.bf16 %v16018_v13  ;;  %5890 = vmatpush1.msra.mxu0 %v5571_v8  ;;  %5996 = vmatprep.subr.mxu1 %v5630_v36  ;;  %v5567_v25 = vld [vmem:[%s19371_s5 + $0x450] sm:$0xff]  ;;  %v10900_v36 = vunpack.i.h.bf16 %v15994_v37 }
 0x672   : > { %v16028_v46 = vpop.permute.xlu1 %10907  ;;  %5753 = vmatprep.mubr.f32.mxu0 %v5409_v58  ;;  %5848 = vmatprep.mubr.f32.mxu1 %v5404_v28 }
 0x673   : > { %v10910_v35 = vunpack.i.h.bf16 %v16028_v46  ;;  %v10909_v22 = vunpack.i.l.bf16 %v16028_v46  ;;  %5849 = vmatmul.mubr.f32.gmra.mxu1 %v5403_v20  ;;  %v5330_v33 = vsel %vm1476_vm4, %v10884_v62, %v10885_v18  ;;  %v5329_v56 = vsel %vm1476_vm4, %v10879_v40, %v10884_v62  ;;  %5891 = vmatprep.subr.mxu0 %v5570_v45  ;;  %v19822_v62 = vld [vmem:[#allocation14_spill] sm:$0xff] }
 0x674   : > { %5754 = vmatmul.mubr.f32.gmra.mxu0 %v5408_v12  ;;  %v10893_v15 = vpop.permute.xlu0 %10892  ;;  %v5411_v14 = vmax.f32 %v15703_v49, %v5330_v33  ;;  %v5410_v17 = vmax.f32 %v19821_v16, %v5329_v56  ;;  %v5568_v49 = vld [vmem:[%s19371_s5 + $0x458] sm:$0xff]  ;;  %5997 = vmatpush1.msra.mxu1 %v5629_v60 }
 0x675   : > { %v10895_v3 = vunpack.i.h.bf16 %v10893_v15  ;;  %v10894_v40 = vunpack.i.l.bf16 %v10893_v15  ;;  %5759 = vmatprep.mubr.f32.mxu0 %v5416_v11  ;;  %v5342_v1 = vsel %vm1476_vm4, %v10909_v22, %v10910_v35  ;;  %5892 = vmatpush1.msra.mxu0 %v5569_v42  ;;  %v5565_v11 = vld [vmem:[%s19371_s5 + $0x440] sm:$0xff] }
 0x676   : > { %5854 = vmatprep.mubr.f32.mxu1 %v5411_v14  ;;  %5998 = vmatprep.subr.mxu1 %v5628_v4  ;;  %v5621_v42 = vld [vmem:[%s19371_s5 + $0x600] sm:$0xff]  ;;  %v5559_v4 = vld [vmem:[%s19371_s5 + $0x410] sm:$0xff] }
 0x677   : > { %v5333_v47 = vsel %vm1476_vm4, %v10894_v40, %v10889_v24  ;;  %5855 = vmatmul.mubr.f32.gmra.mxu1 %v5410_v17  ;;  %v5336_v58 = vsel %vm1476_vm4, %v10895_v3, %v10899_v38  ;;  %v5335_v28 = vsel %vm1476_vm4, %v10890_v5, %v10895_v3  ;;  %5893 = vmatprep.subr.mxu0 %v5568_v49  ;;  %v5626_v24 = vld [vmem:[%s19371_s5 + $0x628] sm:$0xff]  ;;  %v5625_v5 = vld [vmem:[%s19371_s5 + $0x620] sm:$0xff]  ;;  %v5564_v17 = vld [vmem:[%s19371_s5 + $0x438] sm:$0xff]  ;;  %v19823_v49 = vmov 0.0  }
 0x678   : > { %v10903_v29 = vpop.permute.xlu0 %10902  ;;  %v5415_v12 = vmax.f32 %v15741_v10, %v5333_v47  ;;  %v5418_v8 = vmax.f32 %v15731_v54, %v5336_v58  ;;  %v5417_v20 = vmax.f32 %v19822_v62, %v5335_v28  ;;  %5999 = vmatpush1.msra.mxu1 %v5627_v41  ;;  %5894 = vmatpush1.msra.mxu0 %v5567_v25  ;;  %v5566_v10 = vld [vmem:[%s19371_s5 + $0x448] sm:$0xff]  ;;  %v5561_v3 = vld [vmem:[%s19371_s5 + $0x420] sm:$0xff]  ;;  %v5560_v40 = vld [vmem:[%s19371_s5 + $0x418] sm:$0xff] }
 0x679   : > { %v10905_v45 = vunpack.i.h.bf16 %v10903_v29  ;;  %v10904_v0 = vunpack.i.l.bf16 %v10903_v29  ;;  %v5425_v54 = vmax.f32 %v15720_v9, %v5342_v1  ;;  %6000 = vmatprep.subr.mxu1 %v5626_v24  ;;  %v5624_v9 = vld [vmem:[%s19371_s5 + $0x618] sm:$0xff]  ;;  %5895 = vmatprep.subr.mxu0 %v5566_v10  ;;  %v5558_v1 = vld [vmem:[%s19371_s5 + $0x408] sm:$0xff]  ;;  %v5557_v41 = vld [vmem:[%s19371_s5 + $0x400] sm:$0xff] }
 0x67a   : > { %5760 = vmatmul.mubr.f32.gmra.mxu0 %v5415_v12  ;;  %5860 = vmatprep.mubr.f32.mxu1 %v5418_v8  ;;  %v5620_v25 = vld [vmem:[%s19371_s5 + $0x5f8] sm:$0xff]  ;;  %v5619_v47 = vld [vmem:[%s19371_s5 + $0x5f0] sm:$0xff]  ;;  %v5618_v58 = vld [vmem:[%s19371_s5 + $0x5e8] sm:$0xff] }
 0x67b   : > { %v5339_v33 = vsel %vm1476_vm4, %v10905_v45, %v10900_v36  ;;  %5861 = vmatmul.mubr.f32.gmra.mxu1 %v5417_v20  ;;  %v5340_v56 = vsel %vm1476_vm4, %v10900_v36, %v10904_v0  ;;  %v5341_v60 = vsel %vm1476_vm4, %v10904_v0, %v10909_v22  ;;  %5896 = vmatpush1.msra.mxu0 %v5565_v11  ;;  %v5623_v22 = vld [vmem:[%s19371_s5 + $0x610] sm:$0xff]  ;;  %v5617_v28 = vld [vmem:[%s19371_s5 + $0x5e0] sm:$0xff]  ;;  %v5616_v29 = vld [vmem:[%s19371_s5 + $0x5d8] sm:$0xff] }
 0x67c   : > { %5866 = vmatprep.mubr.f32.mxu1 %v5425_v54  ;;  %v5423_v15 = vmax.f32 %v15693_v23, %v5340_v56  ;;  %v5422_v14 = vmax.f32 %v15750_v26, %v5339_v33  ;;  %v5424_v16 = vmax.f32 %v15754_v27, %v5341_v60  ;;  %6001 = vmatpush1.msra.mxu1 %v5625_v5  ;;  %v5563_v23 = vld [vmem:[%s19371_s5 + $0x430] sm:$0xff]  ;;  %v5622_v26 = vld [vmem:[%s19371_s5 + $0x608] sm:$0xff]  ;;  %v5613_v62 = vld [vmem:[%s19371_s5 + $0x5c0] sm:$0xff] }
 0x67d   : > { %6002 = vmatprep.subr.mxu1 %v5624_v9  ;;  %v5562_v27 = vld [vmem:[%s19371_s5 + $0x428] sm:$0xff]  ;;  %5897 = vmatprep.subr.mxu0 %v5564_v17  ;;  %v5615_v12 = vld [vmem:[%s19371_s5 + $0x5d0] sm:$0xff]  ;;  %v5612_v20 = vld [vmem:[%s19371_s5 + $0x5b8] sm:$0xff] }
 0x67e   : > { %5765 = vmatprep.mubr.f32.mxu0 %v5423_v15  ;;  %6003 = vmatpush1.msra.mxu1 %v5623_v22  ;;  %v5614_v8 = vld [vmem:[%s19371_s5 + $0x5c8] sm:$0xff]  ;;  %v5611_v24 = vld [vmem:[%s19371_s5 + $0x5b0] sm:$0xff]  ;;  %v5609_v45 = vld [vmem:[%s19371_s5 + $0x5a0] sm:$0xff] }
 0x67f   : > { %5766 = vmatmul.mubr.f32.gmra.mxu0 %v5422_v14  ;;  %5867 = vmatmul.mubr.f32.gmra.mxu1 %v5424_v16  ;;  %v5610_v36 = vld [vmem:[%s19371_s5 + $0x5a8] sm:$0xff]  ;;  %v5608_v0 = vld [vmem:[%s19371_s5 + $0x598] sm:$0xff]  ;;  %v5607_v10 = vld [vmem:[%s19371_s5 + $0x590] sm:$0xff] }
 0x680   : > { %5898 = vmatpush1.msra.mxu0 %v5563_v23  ;;  %6004 = vmatprep.subr.mxu1 %v5622_v26  ;;  %v5606_v54 = vld [vmem:[%s19371_s5 + $0x588] sm:$0xff]  ;;  %v5605_v5 = vld [vmem:[%s19371_s5 + $0x580] sm:$0xff]  ;;  %v5604_v11 = vld [vmem:[%s19371_s5 + $0x578] sm:$0xff] }
 0x681   : > { %5899 = vmatprep.subr.mxu0 %v5562_v27  ;;  %6005 = vmatpush1.msra.mxu1 %v5621_v42  ;;  %v5603_v33 = vld [vmem:[%s19371_s5 + $0x570] sm:$0xff]  ;;  %v5602_v56 = vld [vmem:[%s19371_s5 + $0x568] sm:$0xff]  ;;  %v5601_v60 = vld [vmem:[%s19371_s5 + $0x560] sm:$0xff] }
 0x682   : > { %6038 = vmatprep.mubr.f32.mxu1 %v19823_v49  ;;  %5900 = vmatpush1.msra.mxu0 %v5561_v3  ;;  %v5600_v9 = vld [vmem:[%s19371_s5 + $0x558] sm:$0xff]  ;;  %v5599_v15 = vld [vmem:[%s19371_s5 + $0x550] sm:$0xff]  ;;  %v5598_v14 = vld [vmem:[%s19371_s5 + $0x548] sm:$0xff] }
 0x683   : > { %5901 = vmatprep.subr.mxu0 %v5560_v40  ;;  %v5597_v16 = vld [vmem:[%s19371_s5 + $0x540] sm:$0xff]  ;;  %v5596_v17 = vld [vmem:[%s19371_s5 + $0x538] sm:$0xff]  ;;  %v5595_v22 = vld [vmem:[%s19371_s5 + $0x530] sm:$0xff] }
 0x684   : > { %5902 = vmatpush1.msra.mxu0 %v5559_v4  ;;  %v5594_v23 = vld [vmem:[%s19371_s5 + $0x528] sm:$0xff]  ;;  %v5593_v26 = vld [vmem:[%s19371_s5 + $0x520] sm:$0xff]  ;;  %v5592_v27 = vld [vmem:[%s19371_s5 + $0x518] sm:$0xff] }
 0x685   : > { %5903 = vmatprep.subr.mxu0 %v5558_v1  ;;  %v5591_v42 = vld [vmem:[%s19371_s5 + $0x510] sm:$0xff]  ;;  %v5590_v3 = vld [vmem:[%s19371_s5 + $0x508] sm:$0xff]  ;;  %v5589_v4 = vld [vmem:[%s19371_s5 + $0x500] sm:$0xff] }
 0x686   : > { %5904 = vmatpush1.msra.mxu0 %v5557_v41 }
 0x687   : > { %5905 = vmatprep.subr.mxu0 %v5620_v25 }
 0x688   : > { %5906 = vmatpush2.msra.mxu0 %v5619_v47 }
 0x689   : > { %5907 = vmatprep.subr.mxu0 %v5618_v58 }
 0x68a   : > { %5908 = vmatpush2.msra.mxu0 %v5617_v28 }
 0x68b   : > { %5909 = vmatprep.subr.mxu0 %v5616_v29  ;;  %v19824_v29 = vld [vmem:[#allocation11_spill] sm:$0xff] }
 0x68c   : > { %5910 = vmatpush2.msra.mxu0 %v5615_v12 }
 0x68d   : > { %5911 = vmatprep.subr.mxu0 %v5614_v8 }
 0x68e   : > { %5912 = vmatpush2.msra.mxu0 %v5613_v62 }
 0x68f   : > { %5913 = vmatprep.subr.mxu0 %v5612_v20 }
 0x690   : > { %5914 = vmatpush2.msra.mxu0 %v5611_v24 }
 0x691   : > { %5915 = vmatprep.subr.mxu0 %v5610_v36 }
 0x692   : > { %5916 = vmatpush2.msra.mxu0 %v5609_v45 }
 0x693   : > { %5917 = vmatprep.subr.mxu0 %v5608_v0 }
 0x694   : > { %5918 = vmatpush2.msra.mxu0 %v5607_v10 }
 0x695   : > { %5919 = vmatprep.subr.mxu0 %v5606_v54 }
 0x696   : > { %5920 = vmatpush2.msra.mxu0 %v5605_v5 }
 0x697   : > { %5921 = vmatprep.subr.mxu0 %v5604_v11 }
 0x698   : > { %5922 = vmatpush2.msra.mxu0 %v5603_v33 }
 0x699   : > { %5923 = vmatprep.subr.mxu0 %v5602_v56 }
 0x69a   : > { %5924 = vmatpush2.msra.mxu0 %v5601_v60 }
 0x69b   : > { %5925 = vmatprep.subr.mxu0 %v5600_v9 }
 0x69c   : > { %5926 = vmatpush2.msra.mxu0 %v5599_v15 }
 0x69d   : > { %5927 = vmatprep.subr.mxu0 %v5598_v14 }
 0x69e   : > { %5928 = vmatpush2.msra.mxu0 %v5597_v16 }
 0x69f   : > { %5929 = vmatprep.subr.mxu0 %v5596_v17 }
 0x6a0   : > { %5930 = vmatpush2.msra.mxu0 %v5595_v22 }
 0x6a1   : > { %5931 = vmatprep.subr.mxu0 %v5594_v23 }
 0x6a2   : > { %5932 = vmatpush2.msra.mxu0 %v5593_v26 }
 0x6a3   : > { %v5238_v40 = vpop.permute.xlu1 %5237  ;;  %5933 = vmatprep.subr.mxu0 %v5592_v27 }
 0x6a4   : > { %v5393_v1 = vmax.f32 %v15770_v43, %v5238_v40  ;;  %5934 = vmatpush2.msra.mxu0 %v5591_v42 }
 0x6a5   : > { %5935 = vmatprep.subr.mxu0 %v5590_v3 }
 0x6a6   : > { %9996 = vmatmul.mubr.msk.f32.vlgmr.msra.gmra.mxu1 %vm5645_vm9, %v5393_v1  ;;  %5936 = vmatpush2.msra.mxu0 %v5589_v4 }
 0x6a7   : > { %6044 = vmatprep.mubr.f32.mxu1 %v19823_v49 }
 0x6d0   : > { %v10913_v41 = vpop.permute.xlu0 %10912 }
 0x6d1   : > { %v10914_v25 = vunpack.i.l.bf16 %v10913_v41  ;;  %v10915_v47 = vunpack.i.h.bf16 %v10913_v41 }
 0x6d3   : > { %v5313_v58 = vsel %vm1476_vm4, %v10849_v59, %v10914_v25  ;;  %v5314_v28 = vsel %vm1476_vm4, %v10914_v25, %v5238_v40  ;;  %v5319_v36 = vsel %vm1476_vm4, %v10860_v39, %v10915_v47 }
 0x6d4   : > { %v5391_v12 = vmax.f32 %v19824_v29, %v5313_v58  ;;  %v5252_v8 = vpop.permute.xlu0 %5251  ;;  %v10918_v43 = vpop.permute.xlu1 %10917  ;;  %v5392_v62 = vmax.f32 %v15805_v34, %v5314_v28  ;;  %v5398_v54 = vmax.f32 %v19825_v52, %v5319_v36 }
 0x6d5   : > { %v5320_v20 = vsel %vm1476_vm4, %v10915_v47, %v5252_v8  ;;  %v5400_v24 = vmax.f32 %v15864_v2, %v5252_v8  ;;  %v10919_v45 = vunpack.i.l.bf16 %v10918_v43  ;;  %v10920_v34 = vunpack.i.h.bf16 %v10918_v43 }
 0x6d6   : > { %5937 = vmatprep.mubr.f32.mxu0 %v5392_v62  ;;  %v5399_v50 = vmax.f32 %v15809_v48, %v5320_v20 }
 0x6d7   : > { %5938 = vmatmul.mubr.f32.vlgmr.msra.gmra.mxu0 %v5391_v12  ;;  %9997 = vmatmul.mubr.msk.f32.gmra.mxu1 %vm5645_vm9, %v5400_v24  ;;  %v5325_v39 = vsel %vm1476_vm4, %v10874_v6, %v10919_v45  ;;  %v5331_v55 = vsel %vm1476_vm4, %v10885_v18, %v10920_v34 }
 0x6d8   : > { %v5266_v59 = vpop.permute.xlu0 %5265  ;;  %v5280_v0 = vpop.permute.xlu1 %5279  ;;  %5943 = vmatprep.mubr.f32.mxu0 %v5399_v50  ;;  %6050 = vmatprep.mubr.f32.mxu1 %v19823_v49  ;;  %v5405_v56 = vmax.f32 %v15669_v32, %v5325_v39  ;;  %v5412_v32 = vmax.f32 %v15707_v21, %v5331_v55 }
 0x6d9   : > { %v5326_v10 = vsel %vm1476_vm4, %v10919_v45, %v5266_v59  ;;  %v5407_v2 = vmax.f32 %v15908_v57, %v5266_v59  ;;  %v5332_v5 = vsel %vm1476_vm4, %v10920_v34, %v5280_v0  ;;  %v5414_v33 = vmax.f32 %v15916_v61, %v5280_v0 }
 0x6da   : > { %v5406_v48 = vmax.f32 %v15849_v51, %v5326_v10  ;;  %v5413_v51 = vmax.f32 %v15853_v30, %v5332_v5 }
 0x6db   : > { %5944 = vmatmul.mubr.f32.gmra.mxu0 %v5398_v54  ;;  %9998 = vmatmul.mubr.msk.f32.gmra.mxu1 %vm5645_vm9, %v5407_v2 }
 0x6dc   : > { %v10923_v11 = vpop.permute.xlu0 %10922  ;;  %5949 = vmatprep.mubr.f32.mxu0 %v5406_v48  ;;  %6056 = vmatprep.mubr.f32.mxu1 %v19823_v49  ;;  %v5294_v6 = vpop.permute.xlu1 %5293 }
 0x6dd   : > { %v10924_v57 = vunpack.i.l.bf16 %v10923_v11  ;;  %v10925_v61 = vunpack.i.h.bf16 %v10923_v11  ;;  %v5421_v15 = vmax.f32 %v15936_v53, %v5294_v6 }
 0x6df   : > { %v5338_v60 = vsel %vm1476_vm4, %v10924_v57, %v5294_v6  ;;  %5950 = vmatmul.mubr.f32.gmra.mxu0 %v5405_v56  ;;  %9999 = vmatmul.mubr.msk.f32.gmra.mxu1 %vm5645_vm9, %v5414_v33  ;;  %v5337_v13 = vsel %vm1476_vm4, %v10899_v38, %v10924_v57  ;;  %v5343_v21 = vsel %vm1476_vm4, %v10910_v35, %v10925_v61 }
 0x6e0   : > { %v5308_v9 = vpop.permute.xlu0 %5307  ;;  %5955 = vmatprep.mubr.f32.mxu0 %v5413_v51  ;;  %6062 = vmatprep.mubr.f32.mxu1 %v19823_v49  ;;  %v5420_v30 = vmax.f32 %v15912_v44, %v5338_v60  ;;  %v5419_v53 = vmax.f32 %v15689_v31, %v5337_v13  ;;  %v5426_v44 = vmax.f32 %v15724_v63, %v5343_v21 }
 0x6e1   : > { %v5344_v18 = vsel %vm1476_vm4, %v10925_v61, %v5308_v9  ;;  %v5428_v14 = vmax.f32 %v15977_v7, %v5308_v9 }
 0x6e2   : > { %v5427_v37 = vmax.f32 %v15894_v19, %v5344_v18 }
 0x6e3   : > { %5956 = vmatmul.mubr.f32.gmra.mxu0 %v5412_v32  ;;  %10000 = vmatmul.mubr.msk.f32.gmra.mxu1 %vm5645_vm9, %v5421_v15 }
 0x6e4   : > { %5961 = vmatprep.mubr.f32.mxu0 %v5420_v30  ;;  %6068 = vmatprep.mubr.f32.mxu1 %v19823_v49 }
 0x6e7   : > { %5962 = vmatmul.mubr.f32.gmra.mxu0 %v5419_v53  ;;  %10001 = vmatmul.mubr.msk.f32.gmra.mxu1 %vm5645_vm9, %v5428_v14 }
 0x6e8   : > { %5967 = vmatprep.mubr.f32.mxu0 %v5427_v37 }
 0x6eb   : > { %5968 = vmatmul.mubr.f32.gmra.mxu0 %v5426_v44 }
 0x71a   : > { %v5737_v17 = vpop.f32.mrf.mxu0 }
 0x71b   : > { %v5838_v38 = vpop.f32.mrf.mxu1 }
 0x71c   : > { %v5739_v7 = vpop.f32.mrf.mxu0  ;;  %v5839_v43 = vadd.f32 %v5838_v38, %v5737_v17 }
 0x71d   : > { %v5840_v16 = vpop.f32.mrf.mxu1 }
 0x71e   : > { %v5841_v24 = vadd.f32 %v5840_v16, %v5739_v7 }
 0x72b   : > { %v5844_v22 = vpop.f32.mrf.mxu1 }
 0x72c   : > { %v5743_v31 = vpop.f32.mrf.mxu0 }
 0x72d   : > { %v5846_v23 = vpop.f32.mrf.mxu1  ;;  %v5845_v59 = vadd.f32 %v5844_v22, %v5743_v31 }
 0x72e   : > { %v5745_v46 = vpop.f32.mrf.mxu0 }
 0x72f   : > { %v5847_v52 = vadd.f32 %v5846_v23, %v5745_v46 }
 0x730   : > { %v5749_v35 = vpop.f32.mrf.mxu0 }
 0x732   : > { %v5751_v19 = vpop.f32.mrf.mxu0 }
 0x733   : > { %v5850_v26 = vpop.f32.mrf.mxu1 }
 0x734   : > { %v5755_v40 = vpop.f32.mrf.mxu0  ;;  %v5851_v11 = vadd.f32 %v5850_v26, %v5749_v35 }
 0x735   : > { %v5852_v27 = vpop.f32.mrf.mxu1 }
 0x736   : > { %v5757_v1 = vpop.f32.mrf.mxu0  ;;  %v5853_v6 = vadd.f32 %v5852_v27, %v5751_v19 }
 0x737   : > { %v5856_v42 = vpop.f32.mrf.mxu1 }
 0x738   : > { %v5857_v15 = vadd.f32 %v5856_v42, %v5755_v40 }
 0x739   : > { %v5858_v3 = vpop.f32.mrf.mxu1 }
 0x73a   : > { %v5761_v63 = vpop.f32.mrf.mxu0  ;;  %v5859_v14 = vadd.f32 %v5858_v3, %v5757_v1 }
 0x73b   : > { %v5862_v4 = vpop.f32.mrf.mxu1 }
 0x73c   : > { %v5763_v47 = vpop.f32.mrf.mxu0  ;;  %v5863_v44 = vadd.f32 %v5862_v4, %v5761_v63 }
 0x73d   : > { %v16286_v41 = vpop.f32.mrf.mxu1 }
 0x73e   : > { %v5865_v7 = vadd.f32 %v16286_v41, %v5763_v47 }
 0x73f   : > { %v16288_v25 = vpop.f32.mrf.mxu1  ;;  %v16292_v28 = vpop.f32.mrf.mxu0 }
 0x740   : > { %v5869_v46 = vadd.f32 %v16288_v25, %v16292_v28 }
 0x741   : > { %v16290_v58 = vpop.f32.mrf.mxu1  ;;  %v16294_v12 = vpop.f32.mrf.mxu0 }
 0x742   : > { %v5871_v3 = vadd.f32 %v16290_v58, %v16294_v12 }
 0x766   : > { %v6040_v29 = vpop.f32.mrf.mxu1 }
 0x768   : > { %v6042_v8 = vpop.f32.mrf.mxu1 }
 0x797   : > { %v5939_v62 = vpop.f32.mrf.mxu0  ;;  %v6046_v20 = vpop.f32.mrf.mxu1 }
 0x798   : > { %v5940_v36 = vadd.f32 %v5939_v62, %v5839_v43 }
 0x799   : > { %v5941_v45 = vpop.f32.mrf.mxu0  ;;  %v6048_v50 = vpop.f32.mrf.mxu1 }
 0x79a   : > { %v16296_v0 = vadd.f32 %v6040_v29, %v5940_v36  ;;  %v5942_v34 = vadd.f32 %v5941_v45, %v5841_v24 }
 0x79b   : > { %v5945_v10 = vpop.f32.mrf.mxu0  ;;  %v6052_v2 = vpop.f32.mrf.mxu1 }
 0x79c   : > { %6075 = vst [vmem:[#allocation3] sm:$0xff] %v16296_v0  ;;  %v6043_v54 = vadd.f32 %v6042_v8, %v5942_v34  ;;  %v5946_v39 = vadd.f32 %v5945_v10, %v5845_v59  ;;  %6154 = vrot.lane.b32.xlu1 %v16296_v0, %s19826_s21 }
 0x79d   : > { %v5947_v48 = vpop.f32.mrf.mxu0  ;;  %v6054_v5 = vpop.f32.mrf.mxu1 }
 0x79e   : > { %6077 = vst.msk [vmem:[#allocation3 + $0x8] sm:$0xff] %vm6076_vm10, %v6043_v54  ;;  %v16302_v33 = vadd.f32 %v6046_v20, %v5946_v39  ;;  %v5948_v57 = vadd.f32 %v5947_v48, %v5847_v52  ;;  %6156 = vrot.lane.b32.xlu0 %v6043_v54, %s19826_s21 }
 0x79f   : > { %v5951_v56 = vpop.f32.mrf.mxu0  ;;  %v6058_v55 = vpop.f32.mrf.mxu1 }
 0x7a0   : > { %6078 = vst [vmem:[#allocation3 + $0x10] sm:$0xff] %v16302_v33  ;;  %v6049_v51 = vadd.f32 %v6048_v50, %v5948_v57  ;;  %v5952_v60 = vadd.f32 %v5951_v56, %v5851_v11  ;;  %6100 = vrot.lane.b32.xlu1 %v16296_v0, %s19757_s15 }
 0x7a1   : > { %v5953_v9 = vpop.f32.mrf.mxu0  ;;  %v6060_v61 = vpop.f32.mrf.mxu1 }
 0x7a2   : > { %6079 = vst.msk [vmem:[#allocation3 + $0x18] sm:$0xff] %vm6076_vm10, %v6049_v51  ;;  %v16309_v32 = vadd.f32 %v6052_v2, %v5952_v60  ;;  %v5954_v13 = vadd.f32 %v5953_v9, %v5853_v6  ;;  %6102 = vrot.lane.b32.xlu0 %v6043_v54, %s19757_s15 }
 0x7a3   : > { %v5957_v30 = vpop.f32.mrf.mxu0  ;;  %v6064_v18 = vpop.f32.mrf.mxu1 }
 0x7a4   : > { %6080 = vst [vmem:[#allocation3 + $0x20] sm:$0xff] %v16309_v32  ;;  %v6055_v53 = vadd.f32 %v6054_v5, %v5954_v13  ;;  %v5958_v21 = vadd.f32 %v5957_v30, %v5857_v15  ;;  %6262 = vrot.lane.b32.xlu1 %v16296_v0, %s19827_s1 }
 0x7a5   : > { %v5959_v37 = vpop.f32.mrf.mxu0  ;;  %v6066_v17 = vpop.f32.mrf.mxu1  ;;  %v16363_v58 = vld [vmem:[#allocation3 + $0x8] sm:$0xff] }
 0x7a6   : > { %6081 = vst.msk [vmem:[#allocation3 + $0x28] sm:$0xff] %vm6076_vm10, %v6055_v53  ;;  %v16316_v38 = vadd.f32 %v6058_v55, %v5958_v21  ;;  %v5960_v16 = vadd.f32 %v5959_v37, %v5859_v14  ;;  %6264 = vrot.lane.b32.xlu0 %v6043_v54, %s19827_s1 }
 0x7a7   : > { %v5963_v22 = vpop.f32.mrf.mxu0  ;;  %v6070_v42 = vpop.f32.mrf.mxu1 }
 0x7a8   : > { %6082 = vst [vmem:[#allocation3 + $0x30] sm:$0xff] %v16316_v38  ;;  %v6061_v23 = vadd.f32 %v6060_v61, %v5960_v16  ;;  %v5964_v31 = vadd.f32 %v5963_v22, %v5863_v44  ;;  %6208 = vrot.lane.b32.xlu1 %v16296_v0, %s19828_s2 }
 0x7a9   : > { %v5965_v26 = vpop.f32.mrf.mxu0  ;;  %v6072_v25 = vpop.f32.mrf.mxu1  ;;  %v16385_v28 = vld [vmem:[#allocation3 + $0x18] sm:$0xff] }
 0x7aa   : > { %6083 = vst.msk [vmem:[#allocation3 + $0x38] sm:$0xff] %vm6076_vm10, %v6061_v23  ;;  %v16326_v27 = vadd.f32 %v6064_v18, %v5964_v31  ;;  %v5966_v35 = vadd.f32 %v5965_v26, %v5865_v7  ;;  %6210 = vrot.lane.b32.xlu0 %v6043_v54, %s19828_s2 }
 0x7ab   : > { %v5969_v19 = vpop.f32.mrf.mxu0 }
 0x7ac   : > { %6084 = vst [vmem:[#allocation3 + $0x40] sm:$0xff] %v16326_v27  ;;  %v6067_v40 = vadd.f32 %v6066_v17, %v5966_v35  ;;  %v5970_v4 = vadd.f32 %v5969_v19, %v5869_v46  ;;  %6158 = vrot.lane.b32.xlu1 %v16302_v33, %s19826_s21 }
 0x7ad   : > { %v5971_v1 = vpop.f32.mrf.mxu0  ;;  %v16407_v29 = vld [vmem:[#allocation3 + $0x28] sm:$0xff] }
 0x7ae   : > { %6085 = vst.msk [vmem:[#allocation3 + $0x48] sm:$0xff] %vm6076_vm10, %v6067_v40  ;;  %v16335_v41 = vadd.f32 %v6070_v42, %v5970_v4  ;;  %v5972_v63 = vadd.f32 %v5971_v1, %v5871_v3  ;;  %6160 = vrot.lane.b32.xlu0 %v6049_v51, %s19826_s21 }
 0x7b0   : > { %6086 = vst [vmem:[#allocation3 + $0x50] sm:$0xff] %v16335_v41  ;;  %v6073_v47 = vadd.f32 %v6072_v25, %v5972_v63  ;;  %6104 = vrot.lane.b32.xlu1 %v16302_v33, %s19757_s15 }
 0x7b1   : > { %v16437_v36 = vld [vmem:[#allocation3 + $0x38] sm:$0xff] }
 0x7b2   : > { %6087 = vst.msk [vmem:[#allocation3 + $0x58] sm:$0xff] %vm6076_vm10, %v6073_v47  ;;  %6106 = vrot.lane.b32.xlu0 %v6049_v51, %s19757_s15 }
 0x7b4   : > { %6266 = vrot.lane.b32.xlu1 %v16302_v33, %s19827_s1 }
 0x7b5   : > { %v16456_v52 = vld [vmem:[#allocation3 + $0x48] sm:$0xff] }
 0x7b6   : > { %6268 = vrot.lane.b32.xlu0 %v6049_v51, %s19827_s1 }
 0x7b8   : > { %6212 = vrot.lane.b32.xlu1 %v16302_v33, %s19828_s2 }
 0x7b9   : > { %v16475_v56 = vld [vmem:[#allocation3 + $0x58] sm:$0xff] }
 0x7ba   : > { %6214 = vrot.lane.b32.xlu0 %v6049_v51, %s19828_s2 }
 0x7bc   : > { %6162 = vrot.lane.b32.xlu1 %v16309_v32, %s19826_s21 }
 0x7be   : > { %6164 = vrot.lane.b32.xlu0 %v6055_v53, %s19826_s21 }
 0x7c0   : > { %6108 = vrot.lane.b32.xlu1 %v16309_v32, %s19757_s15 }
 0x7c2   : > { %6110 = vrot.lane.b32.xlu0 %v6055_v53, %s19757_s15 }
 0x7c4   : > { %6270 = vrot.lane.b32.xlu1 %v16309_v32, %s19827_s1 }
 0x7c6   : > { %6272 = vrot.lane.b32.xlu0 %v6055_v53, %s19827_s1 }
 0x7c8   : > { %6216 = vrot.lane.b32.xlu1 %v16309_v32, %s19828_s2 }
 0x7ca   : > { %6218 = vrot.lane.b32.xlu0 %v6055_v53, %s19828_s2 }
 0x7cc   : > { %6501 = vrot.lane.b32.xlu1 %v16296_v0, %s11430_s20 }
 0x7ce   : > { %6503 = vrot.lane.b32.xlu0 %v16363_v58, %s11430_s20 }
 0x7d0   : > { %7162 = vrot.lane.b32.xlu1 %v16296_v0, %s19756_s23 }
 0x7d2   : > { %7164 = vrot.lane.b32.xlu0 %v16363_v58, %s19756_s23 }
 0x7d4   : > { %6166 = vrot.lane.b32.xlu1 %v16316_v38, %s19826_s21 }
 0x7d6   : > { %6168 = vrot.lane.b32.xlu0 %v6061_v23, %s19826_s21 }
 0x7d8   : > { %6112 = vrot.lane.b32.xlu1 %v16316_v38, %s19757_s15 }
 0x7da   : > { %6114 = vrot.lane.b32.xlu0 %v6061_v23, %s19757_s15 }
 0x7dc   : > { %6274 = vrot.lane.b32.xlu1 %v16316_v38, %s19827_s1 }
 0x7de   : > { %6276 = vrot.lane.b32.xlu0 %v6061_v23, %s19827_s1 }
 0x7e0   : > { %6220 = vrot.lane.b32.xlu1 %v16316_v38, %s19828_s2 }
 0x7e2   : > { %6222 = vrot.lane.b32.xlu0 %v6061_v23, %s19828_s2 }
 0x7e4   : > { %6505 = vrot.lane.b32.xlu1 %v16302_v33, %s11430_s20 }
 0x7e6   : > { %6507 = vrot.lane.b32.xlu0 %v16385_v28, %s11430_s20 }
 0x7e8   : > { %7166 = vrot.lane.b32.xlu1 %v16302_v33, %s19756_s23 }
 0x7ea   : > { %7168 = vrot.lane.b32.xlu0 %v16385_v28, %s19756_s23 }
 0x7ec   : > { %6116 = vrot.lane.b32.xlu1 %v16326_v27, %s19757_s15 }
 0x7ee   : > { %6118 = vrot.lane.b32.xlu0 %v6067_v40, %s19757_s15 }
 0x7f0   : > { %6278 = vrot.lane.b32.xlu1 %v16326_v27, %s19827_s1 }
 0x7f2   : > { %6280 = vrot.lane.b32.xlu0 %v6067_v40, %s19827_s1 }
 0x7f4   : > { %6224 = vrot.lane.b32.xlu1 %v16326_v27, %s19828_s2 }
 0x7f6   : > { %6226 = vrot.lane.b32.xlu0 %v6067_v40, %s19828_s2 }
 0x7f8   : > { %6170 = vrot.lane.b32.xlu1 %v16326_v27, %s19826_s21 }
 0x7fa   : > { %6172 = vrot.lane.b32.xlu0 %v6067_v40, %s19826_s21 }
 0x7fc   : > { %6509 = vrot.lane.b32.xlu1 %v16309_v32, %s11430_s20 }
 0x7fe   : > { %6511 = vrot.lane.b32.xlu0 %v16407_v29, %s11430_s20 }
 0x800   : > { %7170 = vrot.lane.b32.xlu1 %v16309_v32, %s19756_s23 }
 0x802   : > { %7172 = vrot.lane.b32.xlu0 %v16407_v29, %s19756_s23 }
 0x804   : > { %6120 = vrot.lane.b32.xlu1 %v16335_v41, %s19757_s15 }
 0x806   : > { %6122 = vrot.lane.b32.xlu0 %v6073_v47, %s19757_s15 }
 0x808   : > { %6282 = vrot.lane.b32.xlu1 %v16335_v41, %s19827_s1 }
 0x80a   : > { %6284 = vrot.lane.b32.xlu0 %v6073_v47, %s19827_s1  ;;  %s11433_s1 = smov [#allocation4]  }
 0x80b   : > { %s11363_s29 = sshll.u32 %s11433_s1, 4  ;;  %s11364_s29 = int_to_ptr.vmem [resolvable:$false] %s11363_s29 }
 0x80c   : > { %6228 = vrot.lane.b32.xlu1 %v16335_v41, %s19828_s2 }
 0x80e   : > { %v6155_v12 = vpop.permute.xlu1 %6154  ;;  %6230 = vrot.lane.b32.xlu0 %v6073_v47, %s19828_s2 }
 0x810   : > { %v6157_v8 = vpop.permute.xlu0 %6156  ;;  %6174 = vrot.lane.b32.xlu1 %v16335_v41, %s19826_s21 }
 0x811   : > { %v16427_v43 = vsel %vm678_vm2, %v6155_v12, %v6157_v8  ;;  %6197 = vst.msk [vmem:[#allocation3 + $0xc8] sm:$0xff] %vm6076_vm10, %v6157_v8 }
 0x812   : > { %v6101_v62 = vpop.permute.xlu1 %6100  ;;  %6176 = vrot.lane.b32.xlu0 %v6073_v47, %s19826_s21 }
 0x814   : > { %v6103_v20 = vpop.permute.xlu0 %6102  ;;  %6513 = vrot.lane.b32.xlu1 %v16316_v38, %s11430_s20 }
 0x815   : > { %v16434_v24 = vsel %vm560_vm3, %v6101_v62, %v6103_v20  ;;  %6143 = vst.msk [vmem:[#allocation3 + $0x68] sm:$0xff] %vm6076_vm10, %v6103_v20 }
 0x816   : > { %v6263_v45 = vpop.permute.xlu1 %6262  ;;  %6515 = vrot.lane.b32.xlu0 %v16437_v36, %s11430_s20 }
 0x818   : > { %v6265_v50 = vpop.permute.xlu0 %6264  ;;  %7174 = vrot.lane.b32.xlu1 %v16316_v38, %s19756_s23  ;;  %v16494_v15 = vld [vmem:[#allocation3 + $0xc8] sm:$0xff] }
 0x819   : > { %v16444_v59 = vsel %vm470_vm0, %v6263_v45, %v6265_v50  ;;  %6305 = vst.msk [vmem:[#allocation3 + $0x188] sm:$0xff] %vm6076_vm10, %v6265_v50 }
 0x81a   : > { %6304 = vst [vmem:[#allocation3 + $0x180] sm:$0xff] %v16444_v59  ;;  %v6209_v34 = vpop.permute.xlu1 %6208  ;;  %7176 = vrot.lane.b32.xlu0 %v16437_v36, %s19756_s23 }
 0x81c   : > { %v6211_v10 = vpop.permute.xlu0 %6210  ;;  %6517 = vrot.lane.b32.xlu1 %v16326_v27, %s11430_s20  ;;  %v16505_v14 = vld [vmem:[#allocation3 + $0x68] sm:$0xff] }
 0x81d   : > { %v16453_v2 = vsel %vm796_vm1, %v6209_v34, %v6211_v10  ;;  %6251 = vst.msk [vmem:[#allocation3 + $0x128] sm:$0xff] %vm6076_vm10, %v6211_v10 }
 0x81e   : > { %6250 = vst [vmem:[#allocation3 + $0x120] sm:$0xff] %v16453_v2  ;;  %v6159_v54 = vpop.permute.xlu1 %6158  ;;  %6519 = vrot.lane.b32.xlu0 %v16456_v52, %s11430_s20 }
 0x820   : > { %v6161_v39 = vpop.permute.xlu0 %6160  ;;  %7178 = vrot.lane.b32.xlu1 %v16326_v27, %s19756_s23  ;;  %v16515_v44 = vld [vmem:[#allocation3 + $0x188] sm:$0xff] }
 0x821   : > { %v16464_v48 = vsel %vm678_vm2, %v6159_v54, %v6161_v39  ;;  %6199 = vst.msk [vmem:[#allocation3 + $0xd8] sm:$0xff] %vm6076_vm10, %v6161_v39 }
 0x822   : > { %v6105_v5 = vpop.permute.xlu1 %6104  ;;  %7180 = vrot.lane.b32.xlu0 %v16456_v52, %s19756_s23 }
 0x824   : > { %v6107_v11 = vpop.permute.xlu0 %6106  ;;  %6521 = vrot.lane.b32.xlu1 %v16335_v41, %s11430_s20  ;;  %v16525_v7 = vld [vmem:[#allocation3 + $0x128] sm:$0xff] }
 0x825   : > { %v16472_v57 = vsel %vm560_vm3, %v6105_v5, %v6107_v11  ;;  %6145 = vst.msk [vmem:[#allocation3 + $0x78] sm:$0xff] %vm6076_vm10, %v6107_v11 }
 0x826   : > { %v6267_v55 = vpop.permute.xlu1 %6266  ;;  %6523 = vrot.lane.b32.xlu0 %v16475_v56, %s11430_s20 }
 0x828   : > { %v6269_v6 = vpop.permute.xlu0 %6268  ;;  %7182 = vrot.lane.b32.xlu1 %v16335_v41, %s19756_s23  ;;  %v16569_v47 = vld [vmem:[#allocation3 + $0xd8] sm:$0xff] }
 0x829   : > { %v16482_v51 = vsel %vm470_vm0, %v6267_v55, %v6269_v6  ;;  %6307 = vst.msk [vmem:[#allocation3 + $0x198] sm:$0xff] %vm6076_vm10, %v6269_v6 }
 0x82a   : > { %6306 = vst [vmem:[#allocation3 + $0x190] sm:$0xff] %v16482_v51  ;;  %v6213_v60 = vpop.permute.xlu1 %6212  ;;  %7184 = vrot.lane.b32.xlu0 %v16475_v56, %s19756_s23 }
 0x82c   : > { %v6215_v9 = vpop.permute.xlu0 %6214  ;;  %6549 = vrot.lane.b32.xlu1 %v16427_v43, %s11430_s20  ;;  %v16582_v45 = vld [vmem:[#allocation3 + $0x78] sm:$0xff] }
 0x82d   : > { %v16491_v61 = vsel %vm796_vm1, %v6213_v60, %v6215_v9  ;;  %6253 = vst.msk [vmem:[#allocation3 + $0x138] sm:$0xff] %vm6076_vm10, %v6215_v9 }
 0x82e   : > { %6252 = vst [vmem:[#allocation3 + $0x130] sm:$0xff] %v16491_v61  ;;  %v6163_v13 = vpop.permute.xlu1 %6162  ;;  %6551 = vrot.lane.b32.xlu0 %v16494_v15, %s11430_s20 }
 0x830   : > { %v6165_v30 = vpop.permute.xlu0 %6164  ;;  %6525 = vrot.lane.b32.xlu1 %v16434_v24, %s11430_s20  ;;  %v16599_v39 = vld [vmem:[#allocation3 + $0x198] sm:$0xff] }
 0x831   : > { %v16502_v18 = vsel %vm678_vm2, %v6163_v13, %v6165_v30  ;;  %6201 = vst.msk [vmem:[#allocation3 + $0xe8] sm:$0xff] %vm6076_vm10, %v6165_v30 }
 0x832   : > { %v6109_v53 = vpop.permute.xlu1 %6108  ;;  %6527 = vrot.lane.b32.xlu0 %v16505_v14, %s11430_s20 }
 0x834   : > { %v6111_v21 = vpop.permute.xlu0 %6110  ;;  %6597 = vrot.lane.b32.xlu1 %v16444_v59, %s11430_s20  ;;  %v16613_v55 = vld [vmem:[#allocation3 + $0x138] sm:$0xff] }
 0x835   : > { %v16512_v37 = vsel %vm560_vm3, %v6109_v53, %v6111_v21  ;;  %6147 = vst.msk [vmem:[#allocation3 + $0x88] sm:$0xff] %vm6076_vm10, %v6111_v21 }
 0x836   : > { %v6271_v16 = vpop.permute.xlu1 %6270  ;;  %6599 = vrot.lane.b32.xlu0 %v16515_v44, %s11430_s20 }
 0x838   : > { %v6273_v17 = vpop.permute.xlu0 %6272  ;;  %6573 = vrot.lane.b32.xlu1 %v16453_v2, %s11430_s20  ;;  %v16588_v34 = vld [vmem:[#allocation3 + $0xe8] sm:$0xff] }
 0x839   : > { %v16522_v22 = vsel %vm470_vm0, %v6271_v16, %v6273_v17  ;;  %6309 = vst.msk [vmem:[#allocation3 + $0x1a8] sm:$0xff] %vm6076_vm10, %v6273_v17 }
 0x83a   : > { %6308 = vst [vmem:[#allocation3 + $0x1a0] sm:$0xff] %v16522_v22  ;;  %v6217_v23 = vpop.permute.xlu1 %6216  ;;  %6575 = vrot.lane.b32.xlu0 %v16525_v7, %s11430_s20 }
 0x83c   : > { %v6219_v31 = vpop.permute.xlu0 %6218  ;;  %7210 = vrot.lane.b32.xlu1 %v16427_v43, %s19756_s23 }
 0x83d   : > { %v16533_v26 = vsel %vm796_vm1, %v6217_v23, %v6219_v31  ;;  %6255 = vst.msk [vmem:[#allocation3 + $0x148] sm:$0xff] %vm6076_vm10, %v6219_v31 }
 0x83e   : > { %6254 = vst [vmem:[#allocation3 + $0x140] sm:$0xff] %v16533_v26  ;;  %v16537_v46 = vpop.permute.xlu1 %6501  ;;  %7212 = vrot.lane.b32.xlu0 %v16494_v15, %s19756_s23 }
 0x840   : > { %v16541_v35 = vpop.permute.xlu0 %6503  ;;  %7186 = vrot.lane.b32.xlu1 %v16434_v24, %s19756_s23 }
 0x842   : > { %v16545_v42 = vpop.permute.xlu1 %7162  ;;  %7188 = vrot.lane.b32.xlu0 %v16505_v14, %s19756_s23 }
 0x843   : > { %19829 = vst [vmem:[#allocation28_spill] sm:$0xff] %v16545_v42 }
 0x844   : > { %v16549_v19 = vpop.permute.xlu0 %7164  ;;  %7258 = vrot.lane.b32.xlu1 %v16444_v59, %s19756_s23 }
 0x845   : > { %19830 = vst [vmem:[#allocation13_spill] sm:$0xff] %v16549_v19 }
 0x846   : > { %v6167_v3 = vpop.permute.xlu1 %6166  ;;  %7260 = vrot.lane.b32.xlu0 %v16515_v44, %s19756_s23 }
 0x848   : > { %v6169_v40 = vpop.permute.xlu0 %6168  ;;  %7234 = vrot.lane.b32.xlu1 %v16453_v2, %s19756_s23 }
 0x849   : > { %v16558_v4 = vsel %vm678_vm2, %v6167_v3, %v6169_v40  ;;  %6203 = vst.msk [vmem:[#allocation3 + $0xf8] sm:$0xff] %vm6076_vm10, %v6169_v40 }
 0x84a   : > { %v6113_v1 = vpop.permute.xlu1 %6112  ;;  %7236 = vrot.lane.b32.xlu0 %v16525_v7, %s19756_s23 }
 0x84c   : > { %v6115_v63 = vpop.permute.xlu0 %6114  ;;  %6553 = vrot.lane.b32.xlu1 %v16464_v48, %s11430_s20 }
 0x84d   : > { %v16566_v25 = vsel %vm560_vm3, %v6113_v1, %v6115_v63  ;;  %6149 = vst.msk [vmem:[#allocation3 + $0x98] sm:$0xff] %vm6076_vm10, %v6115_v63 }
 0x84e   : > { %v6275_v12 = vpop.permute.xlu1 %6274  ;;  %6555 = vrot.lane.b32.xlu0 %v16569_v47, %s11430_s20 }
 0x850   : > { %v6277_v8 = vpop.permute.xlu0 %6276  ;;  %6529 = vrot.lane.b32.xlu1 %v16472_v57, %s11430_s20  ;;  %v16575_v62 = vld [vmem:[#allocation3 + $0xf8] sm:$0xff] }
 0x851   : > { %v16578_v20 = vsel %vm470_vm0, %v6275_v12, %v6277_v8  ;;  %6311 = vst.msk [vmem:[#allocation3 + $0x1b8] sm:$0xff] %vm6076_vm10, %v6277_v8  ;;  %6968 = vmatprep.subr.mxu0 %v16575_v62  ;;  %v16665_v8 = vld [vmem:[#allocation3 + $0x88] sm:$0xff] }
 0x852   : > { %6310 = vst [vmem:[#allocation3 + $0x1b0] sm:$0xff] %v16578_v20  ;;  %6969 = vmatpush1.msra.mxu0 %v16558_v4  ;;  %v6221_v50 = vpop.permute.xlu1 %6220  ;;  %6531 = vrot.lane.b32.xlu0 %v16582_v45, %s11430_s20 }
 0x853   : > { %6970 = vmatprep.subr.mxu0 %v16588_v34 }
 0x854   : > { %v6223_v10 = vpop.permute.xlu0 %6222  ;;  %6601 = vrot.lane.b32.xlu1 %v16482_v51, %s11430_s20  ;;  %6971 = vmatpush1.msra.mxu0 %v16502_v18 }
 0x855   : > { %v16595_v54 = vsel %vm796_vm1, %v6221_v50, %v6223_v10  ;;  %6257 = vst.msk [vmem:[#allocation3 + $0x158] sm:$0xff] %vm6076_vm10, %v6223_v10  ;;  %6972 = vmatprep.subr.mxu0 %v16569_v47 }
 0x856   : > { %6256 = vst [vmem:[#allocation3 + $0x150] sm:$0xff] %v16595_v54  ;;  %6973 = vmatpush1.msra.mxu0 %v16464_v48  ;;  %v16603_v5 = vpop.permute.xlu1 %6505  ;;  %6603 = vrot.lane.b32.xlu0 %v16599_v39, %s11430_s20 }
 0x857   : > { %6974 = vmatprep.subr.mxu0 %v16494_v15 }
 0x858   : > { %v16608_v11 = vpop.permute.xlu0 %6507  ;;  %6577 = vrot.lane.b32.xlu1 %v16491_v61, %s11430_s20  ;;  %6975 = vmatpush1.msra.mxu0 %v16427_v43 }
 0x85a   : > { %v16615_v6 = vpop.permute.xlu1 %7166  ;;  %6579 = vrot.lane.b32.xlu0 %v16613_v55, %s11430_s20 }
 0x85b   : > { %19831 = vst [vmem:[#allocation30_spill] sm:$0xff] %v16615_v6 }
 0x85c   : > { %v16619_v60 = vpop.permute.xlu0 %7168  ;;  %7214 = vrot.lane.b32.xlu1 %v16464_v48, %s19756_s23 }
 0x85d   : > { %19832 = vst [vmem:[#allocation12_spill] sm:$0xff] %v16619_v60 }
 0x85e   : > { %v6117_v9 = vpop.permute.xlu1 %6116  ;;  %7216 = vrot.lane.b32.xlu0 %v16569_v47, %s19756_s23 }
 0x860   : > { %v6119_v13 = vpop.permute.xlu0 %6118  ;;  %7190 = vrot.lane.b32.xlu1 %v16472_v57, %s19756_s23 }
 0x861   : > { %v16628_v30 = vsel %vm560_vm3, %v6117_v9, %v6119_v13  ;;  %6151 = vst.msk [vmem:[#allocation3 + $0xa8] sm:$0xff] %vm6076_vm10, %v6119_v13  ;;  %v16675_v9 = vld [vmem:[#allocation3 + $0x1a8] sm:$0xff] }
 0x862   : > { %v6279_v53 = vpop.permute.xlu1 %6278  ;;  %7192 = vrot.lane.b32.xlu0 %v16582_v45, %s19756_s23  ;;  %19836 = vst [vmem:[#allocation27_spill] sm:$0xff] %v16675_v9 }
 0x864   : > { %v6281_v21 = vpop.permute.xlu0 %6280  ;;  %7262 = vrot.lane.b32.xlu1 %v16482_v51, %s19756_s23 }
 0x865   : > { %v16636_v16 = vsel %vm470_vm0, %v6279_v53, %v6281_v21  ;;  %6313 = vst.msk [vmem:[#allocation3 + $0x1c8] sm:$0xff] %vm6076_vm10, %v6281_v21 }
 0x866   : > { %19833 = vst [vmem:[#allocation32_spill] sm:$0xff] %v16636_v16  ;;  %v6225_v17 = vpop.permute.xlu1 %6224  ;;  %7264 = vrot.lane.b32.xlu0 %v16599_v39, %s19756_s23 }
 0x868   : > { %v6227_v23 = vpop.permute.xlu0 %6226  ;;  %7238 = vrot.lane.b32.xlu1 %v16491_v61, %s19756_s23 }
 0x869   : > { %v16644_v31 = vsel %vm796_vm1, %v6225_v17, %v6227_v23  ;;  %6259 = vst.msk [vmem:[#allocation3 + $0x168] sm:$0xff] %vm6076_vm10, %v6227_v23  ;;  %v16685_v17 = vld [vmem:[#allocation3 + $0x148] sm:$0xff] }
 0x86a   : > { %6258 = vst [vmem:[#allocation3 + $0x160] sm:$0xff] %v16644_v31  ;;  %v6171_v3 = vpop.permute.xlu1 %6170  ;;  %7240 = vrot.lane.b32.xlu0 %v16613_v55, %s19756_s23 }
 0x86c   : > { %v6173_v40 = vpop.permute.xlu0 %6172  ;;  %6557 = vrot.lane.b32.xlu1 %v16502_v18, %s11430_s20 }
 0x86d   : > { %v16653_v1 = vsel %vm678_vm2, %v6171_v3, %v6173_v40  ;;  %6205 = vst.msk [vmem:[#allocation3 + $0x108] sm:$0xff] %vm6076_vm10, %v6173_v40 }
 0x86e   : > { %6204 = vst [vmem:[#allocation3 + $0x100] sm:$0xff] %v16653_v1  ;;  %v16657_v63 = vpop.permute.xlu1 %6509  ;;  %6559 = vrot.lane.b32.xlu0 %v16588_v34, %s11430_s20 }
 0x870   : > { %v16661_v12 = vpop.permute.xlu0 %6511  ;;  %6533 = vrot.lane.b32.xlu1 %v16512_v37, %s11430_s20 }
 0x872   : > { %v16667_v50 = vpop.permute.xlu1 %7170  ;;  %6535 = vrot.lane.b32.xlu0 %v16665_v8, %s11430_s20 }
 0x873   : > { %19834 = vst [vmem:[#allocation17_spill] sm:$0xff] %v16667_v50 }
 0x874   : > { %v16671_v10 = vpop.permute.xlu0 %7172  ;;  %6605 = vrot.lane.b32.xlu1 %v16522_v22, %s11430_s20 }
 0x875   : > { %19835 = vst [vmem:[#allocation44_spill] sm:$0xff] %v16671_v10 }
 0x876   : > { %v6121_v13 = vpop.permute.xlu1 %6120  ;;  %6607 = vrot.lane.b32.xlu0 %v16675_v9, %s11430_s20 }
 0x878   : > { %6581 = vrot.lane.b32.xlu1 %v16533_v26, %s11430_s20  ;;  %v6123_v53 = vpop.permute.xlu0 %6122 }
 0x879   : > { %v16682_v21 = vsel %vm560_vm3, %v6121_v13, %v6123_v53  ;;  %6153 = vst.msk [vmem:[#allocation3 + $0xb8] sm:$0xff] %vm6076_vm10, %v6123_v53 }
 0x87a   : > { %v6283_v23 = vpop.permute.xlu1 %6282  ;;  %6583 = vrot.lane.b32.xlu0 %v16685_v17, %s11430_s20 }
 0x87c   : > { %7218 = vrot.lane.b32.xlu1 %v16502_v18, %s19756_s23  ;;  %v6285_v3 = vpop.permute.xlu0 %6284 }
 0x87d   : > { %v16692_v40 = vsel %vm470_vm0, %v6283_v23, %v6285_v3  ;;  %6315 = vst.msk [vmem:[#allocation3 + $0x1d8] sm:$0xff] %vm6076_vm10, %v6285_v3  ;;  %v16710_v3 = vld [vmem:[#allocation3 + $0xa8] sm:$0xff] }
 0x87e   : > { %v6229_v49 = vpop.permute.xlu1 %6228  ;;  %7220 = vrot.lane.b32.xlu0 %v16588_v34, %s19756_s23 }
 0x880   : > { %7194 = vrot.lane.b32.xlu1 %v16512_v37, %s19756_s23  ;;  %v6231_v13 = vpop.permute.xlu0 %6230  ;;  %v16699_v53 = vld [vmem:[#allocation3 + $0xb8] sm:$0xff] }
 0x881   : > { %v16702_v42 = vsel %vm796_vm1, %v6229_v49, %v6231_v13  ;;  %6261 = vst.msk [vmem:[#allocation3 + $0x178] sm:$0xff] %vm6076_vm10, %v6231_v13  ;;  %6976 = vmatprep.subr.mxu0 %v16699_v53  ;;  %v16716_v13 = vld [vmem:[#allocation3 + $0x98] sm:$0xff] }
 0x882   : > { %6260 = vst [vmem:[#allocation3 + $0x170] sm:$0xff] %v16702_v42  ;;  %v6175_v23 = vpop.permute.xlu1 %6174  ;;  %6977 = vmatpush1.msra.mxu0 %v16682_v21  ;;  %7196 = vrot.lane.b32.xlu0 %v16665_v8, %s19756_s23 }
 0x883   : > { %6978 = vmatprep.subr.mxu0 %v16710_v3 }
 0x884   : > { %7266 = vrot.lane.b32.xlu1 %v16522_v22, %s19756_s23  ;;  %6979 = vmatpush1.msra.mxu0 %v16628_v30  ;;  %v6177_v49 = vpop.permute.xlu0 %6176 }
 0x885   : > { %v16719_v19 = vsel %vm678_vm2, %v6175_v23, %v6177_v49  ;;  %6207 = vst.msk [vmem:[#allocation3 + $0x118] sm:$0xff] %vm6076_vm10, %v6177_v49  ;;  %6980 = vmatprep.subr.mxu0 %v16716_v13 }
 0x886   : > { %6206 = vst [vmem:[#allocation3 + $0x110] sm:$0xff] %v16719_v19  ;;  %v16724_v6 = vpop.permute.xlu1 %6513  ;;  %6981 = vmatpush1.msra.mxu0 %v16566_v25  ;;  %7268 = vrot.lane.b32.xlu0 %v16675_v9, %s19756_s23 }
 0x887   : > { %6982 = vmatprep.subr.mxu0 %v16665_v8 }
 0x888   : > { %7242 = vrot.lane.b32.xlu1 %v16533_v26, %s19756_s23  ;;  %6983 = vmatpush1.msra.mxu0 %v16512_v37  ;;  %v16733_v23 = vpop.permute.xlu0 %6515 }
 0x889   : > { %6984 = vmatprep.subr.mxu0 %v16582_v45 }
 0x88a   : > { %v16736_v49 = vpop.permute.xlu1 %7174  ;;  %6985 = vmatpush1.msra.mxu0 %v16472_v57  ;;  %7244 = vrot.lane.b32.xlu0 %v16685_v17, %s19756_s23 }
 0x88b   : > { %19837 = vst [vmem:[#allocation45_spill] sm:$0xff] %v16736_v49  ;;  %6986 = vmatprep.subr.mxu0 %v16505_v14 }
 0x88c   : > { %7702 = vrot.lane.b32.xlu1 %v16502_v18, %s11431_s24  ;;  %6987 = vmatpush1.msra.mxu0 %v16434_v24  ;;  %v16745_v60 = vpop.permute.xlu0 %7176 }
 0x88d   : > { %19838 = vst [vmem:[#allocation29_spill] sm:$0xff] %v16745_v60  ;;  %6988 = vmatprep.subr.mxu0 %v16475_v56 }
 0x88e   : > { %v16748_v50 = vpop.permute.xlu1 %6517  ;;  %6563 = vrot.lane.b32.xlu0 %v16575_v62, %s11430_s20  ;;  %6989 = vmatpush1.msra.mxu0 %v16335_v41 }
 0x88f   : > { %6990 = vmatprep.subr.mxu0 %v16456_v52 }
 0x890   : > { %6561 = vrot.lane.b32.xlu1 %v16558_v4, %s11430_s20  ;;  %v16756_v10 = vpop.permute.xlu0 %6519  ;;  %6991 = vmatpush1.msra.mxu0 %v16326_v27  ;;  %v16772_v27 = vld [vmem:[#allocation3 + $0x1b8] sm:$0xff] }
 0x891   : > { %6992 = vmatprep.subr.mxu0 %v16437_v36  ;;  %19841 = vst [vmem:[#allocation16_spill] sm:$0xff] %v16772_v27 }
 0x892   : > { %v16760_v49 = vpop.permute.xlu1 %7178  ;;  %6539 = vrot.lane.b32.xlu0 %v16716_v13, %s11430_s20  ;;  %6993 = vmatpush1.msra.mxu0 %v16316_v38 }
 0x893   : > { %19839 = vst [vmem:[#allocation47_spill] sm:$0xff] %v16760_v49  ;;  %6994 = vmatprep.subr.mxu0 %v16407_v29 }
 0x894   : > { %6537 = vrot.lane.b32.xlu1 %v16566_v25, %s11430_s20  ;;  %v16768_v41 = vpop.permute.xlu0 %7180  ;;  %6995 = vmatpush1.msra.mxu0 %v16309_v32  ;;  %v16785_v32 = vld [vmem:[#allocation3 + $0x1d8] sm:$0xff] }
 0x895   : > { %19840 = vst [vmem:[#allocation58_spill] sm:$0xff] %v16768_v41  ;;  %6996 = vmatprep.subr.mxu0 %v16385_v28  ;;  %v6391_v28 = vld [vmem:[#allocation3 + $0x158] sm:$0xff] }
 0x896   : > { %v16774_v60 = vpop.permute.xlu1 %6521  ;;  %6611 = vrot.lane.b32.xlu0 %v16772_v27, %s11430_s20  ;;  %6997 = vmatpush1.msra.mxu0 %v16302_v33  ;;  %v16792_v33 = vld [vmem:[#allocation3 + $0x1c8] sm:$0xff] }
 0x897   : > { %6998 = vmatprep.subr.mxu0 %v16363_v58  ;;  %19843 = vst [vmem:[#allocation15_spill] sm:$0xff] %v16792_v33 }
 0x898   : > { %6609 = vrot.lane.b32.xlu1 %v16578_v20, %s11430_s20  ;;  %v16782_v38 = vpop.permute.xlu0 %6523  ;;  %6999 = vmatpush1.msra.mxu0 %v16296_v0 }
 0x899   : > { %7004 = vmatprep.subr.mxu0 %v16785_v32 }
 0x89a   : > { %v16788_v29 = vpop.permute.xlu1 %7182  ;;  %6587 = vrot.lane.b32.xlu0 %v6391_v28, %s11430_s20  ;;  %7005 = vmatpush2.msra.mxu0 %v16692_v40 }
 0x89b   : > { %19842 = vst [vmem:[#allocation34_spill] sm:$0xff] %v16788_v29  ;;  %7006 = vmatprep.subr.mxu0 %v16792_v33  ;;  %v6317_v29 = vld [vmem:[%s19369_s3 + $0x8] sm:$0xff] }
 0x89c   : > { %6585 = vrot.lane.b32.xlu1 %v16595_v54, %s11430_s20  ;;  %v16797_v58 = vpop.permute.xlu0 %7184  ;;  %7007 = vmatpush2.msra.mxu0 %v16636_v16 }
 0x89d   : > { %19844 = vst [vmem:[#allocation36_spill] sm:$0xff] %v16797_v58  ;;  %7008 = vmatprep.subr.mxu0 %v16772_v27  ;;  %10050 = vmatprep.mubr.msk.f32.mxu0 %vm6076_vm10, %v6317_v29 }
 0x89e   : > { %v16801_v0 = vpop.permute.xlu1 %6549  ;;  %7224 = vrot.lane.b32.xlu0 %v16575_v62, %s19756_s23  ;;  %7009 = vmatpush2.msra.mxu0 %v16578_v20 }
 0x89f   : > { %7010 = vmatprep.subr.mxu0 %v16675_v9 }
 0x8a0   : > { %7222 = vrot.lane.b32.xlu1 %v16558_v4, %s19756_s23  ;;  %v16809_v49 = vpop.permute.xlu0 %6551  ;;  %7011 = vmatpush2.msra.mxu0 %v16522_v22  ;;  %v16827_v22 = vld [vmem:[#allocation3 + $0x178] sm:$0xff] }
 0x8a1   : > { %7012 = vmatprep.subr.mxu0 %v16599_v39  ;;  %19845 = vst [vmem:[#allocation23_spill] sm:$0xff] %v16827_v22 }
 0x8a2   : > { %v16813_v41 = vpop.permute.xlu1 %6525  ;;  %7200 = vrot.lane.b32.xlu0 %v16716_v13, %s19756_s23  ;;  %7013 = vmatpush2.msra.mxu0 %v16482_v51 }
 0x8a3   : > { %7014 = vmatprep.subr.mxu0 %v16515_v44  ;;  %v6393_v44 = vld [vmem:[#allocation3 + $0x168] sm:$0xff] }
 0x8a4   : > { %7198 = vrot.lane.b32.xlu1 %v16566_v25, %s19756_s23  ;;  %v16824_v58 = vpop.permute.xlu0 %6527  ;;  %7015 = vmatpush2.msra.mxu0 %v16444_v59 }
 0x8a5   : > { %7016 = vmatprep.subr.mxu0 %v16827_v22 }
 0x8a6   : > { %v16831_v51 = vpop.permute.xlu1 %6597  ;;  %7272 = vrot.lane.b32.xlu0 %v16772_v27, %s19756_s23  ;;  %7017 = vmatpush2.msra.mxu0 %v16702_v42 }
 0x8a7   : > { %7018 = vmatprep.subr.mxu0 %v6393_v44 }
 0x8a8   : > { %7270 = vrot.lane.b32.xlu1 %v16578_v20, %s19756_s23  ;;  %v16838_v39 = vpop.permute.xlu0 %6599  ;;  %7019 = vmatpush2.msra.mxu0 %v16644_v31 }
 0x8a9   : > { %7020 = vmatprep.subr.mxu0 %v6391_v28 }
 0x8aa   : > { %v16841_v59 = vpop.permute.xlu1 %6573  ;;  %7248 = vrot.lane.b32.xlu0 %v6391_v28, %s19756_s23  ;;  %7021 = vmatpush2.msra.mxu0 %v16595_v54 }
 0x8ab   : > { %19846 = vst [vmem:[#allocation38_spill] sm:$0xff] %v16841_v59  ;;  %7022 = vmatprep.subr.mxu0 %v16685_v17 }
 0x8ac   : > { %7246 = vrot.lane.b32.xlu1 %v16595_v54, %s19756_s23  ;;  %v16848_v29 = vpop.permute.xlu0 %6575  ;;  %7023 = vmatpush2.msra.mxu0 %v16533_v26  ;;  %v16863_v54 = vld [vmem:[#allocation3 + $0x118] sm:$0xff] }
 0x8ad   : > { %19847 = vst [vmem:[#allocation31_spill] sm:$0xff] %v16848_v29  ;;  %7024 = vmatprep.subr.mxu0 %v16613_v55 }
 0x8ae   : > { %v16852_v20 = vpop.permute.xlu1 %7210  ;;  %7708 = vrot.lane.b32.xlu0 %v16575_v62, %s11431_s24  ;;  %7025 = vmatpush2.msra.mxu0 %v16491_v61  ;;  %v6381_v61 = vld [vmem:[#allocation3 + $0x108] sm:$0xff] }
 0x8af   : > { %19848 = vst [vmem:[#allocation49_spill] sm:$0xff] %v16852_v20  ;;  %7026 = vmatprep.subr.mxu0 %v16525_v7  ;;  %v6316_v7 = vld [vmem:[%s19369_s3] sm:$0xff] }
 0x8b0   : > { %7706 = vrot.lane.b32.xlu1 %v16558_v4, %s11431_s24  ;;  %v16860_v17 = vpop.permute.xlu0 %7212  ;;  %7027 = vmatpush2.msra.mxu0 %v16453_v2 }
 0x8b1   : > { %19849 = vst [vmem:[#allocation18_spill] sm:$0xff] %v16860_v17  ;;  %7028 = vmatprep.subr.mxu0 %v16863_v54 }
 0x8b2   : > { %v16866_v26 = vpop.permute.xlu1 %7186  ;;  %6543 = vrot.lane.b32.xlu0 %v16710_v3, %s11430_s20  ;;  %7029 = vmatpush2.msra.mxu0 %v16719_v19 }
 0x8b3   : > { %19850 = vst [vmem:[#allocation40_spill] sm:$0xff] %v16866_v26  ;;  %7030 = vmatprep.subr.mxu0 %v6381_v61 }
 0x8b4   : > { %6541 = vrot.lane.b32.xlu1 %v16628_v30, %s11430_s20  ;;  %v16876_v2 = vpop.permute.xlu0 %7188  ;;  %7031 = vmatpush2.msra.mxu0 %v16653_v1 }
 0x8b5   : > { %19851 = vst [vmem:[#allocation20_spill] sm:$0xff] %v16876_v2  ;;  %7033 = vmatmul.mubr.f32.vlgmr.msra.gmra.mxu0 %v6316_v7 }
 0x8b6   : > { %v16879_v55 = vpop.permute.xlu1 %7258  ;;  %6615 = vrot.lane.b32.xlu0 %v16792_v33, %s11430_s20 }
 0x8b7   : > { %19852 = vst [vmem:[#allocation42_spill] sm:$0xff] %v16879_v55 }
 0x8b8   : > { %6613 = vrot.lane.b32.xlu1 %v16636_v16, %s11430_s20  ;;  %v16885_v28 = vpop.permute.xlu0 %7260 }
 0x8b9   : > { %19853 = vst [vmem:[#allocation50_spill] sm:$0xff] %v16885_v28 }
 0x8ba   : > { %v16887_v26 = vpop.permute.xlu1 %7234  ;;  %6591 = vrot.lane.b32.xlu0 %v6393_v44, %s11430_s20 }
 0x8bb   : > { %19854 = vst [vmem:[#allocation52_spill] sm:$0xff] %v16887_v26 }
 0x8bc   : > { %6589 = vrot.lane.b32.xlu1 %v16644_v31, %s11430_s20  ;;  %v16892_v2 = vpop.permute.xlu0 %7236 }
 0x8bd   : > { %19855 = vst [vmem:[#allocation54_spill] sm:$0xff] %v16892_v2 }
 0x8be   : > { %v16894_v7 = vpop.permute.xlu1 %6553  ;;  %6567 = vrot.lane.b32.xlu0 %v6381_v61, %s11430_s20 }
 0x8c0   : > { %6565 = vrot.lane.b32.xlu1 %v16653_v1, %s11430_s20  ;;  %v16899_v55 = vpop.permute.xlu0 %6555 }
 0x8c2   : > { %v16901_v20 = vpop.permute.xlu1 %6529  ;;  %7204 = vrot.lane.b32.xlu0 %v16710_v3, %s19756_s23 }
 0x8c4   : > { %7202 = vrot.lane.b32.xlu1 %v16628_v30, %s19756_s23  ;;  %v16907_v26 = vpop.permute.xlu0 %6531 }
 0x8c6   : > { %v16909_v2 = vpop.permute.xlu1 %6601  ;;  %7276 = vrot.lane.b32.xlu0 %v16792_v33, %s19756_s23 }
 0x8c8   : > { %7274 = vrot.lane.b32.xlu1 %v16636_v16, %s19756_s23  ;;  %v16915_v28 = vpop.permute.xlu0 %6603 }
 0x8ca   : > { %v16917_v9 = vpop.permute.xlu1 %6577  ;;  %7252 = vrot.lane.b32.xlu0 %v6393_v44, %s19756_s23 }
 0x8cb   : > { %19856 = vst [vmem:[#allocation59_spill] sm:$0xff] %v16917_v9 }
 0x8cc   : > { %7250 = vrot.lane.b32.xlu1 %v16644_v31, %s19756_s23  ;;  %v16922_v17 = vpop.permute.xlu0 %6579 }
 0x8cd   : > { %19857 = vst [vmem:[#allocation60_spill] sm:$0xff] %v16922_v17 }
 0x8ce   : > { %v16924_v27 = vpop.permute.xlu1 %7214  ;;  %7228 = vrot.lane.b32.xlu0 %v6381_v61, %s19756_s23 }
 0x8cf   : > { %19858 = vst [vmem:[#allocation61_spill] sm:$0xff] %v16924_v27 }
 0x8d0   : > { %7226 = vrot.lane.b32.xlu1 %v16653_v1, %s19756_s23  ;;  %v16929_v59 = vpop.permute.xlu0 %7216 }
 0x8d1   : > { %19859 = vst [vmem:[#allocation62_spill] sm:$0xff] %v16929_v59 }
 0x8d2   : > { %v16931_v29 = vpop.permute.xlu1 %7190  ;;  %6547 = vrot.lane.b32.xlu0 %v16699_v53, %s11430_s20 }
 0x8d3   : > { %19860 = vst [vmem:[#allocation64_spill] sm:$0xff] %v16931_v29 }
 0x8d4   : > { %6545 = vrot.lane.b32.xlu1 %v16682_v21, %s11430_s20  ;;  %v16937_v31 = vpop.permute.xlu0 %7192 }
 0x8d5   : > { %19861 = vst [vmem:[#allocation22_spill] sm:$0xff] %v16937_v31 }
 0x8d6   : > { %v16939_v44 = vpop.permute.xlu1 %7262  ;;  %6619 = vrot.lane.b32.xlu0 %v16785_v32, %s11430_s20 }
 0x8d7   : > { %19862 = vst [vmem:[#allocation78_spill] sm:$0xff] %v16939_v44 }
 0x8d8   : > { %6617 = vrot.lane.b32.xlu1 %v16692_v40, %s11430_s20  ;;  %v16945_v1 = vpop.permute.xlu0 %7264 }
 0x8d9   : > { %19863 = vst [vmem:[#allocation57_spill] sm:$0xff] %v16945_v1 }
 0x8da   : > { %v16947_v61 = vpop.permute.xlu1 %7238  ;;  %6595 = vrot.lane.b32.xlu0 %v16827_v22, %s11430_s20 }
 0x8db   : > { %19864 = vst [vmem:[#allocation68_spill] sm:$0xff] %v16947_v61 }
 0x8dc   : > { %6593 = vrot.lane.b32.xlu1 %v16702_v42, %s11430_s20  ;;  %v16953_v29 = vpop.permute.xlu0 %7240 }
 0x8dd   : > { %19865 = vst [vmem:[#allocation48_spill] sm:$0xff] %v16953_v29 }
 0x8de   : > { %v6558_v31 = vpop.permute.xlu1 %6557  ;;  %6571 = vrot.lane.b32.xlu0 %v16863_v54, %s11430_s20 }
 0x8e0   : > { %6569 = vrot.lane.b32.xlu1 %v16719_v19, %s11430_s20  ;;  %v6560_v44 = vpop.permute.xlu0 %6559 }
 0x8e2   : > { %v16959_v27 = vpop.permute.xlu1 %6533  ;;  %7208 = vrot.lane.b32.xlu0 %v16699_v53, %s19756_s23 }
 0x8e4   : > { %7206 = vrot.lane.b32.xlu1 %v16682_v21, %s19756_s23  ;;  %v16965_v61 = vpop.permute.xlu0 %6535 }
 0x8e6   : > { %v16967_v1 = vpop.permute.xlu1 %6605  ;;  %7280 = vrot.lane.b32.xlu0 %v16785_v32, %s19756_s23 }
 0x8e8   : > { %7278 = vrot.lane.b32.xlu1 %v16692_v40, %s19756_s23  ;;  %v16973_v29 = vpop.permute.xlu0 %6607 }
 0x8ea   : > { %v16975_v59 = vpop.permute.xlu1 %6581  ;;  %7256 = vrot.lane.b32.xlu0 %v16827_v22, %s19756_s23 }
 0x8ec   : > { %7254 = vrot.lane.b32.xlu1 %v16702_v42, %s19756_s23  ;;  %v16981_v9 = vpop.permute.xlu0 %6583 }
 0x8ee   : > { %v16983_v17 = vpop.permute.xlu1 %7218  ;;  %7232 = vrot.lane.b32.xlu0 %v16863_v54, %s19756_s23  ;;  %v10003_v54 = vld [vmem:[%s19369_s3 + $0x108] sm:$0xff] }
 0x8ef   : > { %10034 = vmatprep.mubr.msk.f32.mxu1 %vm6076_vm10, %v10003_v54 }
 0x8f0   : > { %7230 = vrot.lane.b32.xlu1 %v16719_v19, %s19756_s23  ;;  %v16989_v33 = vpop.permute.xlu0 %7220 }
 0x8f2   : > { %v16991_v16 = vpop.permute.xlu1 %7194  ;;  %7704 = vrot.lane.b32.xlu0 %v16588_v34, %s11431_s24 }
 0x8f3   : > { %19866 = vst [vmem:[#allocation67_spill] sm:$0xff] %v16991_v16 }
 0x8f4   : > { %8191 = vrot.lane.b32.xlu1 %v16558_v4, %s19867_s0  ;;  %v16997_v42 = vpop.permute.xlu0 %7196 }
 0x8f6   : > { %v16999_v22 = vpop.permute.xlu1 %7266  ;;  %8193 = vrot.lane.b32.xlu0 %v16575_v62, %s19867_s0 }
 0x8f7   : > { %19868 = vst [vmem:[#allocation72_spill] sm:$0xff] %v16999_v22 }
 0x8f8   : > { %7698 = vrot.lane.b32.xlu1 %v16464_v48, %s11431_s24  ;;  %v17005_v19 = vpop.permute.xlu0 %7268 }
 0x8f9   : > { %19869 = vst [vmem:[#allocation80_spill] sm:$0xff] %v17005_v19 }
 0x8fa   : > { %v17010_v16 = vpop.permute.xlu1 %7242  ;;  %7700 = vrot.lane.b32.xlu0 %v16569_v47, %s11431_s24 }
 0x8fb   : > { %19870 = vst [vmem:[#allocation41_spill] sm:$0xff] %v17010_v16 }
 0x8fc   : > { %8187 = vrot.lane.b32.xlu1 %v16502_v18, %s19867_s0  ;;  %v17017_v4 = vpop.permute.xlu0 %7244 }
 0x8fd   : > { %19871 = vst [vmem:[#allocation71_spill] sm:$0xff] %v17017_v4 }
 0x8fe   : > { %v17019_v62 = vpop.permute.xlu1 %7702  ;;  %8189 = vrot.lane.b32.xlu0 %v16588_v34, %s19867_s0  ;;  %v6635_v34 = vsel %vm6076_vm10, %v6558_v31, %v6560_v44 }
 0x900   : > { %7694 = vrot.lane.b32.xlu1 %v16427_v43, %s11431_s24  ;;  %v6564_v22 = vpop.permute.xlu0 %6563 }
 0x901   : > { %6759 = vmatprep.subr.mxu1 %v6564_v22 }
 0x902   : > { %v6562_v16 = vpop.permute.xlu1 %6561  ;;  %7696 = vrot.lane.b32.xlu0 %v16494_v15, %s11431_s24 }
 0x903   : > { %v6636_v54 = vsel %vm6076_vm10, %v6562_v16, %v6564_v22  ;;  %v6634_v16 = vsel %vm6076_vm10, %v16894_v7, %v16899_v55  ;;  %v6633_v22 = vsel %vm6076_vm10, %v16801_v0, %v16809_v49 }
 0x904   : > { %8183 = vrot.lane.b32.xlu1 %v16464_v48, %s19867_s0  ;;  %6760 = vmatpush1.msra.mxu1 %v6636_v54  ;;  %v17030_v18 = vpop.permute.xlu0 %6539 }
 0x905   : > { %6761 = vmatprep.subr.mxu1 %v6560_v44 }
 0x906   : > { %v17033_v4 = vpop.permute.xlu1 %6537  ;;  %8185 = vrot.lane.b32.xlu0 %v16569_v47, %s19867_s0  ;;  %6762 = vmatpush1.msra.mxu1 %v6635_v34 }
 0x907   : > { %6763 = vmatprep.subr.mxu1 %v16899_v55 }
 0x908   : > { %7690 = vrot.lane.b32.xlu1 %v16682_v21, %s11431_s24  ;;  %6764 = vmatpush1.msra.mxu1 %v6634_v16  ;;  %v17043_v48 = vpop.permute.xlu0 %6611 }
 0x909   : > { %6765 = vmatprep.subr.mxu1 %v16809_v49 }
 0x90a   : > { %v17049_v47 = vpop.permute.xlu1 %6609  ;;  %7692 = vrot.lane.b32.xlu0 %v16699_v53, %s11431_s24  ;;  %6766 = vmatpush1.msra.mxu1 %v6633_v22 }
 0x90c   : > { %8179 = vrot.lane.b32.xlu1 %v16427_v43, %s19867_s0  ;;  %v17055_v55 = vpop.permute.xlu0 %6587 }
 0x90e   : > { %v17057_v7 = vpop.permute.xlu1 %6585  ;;  %8181 = vrot.lane.b32.xlu0 %v16494_v15, %s19867_s0 }
 0x910   : > { %7686 = vrot.lane.b32.xlu1 %v16628_v30, %s11431_s24  ;;  %v17063_v49 = vpop.permute.xlu0 %7224 }
 0x912   : > { %v17065_v0 = vpop.permute.xlu1 %7222  ;;  %7688 = vrot.lane.b32.xlu0 %v16710_v3, %s11431_s24 }
 0x914   : > { %8175 = vrot.lane.b32.xlu1 %v16682_v21, %s19867_s0  ;;  %v17071_v43 = vpop.permute.xlu0 %7200 }
 0x916   : > { %v17073_v31 = vpop.permute.xlu1 %7198  ;;  %8177 = vrot.lane.b32.xlu0 %v16699_v53, %s19867_s0 }
 0x918   : > { %7682 = vrot.lane.b32.xlu1 %v16566_v25, %s11431_s24  ;;  %v17079_v15 = vpop.permute.xlu0 %7272 }
 0x919   : > { %19872 = vst [vmem:[#allocation19_spill] sm:$0xff] %v17079_v15 }
 0x91a   : > { %v17081_v44 = vpop.permute.xlu1 %7270  ;;  %7684 = vrot.lane.b32.xlu0 %v16716_v13, %s11431_s24 }
 0x91b   : > { %19873 = vst [vmem:[#allocation69_spill] sm:$0xff] %v17081_v44 }
 0x91c   : > { %8171 = vrot.lane.b32.xlu1 %v16628_v30, %s19867_s0  ;;  %v17087_v21 = vpop.permute.xlu0 %7248 }
 0x91d   : > { %19874 = vst [vmem:[#allocation79_spill] sm:$0xff] %v17087_v21 }
 0x91e   : > { %v17089_v54 = vpop.permute.xlu1 %7246  ;;  %8173 = vrot.lane.b32.xlu0 %v16710_v3, %s19867_s0 }
 0x91f   : > { %19875 = vst [vmem:[#allocation70_spill] sm:$0xff] %v17089_v54 }
 0x920   : > { %7678 = vrot.lane.b32.xlu1 %v16512_v37, %s11431_s24  ;;  %v7709_v53 = vpop.permute.xlu0 %7708 }
 0x921   : > { %7905 = vmatprep.subr.mxu0 %v7709_v53 }
 0x922   : > { %v7707_v34 = vpop.permute.xlu1 %7706  ;;  %7680 = vrot.lane.b32.xlu0 %v16665_v8, %s11431_s24 }
 0x923   : > { %v7782_v16 = vsel %vm7766_vm11, %v7707_v34, %v7709_v53 }
 0x924   : > { %8167 = vrot.lane.b32.xlu1 %v16566_v25, %s19867_s0  ;;  %v6544_v30 = vpop.permute.xlu0 %6543  ;;  %7906 = vmatpush1.msra.mxu0 %v7782_v16 }
 0x926   : > { %v6542_v22 = vpop.permute.xlu1 %6541  ;;  %8169 = vrot.lane.b32.xlu0 %v16716_v13, %s19867_s0 }
 0x928   : > { %7674 = vrot.lane.b32.xlu1 %v16472_v57, %s11431_s24  ;;  %v17104_v3 = vpop.permute.xlu0 %6615 }
 0x92a   : > { %v17106_v54 = vpop.permute.xlu1 %6613  ;;  %7676 = vrot.lane.b32.xlu0 %v16582_v45, %s11431_s24 }
 0x92c   : > { %8163 = vrot.lane.b32.xlu1 %v16512_v37, %s19867_s0  ;;  %v17112_v25 = vpop.permute.xlu0 %6591 }
 0x92e   : > { %v17114_v53 = vpop.permute.xlu1 %6589  ;;  %8165 = vrot.lane.b32.xlu0 %v16665_v8, %s19867_s0  ;;  %v11326_v8 = vld [vmem:[#allocation3 + $0x50] sm:$0xff] }
 0x930   : > { %7670 = vrot.lane.b32.xlu1 %v16434_v24, %s11431_s24  ;;  %v17120_v13 = vpop.permute.xlu0 %6567 }
 0x932   : > { %v17122_v34 = vpop.permute.xlu1 %6565  ;;  %7672 = vrot.lane.b32.xlu0 %v16505_v14, %s11431_s24 }
 0x934   : > { %8159 = vrot.lane.b32.xlu1 %v16472_v57, %s19867_s0  ;;  %v17128_v37 = vpop.permute.xlu0 %7204 }
 0x936   : > { %v17130_v16 = vpop.permute.xlu1 %7202  ;;  %8161 = vrot.lane.b32.xlu0 %v16582_v45, %s19867_s0  ;;  %v11327_v45 = vld [vmem:[#allocation3 + $0x40] sm:$0xff] }
 0x938   : > { %7666 = vrot.lane.b32.xlu1 %v11326_v8, %s11431_s24  ;;  %v17135_v21 = vpop.permute.xlu0 %7276 }
 0x939   : > { %19876 = vst [vmem:[#allocation24_spill] sm:$0xff] %v17135_v21 }
 0x93a   : > { %v17137_v19 = vpop.permute.xlu1 %7274  ;;  %7668 = vrot.lane.b32.xlu0 %v16475_v56, %s11431_s24 }
 0x93b   : > { %19877 = vst [vmem:[#allocation81_spill] sm:$0xff] %v17137_v19 }
 0x93c   : > { %8155 = vrot.lane.b32.xlu1 %v16434_v24, %s19867_s0  ;;  %v17143_v57 = vpop.permute.xlu0 %7252 }
 0x93d   : > { %19878 = vst [vmem:[#allocation33_spill] sm:$0xff] %v17143_v57 }
 0x93e   : > { %v17145_v44 = vpop.permute.xlu1 %7250  ;;  %8157 = vrot.lane.b32.xlu0 %v16505_v14, %s19867_s0 }
 0x93f   : > { %19879 = vst [vmem:[#allocation51_spill] sm:$0xff] %v17145_v44  ;;  %v11328_v44 = vld [vmem:[#allocation3 + $0x30] sm:$0xff] }
 0x940   : > { %7662 = vrot.lane.b32.xlu1 %v11327_v45, %s11431_s24  ;;  %v17150_v15 = vpop.permute.xlu0 %7228 }
 0x941   : > { %19880 = vst [vmem:[#allocation35_spill] sm:$0xff] %v17150_v15 }
 0x942   : > { %v17152_v21 = vpop.permute.xlu1 %7226  ;;  %7664 = vrot.lane.b32.xlu0 %v16456_v52, %s11431_s24 }
 0x943   : > { %19881 = vst [vmem:[#allocation53_spill] sm:$0xff] %v17152_v21  ;;  %v6631_v21 = vsel %vm6076_vm10, %v6542_v22, %v6544_v30 }
 0x944   : > { %8151 = vrot.lane.b32.xlu1 %v11326_v8, %s19867_s0  ;;  %v6548_v24 = vpop.permute.xlu0 %6547 }
 0x945   : > { %6767 = vmatprep.subr.mxu1 %v6548_v24 }
 0x946   : > { %v6546_v57 = vpop.permute.xlu1 %6545  ;;  %8153 = vrot.lane.b32.xlu0 %v16475_v56, %s19867_s0  ;;  %v6630_v56 = vsel %vm6076_vm10, %v17033_v4, %v17030_v18  ;;  %v11329_v4 = vld [vmem:[#allocation3 + $0x20] sm:$0xff] }
 0x947   : > { %v6632_v14 = vsel %vm6076_vm10, %v6546_v57, %v6548_v24  ;;  %v11333_v57 = vld [vmem:[#allocation3 + $0x18] sm:$0xff]  ;;  %v6621_v24 = vsel %vm6076_vm10, %v16537_v46, %v16541_v35 }
 0x948   : > { %7658 = vrot.lane.b32.xlu1 %v11328_v44, %s11431_s24  ;;  %6768 = vmatpush1.msra.mxu1 %v6632_v14  ;;  %v17161_v15 = vpop.permute.xlu0 %6619 }
 0x949   : > { %6769 = vmatprep.subr.mxu1 %v6544_v30  ;;  %v6629_v30 = vsel %vm6076_vm10, %v16959_v27, %v16965_v61  ;;  %v6627_v27 = vsel %vm6076_vm10, %v16813_v41, %v16824_v58  ;;  %v6625_v41 = vsel %vm6076_vm10, %v16748_v50, %v16756_v10  ;;  %v6319_v50 = vld [vmem:[%s19369_s3 + $0x18] sm:$0xff] }
 0x94a   : > { %v17164_v19 = vpop.permute.xlu1 %6617  ;;  %7660 = vrot.lane.b32.xlu0 %v16437_v36, %s11431_s24  ;;  %6770 = vmatpush1.msra.mxu1 %v6631_v21  ;;  %v6628_v36 = vsel %vm6076_vm10, %v16901_v20, %v16907_v26  ;;  %v6626_v20 = vsel %vm6076_vm10, %v16774_v60, %v16782_v38  ;;  %v11331_v21 = vld [vmem:[#allocation3 + $0x38] sm:$0xff]  ;;  %v6624_v60 = vsel %vm6076_vm10, %v16724_v6, %v16733_v23  ;;  %v6318_v6 = vld [vmem:[%s19369_s3 + $0x10] sm:$0xff] }
 0x94b   : > { %6771 = vmatprep.subr.mxu1 %v17030_v18  ;;  %10051 = vmatprep.mubr.msk.f32.mxu0 %vm6076_vm10, %v6319_v50  ;;  %v6650_v14 = vsel %vm6076_vm10, %v17164_v19, %v17161_v15  ;;  %v6322_v19 = vld [vmem:[%s19369_s3 + $0x30] sm:$0xff]  ;;  %v19885_v50 = vld [vmem:[#allocation59_spill] sm:$0xff] }
 0x94c   : > { %8147 = vrot.lane.b32.xlu1 %v11327_v45, %s19867_s0  ;;  %6772 = vmatpush1.msra.mxu1 %v6630_v56  ;;  %v17173_v8 = vpop.permute.xlu0 %6595  ;;  %v6622_v45 = vsel %vm6076_vm10, %v16603_v5, %v16608_v11  ;;  %v6320_v5 = vld [vmem:[%s19369_s3 + $0x20] sm:$0xff] }
 0x94d   : > { %6773 = vmatprep.subr.mxu1 %v16965_v61  ;;  %v11330_v61 = vld [vmem:[#allocation3 + $0x28] sm:$0xff]  ;;  %7039 = vmatmul.mubr.f32.gmra.mxu0 %v6318_v6  ;;  %v11334_v56 = vld [vmem:[#allocation3] sm:$0xff] }
 0x94e   : > { %v17179_v22 = vpop.permute.xlu1 %6593  ;;  %8149 = vrot.lane.b32.xlu0 %v16456_v52, %s19867_s0  ;;  %6774 = vmatpush1.msra.mxu1 %v6629_v30  ;;  %v6649_v30 = vsel %vm6076_vm10, %v17106_v54, %v17104_v3 }
 0x94f   : > { %6775 = vmatprep.subr.mxu1 %v16907_v26 }
 0x950   : > { %7654 = vrot.lane.b32.xlu1 %v11329_v4, %s11431_s24  ;;  %6776 = vmatpush1.msra.mxu1 %v6628_v36  ;;  %v17188_v18 = vpop.permute.xlu0 %6571  ;;  %v11335_v36 = vld [vmem:[#allocation3 + $0x8] sm:$0xff] }
 0x951   : > { %6777 = vmatprep.subr.mxu1 %v16824_v58 }
 0x952   : > { %v17194_v52 = vpop.permute.xlu1 %6569  ;;  %7656 = vrot.lane.b32.xlu0 %v11330_v61, %s11431_s24  ;;  %6778 = vmatpush1.msra.mxu1 %v6627_v27 }
 0x953   : > { %6779 = vmatprep.subr.mxu1 %v16782_v38  ;;  %v11332_v38 = vld [vmem:[#allocation3 + $0x10] sm:$0xff] }
 0x954   : > { %8143 = vrot.lane.b32.xlu1 %v11328_v44, %s19867_s0  ;;  %6780 = vmatpush1.msra.mxu1 %v6626_v20  ;;  %v17202_v26 = vpop.permute.xlu0 %7208 }
 0x955   : > { %6781 = vmatprep.subr.mxu1 %v16756_v10  ;;  %v6623_v10 = vsel %vm6076_vm10, %v16657_v63, %v16661_v12 }
 0x956   : > { %v17208_v58 = vpop.permute.xlu1 %7206  ;;  %8145 = vrot.lane.b32.xlu0 %v11331_v21, %s19867_s0  ;;  %6782 = vmatpush1.msra.mxu1 %v6625_v41  ;;  %v6326_v21 = vld [vmem:[%s19369_s3 + $0x50] sm:$0xff] }
 0x957   : > { %6783 = vmatprep.subr.mxu1 %v16733_v23 }
 0x958   : > { %7650 = vrot.lane.b32.xlu1 %v11332_v38, %s11431_s24  ;;  %6784 = vmatpush1.msra.mxu1 %v6624_v60  ;;  %v17216_v44 = vpop.permute.xlu0 %7280  ;;  %v6641_v60 = vsel %vm6076_vm10, %v16975_v59, %v16981_v9  ;;  %v19887_v59 = vld [vmem:[#allocation38_spill] sm:$0xff] }
 0x959   : > { %6785 = vmatprep.subr.mxu1 %v16661_v12  ;;  %v6321_v12 = vld [vmem:[%s19369_s3 + $0x28] sm:$0xff] }
 0x95a   : > { %v17229_v23 = vpop.permute.xlu1 %7278  ;;  %7652 = vrot.lane.b32.xlu0 %v11333_v57, %s11431_s24  ;;  %6786 = vmatpush1.msra.mxu1 %v6623_v10 }
 0x95b   : > { %6787 = vmatprep.subr.mxu1 %v16608_v11  ;;  %10052 = vmatprep.mubr.msk.f32.mxu0 %vm6076_vm10, %v6321_v12 }
 0x95c   : > { %8139 = vrot.lane.b32.xlu1 %v11329_v4, %s19867_s0  ;;  %6788 = vmatpush1.msra.mxu1 %v6622_v45  ;;  %v17237_v63 = vpop.permute.xlu0 %7256  ;;  %v6648_v4 = vsel %vm6076_vm10, %v17049_v47, %v17043_v48  ;;  %v6646_v47 = vsel %vm6076_vm10, %v16909_v2, %v16915_v28  ;;  %v6644_v2 = vsel %vm6076_vm10, %v17179_v22, %v17173_v8 }
 0x95d   : > { %6789 = vmatprep.subr.mxu1 %v16541_v35  ;;  %7045 = vmatmul.mubr.f32.gmra.mxu0 %v6320_v5  ;;  %v6323_v35 = vld [vmem:[%s19369_s3 + $0x38] sm:$0xff]  ;;  %v6642_v22 = vsel %vm6076_vm10, %v17057_v7, %v17055_v55  ;;  %v11336_v5 = vld [vmem:[#allocation3 + $0x1b0] sm:$0xff] }
 0x95e   : > { %v17250_v11 = vpop.permute.xlu1 %7254  ;;  %8141 = vrot.lane.b32.xlu0 %v11330_v61, %s19867_s0  ;;  %6790 = vmatpush1.msra.mxu1 %v6621_v24  ;;  %v6638_v24 = vsel %vm6076_vm10, %v17194_v52, %v17188_v18 }
 0x95f   : > { %6795 = vmatprep.subr.mxu1 %v17161_v15  ;;  %10053 = vmatprep.mubr.msk.f32.mxu0 %vm6076_vm10, %v6323_v35  ;;  %v7297_v35 = vsel %vm1476_vm4, %v17065_v0, %v17063_v49  ;;  %v10004_v0 = vld [vmem:[%s19369_s3 + $0x110] sm:$0xff] }
 0x960   : > { %7646 = vrot.lane.b32.xlu1 %v11334_v56, %s11431_s24  ;;  %6796 = vmatpush2.msra.mxu1 %v6650_v14  ;;  %v17258_v46 = vpop.permute.xlu0 %7232 }
 0x961   : > { %6797 = vmatprep.subr.mxu1 %v17104_v3  ;;  %7051 = vmatmul.mubr.f32.gmra.mxu0 %v6322_v19  ;;  %v6647_v3 = vsel %vm6076_vm10, %v16967_v1, %v16973_v29  ;;  %v6324_v1 = vld [vmem:[%s19369_s3 + $0x40] sm:$0xff] }
 0x962   : > { %v17271_v15 = vpop.permute.xlu1 %7230  ;;  %7648 = vrot.lane.b32.xlu0 %v11335_v36, %s11431_s24  ;;  %6798 = vmatpush2.msra.mxu1 %v6649_v30 }
 0x963   : > { %6799 = vmatprep.subr.mxu1 %v17043_v48  ;;  %v6325_v48 = vld [vmem:[%s19369_s3 + $0x48] sm:$0xff] }
 0x964   : > { %8135 = vrot.lane.b32.xlu1 %v11332_v38, %s19867_s0  ;;  %6800 = vmatpush2.msra.mxu1 %v6648_v4  ;;  %v7705_v54 = vpop.permute.xlu0 %7704  ;;  %v19884_v38 = vld [vmem:[#allocation60_spill] sm:$0xff]  ;;  %v19890_v4 = vld [vmem:[#allocation61_spill] sm:$0xff] }
 0x965   : > { %6801 = vmatprep.subr.mxu1 %v16973_v29  ;;  %7907 = vmatprep.subr.mxu0 %v7705_v54  ;;  %v7781_v27 = vsel %vm7766_vm11, %v17019_v62, %v7705_v54  ;;  %v6645_v62 = vsel %vm6076_vm10, %v16831_v51, %v16838_v39  ;;  %v6643_v51 = vsel %vm6076_vm10, %v17114_v53, %v17112_v25 }
 0x966   : > { %v17285_v61 = vpop.permute.xlu1 %8191  ;;  %8137 = vrot.lane.b32.xlu0 %v11333_v57, %s19867_s0  ;;  %6802 = vmatpush2.msra.mxu1 %v6647_v3  ;;  %v6640_v10 = vsel %vm6076_vm10, %v19885_v50, %v19884_v38  ;;  %v19896_v50 = vld [vmem:[#allocation64_spill] sm:$0xff] }
 0x967   : > { %7908 = vmatpush1.msra.mxu0 %v7781_v27  ;;  %6803 = vmatprep.subr.mxu1 %v16915_v28  ;;  %v10007_v27 = vld [vmem:[%s19369_s3 + $0x128] sm:$0xff] }
 0x968   : > { %7762 = vrot.lane.b32.xlu1 %v16692_v40, %s11431_s24  ;;  %6804 = vmatpush2.msra.mxu1 %v6646_v47  ;;  %v17297_v29 = vpop.permute.xlu0 %8193 }
 0x969   : > { %6805 = vmatprep.subr.mxu1 %v16838_v39  ;;  %10054 = vmatprep.mubr.msk.f32.mxu0 %vm6076_vm10, %v6325_v48  ;;  %v11337_v48 = vld [vmem:[#allocation3 + $0x1a0] sm:$0xff] }
 0x96a   : > { %v7699_v20 = vpop.permute.xlu1 %7698  ;;  %7764 = vrot.lane.b32.xlu0 %v16785_v32, %s11431_s24  ;;  %6806 = vmatpush2.msra.mxu1 %v6645_v62  ;;  %v19893_v62 = vld [vmem:[#allocation49_spill] sm:$0xff] }
 0x96b   : > { %6807 = vmatprep.subr.mxu1 %v17173_v8  ;;  %7057 = vmatmul.mubr.f32.gmra.mxu0 %v6324_v1  ;;  %v6327_v8 = vld [vmem:[%s19369_s3 + $0x58] sm:$0xff]  ;;  %v19892_v1 = vld [vmem:[#allocation27_spill] sm:$0xff] }
 0x96c   : > { %8131 = vrot.lane.b32.xlu1 %v11334_v56, %s19867_s0  ;;  %6808 = vmatpush2.msra.mxu1 %v6644_v2  ;;  %v7701_v28 = vpop.permute.xlu0 %7700  ;;  %v6637_v56 = vsel %vm6076_vm10, %v17122_v34, %v17120_v13  ;;  %v10005_v34 = vld [vmem:[%s19369_s3 + $0x118] sm:$0xff]  ;;  %v7293_v2 = vsel %vm1476_vm4, %v17208_v58, %v17202_v26  ;;  %v10008_v58 = vld [vmem:[%s19369_s3 + $0x130] sm:$0xff] }
 0x96d   : > { %6809 = vmatprep.subr.mxu1 %v17112_v25  ;;  %7909 = vmatprep.subr.mxu0 %v7701_v28  ;;  %v7780_v39 = vsel %vm7766_vm11, %v7699_v20, %v7701_v28  ;;  %v19882_v25 = vld [vmem:[#allocation32_spill] sm:$0xff] }
 0x96e   : > { %v17319_v41 = vpop.permute.xlu1 %8187  ;;  %8133 = vrot.lane.b32.xlu0 %v11335_v36, %s19867_s0  ;;  %6810 = vmatpush2.msra.mxu1 %v6643_v51  ;;  %v19889_v36 = vld [vmem:[#allocation62_spill] sm:$0xff]  ;;  %v10009_v51 = vld [vmem:[%s19369_s3 + $0x138] sm:$0xff] }
 0x96f   : > { %7910 = vmatpush1.msra.mxu0 %v7780_v39  ;;  %6811 = vmatprep.subr.mxu1 %v17055_v55  ;;  %v19883_v55 = vld [vmem:[#allocation15_spill] sm:$0xff]  ;;  %v7295_v54 = vsel %vm1476_vm4, %v19890_v4, %v19889_v36 }
 0x970   : > { %7758 = vrot.lane.b32.xlu1 %v19882_v25, %s11431_s24  ;;  %6812 = vmatpush2.msra.mxu1 %v6642_v22  ;;  %v17331_v53 = vpop.permute.xlu0 %8189 }
 0x971   : > { %6813 = vmatprep.subr.mxu1 %v16981_v9  ;;  %10055 = vmatprep.mubr.msk.f32.mxu0 %vm6076_vm10, %v6327_v8  ;;  %v19886_v9 = vld [vmem:[#allocation31_spill] sm:$0xff] }
 0x972   : > { %v7695_v7 = vpop.permute.xlu1 %7694  ;;  %7760 = vrot.lane.b32.xlu0 %v19883_v55, %s11431_s24  ;;  %6814 = vmatpush2.msra.mxu1 %v6641_v60  ;;  %v6639_v57 = vsel %vm6076_vm10, %v19887_v59, %v19886_v9  ;;  %v10010_v60 = vld [vmem:[%s19369_s3 + $0x140] sm:$0xff]  ;;  %v19897_v59 = vld [vmem:[#allocation20_spill] sm:$0xff] }
 0x973   : > { %6815 = vmatprep.subr.mxu1 %v19884_v38  ;;  %7063 = vmatmul.mubr.f32.gmra.mxu0 %v6326_v21  ;;  %v19895_v38 = vld [vmem:[#allocation22_spill] sm:$0xff] }
 0x974   : > { %8247 = vrot.lane.b32.xlu1 %v16692_v40, %s19867_s0  ;;  %6816 = vmatpush2.msra.mxu1 %v6640_v10  ;;  %v7697_v6 = vpop.permute.xlu0 %7696  ;;  %v6329_v40 = vld [vmem:[%s19369_s3 + $0x68] sm:$0xff]  ;;  %v7289_v10 = vsel %vm1476_vm4, %v19896_v50, %v19895_v38  ;;  %v10021_v50 = vld [vmem:[%s19369_s3 + $0x198] sm:$0xff] }
 0x975   : > { %6817 = vmatprep.subr.mxu1 %v19886_v9  ;;  %7911 = vmatprep.subr.mxu0 %v7697_v6  ;;  %v7779_v45 = vsel %vm7766_vm11, %v7695_v7, %v7697_v6  ;;  %v11339_v7 = vld [vmem:[#allocation3 + $0x198] sm:$0xff] }
 0x976   : > { %v17354_v12 = vpop.permute.xlu1 %8183  ;;  %8249 = vrot.lane.b32.xlu0 %v16785_v32, %s19867_s0  ;;  %6818 = vmatpush2.msra.mxu1 %v6639_v57  ;;  %v10002_v32 = vld [vmem:[%s19369_s3 + $0x100] sm:$0xff]  ;;  %v10013_v6 = vld [vmem:[%s19369_s3 + $0x158] sm:$0xff]  ;;  %v10012_v57 = vld [vmem:[%s19369_s3 + $0x150] sm:$0xff] }
 0x977   : > { %7912 = vmatpush1.msra.mxu0 %v7779_v45  ;;  %6819 = vmatprep.subr.mxu1 %v17188_v18  ;;  %v19888_v18 = vld [vmem:[#allocation16_spill] sm:$0xff]  ;;  %v11340_v45 = vld [vmem:[#allocation3 + $0x1a8] sm:$0xff] }
 0x978   : > { %7754 = vrot.lane.b32.xlu1 %v11336_v5, %s11431_s24  ;;  %6820 = vmatpush2.msra.mxu1 %v6638_v24  ;;  %v17366_v14 = vpop.permute.xlu0 %8185 }
 0x979   : > { %6821 = vmatprep.subr.mxu1 %v17120_v13  ;;  %10056 = vmatprep.mubr.msk.f32.mxu0 %vm6076_vm10, %v6329_v40  ;;  %v19898_v40 = vld [vmem:[#allocation40_spill] sm:$0xff] }
 0x97a   : > { %v7691_v52 = vpop.permute.xlu1 %7690  ;;  %7756 = vrot.lane.b32.xlu0 %v19888_v18, %s11431_s24  ;;  %6822 = vmatpush2.msra.mxu1 %v6637_v56  ;;  %v7288_v24 = vsel %vm1476_vm4, %v19898_v40, %v19897_v59  ;;  %v19900_v56 = vld [vmem:[#allocation34_spill] sm:$0xff]  ;;  %v19914_v40 = vld [vmem:[#allocation19_spill] sm:$0xff] }
 0x97b   : > { %6824 = vmatmul.mubr.f32.vlgmr.msra.gmra.mxu1 %v10002_v32  ;;  %7420 = vmatprep.subr.mxu1 %v17063_v49  ;;  %v7296_v49 = vsel %vm1476_vm4, %v16983_v17, %v16989_v33  ;;  %v19891_v17 = vld [vmem:[#allocation18_spill] sm:$0xff]  ;;  %v19899_v32 = vld [vmem:[#allocation36_spill] sm:$0xff] }
 0x97c   : > { %8243 = vrot.lane.b32.xlu1 %v19882_v25, %s19867_s0  ;;  %7421 = vmatpush1.msra.mxu1 %v7297_v35  ;;  %v7693_v13 = vpop.permute.xlu0 %7692  ;;  %v7294_v20 = vsel %vm1476_vm4, %v19893_v62, %v19891_v17  ;;  %v7291_v25 = vsel %vm1476_vm4, %v17073_v31, %v17071_v43  ;;  %v10015_v35 = vld [vmem:[%s19369_s3 + $0x168] sm:$0xff]  ;;  %v10016_v62 = vld [vmem:[%s19369_s3 + $0x170] sm:$0xff] }
 0x97d   : > { %7422 = vmatprep.subr.mxu1 %v16989_v33  ;;  %7913 = vmatprep.subr.mxu0 %v7693_v13  ;;  %v7778_v30 = vsel %vm7766_vm11, %v7691_v52, %v7693_v13  ;;  %v10006_v33 = vld [vmem:[%s19369_s3 + $0x120] sm:$0xff]  ;;  %v7287_v52 = vsel %vm1476_vm4, %v19900_v56, %v19899_v32 }
 0x97e   : > { %v17392_v19 = vpop.permute.xlu1 %8179  ;;  %8245 = vrot.lane.b32.xlu0 %v19883_v55, %s19867_s0  ;;  %10035 = vmatprep.mubr.msk.f32.mxu1 %vm6076_vm10, %v10005_v34  ;;  %v11341_v34 = vld [vmem:[#allocation3 + $0x180] sm:$0xff] }
 0x97f   : > { %7423 = vmatpush1.msra.mxu1 %v7296_v49  ;;  %7914 = vmatpush1.msra.mxu0 %v7778_v30  ;;  %v10014_v13 = vld [vmem:[%s19369_s3 + $0x160] sm:$0xff]  ;;  %v19902_v49 = vld [vmem:[#allocation47_spill] sm:$0xff] }
 0x980   : > { %6830 = vmatmul.mubr.f32.gmra.mxu1 %v10004_v0  ;;  %7424 = vmatprep.subr.mxu1 %v19889_v36  ;;  %v17404_v3 = vpop.permute.xlu0 %8181  ;;  %v19901_v30 = vld [vmem:[#allocation58_spill] sm:$0xff]  ;;  %v11342_v0 = vld [vmem:[#allocation3 + $0x188] sm:$0xff] }
 0x981   : > { %7750 = vrot.lane.b32.xlu1 %v11337_v48, %s11431_s24  ;;  %7425 = vmatpush1.msra.mxu1 %v7295_v54  ;;  %v7286_v36 = vsel %vm1476_vm4, %v19902_v49, %v19901_v30  ;;  %v19903_v54 = vld [vmem:[#allocation29_spill] sm:$0xff] }
 0x982   : > { %7426 = vmatprep.subr.mxu1 %v19891_v17  ;;  %v7687_v47 = vpop.permute.xlu1 %7686  ;;  %7752 = vrot.lane.b32.xlu0 %v19892_v1, %s11431_s24  ;;  %v10017_v17 = vld [vmem:[%s19369_s3 + $0x178] sm:$0xff]  ;;  %v19905_v1 = vld [vmem:[#allocation44_spill] sm:$0xff] }
 0x983   : > { %10036 = vmatprep.mubr.msk.f32.mxu1 %vm6076_vm10, %v10007_v27  ;;  %7427 = vmatpush1.msra.mxu1 %v7294_v20  ;;  %v19904_v27 = vld [vmem:[#allocation45_spill] sm:$0xff] }
 0x984   : > { %6836 = vmatmul.mubr.f32.gmra.mxu1 %v10006_v33  ;;  %7428 = vmatprep.subr.mxu1 %v17202_v26  ;;  %v7689_v28 = vpop.permute.xlu0 %7688  ;;  %v7292_v26 = vsel %vm1476_vm4, %v17130_v16, %v17128_v37  ;;  %v11338_v16 = vld [vmem:[#allocation3 + $0x190] sm:$0xff]  ;;  %v19918_v49 = vld [vmem:[#allocation57_spill] sm:$0xff] }
 0x985   : > { %8239 = vrot.lane.b32.xlu1 %v11336_v5, %s19867_s0  ;;  %7429 = vmatpush1.msra.mxu1 %v7293_v2  ;;  %v7777_v39 = vsel %vm7766_vm11, %v7687_v47, %v7689_v28  ;;  %v19906_v2 = vld [vmem:[#allocation17_spill] sm:$0xff] }
 0x986   : > { %7430 = vmatprep.subr.mxu1 %v17128_v37  ;;  %7915 = vmatprep.subr.mxu0 %v7689_v28  ;;  %v17430_v8 = vpop.permute.xlu1 %8175  ;;  %v10011_v37 = vld [vmem:[%s19369_s3 + $0x148] sm:$0xff]  ;;  %v7284_v28 = vsel %vm1476_vm4, %v19906_v2, %v19905_v1  ;;  %v19921_v2 = vld [vmem:[#allocation42_spill] sm:$0xff] }
 0x987   : > { %8241 = vrot.lane.b32.xlu0 %v19888_v18, %s19867_s0  ;;  %10037 = vmatprep.mubr.msk.f32.mxu1 %vm6076_vm10, %v10009_v51 }
 0x988   : > { %7431 = vmatpush1.msra.mxu1 %v7292_v26  ;;  %7916 = vmatpush1.msra.mxu0 %v7777_v39  ;;  %v17441_v22 = vpop.permute.xlu0 %8177  ;;  %v19907_v39 = vld [vmem:[#allocation12_spill] sm:$0xff] }
 0x989   : > { %6842 = vmatmul.mubr.f32.gmra.mxu1 %v10008_v58  ;;  %7432 = vmatprep.subr.mxu1 %v17071_v43  ;;  %v19894_v43 = vld [vmem:[#allocation67_spill] sm:$0xff]  ;;  %v19908_v58 = vld [vmem:[#allocation30_spill] sm:$0xff] }
 0x98a   : > { %7746 = vrot.lane.b32.xlu1 %v11338_v16, %s11431_s24  ;;  %7433 = vmatpush1.msra.mxu1 %v7291_v25  ;;  %v7683_v21 = vpop.permute.xlu1 %7682  ;;  %v7290_v31 = vsel %vm1476_vm4, %v19894_v43, %v16997_v42  ;;  %v7283_v26 = vsel %vm1476_vm4, %v19908_v58, %v19907_v39  ;;  %v10019_v25 = vld [vmem:[%s19369_s3 + $0x188] sm:$0xff]  ;;  %v19911_v43 = vld [vmem:[#allocation28_spill] sm:$0xff]  ;;  %v7305_v58 = vsel %vm1476_vm4, %v17250_v11, %v17237_v63  ;;  %v11348_v11 = vld [vmem:[#allocation3 + $0x158] sm:$0xff] }
 0x98b   : > { %7434 = vmatprep.subr.mxu1 %v16997_v42  ;;  %7748 = vrot.lane.b32.xlu0 %v11339_v7, %s11431_s24 }
 0x98c   : > { %10038 = vmatprep.mubr.msk.f32.mxu1 %vm6076_vm10, %v10011_v37  ;;  %7435 = vmatpush1.msra.mxu1 %v7290_v31  ;;  %v7685_v55 = vpop.permute.xlu0 %7684  ;;  %v11343_v37 = vld [vmem:[#allocation3 + $0x170] sm:$0xff] }
 0x98d   : > { %6848 = vmatmul.mubr.f32.gmra.mxu1 %v10010_v60  ;;  %7436 = vmatprep.subr.mxu1 %v19895_v38  ;;  %v7776_v42 = vsel %vm7766_vm11, %v7683_v21, %v7685_v55  ;;  %v19909_v60 = vld [vmem:[#allocation13_spill] sm:$0xff]  ;;  %v7311_v38 = vsel %vm1476_vm4, %v17229_v23, %v17216_v44  ;;  %v10020_v23 = vld [vmem:[%s19369_s3 + $0x190] sm:$0xff] }
 0x98e   : > { %8235 = vrot.lane.b32.xlu1 %v11337_v48, %s19867_s0  ;;  %7437 = vmatpush1.msra.mxu1 %v7289_v10  ;;  %v17468_v9 = vpop.permute.xlu1 %8171  ;;  %v7285_v48 = vsel %vm1476_vm4, %v19904_v27, %v19903_v54  ;;  %v7282_v31 = vsel %vm1476_vm4, %v19911_v43, %v19909_v60  ;;  %v19925_v43 = vld [vmem:[#allocation70_spill] sm:$0xff] }
 0x98f   : > { %7438 = vmatprep.subr.mxu1 %v19897_v59  ;;  %7917 = vmatprep.subr.mxu0 %v7685_v55 }
 0x990   : > { %8237 = vrot.lane.b32.xlu0 %v11340_v45, %s19867_s0  ;;  %10039 = vmatprep.mubr.msk.f32.mxu1 %vm6076_vm10, %v10013_v6  ;;  %v17480_v5 = vpop.permute.xlu0 %8173  ;;  %v10023_v45 = vld [vmem:[%s19369_s3 + $0x1a8] sm:$0xff] }
 0x991   : > { %7439 = vmatpush1.msra.mxu1 %v7288_v24  ;;  %7918 = vmatpush1.msra.mxu0 %v7776_v42  ;;  %v19912_v42 = vld [vmem:[#allocation24_spill] sm:$0xff]  ;;  %v19915_v24 = vld [vmem:[#allocation69_spill] sm:$0xff] }
 0x992   : > { %6854 = vmatmul.mubr.f32.gmra.mxu1 %v10012_v57  ;;  %7440 = vmatprep.subr.mxu1 %v19899_v32  ;;  %v7679_v18 = vpop.permute.xlu1 %7678  ;;  %v7309_v32 = vsel %vm1476_vm4, %v19915_v24, %v19914_v40  ;;  %v19929_v24 = vld [vmem:[#allocation68_spill] sm:$0xff] }
 0x993   : > { %7742 = vrot.lane.b32.xlu1 %v11341_v34, %s11431_s24  ;;  %7441 = vmatpush1.msra.mxu1 %v7287_v52  ;;  %v11344_v52 = vld [vmem:[#allocation3 + $0x160] sm:$0xff] }
 0x994   : > { %7442 = vmatprep.subr.mxu1 %v19901_v30  ;;  %7744 = vrot.lane.b32.xlu0 %v11342_v0, %s11431_s24  ;;  %v7681_v4 = vpop.permute.xlu0 %7680 }
 0x995   : > { %10040 = vmatprep.mubr.msk.f32.mxu1 %vm6076_vm10, %v10015_v35  ;;  %7443 = vmatpush1.msra.mxu1 %v7286_v36  ;;  %v7775_v47 = vsel %vm7766_vm11, %v7679_v18, %v7681_v4  ;;  %v10022_v18 = vld [vmem:[%s19369_s3 + $0x1a0] sm:$0xff]  ;;  %v19916_v35 = vld [vmem:[#allocation80_spill] sm:$0xff] }
 0x996   : > { %6860 = vmatmul.mubr.f32.gmra.mxu1 %v10014_v13  ;;  %7444 = vmatprep.subr.mxu1 %v19903_v54  ;;  %v17503_v33 = vpop.permute.xlu1 %8167  ;;  %v19919_v36 = vld [vmem:[#allocation78_spill] sm:$0xff]  ;;  %v10025_v54 = vld [vmem:[%s19369_s3 + $0x1b8] sm:$0xff] }
 0x997   : > { %8231 = vrot.lane.b32.xlu1 %v11338_v16, %s19867_s0  ;;  %7445 = vmatpush1.msra.mxu1 %v7285_v48  ;;  %v10018_v16 = vld [vmem:[%s19369_s3 + $0x180] sm:$0xff] }
 0x998   : > { %7446 = vmatprep.subr.mxu1 %v19905_v1  ;;  %7919 = vmatprep.subr.mxu0 %v7681_v4  ;;  %v17514_v20 = vpop.permute.xlu0 %8169  ;;  %v7307_v4 = vsel %vm1476_vm4, %v19919_v36, %v19918_v49  ;;  %v7299_v36 = vsel %vm1476_vm4, %v17271_v15, %v17258_v46 }
 0x999   : > { %8233 = vrot.lane.b32.xlu0 %v11339_v7, %s19867_s0  ;;  %10041 = vmatprep.mubr.msk.f32.mxu1 %vm6076_vm10, %v10017_v17  ;;  %v19910_v7 = vld [vmem:[#allocation23_spill] sm:$0xff]  ;;  %v19920_v17 = vld [vmem:[#allocation50_spill] sm:$0xff] }
 0x99a   : > { %7447 = vmatpush1.msra.mxu1 %v7284_v28  ;;  %7920 = vmatpush1.msra.mxu0 %v7775_v47  ;;  %v7675_v51 = vpop.permute.xlu1 %7674  ;;  %v10024_v47 = vld [vmem:[%s19369_s3 + $0x1b0] sm:$0xff]  ;;  %v7306_v28 = vsel %vm1476_vm4, %v19921_v2, %v19920_v17 }
 0x99b   : > { %6866 = vmatmul.mubr.f32.gmra.mxu1 %v10016_v62  ;;  %7448 = vmatprep.subr.mxu1 %v19907_v39  ;;  %v11346_v62 = vld [vmem:[#allocation3 + $0x178] sm:$0xff] }
 0x99c   : > { %7738 = vrot.lane.b32.xlu1 %v11343_v37, %s11431_s24  ;;  %7449 = vmatpush1.msra.mxu1 %v7283_v26  ;;  %v7677_v21 = vpop.permute.xlu0 %7676  ;;  %v11347_v26 = vld [vmem:[#allocation3 + $0x150] sm:$0xff] }
 0x99d   : > { %7450 = vmatprep.subr.mxu1 %v19909_v60  ;;  %7740 = vrot.lane.b32.xlu0 %v19910_v7, %s11431_s24  ;;  %v7774_v10 = vsel %vm7766_vm11, %v7675_v51, %v7677_v21  ;;  %v10027_v51 = vld [vmem:[%s19369_s3 + $0x1c8] sm:$0xff] }
 0x99e   : > { %10042 = vmatprep.mubr.msk.f32.mxu1 %vm6076_vm10, %v10019_v25  ;;  %7451 = vmatpush1.msra.mxu1 %v7282_v31  ;;  %v17539_v55 = vpop.permute.xlu1 %8163  ;;  %v10026_v25 = vld [vmem:[%s19369_s3 + $0x1c0] sm:$0xff]  ;;  %v19924_v7 = vld [vmem:[#allocation79_spill] sm:$0xff] }
 0x99f   : > { %6872 = vmatmul.mubr.f32.gmra.mxu1 %v10018_v16  ;;  %7456 = vmatprep.subr.mxu1 %v17216_v44  ;;  %v19913_v44 = vld [vmem:[#allocation81_spill] sm:$0xff]  ;;  %v7303_v31 = vsel %vm1476_vm4, %v19925_v43, %v19924_v7 }
 0x9a0   : > { %8227 = vrot.lane.b32.xlu1 %v11341_v34, %s19867_s0  ;;  %7457 = vmatpush2.msra.mxu1 %v7311_v38  ;;  %v17550_v6 = vpop.permute.xlu0 %8165  ;;  %v7310_v59 = vsel %vm1476_vm4, %v19913_v44, %v19912_v42  ;;  %v19917_v34 = vld [vmem:[#allocation72_spill] sm:$0xff]  ;;  %v19922_v16 = vld [vmem:[#allocation33_spill] sm:$0xff] }
 0x9a1   : > { %7458 = vmatprep.subr.mxu1 %v19912_v42  ;;  %7921 = vmatprep.subr.mxu0 %v7677_v21  ;;  %v7308_v13 = vsel %vm1476_vm4, %v19917_v34, %v19916_v35  ;;  %v19923_v21 = vld [vmem:[#allocation51_spill] sm:$0xff]  ;;  %v10029_v38 = vld [vmem:[%s19369_s3 + $0x1d8] sm:$0xff]  ;;  %v19931_v34 = vld [vmem:[#allocation52_spill] sm:$0xff] }
 0x9a2   : > { %8229 = vrot.lane.b32.xlu0 %v11342_v0, %s19867_s0  ;;  %10043 = vmatprep.mubr.msk.f32.mxu1 %vm6076_vm10, %v10021_v50  ;;  %v7671_v57 = vpop.permute.xlu1 %7670  ;;  %v11345_v0 = vld [vmem:[#allocation3 + $0x168] sm:$0xff]  ;;  %v7304_v60 = vsel %vm1476_vm4, %v19923_v21, %v19922_v16 }
 0x9a3   : > { %7459 = vmatpush2.msra.mxu1 %v7310_v59  ;;  %7922 = vmatpush1.msra.mxu0 %v7774_v10  ;;  %v19926_v42 = vld [vmem:[#allocation71_spill] sm:$0xff]  ;;  %v10028_v59 = vld [vmem:[%s19369_s3 + $0x1d0] sm:$0xff] }
 0x9a4   : > { %6878 = vmatmul.mubr.f32.gmra.mxu1 %v10020_v23  ;;  %7460 = vmatprep.subr.mxu1 %v19914_v40  ;;  %v7673_v56 = vpop.permute.xlu0 %7672  ;;  %v19927_v23 = vld [vmem:[#allocation41_spill] sm:$0xff]  ;;  %v19928_v40 = vld [vmem:[#allocation48_spill] sm:$0xff] }
 0x9a5   : > { %7734 = vrot.lane.b32.xlu1 %v11344_v52, %s11431_s24  ;;  %7461 = vmatpush2.msra.mxu1 %v7309_v32  ;;  %v7773_v48 = vsel %vm7766_vm11, %v7671_v57, %v7673_v56  ;;  %v7302_v44 = vsel %vm1476_vm4, %v19927_v23, %v19926_v42  ;;  %v7301_v32 = vsel %vm1476_vm4, %v19929_v24, %v19928_v40  ;;  %v10072_v24 = vld [vmem:[%s19369_s3 + $0x230] sm:$0xff] }
 0x9a6   : > { %7462 = vmatprep.subr.mxu1 %v19916_v35  ;;  %10044 = vmatprep.mubr.msk.f32.mxu1 %vm6076_vm10, %v10023_v45  ;;  %v17577_v30 = vpop.permute.xlu1 %8159  ;;  %v10031_v45 = vld [vmem:[%s19369_s3 + $0x1e8] sm:$0xff]  ;;  %v19930_v35 = vld [vmem:[#allocation54_spill] sm:$0xff] }
 0x9a7   : > { %7736 = vrot.lane.b32.xlu0 %v11345_v0, %s11431_s24  ;;  %7463 = vmatpush2.msra.mxu1 %v7308_v13  ;;  %v7300_v13 = vsel %vm1476_vm4, %v19931_v34, %v19930_v35 }
 0x9a8   : > { %6884 = vmatmul.mubr.f32.gmra.mxu1 %v10022_v18  ;;  %7464 = vmatprep.subr.mxu1 %v19918_v49  ;;  %v17587_v27 = vpop.permute.xlu0 %8161  ;;  %v10030_v18 = vld [vmem:[%s19369_s3 + $0x1e0] sm:$0xff]  ;;  %v11350_v49 = vld [vmem:[#allocation3 + $0x148] sm:$0xff] }
 0x9a9   : > { %8223 = vrot.lane.b32.xlu1 %v11343_v37, %s19867_s0  ;;  %7465 = vmatpush2.msra.mxu1 %v7307_v4  ;;  %v10033_v4 = vld [vmem:[%s19369_s3 + $0x1f8] sm:$0xff] }
 0x9aa   : > { %7466 = vmatprep.subr.mxu1 %v19920_v17  ;;  %7923 = vmatprep.subr.mxu0 %v7673_v56  ;;  %v7667_v1 = vpop.permute.xlu1 %7666  ;;  %v19932_v17 = vld [vmem:[#allocation35_spill] sm:$0xff] }
 0x9ab   : > { %10045 = vmatprep.mubr.msk.f32.mxu1 %vm6076_vm10, %v10025_v54  ;;  %8225 = vrot.lane.b32.xlu0 %v11346_v62, %s19867_s0  ;;  %v10067_v62 = vld [vmem:[%s19369_s3 + $0x208] sm:$0xff] }
 0x9ac   : > { %7467 = vmatpush2.msra.mxu1 %v7306_v28  ;;  %7924 = vmatpush1.msra.mxu0 %v7773_v48  ;;  %v7669_v39 = vpop.permute.xlu0 %7668  ;;  %v6328_v28 = vld [vmem:[%s19369_s3 + $0x60] sm:$0xff] }
 0x9ad   : > { %6890 = vmatmul.mubr.f32.gmra.mxu1 %v10024_v47  ;;  %7468 = vmatprep.subr.mxu1 %v17237_v63  ;;  %v7772_v50 = vsel %vm7766_vm11, %v7667_v1, %v7669_v39  ;;  %v19933_v47 = vld [vmem:[#allocation53_spill] sm:$0xff] }
 0x9ae   : > { %7730 = vrot.lane.b32.xlu1 %v11347_v26, %s11431_s24  ;;  %7469 = vmatpush2.msra.mxu1 %v7305_v58  ;;  %v17611_v37 = vpop.permute.xlu1 %8155  ;;  %v7298_v1 = vsel %vm1476_vm4, %v19933_v47, %v19932_v17  ;;  %v10066_v58 = vld [vmem:[%s19369_s3 + $0x200] sm:$0xff] }
 0x9af   : > { %7470 = vmatprep.subr.mxu1 %v19922_v16  ;;  %10046 = vmatprep.mubr.msk.f32.mxu1 %vm6076_vm10, %v10027_v51  ;;  %v11352_v16 = vld [vmem:[#allocation3 + $0x138] sm:$0xff] }
 0x9b0   : > { %7732 = vrot.lane.b32.xlu0 %v11348_v11, %s11431_s24  ;;  %7471 = vmatpush2.msra.mxu1 %v7304_v60  ;;  %v17619_v63 = vpop.permute.xlu0 %8157  ;;  %v8266_v60 = vsel %vm2767_vm6, %v17285_v61, %v17297_v29  ;;  %v10069_v61 = vld [vmem:[%s19369_s3 + $0x218] sm:$0xff] }
 0x9b1   : > { %6896 = vmatmul.mubr.f32.gmra.mxu1 %v10026_v25  ;;  %7472 = vmatprep.subr.mxu1 %v19924_v7  ;;  %v6331_v25 = vld [vmem:[%s19369_s3 + $0x78] sm:$0xff]  ;;  %v8265_v7 = vsel %vm2767_vm6, %v17319_v41, %v17331_v53  ;;  %v11353_v41 = vld [vmem:[#allocation3 + $0x120] sm:$0xff] }
 0x9b2   : > { %8219 = vrot.lane.b32.xlu1 %v11344_v52, %s19867_s0  ;;  %7473 = vmatpush2.msra.mxu1 %v7303_v31  ;;  %v7663_v10 = vpop.permute.xlu1 %7662  ;;  %v11349_v52 = vld [vmem:[#allocation3 + $0x140] sm:$0xff] }
 0x9b3   : > { %7474 = vmatprep.subr.mxu1 %v19926_v42  ;;  %7925 = vmatprep.subr.mxu0 %v7669_v39  ;;  %v11351_v39 = vld [vmem:[#allocation3 + $0x130] sm:$0xff] }
 0x9b4   : > { %10047 = vmatprep.mubr.msk.f32.mxu1 %vm6076_vm10, %v10029_v38  ;;  %7475 = vmatpush2.msra.mxu1 %v7302_v44  ;;  %v7665_v57 = vpop.permute.xlu0 %7664  ;;  %v10068_v38 = vld [vmem:[%s19369_s3 + $0x210] sm:$0xff]  ;;  %v10070_v44 = vld [vmem:[%s19369_s3 + $0x220] sm:$0xff] }
 0x9b5   : > { %8221 = vrot.lane.b32.xlu0 %v11345_v0, %s19867_s0  ;;  %7926 = vmatpush1.msra.mxu0 %v7772_v50  ;;  %v7771_v48 = vsel %vm7766_vm11, %v7663_v10, %v7665_v57  ;;  %v8263_v50 = vsel %vm2767_vm6, %v17392_v19, %v17404_v3  ;;  %v8262_v10 = vsel %vm2767_vm6, %v17430_v8, %v17441_v22  ;;  %v10071_v8 = vld [vmem:[%s19369_s3 + $0x228] sm:$0xff] }
 0x9b6   : > { %6902 = vmatmul.mubr.f32.gmra.mxu1 %v10028_v59  ;;  %7476 = vmatprep.subr.mxu1 %v19928_v40  ;;  %v17646_v56 = vpop.permute.xlu1 %8151  ;;  %v8261_v19 = vsel %vm2767_vm6, %v17468_v9, %v17480_v5  ;;  %v11355_v9 = vld [vmem:[#allocation3 + $0x110] sm:$0xff]  ;;  %v8259_v59 = vsel %vm2767_vm6, %v17539_v55, %v17550_v6  ;;  %v8257_v55 = vsel %vm2767_vm6, %v17611_v37, %v17619_v63  ;;  %v11357_v37 = vld [vmem:[#allocation3 + $0x100] sm:$0xff] }
 0x9b7   : > { %7726 = vrot.lane.b32.xlu1 %v11349_v52, %s11431_s24  ;;  %7477 = vmatpush2.msra.mxu1 %v7301_v32 }
 0x9b8   : > { %7478 = vmatprep.subr.mxu1 %v19930_v35  ;;  %10048 = vmatprep.mubr.msk.f32.mxu1 %vm6076_vm10, %v10031_v45  ;;  %v17657_v0 = vpop.permute.xlu0 %8153 }
 0x9b9   : > { %7479 = vmatpush2.msra.mxu1 %v7300_v13  ;;  %7728 = vrot.lane.b32.xlu0 %v11350_v49, %s11431_s24 }
 0x9ba   : > { %6908 = vmatmul.mubr.f32.gmra.mxu1 %v10030_v18  ;;  %7480 = vmatprep.subr.mxu1 %v17258_v46  ;;  %v7659_v54 = vpop.permute.xlu1 %7658  ;;  %v10032_v46 = vld [vmem:[%s19369_s3 + $0x1f0] sm:$0xff] }
 0x9bb   : > { %8215 = vrot.lane.b32.xlu1 %v11347_v26, %s19867_s0  ;;  %7481 = vmatpush2.msra.mxu1 %v7299_v36  ;;  %v10075_v36 = vld [vmem:[%s19369_s3 + $0x248] sm:$0xff] }
 0x9bc   : > { %7482 = vmatprep.subr.mxu1 %v19932_v17  ;;  %7927 = vmatprep.subr.mxu0 %v7665_v57  ;;  %v7661_v15 = vpop.permute.xlu0 %7660  ;;  %v8258_v57 = vsel %vm2767_vm6, %v17577_v30, %v17587_v27  ;;  %v10073_v30 = vld [vmem:[%s19369_s3 + $0x238] sm:$0xff]  ;;  %v8582_v17 = vld [vmem:[%s19370_s4] sm:$0xff] }
 0x9bd   : > { %10049 = vmatprep.mubr.msk.f32.mxu1 %vm6076_vm10, %v10033_v4  ;;  %7483 = vmatpush2.msra.mxu1 %v7298_v1  ;;  %v7770_v51 = vsel %vm7766_vm11, %v7659_v54, %v7661_v15  ;;  %v10074_v4 = vld [vmem:[%s19369_s3 + $0x240] sm:$0xff]  ;;  %v6330_v1 = vld [vmem:[%s19369_s3 + $0x70] sm:$0xff] }
 0x9be   : > { %8217 = vrot.lane.b32.xlu0 %v11348_v11, %s19867_s0  ;;  %7928 = vmatpush1.msra.mxu0 %v7771_v48  ;;  %v17681_v2 = vpop.permute.xlu1 %8147  ;;  %v10077_v48 = vld [vmem:[%s19369_s3 + $0x258] sm:$0xff] }
 0x9bf   : > { %6914 = vmatmul.mubr.f32.gmra.mxu1 %v10032_v46  ;;  %8389 = vmatprep.subr.mxu1 %v17297_v29  ;;  %v8264_v29 = vsel %vm2767_vm6, %v17354_v12, %v17366_v14  ;;  %v11354_v12 = vld [vmem:[#allocation3 + $0x128] sm:$0xff] }
 0x9c0   : > { %7722 = vrot.lane.b32.xlu1 %v11351_v39, %s11431_s24  ;;  %10098 = vmatprep.mubr.msk.f32.mxu1 %vm6076_vm10, %v10067_v62  ;;  %v17693_v26 = vpop.permute.xlu0 %8149  ;;  %v8583_v62 = vld [vmem:[%s19370_s4 + $0x8] sm:$0xff] }
 0x9c1   : > { %7929 = vmatprep.subr.mxu0 %v7661_v15  ;;  %7069 = vmatmul.mubr.f32.gmra.mxu0 %v6328_v28  ;;  %v8255_v32 = vsel %vm2767_vm6, %v17681_v2, %v17693_v26  ;;  %v6333_v15 = vld [vmem:[%s19369_s3 + $0x88] sm:$0xff]  ;;  %v10076_v2 = vld [vmem:[%s19369_s3 + $0x250] sm:$0xff] }
 0x9c2   : > { %7724 = vrot.lane.b32.xlu0 %v11352_v16, %s11431_s24  ;;  %7930 = vmatpush1.msra.mxu0 %v7770_v51  ;;  %v7655_v21 = vpop.permute.xlu1 %7654  ;;  %v10079_v51 = vld [vmem:[%s19369_s3 + $0x268] sm:$0xff] }
 0x9c3   : > { %7485 = vmatmul.mubr.f32.vlgmr.msra.gmra.mxu1 %v10066_v58  ;;  %10057 = vmatprep.mubr.msk.f32.mxu0 %vm6076_vm10, %v6331_v25 }
 0x9c4   : > { %8390 = vmatpush1.msra.mxu1 %v8266_v60  ;;  %8211 = vrot.lane.b32.xlu1 %v11349_v52, %s19867_s0  ;;  %v7657_v11 = vpop.permute.xlu0 %7656  ;;  %v10078_v60 = vld [vmem:[%s19369_s3 + $0x260] sm:$0xff] }
 0x9c5   : > { %8391 = vmatprep.subr.mxu1 %v17331_v53  ;;  %7931 = vmatprep.subr.mxu0 %v7657_v11  ;;  %v7769_v43 = vsel %vm7766_vm11, %v7655_v21, %v7657_v11  ;;  %v8585_v21 = vld [vmem:[%s19370_s4 + $0x18] sm:$0xff] }
 0x9c6   : > { %8392 = vmatpush1.msra.mxu1 %v8265_v7  ;;  %8213 = vrot.lane.b32.xlu0 %v11350_v49, %s19867_s0  ;;  %v17710_v31 = vpop.permute.xlu1 %8143  ;;  %v10081_v7 = vld [vmem:[%s19369_s3 + $0x278] sm:$0xff] }
 0x9c7   : > { %8393 = vmatprep.subr.mxu1 %v17366_v14  ;;  %7932 = vmatpush1.msra.mxu0 %v7769_v43  ;;  %v8586_v43 = vld [vmem:[%s19370_s4 + $0x20] sm:$0xff] }
 0x9c8   : > { %8394 = vmatpush1.msra.mxu1 %v8264_v29  ;;  %7718 = vrot.lane.b32.xlu1 %v11353_v41, %s11431_s24  ;;  %v17720_v53 = vpop.permute.xlu0 %8145 }
 0x9c9   : > { %8395 = vmatprep.subr.mxu1 %v17404_v3  ;;  %10099 = vmatprep.mubr.msk.f32.mxu1 %vm6076_vm10, %v10069_v61  ;;  %v8254_v18 = vsel %vm2767_vm6, %v17710_v31, %v17720_v53  ;;  %v6334_v61 = vld [vmem:[%s19369_s3 + $0x90] sm:$0xff] }
 0x9ca   : > { %8396 = vmatpush1.msra.mxu1 %v8263_v50  ;;  %7720 = vrot.lane.b32.xlu0 %v11354_v12, %s11431_s24  ;;  %v7651_v14 = vpop.permute.xlu1 %7650 }
 0x9cb   : > { %8397 = vmatprep.subr.mxu1 %v17441_v22  ;;  %7491 = vmatmul.mubr.f32.gmra.mxu1 %v10068_v38  ;;  %v8260_v22 = vsel %vm2767_vm6, %v17503_v33, %v17514_v20  ;;  %v11356_v33 = vld [vmem:[#allocation3 + $0x118] sm:$0xff]  ;;  %v10080_v38 = vld [vmem:[%s19369_s3 + $0x270] sm:$0xff] }
 0x9cc   : > { %8398 = vmatpush1.msra.mxu1 %v8262_v10  ;;  %8207 = vrot.lane.b32.xlu1 %v11351_v39, %s19867_s0  ;;  %v7653_v42 = vpop.permute.xlu0 %7652  ;;  %v8584_v39 = vld [vmem:[%s19370_s4 + $0x10] sm:$0xff] }
 0x9cd   : > { %8399 = vmatprep.subr.mxu1 %v17480_v5  ;;  %7933 = vmatprep.subr.mxu0 %v7653_v42  ;;  %v7768_v3 = vsel %vm7766_vm11, %v7651_v14, %v7653_v42  ;;  %v8588_v14 = vld [vmem:[%s19370_s4 + $0x30] sm:$0xff]  ;;  %v6336_v42 = vld [vmem:[%s19369_s3 + $0xa0] sm:$0xff] }
 0x9ce   : > { %8400 = vmatpush1.msra.mxu1 %v8261_v19  ;;  %8209 = vrot.lane.b32.xlu0 %v11352_v16, %s19867_s0  ;;  %v8140_v23 = vpop.permute.xlu1 %8139  ;;  %v6335_v16 = vld [vmem:[%s19369_s3 + $0x98] sm:$0xff] }
 0x9cf   : > { %8401 = vmatprep.subr.mxu1 %v17514_v20  ;;  %7934 = vmatpush1.msra.mxu0 %v7768_v3  ;;  %v6339_v3 = vld [vmem:[%s19369_s3 + $0xb8] sm:$0xff] }
 0x9d0   : > { %8402 = vmatpush1.msra.mxu1 %v8260_v22  ;;  %7714 = vrot.lane.b32.xlu1 %v11355_v9, %s11431_s24  ;;  %v8142_v5 = vpop.permute.xlu0 %8141 }
 0x9d1   : > { %8403 = vmatprep.subr.mxu1 %v17550_v6  ;;  %10100 = vmatprep.mubr.msk.f32.mxu1 %vm6076_vm10, %v10071_v8  ;;  %v8253_v34 = vsel %vm2767_vm6, %v8140_v23, %v8142_v5  ;;  %v8589_v23 = vld [vmem:[%s19370_s4 + $0x38] sm:$0xff]  ;;  %v10082_v8 = vld [vmem:[%s19369_s3 + $0x280] sm:$0xff] }
 0x9d2   : > { %8404 = vmatpush1.msra.mxu1 %v8259_v59  ;;  %7716 = vrot.lane.b32.xlu0 %v11356_v33, %s11431_s24  ;;  %v7647_v20 = vpop.permute.xlu1 %7646  ;;  %v6338_v59 = vld [vmem:[%s19369_s3 + $0xb0] sm:$0xff] }
 0x9d3   : > { %8405 = vmatprep.subr.mxu1 %v17587_v27  ;;  %7497 = vmatmul.mubr.f32.gmra.mxu1 %v10070_v44  ;;  %v8256_v27 = vsel %vm2767_vm6, %v17646_v56, %v17657_v0  ;;  %v11358_v56 = vld [vmem:[#allocation3 + $0x108] sm:$0xff] }
 0x9d4   : > { %8406 = vmatpush1.msra.mxu1 %v8258_v57  ;;  %8203 = vrot.lane.b32.xlu1 %v11353_v41, %s19867_s0  ;;  %v7649_v45 = vpop.permute.xlu0 %7648  ;;  %v6337_v41 = vld [vmem:[%s19369_s3 + $0xa8] sm:$0xff] }
 0x9d5   : > { %8407 = vmatprep.subr.mxu1 %v17619_v63  ;;  %7935 = vmatprep.subr.mxu0 %v7649_v45  ;;  %v7767_v6 = vsel %vm7766_vm11, %v7647_v20, %v7649_v45  ;;  %v8591_v20 = vld [vmem:[%s19370_s4 + $0x48] sm:$0xff]  ;;  %v10084_v45 = vld [vmem:[%s19369_s3 + $0x290] sm:$0xff] }
 0x9d6   : > { %8408 = vmatpush1.msra.mxu1 %v8257_v55  ;;  %8205 = vrot.lane.b32.xlu0 %v11354_v12, %s19867_s0  ;;  %v8136_v40 = vpop.permute.xlu1 %8135  ;;  %v10083_v12 = vld [vmem:[%s19369_s3 + $0x288] sm:$0xff] }
 0x9d7   : > { %8409 = vmatprep.subr.mxu1 %v17657_v0  ;;  %7936 = vmatpush1.msra.mxu0 %v7767_v6  ;;  %v10087_v6 = vld [vmem:[%s19369_s3 + $0x2a8] sm:$0xff] }
 0x9d8   : > { %8410 = vmatpush1.msra.mxu1 %v8256_v27  ;;  %7710 = vrot.lane.b32.xlu1 %v11357_v37, %s11431_s24  ;;  %v8138_v63 = vpop.permute.xlu0 %8137  ;;  %v6340_v27 = vld [vmem:[%s19369_s3 + $0xc0] sm:$0xff] }
 0x9d9   : > { %8411 = vmatprep.subr.mxu1 %v17693_v26  ;;  %10101 = vmatprep.mubr.msk.f32.mxu1 %vm6076_vm10, %v10073_v30  ;;  %v8252_v13 = vsel %vm2767_vm6, %v8136_v40, %v8138_v63  ;;  %v6332_v26 = vld [vmem:[%s19369_s3 + $0x80] sm:$0xff]  ;;  %v8592_v40 = vld [vmem:[%s19370_s4 + $0x50] sm:$0xff] }
 0x9da   : > { %8412 = vmatpush1.msra.mxu1 %v8255_v32  ;;  %7712 = vrot.lane.b32.xlu0 %v11358_v56, %s11431_s24  ;;  %v7763_v52 = vpop.permute.xlu1 %7762  ;;  %v10086_v32 = vld [vmem:[%s19369_s3 + $0x2a0] sm:$0xff]  ;;  %s19954_s24 = smov 32  }
 0x9db   : > { %8413 = vmatprep.subr.mxu1 %v17720_v53  ;;  %7503 = vmatmul.mubr.f32.gmra.mxu1 %v10072_v24  ;;  %v8587_v53 = vld [vmem:[%s19370_s4 + $0x28] sm:$0xff] }
 0x9dc   : > { %8414 = vmatpush1.msra.mxu1 %v8254_v18  ;;  %8199 = vrot.lane.b32.xlu1 %v11355_v9, %s19867_s0  ;;  %v7765_v35 = vpop.permute.xlu0 %7764  ;;  %v10085_v9 = vld [vmem:[%s19369_s3 + $0x298] sm:$0xff] }
 0x9dd   : > { %8415 = vmatprep.subr.mxu1 %v8142_v5  ;;  %7941 = vmatprep.subr.mxu0 %v7765_v35  ;;  %v7796_v0 = vsel %vm7766_vm11, %v7763_v52, %v7765_v35  ;;  %v8590_v5 = vld [vmem:[%s19370_s4 + $0x40] sm:$0xff] }
 0x9de   : > { %8416 = vmatpush1.msra.mxu1 %v8253_v34  ;;  %8201 = vrot.lane.b32.xlu0 %v11356_v33, %s19867_s0  ;;  %v8132_v49 = vpop.permute.xlu1 %8131  ;;  %v6341_v33 = vld [vmem:[%s19369_s3 + $0xc8] sm:$0xff]  ;;  %v8594_v52 = vld [vmem:[%s19370_s4 + $0x60] sm:$0xff]  ;;  %v6342_v34 = vld [vmem:[%s19369_s3 + $0xd0] sm:$0xff] }
 0x9df   : > { %8417 = vmatprep.subr.mxu1 %v8138_v63  ;;  %7942 = vmatpush2.msra.mxu0 %v7796_v0  ;;  %v8593_v63 = vld [vmem:[%s19370_s4 + $0x58] sm:$0xff]  ;;  %v10088_v0 = vld [vmem:[%s19369_s3 + $0x2b0] sm:$0xff] }
 0x9e0   : > { %8195 = vrot.lane.b32.xlu1 %v11357_v37, %s19867_s0  ;;  %8418 = vmatpush1.msra.mxu1 %v8252_v13  ;;  %v8134_v54 = vpop.permute.xlu0 %8133  ;;  %v6343_v37 = vld [vmem:[%s19369_s3 + $0xd8] sm:$0xff]  ;;  %v8595_v13 = vld [vmem:[%s19370_s4 + $0x68] sm:$0xff] }
 0x9e1   : > { %10102 = vmatprep.mubr.msk.f32.mxu1 %vm6076_vm10, %v10075_v36  ;;  %8419 = vmatprep.subr.mxu1 %v8134_v54  ;;  %v8251_v47 = vsel %vm2767_vm6, %v8132_v49, %v8134_v54  ;;  %v10091_v36 = vld [vmem:[%s19369_s3 + $0x2c8] sm:$0xff] }
 0x9e2   : > { %8197 = vrot.lane.b32.xlu0 %v11358_v56, %s19867_s0  ;;  %7509 = vmatmul.mubr.f32.gmra.mxu1 %v10074_v4  ;;  %v7759_v46 = vpop.permute.xlu1 %7758  ;;  %v10089_v56 = vld [vmem:[%s19369_s3 + $0x2b8] sm:$0xff]  ;;  %v8596_v4 = vld [vmem:[%s19370_s4 + $0x70] sm:$0xff] }
 0x9e3   : > { %8420 = vmatpush1.msra.mxu1 %v8251_v47  ;;  %10103 = vmatprep.mubr.msk.f32.mxu1 %vm6076_vm10, %v10077_v48  ;;  %v8597_v47 = vld [vmem:[%s19370_s4 + $0x78] sm:$0xff] }
 0x9e4   : > { %8600 = vperm.xlu1 %10745, %v8582_v17   ;;  %v7761_v28 = vpop.permute.xlu0 %7760  ;;  %7075 = vmatmul.mubr.f32.gmra.mxu0 %v6330_v1  ;;  %v6345_v17 = vld [vmem:[%s19369_s3 + $0xe8] sm:$0xff]  ;;  %v10090_v1 = vld [vmem:[%s19369_s3 + $0x2c0] sm:$0xff] }
 0x9e5   : > { %7943 = vmatprep.subr.mxu0 %v7761_v28  ;;  %v7795_v58 = vsel %vm7766_vm11, %v7759_v46, %v7761_v28  ;;  %10058 = vmatprep.mubr.msk.f32.mxu0 %vm6076_vm10, %v6333_v15  ;;  %v10093_v15 = vld [vmem:[%s19369_s3 + $0x2d8] sm:$0xff] }
 0x9e6   : > { %8605 = vperm.xlu0 %10744, %v8583_v62   ;;  %7515 = vmatmul.mubr.f32.gmra.mxu1 %v10076_v2  ;;  %v8248_v25 = vpop.permute.xlu1 %8247  ;;  %v6344_v62 = vld [vmem:[%s19369_s3 + $0xe0] sm:$0xff]  ;;  %v6347_v28 = vld [vmem:[%s19369_s3 + $0xf8] sm:$0xff] }
 0x9e7   : > { %7944 = vmatpush2.msra.mxu0 %v7795_v58  ;;  %10104 = vmatprep.mubr.msk.f32.mxu1 %vm6076_vm10, %v10079_v51  ;;  %v10095_v58 = vld [vmem:[%s19369_s3 + $0x2e8] sm:$0xff] }
 0x9e8   : > { %8610 = vperm.xlu1 %10745, %v8584_v39   ;;  %v8250_v11 = vpop.permute.xlu0 %8249  ;;  %7081 = vmatmul.mubr.f32.gmra.mxu0 %v6332_v26  ;;  %v10092_v39 = vld [vmem:[%s19369_s3 + $0x2d0] sm:$0xff] }
 0x9e9   : > { %8425 = vmatprep.subr.mxu1 %v8250_v11  ;;  %v8280_v31 = vsel %vm2767_vm6, %v8248_v25, %v8250_v11  ;;  %10059 = vmatprep.mubr.msk.f32.mxu0 %vm6076_vm10, %v6335_v16  ;;  %v6346_v16 = vld [vmem:[%s19369_s3 + $0xf0] sm:$0xff]  ;;  %v10115_v11 = vld [vmem:[%s19369_s3 + $0x308] sm:$0xff] }
 0x9ea   : > { %8615 = vperm.xlu0 %10744, %v8585_v21   ;;  %7521 = vmatmul.mubr.f32.gmra.mxu1 %v10078_v60  ;;  %v7755_v29 = vpop.permute.xlu1 %7754  ;;  %v10094_v60 = vld [vmem:[%s19369_s3 + $0x2e0] sm:$0xff] }
 0x9eb   : > { %8426 = vmatpush2.msra.mxu1 %v8280_v31  ;;  %10105 = vmatprep.mubr.msk.f32.mxu1 %vm6076_vm10, %v10081_v7  ;;  %v10097_v7 = vld [vmem:[%s19369_s3 + $0x2f8] sm:$0xff] }
 0x9ec   : > { %8620 = vperm.xlu1 %10745, %v8586_v43   ;;  %v7757_v50 = vpop.permute.xlu0 %7756  ;;  %7087 = vmatmul.mubr.f32.gmra.mxu0 %v6334_v61  ;;  %v10096_v61 = vld [vmem:[%s19369_s3 + $0x2f0] sm:$0xff] }
 0x9ed   : > { %7945 = vmatprep.subr.mxu0 %v7757_v50  ;;  %v7794_v10 = vsel %vm7766_vm11, %v7755_v29, %v7757_v50  ;;  %10060 = vmatprep.mubr.msk.f32.mxu0 %vm6076_vm10, %v6337_v41  ;;  %v10163_v41 = vld [vmem:[%s19369_s3 + $0x408] sm:$0xff] }
 0x9ee   : > { %8625 = vperm.xlu0 %10744, %v8587_v53   ;;  %7527 = vmatmul.mubr.f32.gmra.mxu1 %v10080_v38  ;;  %v8244_v19 = vpop.permute.xlu1 %8243 }
 0x9ef   : > { %7946 = vmatpush2.msra.mxu0 %v7794_v10  ;;  %10106 = vmatprep.mubr.msk.f32.mxu1 %vm6076_vm10, %v10083_v12 }
 0x9f0   : > { %8630 = vperm.xlu1 %10745, %v8588_v14   ;;  %v8246_v22 = vpop.permute.xlu0 %8245  ;;  %7093 = vmatmul.mubr.f32.gmra.mxu0 %v6336_v42 }
 0x9f1   : > { %8427 = vmatprep.subr.mxu1 %v8246_v22  ;;  %v8279_v44 = vsel %vm2767_vm6, %v8244_v19, %v8246_v22  ;;  %10061 = vmatprep.mubr.msk.f32.mxu0 %vm6076_vm10, %v6339_v3 }
 0x9f2   : > { %8635 = vperm.xlu0 %10744, %v8589_v23   ;;  %7533 = vmatmul.mubr.f32.gmra.mxu1 %v10082_v8 }
 0x9f3   : > { %v7751_v57 = vpop.permute.xlu1 %7750  ;;  %8428 = vmatpush2.msra.mxu1 %v8279_v44  ;;  %10107 = vmatprep.mubr.msk.f32.mxu1 %vm6076_vm10, %v10085_v9 }
 0x9f4   : > { %8640 = vperm.xlu1 %10745, %v8590_v5   ;;  %v7753_v55 = vpop.permute.xlu0 %7752  ;;  %7099 = vmatmul.mubr.f32.gmra.mxu0 %v6338_v59 }
 0x9f5   : > { %7947 = vmatprep.subr.mxu0 %v7753_v55  ;;  %v7793_v30 = vsel %vm7766_vm11, %v7751_v57, %v7753_v55  ;;  %10062 = vmatprep.mubr.msk.f32.mxu0 %vm6076_vm10, %v6341_v33  ;;  %v7034_v33 = vpop.f32.mrf.mxu0 }
 0x9f6   : > { %8645 = vperm.xlu0 %10744, %v8591_v20   ;;  %7539 = vmatmul.mubr.f32.gmra.mxu1 %v10084_v45 }
 0x9f7   : > { %v8240_v24 = vpop.permute.xlu1 %8239  ;;  %7948 = vmatpush2.msra.mxu0 %v7793_v30  ;;  %10108 = vmatprep.mubr.msk.f32.mxu1 %vm6076_vm10, %v10087_v6  ;;  %v18014_v55 = vpop.f32.mrf.mxu0 }
 0x9f8   : > { %8650 = vperm.xlu1 %10745, %v8592_v40   ;;  %7105 = vmatmul.mubr.f32.gmra.mxu0 %v6340_v27 }
 0x9f9   : > { %v8242_v18 = vpop.permute.xlu0 %8241  ;;  %10063 = vmatprep.mubr.msk.f32.mxu0 %vm6076_vm10, %v6343_v37 }
 0x9fa   : > { %8655 = vperm.xlu0 %10744, %v8593_v63   ;;  %7545 = vmatmul.mubr.f32.gmra.mxu1 %v10086_v32  ;;  %v8278_v35 = vsel %vm2767_vm6, %v8240_v24, %v8242_v18 }
 0x9fb   : > { %8429 = vmatprep.subr.mxu1 %v8242_v18  ;;  %10109 = vmatprep.mubr.msk.f32.mxu1 %vm6076_vm10, %v10089_v56 }
 0x9fc   : > { %8660 = vperm.xlu1 %10745, %v8594_v52   ;;  %v7747_v49 = vpop.permute.xlu1 %7746  ;;  %8430 = vmatpush2.msra.mxu1 %v8278_v35 }
 0x9fd   : > { %v7749_v54 = vpop.permute.xlu0 %7748  ;;  %7111 = vmatmul.mubr.f32.gmra.mxu0 %v6342_v34 }
 0x9fe   : > { %8665 = vperm.xlu0 %10744, %v8595_v13   ;;  %7551 = vmatmul.mubr.f32.gmra.mxu1 %v10088_v0  ;;  %v7792_v48 = vsel %vm7766_vm11, %v7747_v49, %v7749_v54 }
 0x9ff   : > { %7949 = vmatprep.subr.mxu0 %v7749_v54  ;;  %10110 = vmatprep.mubr.msk.f32.mxu1 %vm6076_vm10, %v10091_v36 }
 0xa00   : > { %8670 = vperm.xlu1 %10745, %v8596_v4   ;;  %v8236_v46 = vpop.permute.xlu1 %8235  ;;  %7950 = vmatpush2.msra.mxu0 %v7792_v48 }
 0xa01   : > { %10064 = vmatprep.mubr.msk.f32.mxu0 %vm6076_vm10, %v6345_v17 }
 0xa02   : > { %8675 = vperm.xlu0 %10744, %v8597_v47   ;;  %7557 = vmatmul.mubr.f32.gmra.mxu1 %v10090_v1  ;;  %v8238_v2 = vpop.permute.xlu0 %8237 }
 0xa03   : > { %8431 = vmatprep.subr.mxu1 %v8238_v2  ;;  %v8277_v51 = vsel %vm2767_vm6, %v8236_v46, %v8238_v2  ;;  %10111 = vmatprep.mubr.msk.f32.mxu1 %vm6076_vm10, %v10093_v15 }
 0xa04   : > { %8432 = vmatpush2.msra.mxu1 %v8277_v51  ;;  %7117 = vmatmul.mubr.f32.gmra.mxu0 %v6344_v62 }
 0xa05   : > { %v7743_v26 = vpop.permute.xlu1 %7742  ;;  %10065 = vmatprep.mubr.msk.f32.mxu0 %vm6076_vm10, %v6347_v28 }
 0xa06   : > { %7563 = vmatmul.mubr.f32.gmra.mxu1 %v10092_v39  ;;  %v7745_v25 = vpop.permute.xlu0 %7744 }
 0xa07   : > { %7951 = vmatprep.subr.mxu0 %v7745_v25  ;;  %v7791_v21 = vsel %vm7766_vm11, %v7743_v26, %v7745_v25  ;;  %10112 = vmatprep.mubr.msk.f32.mxu1 %vm6076_vm10, %v10095_v58 }
 0xa08   : > { %7952 = vmatpush2.msra.mxu0 %v7791_v21 }
 0xa09   : > { %v8232_v43 = vpop.permute.xlu1 %8231  ;;  %7123 = vmatmul.mubr.f32.gmra.mxu0 %v6346_v16 }
 0xa0a   : > { %7569 = vmatmul.mubr.f32.gmra.mxu1 %v10094_v60  ;;  %10146 = vmatprep.mubr.msk.f32.mxu0 %vm6076_vm10, %v10115_v11 }
 0xa0b   : > { %v8234_v31 = vpop.permute.xlu0 %8233  ;;  %10113 = vmatprep.mubr.msk.f32.mxu1 %vm6076_vm10, %v10097_v7 }
 0xa0c   : > { %8433 = vmatprep.subr.mxu1 %v8234_v31  ;;  %v8276_v29 = vsel %vm2767_vm6, %v8232_v43, %v8234_v31 }
 0xa0d   : > { %8434 = vmatpush2.msra.mxu1 %v8276_v29  ;;  %v18017_v27 = vpop.f32.mrf.mxu0 }
 0xa0e   : > { %v7739_v53 = vpop.permute.xlu1 %7738  ;;  %7575 = vmatmul.mubr.f32.gmra.mxu1 %v10096_v61 }
 0xa0f   : > { %v7741_v38 = vpop.permute.xlu0 %7740  ;;  %10194 = vmatprep.mubr.msk.f32.mxu1 %vm6076_vm10, %v10163_v41  ;;  %v7042_v24 = vpop.f32.mrf.mxu0 }
 0xa10   : > { %7953 = vmatprep.subr.mxu0 %v7741_v38  ;;  %v7790_v50 = vsel %vm7766_vm11, %v7739_v53, %v7741_v38 }
 0xa11   : > { %7954 = vmatpush2.msra.mxu0 %v7790_v50  ;;  %v10114_v50 = vld [vmem:[%s19369_s3 + $0x300] sm:$0xff] }
 0xa12   : > { %v8228_v12 = vpop.permute.xlu1 %8227 }
 0xa14   : > { %v8230_v14 = vpop.permute.xlu0 %8229 }
 0xa15   : > { %8435 = vmatprep.subr.mxu1 %v8230_v14  ;;  %v8275_v10 = vsel %vm2767_vm6, %v8228_v12, %v8230_v14 }
 0xa16   : > { %8436 = vmatpush2.msra.mxu1 %v8275_v10  ;;  %v10117_v10 = vld [vmem:[%s19369_s3 + $0x318] sm:$0xff] }
 0xa17   : > { %v7735_v42 = vpop.permute.xlu1 %7734 }
 0xa19   : > { %v7737_v19 = vpop.permute.xlu0 %7736 }
 0xa1a   : > { %7955 = vmatprep.subr.mxu0 %v7737_v19  ;;  %v7789_v3 = vsel %vm7766_vm11, %v7735_v42, %v7737_v19 }
 0xa1b   : > { %v8224_v23 = vpop.permute.xlu1 %8223  ;;  %7956 = vmatpush2.msra.mxu0 %v7789_v3 }
 0xa1d   : > { %v8226_v8 = vpop.permute.xlu0 %8225  ;;  %v7046_v18 = vpop.f32.mrf.mxu0 }
 0xa1e   : > { %8437 = vmatprep.subr.mxu1 %v8226_v8  ;;  %v8274_v22 = vsel %vm2767_vm6, %v8224_v23, %v8226_v8 }
 0xa1f   : > { %8438 = vmatpush2.msra.mxu1 %v8274_v22  ;;  %v7048_v0 = vpop.f32.mrf.mxu0  ;;  %v19934_v22 = vmov 0.0  }
 0xa20   : > { %v7731_v9 = vpop.permute.xlu1 %7730 }
 0xa21   : > { %v18027_v47 = vpop.f32.mrf.mxu0 }
 0xa22   : > { %v7733_v5 = vpop.permute.xlu0 %7732 }
 0xa23   : > { %7957 = vmatprep.subr.mxu0 %v7733_v5  ;;  %v7788_v44 = vsel %vm7766_vm11, %v7731_v9, %v7733_v5  ;;  %v7054_v2 = vpop.f32.mrf.mxu0  ;;  %v10116_v5 = vld [vmem:[%s19369_s3 + $0x310] sm:$0xff] }
 0xa24   : > { %v8220_v59 = vpop.permute.xlu1 %8219  ;;  %7958 = vmatpush2.msra.mxu0 %v7788_v44 }
 0xa27   : > { %v8222_v20 = vpop.permute.xlu0 %8221 }
 0xa28   : > { %8439 = vmatprep.subr.mxu1 %v8222_v20  ;;  %v8273_v57 = vsel %vm2767_vm6, %v8220_v59, %v8222_v20 }
 0xa29   : > { %v7727_v45 = vpop.permute.xlu1 %7726  ;;  %8440 = vmatpush2.msra.mxu1 %v8273_v57 }
 0xa2b   : > { %v7729_v6 = vpop.permute.xlu0 %7728  ;;  %v7058_v21 = vpop.f32.mrf.mxu0 }
 0xa2c   : > { %7959 = vmatprep.subr.mxu0 %v7729_v6  ;;  %v7787_v40 = vsel %vm7766_vm11, %v7727_v45, %v7729_v6 }
 0xa2d   : > { %v8216_v30 = vpop.permute.xlu1 %8215  ;;  %7960 = vmatpush2.msra.mxu0 %v7787_v40  ;;  %v7060_v41 = vpop.f32.mrf.mxu0  ;;  %v10118_v40 = vld [vmem:[%s19369_s3 + $0x320] sm:$0xff] }
 0xa30   : > { %v8218_v37 = vpop.permute.xlu0 %8217 }
 0xa31   : > { %v8272_v63 = vsel %vm2767_vm6, %v8216_v30, %v8218_v37  ;;  %8441 = vmatprep.subr.mxu1 %v8218_v37  ;;  %v10162_v30 = vld [vmem:[%s19369_s3 + $0x400] sm:$0xff] }
 0xa32   : > { %v7723_v32 = vpop.permute.xlu1 %7722  ;;  %8442 = vmatpush2.msra.mxu1 %v8272_v63 }
 0xa33   : > { %v18053_v23 = vpop.f32.mrf.mxu0 }
 0xa34   : > { %v7725_v56 = vpop.permute.xlu0 %7724 }
 0xa35   : > { %v7786_v52 = vsel %vm7766_vm11, %v7723_v32, %v7725_v56  ;;  %7961 = vmatprep.subr.mxu0 %v7725_v56  ;;  %v7066_v57 = vpop.f32.mrf.mxu0  ;;  %v10165_v32 = vld [vmem:[%s19369_s3 + $0x418] sm:$0xff] }
 0xa36   : > { %v8212_v35 = vpop.permute.xlu1 %8211  ;;  %7962 = vmatpush2.msra.mxu0 %v7786_v52 }
 0xa38   : > { %v8214_v34 = vpop.permute.xlu0 %8213 }
 0xa39   : > { %v8271_v13 = vsel %vm2767_vm6, %v8212_v35, %v8214_v34  ;;  %8443 = vmatprep.subr.mxu1 %v8214_v34  ;;  %v10164_v35 = vld [vmem:[%s19369_s3 + $0x410] sm:$0xff] }
 0xa3a   : > { %v7719_v49 = vpop.permute.xlu1 %7718  ;;  %8444 = vmatpush2.msra.mxu1 %v8271_v13  ;;  %v10123_v13 = vld [vmem:[%s19369_s3 + $0x348] sm:$0xff] }
 0xa3b   : > { %v6825_v36 = vpop.f32.mrf.mxu1 }
 0xa3c   : > { %v7721_v4 = vpop.permute.xlu0 %7720  ;;  %v18022_v54 = vadd.f32 %v7034_v33, %v6825_v36  ;;  %v10119_v33 = vld [vmem:[%s19369_s3 + $0x328] sm:$0xff]  ;;  %v10122_v36 = vld [vmem:[%s19369_s3 + $0x340] sm:$0xff] }
 0xa3d   : > { %v7785_v48 = vsel %vm7766_vm11, %v7719_v49, %v7721_v4  ;;  %7963 = vmatprep.subr.mxu0 %v7721_v4  ;;  %v18025_v17 = vpop.f32.mrf.mxu1  ;;  %v10166_v4 = vld [vmem:[%s19369_s3 + $0x420] sm:$0xff] }
 0xa3e   : > { %v8208_v1 = vpop.permute.xlu1 %8207  ;;  %7964 = vmatpush2.msra.mxu0 %v7785_v48  ;;  %v10125_v48 = vld [vmem:[%s19369_s3 + $0x358] sm:$0xff] }
 0xa40   : > { %v8210_v46 = vpop.permute.xlu0 %8209  ;;  %v18029_v15 = vpop.f32.mrf.mxu1 }
 0xa41   : > { %v8270_v62 = vsel %vm2767_vm6, %v8208_v1, %v8210_v46  ;;  %8445 = vmatprep.subr.mxu1 %v8210_v46  ;;  %v10169_v1 = vld [vmem:[%s19369_s3 + $0x438] sm:$0xff] }
 0xa42   : > { %v7715_v28 = vpop.permute.xlu1 %7714  ;;  %8446 = vmatpush2.msra.mxu1 %v8270_v62  ;;  %v6833_v51 = vpop.f32.mrf.mxu1 }
 0xa43   : > { %v18032_v39 = vadd.f32 %v7042_v24, %v6833_v51  ;;  %v10121_v24 = vld [vmem:[%s19369_s3 + $0x338] sm:$0xff]  ;;  %v10127_v51 = vld [vmem:[%s19369_s3 + $0x368] sm:$0xff] }
 0xa44   : > { %v7717_v58 = vpop.permute.xlu0 %7716  ;;  %v6837_v26 = vpop.f32.mrf.mxu1 }
 0xa45   : > { %v7784_v25 = vsel %vm7766_vm11, %v7715_v28, %v7717_v58  ;;  %7965 = vmatprep.subr.mxu0 %v7717_v58  ;;  %v18035_v16 = vadd.f32 %v7046_v18, %v6837_v26  ;;  %v10120_v18 = vld [vmem:[%s19369_s3 + $0x330] sm:$0xff]  ;;  %v10171_v58 = vld [vmem:[%s19369_s3 + $0x448] sm:$0xff] }
 0xa46   : > { %v8204_v60 = vpop.permute.xlu1 %8203  ;;  %7966 = vmatpush2.msra.mxu0 %v7784_v25  ;;  %v6839_v11 = vpop.f32.mrf.mxu1  ;;  %v10168_v28 = vld [vmem:[%s19369_s3 + $0x430] sm:$0xff]  ;;  %v10126_v25 = vld [vmem:[%s19369_s3 + $0x360] sm:$0xff] }
 0xa47   : > { %v18037_v7 = vadd.f32 %v7048_v0, %v6839_v11  ;;  %v10167_v0 = vld [vmem:[%s19369_s3 + $0x428] sm:$0xff]  ;;  %v10129_v11 = vld [vmem:[%s19369_s3 + $0x378] sm:$0xff] }
 0xa48   : > { %v8206_v43 = vpop.permute.xlu0 %8205 }
 0xa49   : > { %v8269_v31 = vsel %vm2767_vm6, %v8204_v60, %v8206_v43  ;;  %8447 = vmatprep.subr.mxu1 %v8206_v43  ;;  %v18040_v61 = vpop.f32.mrf.mxu1  ;;  %v10173_v43 = vld [vmem:[%s19369_s3 + $0x458] sm:$0xff] }
 0xa4a   : > { %v7711_v29 = vpop.permute.xlu1 %7710  ;;  %8448 = vmatpush2.msra.mxu1 %v8269_v31 }
 0xa4b   : > { %v6845_v53 = vpop.f32.mrf.mxu1 }
 0xa4c   : > { %v7713_v38 = vpop.permute.xlu0 %7712  ;;  %v18045_v12 = vadd.f32 %v7054_v2, %v6845_v53  ;;  %v10124_v2 = vld [vmem:[%s19369_s3 + $0x350] sm:$0xff] }
 0xa4d   : > { %v7783_v14 = vsel %vm7766_vm11, %v7711_v29, %v7713_v38  ;;  %7967 = vmatprep.subr.mxu0 %v7713_v38  ;;  %v6849_v42 = vpop.f32.mrf.mxu1  ;;  %v10128_v29 = vld [vmem:[%s19369_s3 + $0x370] sm:$0xff]  ;;  %v10131_v38 = vld [vmem:[%s19369_s3 + $0x388] sm:$0xff] }
 0xa4e   : > { %v8200_v19 = vpop.permute.xlu1 %8199  ;;  %7968 = vmatpush2.msra.mxu0 %v7783_v14  ;;  %v18051_v3 = vadd.f32 %v7058_v21, %v6849_v42  ;;  %v10170_v21 = vld [vmem:[%s19369_s3 + $0x440] sm:$0xff] }
 0xa4f   : > { %7970 = vmatmul.mubr.f32.vlgmr.msra.gmra.mxu0 %v10114_v50  ;;  %v6851_v8 = vpop.f32.mrf.mxu1  ;;  %9161 = vmatprep.subr.mxu0 %v19934_v22  ;;  %v10175_v50 = vld [vmem:[%s19369_s3 + $0x468] sm:$0xff]  ;;  %v10174_v42 = vld [vmem:[%s19369_s3 + $0x460] sm:$0xff] }
 0xa50   : > { %v8202_v9 = vpop.permute.xlu0 %8201  ;;  %10147 = vmatprep.mubr.msk.f32.mxu0 %vm6076_vm10, %v10117_v10  ;;  %v18060_v44 = vadd.f32 %v7060_v41, %v6851_v8  ;;  %v10172_v41 = vld [vmem:[%s19369_s3 + $0x450] sm:$0xff]  ;;  %v10130_v10 = vld [vmem:[%s19369_s3 + $0x380] sm:$0xff]  ;;  %v10177_v8 = vld [vmem:[%s19369_s3 + $0x478] sm:$0xff] }
 0xa51   : > { %v8268_v59 = vsel %vm2767_vm6, %v8200_v19, %v8202_v9  ;;  %8449 = vmatprep.subr.mxu1 %v8202_v9  ;;  %v10133_v19 = vld [vmem:[%s19369_s3 + $0x398] sm:$0xff] }
 0xa52   : > { %8450 = vmatpush2.msra.mxu1 %v8268_v59  ;;  %v18066_v20 = vpop.f32.mrf.mxu1  ;;  %v8196_v45 = vpop.permute.xlu1 %8195  ;;  %v10132_v59 = vld [vmem:[%s19369_s3 + $0x390] sm:$0xff] }
 0xa53   : > { %7976 = vmatmul.mubr.f32.gmra.mxu0 %v10116_v5 }
 0xa54   : > { %v8198_v6 = vpop.permute.xlu0 %8197  ;;  %10148 = vmatprep.mubr.msk.f32.mxu0 %vm6076_vm10, %v10119_v33  ;;  %v6857_v37 = vpop.f32.mrf.mxu1  ;;  %v10176_v33 = vld [vmem:[%s19369_s3 + $0x470] sm:$0xff] }
 0xa55   : > { %v8267_v63 = vsel %vm2767_vm6, %v8196_v45, %v8198_v6  ;;  %8451 = vmatprep.subr.mxu1 %v8198_v6  ;;  %v18082_v56 = vadd.f32 %v7066_v57, %v6857_v37  ;;  %v10135_v57 = vld [vmem:[%s19369_s3 + $0x3a8] sm:$0xff]  ;;  %v10178_v37 = vld [vmem:[%s19369_s3 + $0x480] sm:$0xff] }
 0xa56   : > { %8452 = vmatpush2.msra.mxu1 %v8267_v63  ;;  %v18084_v52 = vpop.f32.mrf.mxu1  ;;  %v10179_v45 = vld [vmem:[%s19369_s3 + $0x488] sm:$0xff]  ;;  %v10137_v63 = vld [vmem:[%s19369_s3 + $0x3b8] sm:$0xff] }
 0xa57   : > { %7982 = vmatmul.mubr.f32.gmra.mxu0 %v10118_v40  ;;  %8454 = vmatmul.mubr.f32.vlgmr.msra.gmra.mxu1 %v10162_v30  ;;  %v10134_v30 = vld [vmem:[%s19369_s3 + $0x3a0] sm:$0xff] }
 0xa58   : > { %10149 = vmatprep.mubr.msk.f32.mxu0 %vm6076_vm10, %v10121_v24  ;;  %10195 = vmatprep.mubr.msk.f32.mxu1 %vm6076_vm10, %v10165_v32  ;;  %v18094_v34 = vpop.f32.mrf.mxu1  ;;  %v10181_v24 = vld [vmem:[%s19369_s3 + $0x498] sm:$0xff] }
 0xa5b   : > { %7988 = vmatmul.mubr.f32.gmra.mxu0 %v10120_v18  ;;  %8460 = vmatmul.mubr.f32.gmra.mxu1 %v10164_v35  ;;  %v18102_v49 = vpop.f32.mrf.mxu1  ;;  %v10136_v18 = vld [vmem:[%s19369_s3 + $0x3b0] sm:$0xff] }
 0xa5c   : > { %10150 = vmatprep.mubr.msk.f32.mxu0 %vm6076_vm10, %v10123_v13  ;;  %10196 = vmatprep.mubr.msk.f32.mxu1 %vm6076_vm10, %v10167_v0  ;;  %v10180_v35 = vld [vmem:[%s19369_s3 + $0x490] sm:$0xff]  ;;  %v10139_v0 = vld [vmem:[%s19369_s3 + $0x3c8] sm:$0xff] }
 0xa5d   : > { %v18118_v46 = vpop.f32.mrf.mxu1 }
 0xa5f   : > { %7994 = vmatmul.mubr.f32.gmra.mxu0 %v10122_v36  ;;  %8466 = vmatmul.mubr.f32.gmra.mxu1 %v10166_v4  ;;  %v18120_v62 = vpop.f32.mrf.mxu1  ;;  %v10183_v36 = vld [vmem:[%s19369_s3 + $0x4a8] sm:$0xff] }
 0xa60   : > { %10151 = vmatprep.mubr.msk.f32.mxu0 %vm6076_vm10, %v10125_v48  ;;  %10197 = vmatprep.mubr.msk.f32.mxu1 %vm6076_vm10, %v10169_v1  ;;  %v10138_v48 = vld [vmem:[%s19369_s3 + $0x3c0] sm:$0xff] }
 0xa61   : > { %v18136_v26 = vpop.f32.mrf.mxu1  ;;  %v10182_v1 = vld [vmem:[%s19369_s3 + $0x4a0] sm:$0xff] }
 0xa63   : > { %8000 = vmatmul.mubr.f32.gmra.mxu0 %v10124_v2  ;;  %8472 = vmatmul.mubr.f32.gmra.mxu1 %v10168_v28  ;;  %v10141_v28 = vld [vmem:[%s19369_s3 + $0x3d8] sm:$0xff] }
 0xa64   : > { %10152 = vmatprep.mubr.msk.f32.mxu0 %vm6076_vm10, %v10127_v51  ;;  %10198 = vmatprep.mubr.msk.f32.mxu1 %vm6076_vm10, %v10171_v58  ;;  %v18146_v60 = vpop.f32.mrf.mxu1  ;;  %v10185_v51 = vld [vmem:[%s19369_s3 + $0x4b8] sm:$0xff] }
 0xa66   : > { %v18154_v31 = vpop.f32.mrf.mxu1 }
 0xa67   : > { %8006 = vmatmul.mubr.f32.gmra.mxu0 %v10126_v25  ;;  %8478 = vmatmul.mubr.f32.gmra.mxu1 %v10170_v21  ;;  %v10140_v25 = vld [vmem:[%s19369_s3 + $0x3d0] sm:$0xff] }
 0xa68   : > { %10153 = vmatprep.mubr.msk.f32.mxu0 %vm6076_vm10, %v10129_v11  ;;  %10199 = vmatprep.mubr.msk.f32.mxu1 %vm6076_vm10, %v10173_v43  ;;  %v18164_v53 = vpop.f32.mrf.mxu1  ;;  %v10184_v21 = vld [vmem:[%s19369_s3 + $0x4b0] sm:$0xff]  ;;  %v10143_v11 = vld [vmem:[%s19369_s3 + $0x3e8] sm:$0xff] }
 0xa69   : > { %v10187_v43 = vld [vmem:[%s19369_s3 + $0x4c8] sm:$0xff] }
 0xa6a   : > { %v18172_v14 = vpop.f32.mrf.mxu1 }
 0xa6b   : > { %8012 = vmatmul.mubr.f32.gmra.mxu0 %v10128_v29  ;;  %8484 = vmatmul.mubr.f32.gmra.mxu1 %v10172_v41 }
 0xa6c   : > { %10154 = vmatprep.mubr.msk.f32.mxu0 %vm6076_vm10, %v10131_v38  ;;  %10200 = vmatprep.mubr.msk.f32.mxu1 %vm6076_vm10, %v10175_v50 }
 0xa6d   : > { %v18188_v9 = vpop.f32.mrf.mxu1 }
 0xa6f   : > { %8018 = vmatmul.mubr.f32.gmra.mxu0 %v10130_v10  ;;  %8490 = vmatmul.mubr.f32.gmra.mxu1 %v10174_v42  ;;  %v18190_v5 = vpop.f32.mrf.mxu1  ;;  %v10142_v42 = vld [vmem:[%s19369_s3 + $0x3e0] sm:$0xff] }
 0xa70   : > { %10155 = vmatprep.mubr.msk.f32.mxu0 %vm6076_vm10, %v10133_v19  ;;  %10201 = vmatprep.mubr.msk.f32.mxu1 %vm6076_vm10, %v10177_v8  ;;  %v10186_v19 = vld [vmem:[%s19369_s3 + $0x4c0] sm:$0xff] }
 0xa71   : > { %v18206_v6 = vpop.f32.mrf.mxu1 }
 0xa73   : > { %8024 = vmatmul.mubr.f32.gmra.mxu0 %v10132_v59  ;;  %8496 = vmatmul.mubr.f32.gmra.mxu1 %v10176_v33  ;;  %v18208_v40 = vpop.f32.mrf.mxu1  ;;  %v10145_v59 = vld [vmem:[%s19369_s3 + $0x3f8] sm:$0xff] }
 0xa74   : > { %10156 = vmatprep.mubr.msk.f32.mxu0 %vm6076_vm10, %v10135_v57  ;;  %10202 = vmatprep.mubr.msk.f32.mxu1 %vm6076_vm10, %v10179_v45  ;;  %v10189_v33 = vld [vmem:[%s19369_s3 + $0x4d8] sm:$0xff]  ;;  %v10191_v45 = vld [vmem:[%s19369_s3 + $0x4e8] sm:$0xff] }
 0xa76   : > { %v18224_v32 = vpop.f32.mrf.mxu1 }
 0xa77   : > { %8030 = vmatmul.mubr.f32.gmra.mxu0 %v10134_v30  ;;  %8502 = vmatmul.mubr.f32.gmra.mxu1 %v10178_v37  ;;  %v10190_v37 = vld [vmem:[%s19369_s3 + $0x4e0] sm:$0xff] }
 0xa78   : > { %10157 = vmatprep.mubr.msk.f32.mxu0 %vm6076_vm10, %v10137_v63  ;;  %10203 = vmatprep.mubr.msk.f32.mxu1 %vm6076_vm10, %v10181_v24  ;;  %v18234_v13 = vpop.f32.mrf.mxu1  ;;  %v10193_v63 = vld [vmem:[%s19369_s3 + $0x4f8] sm:$0xff] }
 0xa7a   : > { %v18242_v4 = vpop.f32.mrf.mxu1 }
 0xa7b   : > { %8036 = vmatmul.mubr.f32.gmra.mxu0 %v10136_v18  ;;  %8508 = vmatmul.mubr.f32.gmra.mxu1 %v10180_v35  ;;  %v10192_v35 = vld [vmem:[%s19369_s3 + $0x4f0] sm:$0xff] }
 0xa7c   : > { %10158 = vmatprep.mubr.msk.f32.mxu0 %vm6076_vm10, %v10139_v0  ;;  %10204 = vmatprep.mubr.msk.f32.mxu1 %vm6076_vm10, %v10183_v36  ;;  %v18252_v2 = vpop.f32.mrf.mxu1 }
 0xa7f   : > { %8042 = vmatmul.mubr.f32.gmra.mxu0 %v10138_v48  ;;  %8514 = vmatmul.mubr.f32.gmra.mxu1 %v10182_v1  ;;  %v18260_v58 = vpop.f32.mrf.mxu1 }
 0xa80   : > { %10159 = vmatprep.mubr.msk.f32.mxu0 %vm6076_vm10, %v10141_v28  ;;  %10205 = vmatprep.mubr.msk.f32.mxu1 %vm6076_vm10, %v10185_v51 }
 0xa81   : > { %v18276_v29 = vpop.f32.mrf.mxu1  ;;  %v7070_v41 = vpop.f32.mrf.mxu0 }
 0xa82   : > { %v7071_v38 = vadd.f32 %v7070_v41, %v18084_v52 }
 0xa83   : > { %8048 = vmatmul.mubr.f32.gmra.mxu0 %v10140_v25  ;;  %8520 = vmatmul.mubr.f32.gmra.mxu1 %v10184_v21  ;;  %v7486_v50 = vpop.f32.mrf.mxu1  ;;  %v7072_v10 = vpop.f32.mrf.mxu0 }
 0xa84   : > { %10160 = vmatprep.mubr.msk.f32.mxu0 %vm6076_vm10, %v10143_v11  ;;  %10206 = vmatprep.mubr.msk.f32.mxu1 %vm6076_vm10, %v10187_v43  ;;  %v18288_v8 = vadd.f32 %v7486_v50, %v18022_v54  ;;  %v7073_v52 = vadd.f32 %v7072_v10, %v18094_v34  ;;  %v10144_v54 = vld [vmem:[%s19369_s3 + $0x3f0] sm:$0xff] }
 0xa85   : > { %v18297_v57 = vpop.f32.mrf.mxu1  ;;  %v10188_v34 = vld [vmem:[%s19369_s3 + $0x4d0] sm:$0xff] }
 0xa87   : > { %8054 = vmatmul.mubr.f32.gmra.mxu0 %v10142_v42  ;;  %8526 = vmatmul.mubr.f32.gmra.mxu1 %v10186_v19 }
 0xa88   : > { %10161 = vmatprep.mubr.msk.f32.mxu0 %vm6076_vm10, %v10145_v59  ;;  %10207 = vmatprep.mubr.msk.f32.mxu1 %vm6076_vm10, %v10189_v33 }
 0xa8b   : > { %8060 = vmatmul.mubr.f32.gmra.mxu0 %v10144_v54  ;;  %8532 = vmatmul.mubr.f32.gmra.mxu1 %v10188_v34  ;;  %v18310_v30 = vpop.f32.mrf.mxu1 }
 0xa8c   : > { %10208 = vmatprep.mubr.msk.f32.mxu1 %vm6076_vm10, %v10191_v45 }
 0xa8d   : > { %v7494_v24 = vpop.f32.mrf.mxu1 }
 0xa8e   : > { %v18320_v18 = vadd.f32 %v7494_v24, %v18032_v39 }
 0xa8f   : > { %8538 = vmatmul.mubr.f32.gmra.mxu1 %v10190_v37 }
 0xa90   : > { %10209 = vmatprep.mubr.msk.f32.mxu1 %vm6076_vm10, %v10193_v63 }
 0xa93   : > { %8544 = vmatmul.mubr.f32.gmra.mxu1 %v10192_v35  ;;  %v7498_v0 = vpop.f32.mrf.mxu1 }
 0xa94   : > { %v18327_v36 = vadd.f32 %v7498_v0, %v18035_v16 }
 0xa95   : > { %v7500_v48 = vpop.f32.mrf.mxu1 }
 0xa96   : > { %v18330_v1 = vadd.f32 %v7500_v48, %v18037_v7 }
 0xa9b   : > { %v18332_v28 = vpop.f32.mrf.mxu1 }
 0xa9d   : > { %v7506_v39 = vpop.f32.mrf.mxu1 }
 0xa9e   : > { %v18335_v51 = vadd.f32 %v7506_v39, %v18045_v12 }
 0xaa2   : > { %v7510_v25 = vpop.f32.mrf.mxu1 }
 0xaa3   : > { %v18338_v21 = vadd.f32 %v7510_v25, %v18051_v3 }
 0xaa4   : > { %v7512_v11 = vpop.f32.mrf.mxu1  ;;  %v18340_v43 = vpop.f32.mrf.mxu0 }
 0xaa5   : > { %v18343_v16 = vadd.f32 %v7512_v11, %v18060_v44 }
 0xaa6   : > { %v18345_v41 = vpop.f32.mrf.mxu1  ;;  %v7078_v7 = vpop.f32.mrf.mxu0 }
 0xaa7   : > { %v7079_v44 = vadd.f32 %v7078_v7, %v18118_v46 }
 0xaa8   : > { %v7518_v50 = vpop.f32.mrf.mxu1  ;;  %v7082_v10 = vpop.f32.mrf.mxu0 }
 0xaa9   : > { %v18348_v42 = vadd.f32 %v7518_v50, %v18082_v56  ;;  %v7083_v37 = vadd.f32 %v7082_v10, %v18120_v62 }
 0xaaa   : > { %v7522_v12 = vpop.f32.mrf.mxu1  ;;  %v7084_v19 = vpop.f32.mrf.mxu0 }
 0xaab   : > { %v18350_v59 = vadd.f32 %v7522_v12, %v7071_v38  ;;  %v7085_v35 = vadd.f32 %v7084_v19, %v18136_v26 }
 0xaac   : > { %v7524_v3 = vpop.f32.mrf.mxu1  ;;  %v18352_v33 = vpop.f32.mrf.mxu0 }
 0xaad   : > { %v18354_v54 = vadd.f32 %v7524_v3, %v7073_v52 }
 0xaae   : > { %v18357_v34 = vpop.f32.mrf.mxu1  ;;  %v7090_v45 = vpop.f32.mrf.mxu0 }
 0xaaf   : > { %v7091_v46 = vadd.f32 %v7090_v45, %v18154_v31 }
 0xab0   : > { %v7530_v63 = vpop.f32.mrf.mxu1  ;;  %v7094_v24 = vpop.f32.mrf.mxu0 }
 0xab1   : > { %v18360_v56 = vadd.f32 %v7530_v63, %v7079_v44  ;;  %v7095_v7 = vadd.f32 %v7094_v24, %v18164_v53 }
 0xab2   : > { %v7534_v38 = vpop.f32.mrf.mxu1  ;;  %v7096_v0 = vpop.f32.mrf.mxu0 }
 0xab3   : > { %v18363_v48 = vadd.f32 %v7534_v38, %v7083_v37  ;;  %v7097_v26 = vadd.f32 %v7096_v0, %v18172_v14 }
 0xab4   : > { %v7536_v39 = vpop.f32.mrf.mxu1  ;;  %v18365_v52 = vpop.f32.mrf.mxu0 }
 0xab5   : > { %v18367_v25 = vadd.f32 %v7536_v39, %v7085_v35 }
 0xab6   : > { %v18370_v11 = vpop.f32.mrf.mxu1  ;;  %v7102_v62 = vpop.f32.mrf.mxu0 }
 0xab7   : > { %v7103_v31 = vadd.f32 %v7102_v62, %v18190_v5 }
 0xab8   : > { %v7542_v50 = vpop.f32.mrf.mxu1  ;;  %v7106_v10 = vpop.f32.mrf.mxu0 }
 0xab9   : > { %v18373_v12 = vadd.f32 %v7542_v50, %v7091_v46  ;;  %v7107_v53 = vadd.f32 %v7106_v10, %v18206_v6 }
 0xaba   : > { %v7546_v19 = vpop.f32.mrf.mxu1  ;;  %v7108_v3 = vpop.f32.mrf.mxu0 }
 0xabb   : > { %v18376_v44 = vadd.f32 %v7546_v19, %v7095_v7  ;;  %v7109_v14 = vadd.f32 %v7108_v3, %v18208_v40 }
 0xabc   : > { %v7548_v37 = vpop.f32.mrf.mxu1 }
 0xabd   : > { %v18378_v63 = vadd.f32 %v7548_v37, %v7097_v26  ;;  %v18381_v45 = vpop.f32.mrf.mxu0 }
 0xabe   : > { %v18383_v35 = vpop.f32.mrf.mxu1 }
 0xabf   : > { %v7114_v38 = vpop.f32.mrf.mxu0 }
 0xac0   : > { %v7554_v24 = vpop.f32.mrf.mxu1  ;;  %v7115_v5 = vadd.f32 %v7114_v38, %v18234_v13 }
 0xac1   : > { %v18386_v39 = vadd.f32 %v7554_v24, %v7103_v31 }
 0xac2   : > { %v7558_v0 = vpop.f32.mrf.mxu1 }
 0xac3   : > { %v18389_v46 = vadd.f32 %v7558_v0, %v7107_v53 }
 0xac4   : > { %v7560_v7 = vpop.f32.mrf.mxu1  ;;  %v7118_v50 = vpop.f32.mrf.mxu0 }
 0xac5   : > { %v18391_v26 = vadd.f32 %v7560_v7, %v7109_v14  ;;  %v7119_v6 = vadd.f32 %v7118_v50, %v18242_v4 }
 0xac6   : > { %v18394_v62 = vpop.f32.mrf.mxu1  ;;  %v7120_v19 = vpop.f32.mrf.mxu0 }
 0xac7   : > { %v7121_v31 = vadd.f32 %v7120_v19, %v18252_v2  ;;  %v7037_v2 = vadd.f32 %v18014_v55, %v18025_v17  ;;  %v7053_v17 = vadd.f32 %v18027_v47, %v18040_v61 }
 0xac8   : > { %v7566_v10 = vpop.f32.mrf.mxu1 }
 0xac9   : > { %v18397_v37 = vadd.f32 %v7566_v10, %v7115_v5  ;;  %v18400_v40 = vpop.f32.mrf.mxu0 }
 0xaca   : > { %v7570_v3 = vpop.f32.mrf.mxu1 }
 0xacb   : > { %v18402_v53 = vadd.f32 %v7570_v3, %v7119_v6  ;;  %v7126_v24 = vpop.f32.mrf.mxu0  ;;  %v7041_v6 = vadd.f32 %v18017_v27, %v18029_v15 }
 0xacc   : > { %v7572_v14 = vpop.f32.mrf.mxu1  ;;  %v7127_v13 = vadd.f32 %v7126_v24, %v18276_v29 }
 0xacd   : > { %19935 = vst [vmem:[#allocation63_spill] sm:$0xff] %v18402_v53  ;;  %v18404_v0 = vadd.f32 %v7572_v14, %v7121_v31  ;;  %v7582_v31 = vadd.f32 %v18297_v57, %v7037_v2  ;;  %v7583_v14 = vadd.f32 %v18310_v30, %v7041_v6  ;;  %v8606_v53 = vpop.permute.xlu0 %8605 }
 0xace   : > { %v18407_v38 = vpop.f32.mrf.mxu1 }
 0xacf   : > { %19936 = vst [vmem:[#allocation74_spill] sm:$0xff] %v18404_v0  ;;  %19937 = vst [vmem:[#allocation37_spill] sm:$0xff] %v18407_v38  ;;  %v8601_v0 = vpop.permute.xlu1 %8600 }
 0xad0   : > { %v7578_v7 = vpop.f32.mrf.mxu1 }
 0xad1   : > { %v18409_v4 = vadd.f32 %v7578_v7, %v7127_v13 }
 0xad3   : > { %19938 = vst [vmem:[#allocation55_spill] sm:$0xff] %v18409_v4 }
 0xb0f   : > { %v7971_v50 = vpop.f32.mrf.mxu0 }
 0xb10   : > { %v8066_v3 = vadd.f32 %v7971_v50, %v18288_v8 }
 0xb11   : > { %v7973_v5 = vpop.f32.mrf.mxu0 }
 0xb12   : > { %v8067_v13 = vadd.f32 %v7973_v5, %v7582_v31 }
 0xb13   : > { %v7977_v19 = vpop.f32.mrf.mxu0 }
 0xb14   : > { %v8068_v38 = vadd.f32 %v7977_v19, %v7583_v14 }
 0xb15   : > { %v7979_v10 = vpop.f32.mrf.mxu0 }
 0xb16   : > { %v8069_v57 = vadd.f32 %v7979_v10, %v18320_v18 }
 0xb17   : > { %v7983_v29 = vpop.f32.mrf.mxu0  ;;  %v8455_v24 = vpop.f32.mrf.mxu1 }
 0xb18   : > { %v8550_v7 = vadd.f32 %v8455_v24, %v8066_v3  ;;  %v8070_v6 = vadd.f32 %v7983_v29, %v18327_v36  ;;  %v7587_v3 = vadd.f32 %v18332_v28, %v7053_v17  ;;  %v8611_v24 = vpop.permute.xlu1 %8610 }
 0xb19   : > { %v7985_v22 = vpop.f32.mrf.mxu0  ;;  %v8457_v4 = vpop.f32.mrf.mxu1 }
 0xb1a   : > { %v8551_v55 = vadd.f32 %v8457_v4, %v8067_v13  ;;  %v18421_v8 = vadd.f32 %v8601_v0, %v8550_v7  ;;  %v8071_v36 = vadd.f32 %v7985_v22, %v18330_v1 }
 0xb1b   : > { %v7989_v27 = vpop.f32.mrf.mxu0  ;;  %v8461_v15 = vpop.f32.mrf.mxu1 }
 0xb1c   : > { %v18423_v50 = vadd.f32 %v8601_v0, %v8551_v55  ;;  %v8552_v30 = vadd.f32 %v8461_v15, %v8068_v38  ;;  %v8710_v18 = vmax.f32 %v18421_v8, 0.0  ;;  %v8072_v14 = vadd.f32 %v7989_v27, %v7587_v3  ;;  %v8616_v15 = vpop.permute.xlu0 %8615 }
 0xb1d   : > { %v7991_v5 = vpop.f32.mrf.mxu0  ;;  %v8463_v2 = vpop.f32.mrf.mxu1 }
 0xb1e   : > { %v8711_v19 = vmax.f32 %v18423_v50, 0.0  ;;  %v18427_v4 = vadd.f32 %v8606_v53, %v8552_v30  ;;  %v8553_v31 = vadd.f32 %v8463_v2, %v8069_v57  ;;  %v7065_v57 = vadd.f32 %v18053_v23, %v18066_v20 }
 0xb1f   : > { %v7995_v47 = vpop.f32.mrf.mxu0  ;;  %v8467_v61 = vpop.f32.mrf.mxu1  ;;  %v8073_v22 = vadd.f32 %v7991_v5, %v18335_v51 }
 0xb20   : > { %v8712_v10 = vmax.f32 %v18427_v4, 0.0  ;;  %v8554_v0 = vadd.f32 %v8467_v61, %v8070_v6  ;;  %8776 = vrot.lane.b32.xlu0 %v8711_v19, %s19757_s15  ;;  %v18440_v13 = vadd.f32 %v8606_v53, %v8553_v31  ;;  %v8074_v27 = vadd.f32 %v7995_v47, %v18338_v21 }
 0xb21   : > { %v7997_v38 = vpop.f32.mrf.mxu0  ;;  %v8469_v29 = vpop.f32.mrf.mxu1  ;;  %v7591_v20 = vadd.f32 %v18345_v41, %v7065_v57 }
 0xb22   : > { %v10926_v28 = vpack.i.bf16 %v8712_v10, %v8710_v18  ;;  %v8555_v7 = vadd.f32 %v8469_v29, %v8071_v36  ;;  %v18445_v1 = vadd.f32 %v8611_v24, %v8554_v0  ;;  %v8713_v53 = vmax.f32 %v18440_v13, 0.0 }
 0xb23   : > { %v8001_v55 = vpop.f32.mrf.mxu0  ;;  %v8473_v17 = vpop.f32.mrf.mxu1  ;;  %v8075_v21 = vadd.f32 %v7997_v38, %v18343_v16 }
 0xb24   : > { %v8556_v30 = vadd.f32 %v8473_v17, %v8072_v14  ;;  %10927 = vrot.lane.b32.xlu1 %v10926_v28, %s19757_s15  ;;  %v18450_v31 = vadd.f32 %v8611_v24, %v8555_v7  ;;  %v8714_v51 = vmax.f32 %v18445_v1, 0.0  ;;  %v8621_v24 = vpop.permute.xlu1 %8620  ;;  %v8076_v28 = vadd.f32 %v8001_v55, %v7591_v20  ;;  %v8626_v16 = vpop.permute.xlu0 %8625 }
 0xb25   : > { %v8003_v2 = vpop.f32.mrf.mxu0  ;;  %v8475_v6 = vpop.f32.mrf.mxu1  ;;  %v7077_v17 = vadd.f32 %v18340_v43, %v18102_v49 }
 0xb26   : > { %v18452_v61 = vadd.f32 %v8616_v15, %v8556_v30  ;;  %v8557_v3 = vadd.f32 %v8475_v6, %v8073_v22  ;;  %v8715_v14 = vmax.f32 %v18450_v31, 0.0  ;;  %v8077_v38 = vadd.f32 %v8003_v2, %v18348_v42 }
 0xb27   : > { %v8007_v36 = vpop.f32.mrf.mxu0  ;;  %v8479_v23 = vpop.f32.mrf.mxu1 }
 0xb28   : > { %v19513_v5 = vmax.f32 %v18452_v61, 0.0  ;;  %v8558_v0 = vadd.f32 %v8479_v23, %v8074_v27  ;;  %8780 = vrot.lane.b32.xlu1 %v8713_v53, %s19757_s15  ;;  %v18466_v7 = vadd.f32 %v8616_v15, %v8557_v3  ;;  %v8078_v55 = vadd.f32 %v8007_v36, %v18350_v59 }
 0xb29   : > { %v8009_v47 = vpop.f32.mrf.mxu0  ;;  %v8481_v29 = vpop.f32.mrf.mxu1 }
 0xb2a   : > { %v10931_v41 = vpack.i.bf16 %v19513_v5, %v8714_v51  ;;  %v8559_v57 = vadd.f32 %v8481_v29, %v8075_v21  ;;  %v18471_v27 = vadd.f32 %v8621_v24, %v8558_v0  ;;  %v8717_v49 = vmax.f32 %v18466_v7, 0.0 }
 0xb2b   : > { %v8013_v22 = vpop.f32.mrf.mxu0  ;;  %v8485_v30 = vpop.f32.mrf.mxu1  ;;  %v7595_v0 = vadd.f32 %v18357_v34, %v7077_v17  ;;  %v8079_v59 = vadd.f32 %v8009_v47, %v18354_v54 }
 0xb2c   : > { %v8560_v6 = vadd.f32 %v8485_v30, %v8076_v28  ;;  %10932 = vrot.lane.b32.xlu0 %v10931_v41, %s19757_s15  ;;  %8784 = vrot.lane.b32.xlu1 %v8715_v14, %s19757_s15  ;;  %v18479_v43 = vadd.f32 %v8621_v24, %v8559_v57  ;;  %v8718_v21 = vmax.f32 %v18471_v27, 0.0  ;;  %v8631_v41 = vpop.permute.xlu1 %8630  ;;  %v8636_v54 = vpop.permute.xlu0 %8635 }
 0xb2d   : > { %v8015_v15 = vpop.f32.mrf.mxu0  ;;  %v8487_v3 = vpop.f32.mrf.mxu1  ;;  %v8080_v30 = vadd.f32 %v8013_v22, %v7595_v0 }
 0xb2e   : > { %v18481_v23 = vadd.f32 %v8626_v16, %v8560_v6  ;;  %v8561_v42 = vadd.f32 %v8487_v3, %v8077_v38  ;;  %v8719_v57 = vmax.f32 %v18479_v43, 0.0  ;;  %v7089_v38 = vadd.f32 %v18352_v33, %v18146_v60 }
 0xb2f   : > { %v8019_v2 = vpop.f32.mrf.mxu0  ;;  %v8491_v20 = vpop.f32.mrf.mxu1  ;;  %v8081_v47 = vadd.f32 %v8015_v15, %v18360_v56 }
 0xb30   : > { %v19514_v29 = vmax.f32 %v18481_v23, 0.0  ;;  %v8562_v28 = vadd.f32 %v8491_v20, %v8078_v55  ;;  %8788 = vrot.lane.b32.xlu0 %v8717_v49, %s19757_s15  ;;  %v18495_v17 = vadd.f32 %v8626_v16, %v8561_v42  ;;  %v8082_v22 = vadd.f32 %v8019_v2, %v18363_v48 }
 0xb31   : > { %v8021_v36 = vpop.f32.mrf.mxu0  ;;  %v8493_v24 = vpop.f32.mrf.mxu1 }
 0xb32   : > { %v10936_v34 = vpack.i.bf16 %v19514_v29, %v8718_v21  ;;  %v8563_v6 = vadd.f32 %v8493_v24, %v8079_v59  ;;  %v18500_v20 = vadd.f32 %v8631_v41, %v8562_v28  ;;  %v19515_v60 = vmax.f32 %v18495_v17, 0.0 }
 0xb33   : > { %v8025_v55 = vpop.f32.mrf.mxu0  ;;  %v8497_v3 = vpop.f32.mrf.mxu1  ;;  %v7599_v59 = vadd.f32 %v18370_v11, %v7089_v38  ;;  %v8083_v48 = vadd.f32 %v8021_v36, %v18367_v25  ;;  %v19945_v43 = vmax.f32 %v18495_v17, 0.0 }
 0xb34   : > { %v8564_v5 = vadd.f32 %v8497_v3, %v8080_v30  ;;  %8792 = vrot.lane.b32.xlu0 %v8719_v57, %s19757_s15  ;;  %10937 = vrot.lane.b32.xlu1 %v10936_v34, %s19757_s15  ;;  %v18508_v33 = vadd.f32 %v8631_v41, %v8563_v6  ;;  %v8722_v24 = vmax.f32 %v18500_v20, 0.0  ;;  %v8646_v25 = vpop.permute.xlu0 %8645 }
 0xb35   : > { %v8027_v16 = vpop.f32.mrf.mxu0  ;;  %v8499_v42 = vpop.f32.mrf.mxu1  ;;  %v8084_v3 = vadd.f32 %v8025_v55, %v7599_v59 }
 0xb36   : > { %v18510_v0 = vadd.f32 %v8636_v54, %v8564_v5  ;;  %v8565_v56 = vadd.f32 %v8499_v42, %v8081_v47  ;;  %v8641_v5 = vpop.permute.xlu1 %8640  ;;  %v8723_v6 = vmax.f32 %v18508_v33, 0.0  ;;  %v7101_v47 = vadd.f32 %v18365_v52, %v18188_v9 }
 0xb37   : > { %v8031_v15 = vpop.f32.mrf.mxu0  ;;  %v8503_v28 = vpop.f32.mrf.mxu1  ;;  %v8085_v36 = vadd.f32 %v8027_v16, %v18373_v12 }
 0xb38   : > { %v19516_v30 = vmax.f32 %v18510_v0, 0.0  ;;  %v8566_v34 = vadd.f32 %v8503_v28, %v8082_v22  ;;  %8796 = vrot.lane.b32.xlu1 %v19515_v60, %s19757_s15  ;;  %v18524_v38 = vadd.f32 %v8636_v54, %v8565_v56  ;;  %v8086_v55 = vadd.f32 %v8031_v15, %v18376_v44 }
 0xb39   : > { %v8033_v2 = vpop.f32.mrf.mxu0  ;;  %v8505_v41 = vpop.f32.mrf.mxu1 }
 0xb3a   : > { %v10941_v11 = vpack.i.bf16 %v19516_v30, %v8722_v24  ;;  %v8567_v22 = vadd.f32 %v8505_v41, %v8083_v48  ;;  %v18529_v29 = vadd.f32 %v8641_v5, %v8566_v34  ;;  %v19517_v9 = vmax.f32 %v18524_v38, 0.0 }
 0xb3b   : > { %v8037_v42 = vpop.f32.mrf.mxu0  ;;  %v8509_v28 = vpop.f32.mrf.mxu1  ;;  %v7603_v48 = vadd.f32 %v18383_v35, %v7101_v47  ;;  %v8087_v44 = vadd.f32 %v8033_v2, %v18378_v63  ;;  %v19947_v33 = vmax.f32 %v18524_v38, 0.0 }
 0xb3c   : > { %v8568_v60 = vadd.f32 %v8509_v28, %v8084_v3  ;;  %10942 = vrot.lane.b32.xlu0 %v10941_v11, %s19757_s15  ;;  %8800 = vrot.lane.b32.xlu1 %v8723_v6, %s19757_s15  ;;  %v18537_v52 = vadd.f32 %v8641_v5, %v8567_v22  ;;  %v8726_v41 = vmax.f32 %v18529_v29, 0.0  ;;  %v8656_v63 = vpop.permute.xlu0 %8655 }
 0xb3d   : > { %v8039_v54 = vpop.f32.mrf.mxu0  ;;  %v8511_v56 = vpop.f32.mrf.mxu1  ;;  %v8088_v28 = vadd.f32 %v8037_v42, %v7603_v48 }
 0xb3e   : > { %v18539_v59 = vadd.f32 %v8646_v25, %v8568_v60  ;;  %v8569_v12 = vadd.f32 %v8511_v56, %v8085_v36  ;;  %v8651_v60 = vpop.permute.xlu1 %8650  ;;  %v8727_v22 = vmax.f32 %v18537_v52, 0.0  ;;  %v7113_v36 = vadd.f32 %v18381_v45, %v18224_v32 }
 0xb3f   : > { %v8043_v16 = vpop.f32.mrf.mxu0  ;;  %v8515_v34 = vpop.f32.mrf.mxu1  ;;  %v8089_v2 = vadd.f32 %v8039_v54, %v18386_v39 }
 0xb40   : > { %v19518_v3 = vmax.f32 %v18539_v59, 0.0  ;;  %v8570_v11 = vadd.f32 %v8515_v34, %v8086_v55  ;;  %8804 = vrot.lane.b32.xlu0 %v19517_v9, %s19757_s15  ;;  %v18553_v47 = vadd.f32 %v8646_v25, %v8569_v12  ;;  %v8090_v42 = vadd.f32 %v8043_v16, %v18389_v46 }
 0xb41   : > { %v8045_v15 = vpop.f32.mrf.mxu0  ;;  %v8517_v5 = vpop.f32.mrf.mxu1 }
 0xb42   : > { %v10946_v35 = vpack.i.bf16 %v19518_v3, %v8726_v41  ;;  %v8571_v55 = vadd.f32 %v8517_v5, %v8087_v44  ;;  %v18558_v30 = vadd.f32 %v8651_v60, %v8570_v11  ;;  %v8729_v32 = vmax.f32 %v18553_v47, 0.0 }
 0xb43   : > { %v8049_v56 = vpop.f32.mrf.mxu0  ;;  %v8521_v34 = vpop.f32.mrf.mxu1  ;;  %v7607_v44 = vadd.f32 %v18394_v62, %v7113_v36  ;;  %v8091_v46 = vadd.f32 %v8045_v15, %v18391_v26 }
 0xb44   : > { %v8572_v9 = vadd.f32 %v8521_v34, %v8088_v28  ;;  %8808 = vrot.lane.b32.xlu0 %v8727_v22, %s19757_s15  ;;  %10947 = vrot.lane.b32.xlu1 %v10946_v35, %s19757_s15  ;;  %v18566_v45 = vadd.f32 %v8651_v60, %v8571_v55  ;;  %v19520_v5 = vmax.f32 %v18558_v30, 0.0  ;;  %v8661_v34 = vpop.permute.xlu1 %8660 }
 0xb45   : > { %v8051_v25 = vpop.f32.mrf.mxu0  ;;  %v8523_v12 = vpop.f32.mrf.mxu1  ;;  %v8092_v55 = vadd.f32 %v8049_v56, %v7607_v44  ;;  %v19939_v56 = vld [vmem:[#allocation63_spill] sm:$0xff] }
 0xb46   : > { %v18568_v48 = vadd.f32 %v8656_v63, %v8572_v9  ;;  %v8573_v39 = vadd.f32 %v8523_v12, %v8089_v2  ;;  %v8731_v9 = vmax.f32 %v18566_v45, 0.0  ;;  %v7125_v2 = vadd.f32 %v18400_v40, %v18260_v58 }
 0xb47   : > { %v8055_v54 = vpop.f32.mrf.mxu0  ;;  %v8527_v11 = vpop.f32.mrf.mxu1  ;;  %v8093_v26 = vadd.f32 %v8051_v25, %v18397_v37  ;;  %v19940_v25 = vld [vmem:[#allocation37_spill] sm:$0xff] }
 0xb48   : > { %v19519_v28 = vmax.f32 %v18568_v48, 0.0  ;;  %v8574_v35 = vadd.f32 %v8527_v11, %v8090_v42  ;;  %8812 = vrot.lane.b32.xlu1 %v8729_v32, %s19757_s15  ;;  %v18582_v36 = vadd.f32 %v8656_v63, %v8573_v39  ;;  %v8666_v11 = vpop.permute.xlu0 %8665  ;;  %v8094_v63 = vadd.f32 %v8055_v54, %v19939_v56  ;;  %v8671_v56 = vpop.permute.xlu1 %8670 }
 0xb49   : > { %v8057_v16 = vpop.f32.mrf.mxu0  ;;  %v8529_v60 = vpop.f32.mrf.mxu1 }
 0xb4a   : > { %v10951_v62 = vpack.i.bf16 %v19519_v28, %v19520_v5  ;;  %v8575_v42 = vadd.f32 %v8529_v60, %v8091_v46  ;;  %v18587_v15 = vadd.f32 %v8661_v34, %v8574_v35  ;;  %v8733_v58 = vmax.f32 %v18582_v36, 0.0 }
 0xb4b   : > { %v8533_v12 = vpop.f32.mrf.mxu1  ;;  %v8061_v39 = vpop.f32.mrf.mxu0  ;;  %v7611_v35 = vadd.f32 %v19940_v25, %v7125_v2 }
 0xb4c   : > { %v8576_v3 = vadd.f32 %v8533_v12, %v8092_v55  ;;  %10952 = vrot.lane.b32.xlu0 %v10951_v62, %s19757_s15  ;;  %8816 = vrot.lane.b32.xlu1 %v8731_v9, %s19757_s15  ;;  %v18595_v40 = vadd.f32 %v8661_v34, %v8575_v42  ;;  %v8734_v55 = vmax.f32 %v18587_v15, 0.0  ;;  %v19941_v62 = vld [vmem:[#allocation74_spill] sm:$0xff] }
 0xb4d   : > { %v8535_v44 = vpop.f32.mrf.mxu1  ;;  %v8095_v12 = vadd.f32 %v8057_v16, %v19941_v62  ;;  %v8096_v54 = vadd.f32 %v8061_v39, %v7611_v35  ;;  %v8063_v34 = vpop.f32.mrf.mxu0  ;;  %v9109_v39 = vld [vmem:[%s19372_s6 + $0x78] sm:$0xff]  ;;  %v9108_v35 = vld [vmem:[%s19372_s6 + $0x70] sm:$0xff] }
 0xb4e   : > { %v18597_v46 = vadd.f32 %v8666_v11, %v8576_v3  ;;  %v8577_v37 = vadd.f32 %v8535_v44, %v8093_v26  ;;  %v8735_v3 = vmax.f32 %v18595_v40, 0.0  ;;  %9162 = vmatpush1.msra.mxu0 %v9109_v39  ;;  %v9105_v39 = vld [vmem:[%s19372_s6 + $0x58] sm:$0xff] }
 0xb4f   : > { %v8539_v60 = vpop.f32.mrf.mxu1 }
 0xb50   : > { %v8736_v28 = vmax.f32 %v18597_v46, 0.0  ;;  %v8578_v5 = vadd.f32 %v8539_v60, %v8094_v63  ;;  %8820 = vrot.lane.b32.xlu0 %v8733_v58, %s19757_s15  ;;  %v18611_v26 = vadd.f32 %v8666_v11, %v8577_v37  ;;  %v19942_v63 = vld [vmem:[#allocation55_spill] sm:$0xff]  ;;  %v8676_v11 = vpop.permute.xlu0 %8675 }
 0xb51   : > { %v8541_v42 = vpop.f32.mrf.mxu1  ;;  %v8097_v25 = vadd.f32 %v8063_v34, %v19942_v63 }
 0xb52   : > { %v10956_v2 = vpack.i.bf16 %v8736_v28, %v8734_v55  ;;  %v8579_v16 = vadd.f32 %v8541_v42, %v8095_v12  ;;  %v18614_v60 = vadd.f32 %v8671_v56, %v8578_v5  ;;  %v8737_v5 = vmax.f32 %v18611_v26, 0.0 }
 0xb53   : > { %v8545_v44 = vpop.f32.mrf.mxu1  ;;  %v19943_v42 = vmov 0.0  }
 0xb54   : > { %v8580_v62 = vadd.f32 %v8545_v44, %v8096_v54  ;;  %8824 = vrot.lane.b32.xlu0 %v8735_v3, %s19757_s15  ;;  %10957 = vrot.lane.b32.xlu1 %v10956_v2, %s19757_s15  ;;  %v18627_v12 = vadd.f32 %v8671_v56, %v8579_v16  ;;  %v8738_v2 = vmax.f32 %v18614_v60, 0.0  ;;  %v9107_v16 = vld [vmem:[%s19372_s6 + $0x68] sm:$0xff]  ;;  %v9106_v56 = vld [vmem:[%s19372_s6 + $0x60] sm:$0xff] }
 0xb55   : > { %v8547_v37 = vpop.f32.mrf.mxu1  ;;  %9163 = vmatprep.subr.mxu0 %v19943_v42 }
 0xb56   : > { %v18629_v54 = vadd.f32 %v8676_v11, %v8580_v62  ;;  %v8581_v34 = vadd.f32 %v8547_v37, %v8097_v25  ;;  %9164 = vmatpush1.msra.mxu0 %v9108_v35  ;;  %v8739_v63 = vmax.f32 %v18627_v12, 0.0  ;;  %v9103_v35 = vld [vmem:[%s19372_s6 + $0x48] sm:$0xff] }
 0xb57   : > { %9165 = vmatprep.subr.mxu0 %v19943_v42 }
 0xb58   : > { %v19521_v44 = vmax.f32 %v18629_v54, 0.0  ;;  %8828 = vrot.lane.b32.xlu1 %v8737_v5, %s19757_s15  ;;  %9166 = vmatpush1.msra.mxu0 %v9107_v16  ;;  %v18649_v62 = vadd.f32 %v8676_v11, %v8581_v34  ;;  %v9104_v11 = vld [vmem:[%s19372_s6 + $0x50] sm:$0xff]  ;;  %v9102_v34 = vld [vmem:[%s19372_s6 + $0x40] sm:$0xff]  ;;  %v9101_v16 = vld [vmem:[%s19372_s6 + $0x38] sm:$0xff] }
 0xb59   : > { %9167 = vmatprep.subr.mxu0 %v19943_v42 }
 0xb5a   : > { %v10961_v25 = vpack.i.bf16 %v19521_v44, %v8738_v2  ;;  %9168 = vmatpush1.msra.mxu0 %v9106_v56  ;;  %v19522_v37 = vmax.f32 %v18649_v62, 0.0  ;;  %v9100_v56 = vld [vmem:[%s19372_s6 + $0x30] sm:$0xff]  ;;  %v19952_v12 = vmax.f32 %v18649_v62, 0.0 }
 0xb5b   : > { %9169 = vmatprep.subr.mxu0 %v19943_v42 }
 0xb5c   : > { %10962 = vrot.lane.b32.xlu0 %v10961_v25, %s19757_s15  ;;  %8832 = vrot.lane.b32.xlu1 %v8739_v63, %s19757_s15  ;;  %v9099_v25 = vld [vmem:[%s19372_s6 + $0x28] sm:$0xff] }
 0xb5d   : > { %9170 = vmatpush1.msra.mxu0 %v9105_v39  ;;  %v9098_v39 = vld [vmem:[%s19372_s6 + $0x20] sm:$0xff] }
 0xb5e   : > { %9171 = vmatprep.subr.mxu0 %v19943_v42 }
 0xb5f   : > { %9172 = vmatpush1.msra.mxu0 %v9104_v11  ;;  %v9097_v11 = vld [vmem:[%s19372_s6 + $0x18] sm:$0xff] }
 0xb60   : > { %8836 = vrot.lane.b32.xlu0 %v19522_v37, %s19757_s15  ;;  %9173 = vmatprep.subr.mxu0 %v19943_v42 }
 0xb61   : > { %9174 = vmatpush1.msra.mxu0 %v9103_v35  ;;  %v9096_v35 = vld [vmem:[%s19372_s6 + $0x10] sm:$0xff] }
 0xb62   : > { %9175 = vmatprep.subr.mxu0 %v19943_v42 }
 0xb63   : > { %9176 = vmatpush1.msra.mxu0 %v9102_v34  ;;  %v9095_v34 = vld [vmem:[%s19372_s6 + $0x8] sm:$0xff] }
 0xb64   : > { %9177 = vmatprep.subr.mxu0 %v19943_v42 }
 0xb65   : > { %9178 = vmatpush1.msra.mxu0 %v9101_v16  ;;  %v9094_v16 = vld [vmem:[%s19372_s6] sm:$0xff] }
 0xb66   : > { %9179 = vmatprep.subr.mxu0 %v19943_v42 }
 0xb67   : > { %9180 = vmatpush1.msra.mxu0 %v9100_v56  ;;  %v9111_v56 = vld [vmem:[%s19372_s6 + $0x88] sm:$0xff] }
 0xb68   : > { %9181 = vmatprep.subr.mxu0 %v19943_v42 }
 0xb69   : > { %9182 = vmatpush1.msra.mxu0 %v9099_v25  ;;  %v9110_v25 = vld [vmem:[%s19372_s6 + $0x80] sm:$0xff] }
 0xb6a   : > { %9183 = vmatprep.subr.mxu0 %v19943_v42 }
 0xb6b   : > { %9184 = vmatpush1.msra.mxu0 %v9098_v39 }
 0xb6c   : > { %9185 = vmatprep.subr.mxu0 %v19943_v42 }
 0xb6d   : > { %9186 = vmatpush1.msra.mxu0 %v9097_v11 }
 0xb6e   : > { %9187 = vmatprep.subr.mxu0 %v19943_v42 }
 0xb6f   : > { %9188 = vmatpush1.msra.mxu0 %v9096_v35 }
 0xb70   : > { %9189 = vmatprep.subr.mxu0 %v19943_v42 }
 0xb71   : > { %9190 = vmatpush1.msra.mxu0 %v9095_v34 }
 0xb72   : > { %9191 = vmatprep.subr.mxu0 %v19943_v42 }
 0xb73   : > { %9192 = vmatpush1.msra.mxu0 %v9094_v16 }
 0xb74   : > { %9221 = vmatprep.subr.mxu0 %v19943_v42 }
 0xb75   : > { %9222 = vmatpush2.msra.mxu0 %v9111_v56 }
 0xb76   : > { %9223 = vmatprep.subr.mxu0 %v19943_v42 }
 0xb77   : > { %9224 = vmatpush2.msra.mxu0 %v9110_v25 }
 0xb78   : > { %10634 = vmatprep.subr.mxu0 %v19943_v42 }
 0xb92   : > { %v8777_v39 = vpop.permute.xlu0 %8776 }
 0xb93   : > { %v18719_v11 = vmax.f32 %v8711_v19, %v8777_v39 }
 0xb95   : > { %8952 = vrot.lane.b32.xlu0 %v18719_v11, %s11430_s20 }
 0xb96   : > { %v10928_v35 = vpop.permute.xlu1 %10927 }
 0xb97   : > { %v10929_v34 = vunpack.i.l.bf16 %v10928_v35  ;;  %v10930_v16 = vunpack.i.h.bf16 %v10928_v35 }
 0xb99   : > { %v8838_v56 = vsel %vm560_vm3, %v10929_v34, %v8777_v39 }
 0xb9a   : > { %v18726_v44 = vmax.f32 %v8710_v18, %v8838_v56  ;;  %v8781_v25 = vpop.permute.xlu1 %8780 }
 0xb9b   : > { %v8839_v37 = vsel %vm560_vm3, %v10930_v16, %v8781_v25  ;;  %v18731_v50 = vmax.f32 %v8713_v53, %v8781_v25 }
 0xb9c   : > { %8950 = vrot.lane.b32.xlu1 %v18726_v44, %s11430_s20  ;;  %v18739_v19 = vmax.f32 %v8712_v10, %v8839_v37 }
 0xb9d   : > { %8956 = vrot.lane.b32.xlu0 %v18731_v50, %s11430_s20 }
 0xb9e   : > { %v10933_v8 = vpop.permute.xlu0 %10932  ;;  %v8785_v18 = vpop.permute.xlu1 %8784 }
 0xb9f   : > { %v10934_v39 = vunpack.i.l.bf16 %v10933_v8  ;;  %v18743_v35 = vmax.f32 %v8715_v14, %v8785_v18  ;;  %v10935_v13 = vunpack.i.h.bf16 %v10933_v8  ;;  %v19944_v14 = vmax.f32 %v18452_v61, 0.0 }
 0xba0   : > { %8954 = vrot.lane.b32.xlu1 %v18739_v19, %s11430_s20 }
 0xba1   : > { %v8840_v53 = vsel %vm560_vm3, %v10934_v39, %v8785_v18  ;;  %8960 = vrot.lane.b32.xlu0 %v18743_v35, %s11430_s20  ;;  %v19946_v18 = vmax.f32 %v18481_v23, 0.0 }
 0xba2   : > { %v18752_v4 = vmax.f32 %v8714_v51, %v8840_v53  ;;  %v8789_v10 = vpop.permute.xlu0 %8788 }
 0xba3   : > { %v8841_v37 = vsel %vm560_vm3, %v10935_v13, %v8789_v10  ;;  %v18757_v31 = vmax.f32 %v8717_v49, %v8789_v10 }
 0xba4   : > { %8958 = vrot.lane.b32.xlu1 %v18752_v4, %s11430_s20  ;;  %v18765_v34 = vmax.f32 %v19944_v14, %v8841_v37 }
 0xba5   : > { %8964 = vrot.lane.b32.xlu0 %v18757_v31, %s11430_s20 }
 0xba6   : > { %v8793_v1 = vpop.permute.xlu0 %8792  ;;  %v10938_v51 = vpop.permute.xlu1 %10937 }
 0xba7   : > { %v18769_v16 = vmax.f32 %v8719_v57, %v8793_v1  ;;  %v10939_v56 = vunpack.i.l.bf16 %v10938_v51  ;;  %v10940_v7 = vunpack.i.h.bf16 %v10938_v51 }
 0xba8   : > { %8962 = vrot.lane.b32.xlu1 %v18765_v34, %s11430_s20 }
 0xba9   : > { %v8842_v49 = vsel %vm560_vm3, %v10939_v56, %v8793_v1  ;;  %8968 = vrot.lane.b32.xlu0 %v18769_v16, %s11430_s20  ;;  %v19948_v1 = vmax.f32 %v18510_v0, 0.0 }
 0xbaa   : > { %v18778_v61 = vmax.f32 %v8718_v21, %v8842_v49  ;;  %v8797_v25 = vpop.permute.xlu1 %8796 }
 0xbab   : > { %v8843_v8 = vsel %vm560_vm3, %v10940_v7, %v8797_v25  ;;  %v18783_v57 = vmax.f32 %v19945_v43, %v8797_v25 }
 0xbac   : > { %8966 = vrot.lane.b32.xlu1 %v18778_v61, %s11430_s20  ;;  %v18791_v39 = vmax.f32 %v19946_v18, %v8843_v8 }
 0xbad   : > { %8972 = vrot.lane.b32.xlu0 %v18783_v57, %s11430_s20 }
 0xbae   : > { %v10943_v27 = vpop.permute.xlu0 %10942  ;;  %v8801_v21 = vpop.permute.xlu1 %8800 }
 0xbaf   : > { %v10944_v13 = vunpack.i.l.bf16 %v10943_v27  ;;  %v18795_v53 = vmax.f32 %v8723_v6, %v8801_v21  ;;  %v10945_v17 = vunpack.i.h.bf16 %v10943_v27 }
 0xbb0   : > { %8970 = vrot.lane.b32.xlu1 %v18791_v39, %s11430_s20 }
 0xbb1   : > { %v8844_v10 = vsel %vm560_vm3, %v10944_v13, %v8801_v21  ;;  %8976 = vrot.lane.b32.xlu0 %v18795_v53, %s11430_s20 }
 0xbb2   : > { %v18804_v23 = vmax.f32 %v8722_v24, %v8844_v10  ;;  %v8805_v37 = vpop.permute.xlu0 %8804 }
 0xbb3   : > { %v8845_v14 = vsel %vm560_vm3, %v10945_v17, %v8805_v37  ;;  %v18809_v6 = vmax.f32 %v19947_v33, %v8805_v37 }
 0xbb4   : > { %8974 = vrot.lane.b32.xlu1 %v18804_v23, %s11430_s20  ;;  %v18817_v51 = vmax.f32 %v19948_v1, %v8845_v14 }
 0xbb5   : > { %8980 = vrot.lane.b32.xlu0 %v18809_v6, %s11430_s20 }
 0xbb6   : > { %v8809_v20 = vpop.permute.xlu0 %8808  ;;  %v10948_v24 = vpop.permute.xlu1 %10947 }
 0xbb7   : > { %v18821_v56 = vmax.f32 %v8727_v22, %v8809_v20  ;;  %v10949_v7 = vunpack.i.l.bf16 %v10948_v24  ;;  %v10950_v38 = vunpack.i.h.bf16 %v10948_v24  ;;  %v19949_v22 = vmax.f32 %v18539_v59, 0.0 }
 0xbb8   : > { %8978 = vrot.lane.b32.xlu1 %v18817_v51, %s11430_s20  ;;  %v19950_v59 = vmax.f32 %v18558_v30, 0.0 }
 0xbb9   : > { %v8846_v49 = vsel %vm560_vm3, %v10949_v7, %v8809_v20  ;;  %8984 = vrot.lane.b32.xlu0 %v18821_v56, %s11430_s20 }
 0xbba   : > { %v18830_v0 = vmax.f32 %v8726_v41, %v8846_v49  ;;  %v8813_v25 = vpop.permute.xlu1 %8812  ;;  %v19953_v49 = vmax.f32 %v18629_v54, 0.0 }
 0xbbb   : > { %v8847_v8 = vsel %vm560_vm3, %v10950_v38, %v8813_v25  ;;  %v18835_v52 = vmax.f32 %v8729_v32, %v8813_v25 }
 0xbbc   : > { %8982 = vrot.lane.b32.xlu1 %v18830_v0, %s11430_s20  ;;  %v18843_v43 = vmax.f32 %v19949_v22, %v8847_v8 }
 0xbbd   : > { %8988 = vrot.lane.b32.xlu0 %v18835_v52, %s11430_s20 }
 0xbbe   : > { %v10953_v29 = vpop.permute.xlu0 %10952  ;;  %v8817_v41 = vpop.permute.xlu1 %8816 }
 0xbbf   : > { %v10954_v18 = vunpack.i.l.bf16 %v10953_v29  ;;  %v18847_v27 = vmax.f32 %v8731_v9, %v8817_v41  ;;  %v10955_v47 = vunpack.i.h.bf16 %v10953_v29  ;;  %v19951_v9 = vmax.f32 %v18568_v48, 0.0 }
 0xbc0   : > { %8986 = vrot.lane.b32.xlu1 %v18843_v43, %s11430_s20 }
 0xbc1   : > { %v8848_v32 = vsel %vm560_vm3, %v10954_v18, %v8817_v41  ;;  %8992 = vrot.lane.b32.xlu0 %v18847_v27, %s11430_s20 }
 0xbc2   : > { %v18856_v21 = vmax.f32 %v19950_v59, %v8848_v32  ;;  %v8821_v13 = vpop.permute.xlu0 %8820 }
 0xbc3   : > { %v8849_v17 = vsel %vm560_vm3, %v10955_v47, %v8821_v13  ;;  %v18861_v45 = vmax.f32 %v8733_v58, %v8821_v13 }
 0xbc4   : > { %8990 = vrot.lane.b32.xlu1 %v18856_v21, %s11430_s20  ;;  %v18869_v10 = vmax.f32 %v19951_v9, %v8849_v17 }
 0xbc5   : > { %8996 = vrot.lane.b32.xlu0 %v18861_v45, %s11430_s20 }
 0xbc6   : > { %v8825_v30 = vpop.permute.xlu0 %8824  ;;  %v10958_v37 = vpop.permute.xlu1 %10957 }
 0xbc7   : > { %v18873_v14 = vmax.f32 %v8735_v3, %v8825_v30  ;;  %v10959_v33 = vunpack.i.l.bf16 %v10958_v37  ;;  %v10960_v36 = vunpack.i.h.bf16 %v10958_v37 }
 0xbc8   : > { %8994 = vrot.lane.b32.xlu1 %v18869_v10, %s11430_s20 }
 0xbc9   : > { %v8850_v58 = vsel %vm560_vm3, %v10959_v33, %v8825_v30  ;;  %9000 = vrot.lane.b32.xlu0 %v18873_v14, %s11430_s20 }
 0xbca   : > { %v18882_v48 = vmax.f32 %v8734_v55, %v8850_v58  ;;  %v8829_v1 = vpop.permute.xlu1 %8828 }
 0xbcb   : > { %v8851_v20 = vsel %vm560_vm3, %v10960_v36, %v8829_v1  ;;  %v18887_v40 = vmax.f32 %v8737_v5, %v8829_v1 }
 0xbcc   : > { %8998 = vrot.lane.b32.xlu1 %v18882_v48, %s11430_s20  ;;  %v18895_v3 = vmax.f32 %v8736_v28, %v8851_v20 }
 0xbcd   : > { %9004 = vrot.lane.b32.xlu0 %v18887_v40, %s11430_s20 }
 0xbce   : > { %v10963_v15 = vpop.permute.xlu0 %10962  ;;  %v8833_v55 = vpop.permute.xlu1 %8832 }
 0xbcf   : > { %v10964_v24 = vunpack.i.l.bf16 %v10963_v15  ;;  %v18899_v7 = vmax.f32 %v8739_v63, %v8833_v55  ;;  %v10965_v26 = vunpack.i.h.bf16 %v10963_v15 }
 0xbd0   : > { %9002 = vrot.lane.b32.xlu1 %v18895_v3, %s11430_s20 }
 0xbd1   : > { %v8852_v5 = vsel %vm560_vm3, %v10964_v24, %v8833_v55  ;;  %9008 = vrot.lane.b32.xlu0 %v18899_v7, %s11430_s20 }
 0xbd2   : > { %v18908_v28 = vmax.f32 %v8738_v2, %v8852_v5  ;;  %v8837_v46 = vpop.permute.xlu0 %8836 }
 0xbd3   : > { %v8853_v38 = vsel %vm560_vm3, %v10965_v26, %v8837_v46  ;;  %v18913_v63 = vmax.f32 %v19952_v12, %v8837_v46 }
 0xbd4   : > { %9006 = vrot.lane.b32.xlu1 %v18908_v28, %s11430_s20  ;;  %v18921_v25 = vmax.f32 %v19953_v49, %v8853_v38 }
 0xbd5   : > { %9012 = vrot.lane.b32.xlu0 %v18913_v63, %s11430_s20 }
 0xbd8   : > { %9010 = vrot.lane.b32.xlu1 %v18921_v25, %s11430_s20 }
 0xc07   : > { %v8953_v60 = vpop.permute.xlu0 %8952 }
 0xc08   : > { %v9063_v2 = vmax.f32 %v18719_v11, %v8953_v60 }
 0xc0a   : > { %10210 = vmatprep.mubr.msk.f32.mxu0 %vm9112_vm12, %v9063_v2 }
 0xc0e   : > { %v8951_v62 = vpop.permute.xlu1 %8950 }
 0xc0f   : > { %v9014_v8 = vsel %vm6076_vm10, %v8951_v62, %v8953_v60  ;;  %v8957_v22 = vpop.permute.xlu0 %8956 }
 0xc10   : > { %v9062_v29 = vmax.f32 %v18726_v44, %v9014_v8  ;;  %v9065_v41 = vmax.f32 %v18731_v50, %v8957_v22 }
 0xc12   : > { %9226 = vmatmul.mubr.f32.vlgmr.msra.gmra.mxu0 %v9062_v29  ;;  %v8955_v54 = vpop.permute.xlu1 %8954 }
 0xc13   : > { %v9015_v18 = vsel %vm6076_vm10, %v8955_v54, %v8957_v22  ;;  %v8961_v47 = vpop.permute.xlu0 %8960  ;;  %10211 = vmatprep.mubr.msk.f32.mxu0 %vm9112_vm12, %v9065_v41 }
 0xc14   : > { %v9064_v32 = vmax.f32 %v18739_v19, %v9015_v18  ;;  %v9067_v11 = vmax.f32 %v18743_v35, %v8961_v47 }
 0xc16   : > { %9231 = vmatmul.mubr.f32.gmra.mxu0 %v9064_v32  ;;  %v8959_v59 = vpop.permute.xlu1 %8958 }
 0xc17   : > { %v9016_v13 = vsel %vm6076_vm10, %v8959_v59, %v8961_v47  ;;  %v8965_v17 = vpop.permute.xlu0 %8964  ;;  %10212 = vmatprep.mubr.msk.f32.mxu0 %vm9112_vm12, %v9067_v11 }
 0xc18   : > { %v9066_v44 = vmax.f32 %v18752_v4, %v9016_v13  ;;  %v9069_v50 = vmax.f32 %v18757_v31, %v8965_v17 }
 0xc1a   : > { %9236 = vmatmul.mubr.f32.gmra.mxu0 %v9066_v44  ;;  %v8963_v9 = vpop.permute.xlu1 %8962 }
 0xc1b   : > { %v9017_v30 = vsel %vm6076_vm10, %v8963_v9, %v8965_v17  ;;  %v8969_v37 = vpop.permute.xlu0 %8968  ;;  %10213 = vmatprep.mubr.msk.f32.mxu0 %vm9112_vm12, %v9069_v50 }
 0xc1c   : > { %v9068_v19 = vmax.f32 %v18765_v34, %v9017_v30  ;;  %v9071_v35 = vmax.f32 %v18769_v16, %v8969_v37 }
 0xc1e   : > { %9241 = vmatmul.mubr.f32.gmra.mxu0 %v9068_v19  ;;  %v8967_v33 = vpop.permute.xlu1 %8966 }
 0xc1f   : > { %v9018_v36 = vsel %vm6076_vm10, %v8967_v33, %v8969_v37  ;;  %v8973_v58 = vpop.permute.xlu0 %8972  ;;  %10214 = vmatprep.mubr.msk.f32.mxu0 %vm9112_vm12, %v9071_v35  ;;  %v9381_v35 = vld [vmem:[%s19373_s7 + $0x78] sm:$0xff]  ;;  %v9379_v33 = vld [vmem:[%s19373_s7 + $0x68] sm:$0xff] }
 0xc20   : > { %v9070_v4 = vmax.f32 %v18778_v61, %v9018_v36  ;;  %v9073_v31 = vmax.f32 %v18783_v57, %v8973_v58  ;;  %v9394_v36 = vld [vmem:[%s19373_s7 + $0xe0] sm:$0xff] }
 0xc22   : > { %9246 = vmatmul.mubr.f32.gmra.mxu0 %v9070_v4  ;;  %v8971_v1 = vpop.permute.xlu1 %8970  ;;  %v9393_v4 = vld [vmem:[%s19373_s7 + $0xd8] sm:$0xff] }
 0xc23   : > { %v9019_v20 = vsel %vm6076_vm10, %v8971_v1, %v8973_v58  ;;  %v8977_v15 = vpop.permute.xlu0 %8976  ;;  %10215 = vmatprep.mubr.msk.f32.mxu0 %vm9112_vm12, %v9073_v31  ;;  %v9378_v58 = vld [vmem:[%s19373_s7 + $0x60] sm:$0xff]  ;;  %v9377_v31 = vld [vmem:[%s19373_s7 + $0x58] sm:$0xff]  ;;  %v9392_v1 = vld [vmem:[%s19373_s7 + $0xd0] sm:$0xff] }
 0xc24   : > { %v9072_v34 = vmax.f32 %v18791_v39, %v9019_v20  ;;  %v9075_v16 = vmax.f32 %v18795_v53, %v8977_v15  ;;  %v9376_v20 = vld [vmem:[%s19373_s7 + $0x50] sm:$0xff] }
 0xc26   : > { %9251 = vmatmul.mubr.f32.gmra.mxu0 %v9072_v34  ;;  %v8975_v55 = vpop.permute.xlu1 %8974  ;;  %v9375_v34 = vld [vmem:[%s19373_s7 + $0x48] sm:$0xff] }
 0xc27   : > { %v9020_v24 = vsel %vm6076_vm10, %v8975_v55, %v8977_v15  ;;  %v8981_v26 = vpop.permute.xlu0 %8980  ;;  %10216 = vmatprep.mubr.msk.f32.mxu0 %vm9112_vm12, %v9075_v16  ;;  %v9391_v15 = vld [vmem:[%s19373_s7 + $0xc8] sm:$0xff]  ;;  %v9390_v16 = vld [vmem:[%s19373_s7 + $0xc0] sm:$0xff] }
 0xc28   : > { %v9074_v61 = vmax.f32 %v18804_v23, %v9020_v24  ;;  %v9077_v57 = vmax.f32 %v18809_v6, %v8981_v26  ;;  %v9374_v55 = vld [vmem:[%s19373_s7 + $0x40] sm:$0xff]  ;;  %v9389_v24 = vld [vmem:[%s19373_s7 + $0xb8] sm:$0xff] }
 0xc2a   : > { %9256 = vmatmul.mubr.f32.gmra.mxu0 %v9074_v61  ;;  %v8979_v5 = vpop.permute.xlu1 %8978  ;;  %v9388_v61 = vld [vmem:[%s19373_s7 + $0xb0] sm:$0xff] }
 0xc2b   : > { %v9021_v46 = vsel %vm6076_vm10, %v8979_v5, %v8981_v26  ;;  %v8985_v38 = vpop.permute.xlu0 %8984  ;;  %10217 = vmatprep.mubr.msk.f32.mxu0 %vm9112_vm12, %v9077_v57  ;;  %v9373_v26 = vld [vmem:[%s19373_s7 + $0x38] sm:$0xff]  ;;  %v9372_v57 = vld [vmem:[%s19373_s7 + $0x30] sm:$0xff]  ;;  %v9387_v5 = vld [vmem:[%s19373_s7 + $0xa8] sm:$0xff] }
 0xc2c   : > { %v9076_v39 = vmax.f32 %v18817_v51, %v9021_v46  ;;  %v9079_v53 = vmax.f32 %v18821_v56, %v8985_v38  ;;  %v9371_v46 = vld [vmem:[%s19373_s7 + $0x28] sm:$0xff] }
 0xc2e   : > { %9261 = vmatmul.mubr.f32.gmra.mxu0 %v9076_v39  ;;  %v8983_v12 = vpop.permute.xlu1 %8982  ;;  %v9370_v39 = vld [vmem:[%s19373_s7 + $0x20] sm:$0xff] }
 0xc2f   : > { %v9022_v49 = vsel %vm6076_vm10, %v8983_v12, %v8985_v38  ;;  %v8989_v60 = vpop.permute.xlu0 %8988  ;;  %10218 = vmatprep.mubr.msk.f32.mxu0 %vm9112_vm12, %v9079_v53  ;;  %v9386_v38 = vld [vmem:[%s19373_s7 + $0xa0] sm:$0xff]  ;;  %v9385_v53 = vld [vmem:[%s19373_s7 + $0x98] sm:$0xff] }
 0xc30   : > { %v9078_v23 = vmax.f32 %v18830_v0, %v9022_v49  ;;  %v9081_v6 = vmax.f32 %v18835_v52, %v8989_v60  ;;  %v9369_v12 = vld [vmem:[%s19373_s7 + $0x18] sm:$0xff] }
 0xc32   : > { %9266 = vmatmul.mubr.f32.gmra.mxu0 %v9078_v23  ;;  %v8987_v2 = vpop.permute.xlu1 %8986 }
 0xc33   : > { %v9023_v62 = vsel %vm6076_vm10, %v8987_v2, %v8989_v60  ;;  %v8993_v8 = vpop.permute.xlu0 %8992  ;;  %10219 = vmatprep.mubr.msk.f32.mxu0 %vm9112_vm12, %v9081_v6 }
 0xc34   : > { %v9080_v51 = vmax.f32 %v18843_v43, %v9023_v62  ;;  %v9083_v56 = vmax.f32 %v18847_v27, %v8993_v8 }
 0xc36   : > { %9271 = vmatmul.mubr.f32.gmra.mxu0 %v9080_v51  ;;  %v8991_v22 = vpop.permute.xlu1 %8990  ;;  %v9384_v51 = vld [vmem:[%s19373_s7 + $0x90] sm:$0xff] }
 0xc37   : > { %v9024_v29 = vsel %vm6076_vm10, %v8991_v22, %v8993_v8  ;;  %v8997_v41 = vpop.permute.xlu0 %8996  ;;  %10220 = vmatprep.mubr.msk.f32.mxu0 %vm9112_vm12, %v9083_v56  ;;  %v9368_v56 = vld [vmem:[%s19373_s7 + $0x10] sm:$0xff] }
 0xc38   : > { %v9082_v0 = vmax.f32 %v18856_v21, %v9024_v29  ;;  %v9085_v52 = vmax.f32 %v18861_v45, %v8997_v41 }
 0xc3a   : > { %9276 = vmatmul.mubr.f32.gmra.mxu0 %v9082_v0  ;;  %v8995_v54 = vpop.permute.xlu1 %8994  ;;  %v9367_v0 = vld [vmem:[%s19373_s7 + $0x8] sm:$0xff] }
 0xc3b   : > { %v9025_v18 = vsel %vm6076_vm10, %v8995_v54, %v8997_v41  ;;  %v9001_v47 = vpop.permute.xlu0 %9000  ;;  %10221 = vmatprep.mubr.msk.f32.mxu0 %vm9112_vm12, %v9085_v52  ;;  %v9383_v41 = vld [vmem:[%s19373_s7 + $0x88] sm:$0xff] }
 0xc3c   : > { %v9084_v43 = vmax.f32 %v18869_v10, %v9025_v18  ;;  %v9087_v27 = vmax.f32 %v18873_v14, %v9001_v47  ;;  %v9382_v18 = vld [vmem:[%s19373_s7 + $0x80] sm:$0xff] }
 0xc3e   : > { %9281 = vmatmul.mubr.f32.gmra.mxu0 %v9084_v43  ;;  %v8999_v32 = vpop.permute.xlu1 %8998 }
 0xc3f   : > { %v9026_v11 = vsel %vm6076_vm10, %v8999_v32, %v9001_v47  ;;  %v9005_v59 = vpop.permute.xlu0 %9004  ;;  %10222 = vmatprep.mubr.msk.f32.mxu0 %vm9112_vm12, %v9087_v27  ;;  %v9366_v47 = vld [vmem:[%s19373_s7] sm:$0xff]  ;;  %v9429_v32 = vld [vmem:[%s19373_s7 + $0x1f8] sm:$0xff] }
 0xc40   : > { %v9086_v21 = vmax.f32 %v18882_v48, %v9026_v11  ;;  %v9089_v45 = vmax.f32 %v18887_v40, %v9005_v59 }
 0xc42   : > { %9286 = vmatmul.mubr.f32.gmra.mxu0 %v9086_v21  ;;  %v9003_v13 = vpop.permute.xlu1 %9002 }
 0xc43   : > { %v9027_v17 = vsel %vm6076_vm10, %v9003_v13, %v9005_v59  ;;  %v9009_v44 = vpop.permute.xlu0 %9008  ;;  %10223 = vmatprep.mubr.msk.f32.mxu0 %vm9112_vm12, %v9089_v45 }
 0xc44   : > { %v9088_v10 = vmax.f32 %v18895_v3, %v9027_v17  ;;  %v9091_v14 = vmax.f32 %v18899_v7, %v9009_v44  ;;  %v9397_v7 = vld [vmem:[%s19373_s7 + $0xf8] sm:$0xff] }
 0xc45   : > { %10341 = vmatprep.subr.mxu1 %v9397_v7 }
 0xc46   : > { %9291 = vmatmul.mubr.f32.gmra.mxu0 %v9088_v10  ;;  %v9007_v50 = vpop.permute.xlu1 %9006  ;;  %10342 = vmatpush3.msra.mxu1 %v9381_v35 }
 0xc47   : > { %v9028_v9 = vsel %vm6076_vm10, %v9007_v50, %v9009_v44  ;;  %v9013_v30 = vpop.permute.xlu0 %9012  ;;  %10224 = vmatprep.mubr.msk.f32.mxu0 %vm9112_vm12, %v9091_v14 }
 0xc48   : > { %v9090_v48 = vmax.f32 %v18908_v28, %v9028_v9  ;;  %v9093_v40 = vmax.f32 %v18913_v63, %v9013_v30  ;;  %v9396_v28 = vld [vmem:[%s19373_s7 + $0xf0] sm:$0xff] }
 0xc49   : > { %v9380_v63 = vld [vmem:[%s19373_s7 + $0x70] sm:$0xff]  ;;  %10343 = vmatprep.subr.mxu1 %v9396_v28 }
 0xc4a   : > { %9296 = vmatmul.mubr.f32.gmra.mxu0 %v9090_v48  ;;  %v9011_v37 = vpop.permute.xlu1 %9010  ;;  %10344 = vmatpush3.msra.mxu1 %v9380_v63  ;;  %v9592_v28 = vld [vmem:[%s19375_s9 + $0x70] sm:$0xff]  ;;  %v9591_v63 = vld [vmem:[%s19375_s9 + $0x68] sm:$0xff] }
 0xc4b   : > { %v9029_v19 = vsel %vm6076_vm10, %v9011_v37, %v9013_v30  ;;  %10225 = vmatprep.mubr.msk.f32.mxu0 %vm9112_vm12, %v9093_v40  ;;  %10635 = vmatpush3.msra.mxu0 %v9592_v28 }
 0xc4c   : > { %v9092_v3 = vmax.f32 %v18921_v25, %v9029_v19  ;;  %v9395_v25 = vld [vmem:[%s19373_s7 + $0xe8] sm:$0xff]  ;;  %10636 = vmatprep.subr.mxu0 %v19943_v42 }
 0xc4d   : > { %10345 = vmatprep.subr.mxu1 %v9395_v25  ;;  %10637 = vmatpush3.msra.mxu0 %v9591_v63  ;;  %v9414_v63 = vld [vmem:[%s19373_s7 + $0x180] sm:$0xff] }
 0xc4e   : > { %9301 = vmatmul.mubr.f32.gmra.mxu0 %v9092_v3  ;;  %10346 = vmatpush3.msra.mxu1 %v9379_v33  ;;  %v9590_v33 = vld [vmem:[%s19375_s9 + $0x60] sm:$0xff] }
 0xc4f   : > { %10347 = vmatprep.subr.mxu1 %v9394_v36  ;;  %10638 = vmatprep.subr.mxu0 %v19943_v42 }
 0xc50   : > { %10348 = vmatpush3.msra.mxu1 %v9378_v58  ;;  %10639 = vmatpush3.msra.mxu0 %v9590_v33 }
 0xc51   : > { %10349 = vmatprep.subr.mxu1 %v9393_v4  ;;  %v9589_v4 = vld [vmem:[%s19375_s9 + $0x58] sm:$0xff]  ;;  %10640 = vmatprep.subr.mxu0 %v19943_v42 }
 0xc52   : > { %10350 = vmatpush3.msra.mxu1 %v9377_v31  ;;  %10641 = vmatpush3.msra.mxu0 %v9589_v4 }
 0xc53   : > { %10351 = vmatprep.subr.mxu1 %v9392_v1  ;;  %v9588_v1 = vld [vmem:[%s19375_s9 + $0x50] sm:$0xff]  ;;  %10642 = vmatprep.subr.mxu0 %v19943_v42 }
 0xc54   : > { %10352 = vmatpush3.msra.mxu1 %v9376_v20  ;;  %10643 = vmatpush3.msra.mxu0 %v9588_v1 }
 0xc55   : > { %10353 = vmatprep.subr.mxu1 %v9391_v15  ;;  %10644 = vmatprep.subr.mxu0 %v19943_v42 }
 0xc56   : > { %10354 = vmatpush3.msra.mxu1 %v9375_v34  ;;  %10664 = vmatprep.mubr.msk.f32.mxu0 %vm11432_vm13, %v19943_v42 }
 0xc57   : > { %10355 = vmatprep.subr.mxu1 %v9390_v16 }
 0xc58   : > { %10356 = vmatpush3.msra.mxu1 %v9374_v55 }
 0xc59   : > { %10357 = vmatprep.subr.mxu1 %v9389_v24 }
 0xc5a   : > { %10358 = vmatpush3.msra.mxu1 %v9373_v26 }
 0xc5b   : > { %10359 = vmatprep.subr.mxu1 %v9388_v61 }
 0xc5c   : > { %10360 = vmatpush3.msra.mxu1 %v9372_v57 }
 0xc5d   : > { %10361 = vmatprep.subr.mxu1 %v9387_v5 }
 0xc5e   : > { %10362 = vmatpush3.msra.mxu1 %v9371_v46 }
 0xc5f   : > { %10363 = vmatprep.subr.mxu1 %v9386_v38 }
 0xc60   : > { %10364 = vmatpush3.msra.mxu1 %v9370_v39 }
 0xc61   : > { %10365 = vmatprep.subr.mxu1 %v9385_v53 }
 0xc62   : > { %10366 = vmatpush3.msra.mxu1 %v9369_v12 }
 0xc63   : > { %10367 = vmatprep.subr.mxu1 %v9384_v51  ;;  %v9426_v51 = vld [vmem:[%s19373_s7 + $0x1e0] sm:$0xff] }
 0xc64   : > { %10368 = vmatpush3.msra.mxu1 %v9368_v56  ;;  %v9410_v56 = vld [vmem:[%s19373_s7 + $0x160] sm:$0xff] }
 0xc65   : > { %10369 = vmatprep.subr.mxu1 %v9383_v41  ;;  %v9424_v41 = vld [vmem:[%s19373_s7 + $0x1d0] sm:$0xff] }
 0xc66   : > { %10370 = vmatpush3.msra.mxu1 %v9367_v0  ;;  %v9408_v0 = vld [vmem:[%s19373_s7 + $0x150] sm:$0xff] }
 0xc67   : > { %10371 = vmatprep.subr.mxu1 %v9382_v18  ;;  %v9422_v18 = vld [vmem:[%s19373_s7 + $0x1c0] sm:$0xff] }
 0xc68   : > { %10372 = vmatpush3.msra.mxu1 %v9366_v47  ;;  %v9406_v47 = vld [vmem:[%s19373_s7 + $0x140] sm:$0xff] }
 0xc69   : > { %10376 = vmatprep.subr.mxu1 %v9429_v32  ;;  %v9420_v32 = vld [vmem:[%s19373_s7 + $0x1b0] sm:$0xff] }
 0xcd2   : > { %v19067_v49 = vpop.f32.mrf.mxu0 }
 0xcd4   : > { %v9229_v60 = vpop.f32.mrf.mxu0 }
 0xcd6   : > { %v9232_v23 = vpop.f32.mrf.mxu0 }
 0xcd8   : > { %v9234_v6 = vpop.f32.mrf.mxu0 }
 0xcd9   : > { %v9413_v6 = vld [vmem:[%s19373_s7 + $0x178] sm:$0xff] }
 0xcda   : > { %v9237_v2 = vpop.f32.mrf.mxu0 }
 0xcdc   : > { %v9239_v62 = vpop.f32.mrf.mxu0 }
 0xcdd   : > { %v9427_v62 = vld [vmem:[%s19373_s7 + $0x1e8] sm:$0xff] }
 0xcde   : > { %v9242_v8 = vpop.f32.mrf.mxu0 }
 0xce0   : > { %v9244_v22 = vpop.f32.mrf.mxu0 }
 0xce1   : > { %v9425_v22 = vld [vmem:[%s19373_s7 + $0x1d8] sm:$0xff] }
 0xce2   : > { %v19075_v29 = vpop.f32.mrf.mxu0 }
 0xce4   : > { %v9249_v52 = vpop.f32.mrf.mxu0 }
 0xce5   : > { %v9423_v52 = vld [vmem:[%s19373_s7 + $0x1c8] sm:$0xff] }
 0xce6   : > { %v9252_v54 = vpop.f32.mrf.mxu0 }
 0xce7   : > { %v10966_v43 = vpack.i.bf16 %v9232_v23, %v9252_v54  ;;  %v9407_v54 = vld [vmem:[%s19373_s7 + $0x148] sm:$0xff] }
 0xce8   : > { %v9254_v27 = vpop.f32.mrf.mxu0 }
 0xce9   : > { %10967 = vrot.lane.b32.xlu1 %v10966_v43, %s19954_s24  ;;  %v9421_v43 = vld [vmem:[%s19373_s7 + $0x1b8] sm:$0xff] }
 0xcea   : > { %v9257_v11 = vpop.f32.mrf.mxu0  ;;  %v9405_v27 = vld [vmem:[%s19373_s7 + $0x138] sm:$0xff] }
 0xceb   : > { %v10971_v59 = vpack.i.bf16 %v9237_v2, %v9257_v11  ;;  %v9412_v2 = vld [vmem:[%s19373_s7 + $0x170] sm:$0xff] }
 0xcec   : > { %v9259_v21 = vpop.f32.mrf.mxu0  ;;  %v9404_v11 = vld [vmem:[%s19373_s7 + $0x130] sm:$0xff] }
 0xced   : > { %10972 = vrot.lane.b32.xlu0 %v10971_v59, %s19867_s0  ;;  %v9419_v59 = vld [vmem:[%s19373_s7 + $0x1a8] sm:$0xff] }
 0xcee   : > { %v9262_v45 = vpop.f32.mrf.mxu0  ;;  %v9403_v21 = vld [vmem:[%s19373_s7 + $0x128] sm:$0xff] }
 0xcef   : > { %v10976_v13 = vpack.i.bf16 %v9242_v8, %v9262_v45  ;;  %v9411_v8 = vld [vmem:[%s19373_s7 + $0x168] sm:$0xff]  ;;  %v9418_v45 = vld [vmem:[%s19373_s7 + $0x1a0] sm:$0xff] }
 0xcf0   : > { %v9264_v17 = vpop.f32.mrf.mxu0 }
 0xcf1   : > { %10977 = vrot.lane.b32.xlu1 %v10976_v13, %s19756_s23  ;;  %v9402_v13 = vld [vmem:[%s19373_s7 + $0x120] sm:$0xff] }
 0xcf2   : > { %v19095_v44 = vpop.f32.mrf.mxu0 }
 0xcf4   : > { %v9269_v10 = vpop.f32.mrf.mxu0 }
 0xcf5   : > { %v9417_v10 = vld [vmem:[%s19373_s7 + $0x198] sm:$0xff] }
 0xcf6   : > { %v9272_v14 = vpop.f32.mrf.mxu0 }
 0xcf8   : > { %v9274_v50 = vpop.f32.mrf.mxu0 }
 0xcfa   : > { %v9277_v9 = vpop.f32.mrf.mxu0 }
 0xcfc   : > { %v9279_v30 = vpop.f32.mrf.mxu0 }
 0xcfe   : > { %v9282_v48 = vpop.f32.mrf.mxu0 }
 0xd00   : > { %v9284_v40 = vpop.f32.mrf.mxu0 }
 0xd01   : > { %v9400_v40 = vld [vmem:[%s19373_s7 + $0x110] sm:$0xff] }
 0xd02   : > { %v19097_v37 = vpop.f32.mrf.mxu0 }
 0xd04   : > { %v9289_v19 = vpop.f32.mrf.mxu0 }
 0xd06   : > { %v9292_v3 = vpop.f32.mrf.mxu0 }
 0xd07   : > { %v10981_v7 = vpack.i.bf16 %v9272_v14, %v9292_v3  ;;  %v9401_v14 = vld [vmem:[%s19373_s7 + $0x118] sm:$0xff] }
 0xd08   : > { %v9294_v35 = vpop.f32.mrf.mxu0 }
 0xd09   : > { %10982 = vrot.lane.b32.xlu0 %v10981_v7, %s19954_s24  ;;  %v9415_v7 = vld [vmem:[%s19373_s7 + $0x188] sm:$0xff] }
 0xd0a   : > { %v9297_v25 = vpop.f32.mrf.mxu0  ;;  %v9399_v35 = vld [vmem:[%s19373_s7 + $0x108] sm:$0xff] }
 0xd0b   : > { %v10986_v36 = vpack.i.bf16 %v9277_v9, %v9297_v25  ;;  %v9416_v9 = vld [vmem:[%s19373_s7 + $0x190] sm:$0xff] }
 0xd0c   : > { %v9299_v58 = vpop.f32.mrf.mxu0 }
 0xd0d   : > { %10987 = vrot.lane.b32.xlu1 %v10986_v36, %s19867_s0  ;;  %v9398_v58 = vld [vmem:[%s19373_s7 + $0x100] sm:$0xff] }
 0xd0e   : > { %v9302_v31 = vpop.f32.mrf.mxu0 }
 0xd0f   : > { %v10991_v20 = vpack.i.bf16 %v9282_v48, %v9302_v31 }
 0xd10   : > { %v9304_v15 = vpop.f32.mrf.mxu0 }
 0xd11   : > { %10992 = vrot.lane.b32.xlu0 %v10991_v20, %s19756_s23  ;;  %v9587_v15 = vld [vmem:[%s19375_s9 + $0x48] sm:$0xff]  ;;  %s431_s23 = sand.u32 1, %s11411_s26  }
 0xd12   : > { %10645 = vmatpush3.msra.mxu0 %v9587_v15  ;;  %s9848_s0 = sshll.u32 %s431_s23, 3  ;;  %s9772_s21 = scalar_lea.sflag [#allocation5], %s431_s23 }
 0xd13   : > { %10646 = vmatprep.subr.mxu0 %v19943_v42  ;;  %s433_s20 = scalar_lea.vmem [#allocation4], %s9848_s0  ;;  %s11365_s0 = scalar_lea.vmem %s11364_s29, 256 }
 0xd14   : > { %s9785_s17 = sshll.u32 %s433_s20, 4  ;;  %s9786_s17 = int_to_ptr.vmem [resolvable:$true] %s9785_s17 }
 0xd15   : > { %s11359_s24 = scalar_lea.vmem %s9786_s17, 128  ;;  %p11366_p0 = scmp.lt.s32.totalorder %s9786_s17, %s11364_s29 }
 0xd16   : > { %p11360_p11 = scmp.ne.s32.totalorder %s9786_s17, %s11359_s24  ;;  %p11367_p1 = scmp.lt.s32.totalorder %s11365_s0, %s11359_s24 }
 0xd18   : > { %p11361_p12 = pnand %p11360_p11, %p11542_p5  ;;  %p11368_p2 = por %p11367_p1, %p11366_p0 }
 0xd1a   : > { %p11362_p13 = pneg %p11361_p12 }
 0xd1c   : > { %p11369_p3 = pnand %p11368_p2, %p11362_p13 }
 0xd5b   : > { %v10968_v34 = vpop.permute.xlu1 %10967 }
 0xd5c   : > { %v10970_v55 = vunpack.i.h.bf16 %v10968_v34  ;;  %v10969_v24 = vunpack.i.l.bf16 %v10968_v34  ;;  %v9585_v34 = vld [vmem:[%s19375_s9 + $0x38] sm:$0xff] }
 0xd5e   : > { %v9354_v5 = vsel %vm3683_vm7, %v19067_v49, %v10970_v55  ;;  %v9357_v39 = vsel %vm3683_vm7, %v19075_v29, %v10969_v24  ;;  %v9428_v49 = vld [vmem:[%s19373_s7 + $0x1f0] sm:$0xff]  ;;  %v9409_v29 = vld [vmem:[%s19373_s7 + $0x158] sm:$0xff]  ;;  %v9583_v55 = vld [vmem:[%s19375_s9 + $0x28] sm:$0xff] }
 0xd5f   : > { %v10973_v16 = vpop.permute.xlu0 %10972  ;;  %v9582_v24 = vld [vmem:[%s19375_s9 + $0x20] sm:$0xff] }
 0xd60   : > { %v10975_v26 = vunpack.i.h.bf16 %v10973_v16  ;;  %v10974_v61 = vunpack.i.l.bf16 %v10973_v16  ;;  %v9584_v16 = vld [vmem:[%s19375_s9 + $0x30] sm:$0xff] }
 0xd62   : > { %v9355_v53 = vsel %vm2767_vm6, %v9354_v5, %v10975_v26  ;;  %v9358_v12 = vsel %vm2767_vm6, %v9357_v39, %v10974_v61  ;;  %v9581_v26 = vld [vmem:[%s19375_s9 + $0x18] sm:$0xff]  ;;  %v9580_v61 = vld [vmem:[%s19375_s9 + $0x10] sm:$0xff]  ;;  %v9578_v5 = vld [vmem:[%s19375_s9] sm:$0xff] }
 0xd63   : > { %v10978_v57 = vpop.permute.xlu1 %10977  ;;  %v9682_v39 = vld [vmem:[%s19377_s11 + $0x40] sm:$0xff] }
 0xd64   : > { %v10980_v46 = vunpack.i.h.bf16 %v10978_v57  ;;  %v10979_v38 = vunpack.i.l.bf16 %v10978_v57  ;;  %v9579_v57 = vld [vmem:[%s19375_s9 + $0x8] sm:$0xff] }
 0xd66   : > { %v9356_v60 = vsel %vm1476_vm4, %v9355_v53, %v10980_v46  ;;  %v9359_v23 = vsel %vm1476_vm4, %v9358_v12, %v10979_v38  ;;  %v9684_v46 = vld [vmem:[%s19377_s11 + $0x50] sm:$0xf]  ;;  %v9683_v38 = vld [vmem:[%s19377_s11 + $0x48] sm:$0xff]  ;;  %v9681_v53 = vld [vmem:[%s19377_s11 + $0x38] sm:$0xff] }
 0xd67   : > { %9501 = vmatprep.mubr.f32.mxu1 %v9359_v23  ;;  %v9680_v12 = vld [vmem:[%s19377_s11 + $0x30] sm:$0xff]  ;;  %v9678_v23 = vld [vmem:[%s19377_s11 + $0x20] sm:$0xff] }
 0xd68   : > { %9502 = vmatmul.mubr.f32.vlgmr.msra.gmra.mxu1 %v9356_v60  ;;  %v9679_v60 = vld [vmem:[%s19377_s11 + $0x28] sm:$0xff] }
 0xd69   : > { %10377 = vmatpush3.msra.mxu1 %v9413_v6  ;;  %v9677_v6 = vld [vmem:[%s19377_s11 + $0x18] sm:$0xff] }
 0xd6a   : > { %10378 = vmatprep.subr.mxu1 %v9428_v49 }
 0xd6b   : > { %10379 = vmatpush3.msra.mxu1 %v9412_v2 }
 0xd6c   : > { %10380 = vmatprep.subr.mxu1 %v9427_v62 }
 0xd6d   : > { %10381 = vmatpush3.msra.mxu1 %v9411_v8  ;;  %v10226_v8 = vld [vmem:[%s19374_s8] ss:$0 sm:$0xff] }
 0xd6e   : > { %10382 = vmatprep.subr.mxu1 %v9426_v51 }
 0xd6f   : > { %10383 = vmatpush3.msra.mxu1 %v9410_v56 }
 0xd70   : > { %10384 = vmatprep.subr.mxu1 %v9425_v22 }
 0xd71   : > { %10385 = vmatpush3.msra.mxu1 %v9409_v29 }
 0xd72   : > { %10386 = vmatprep.subr.mxu1 %v9424_v41 }
 0xd73   : > { %10387 = vmatpush3.msra.mxu1 %v9408_v0 }
 0xd74   : > { %10388 = vmatprep.subr.mxu1 %v9423_v52  ;;  %v9676_v52 = vld [vmem:[%s19377_s11 + $0x10] sm:$0xff] }
 0xd75   : > { %10389 = vmatpush3.msra.mxu1 %v9407_v54  ;;  %v9675_v54 = vld [vmem:[%s19377_s11 + $0x8] sm:$0xff] }
 0xd76   : > { %10390 = vmatprep.subr.mxu1 %v9422_v18  ;;  %v9674_v18 = vld [vmem:[%s19377_s11] sm:$0xff] }
 0xd77   : > { %10391 = vmatpush3.msra.mxu1 %v9406_v47  ;;  %v10227_v47 = vld [vmem:[%s19376_s10] ss:$0 sm:$0xff] }
 0xd78   : > { %10392 = vmatprep.subr.mxu1 %v9421_v43 }
 0xd79   : > { %10393 = vmatpush3.msra.mxu1 %v9405_v27 }
 0xd7a   : > { %10394 = vmatprep.subr.mxu1 %v9420_v32 }
 0xd7b   : > { %10395 = vmatpush3.msra.mxu1 %v9404_v11  ;;  %v10983_v17 = vpop.permute.xlu0 %10982 }
 0xd7c   : > { %10396 = vmatprep.subr.mxu1 %v9419_v59  ;;  %v10985_v30 = vunpack.i.h.bf16 %v10983_v17  ;;  %v10984_v48 = vunpack.i.l.bf16 %v10983_v17  ;;  %v10229_v59 = vld [vmem:[%s19378_s12] ss:$0 sm:$0xff] }
 0xd7d   : > { %10397 = vmatpush3.msra.mxu1 %v9403_v21 }
 0xd7e   : > { %10398 = vmatprep.subr.mxu1 %v9418_v45  ;;  %v9360_v25 = vsel %vm3683_vm7, %v19095_v44, %v10985_v30  ;;  %v9363_v4 = vsel %vm3683_vm7, %v19097_v37, %v10984_v48  ;;  %v9586_v37 = vld [vmem:[%s19375_s9 + $0x40] sm:$0xff] }
 0xd7f   : > { %v10988_v50 = vpop.permute.xlu1 %10987  ;;  %10399 = vmatpush3.msra.mxu1 %v9402_v13  ;;  %10647 = vmatpush3.msra.mxu0 %v9586_v37 }
 0xd80   : > { %10400 = vmatprep.subr.mxu1 %v9417_v10  ;;  %v10990_v19 = vunpack.i.h.bf16 %v10988_v50  ;;  %v10989_v3 = vunpack.i.l.bf16 %v10988_v50  ;;  %10648 = vmatprep.subr.mxu0 %v19943_v42 }
 0xd81   : > { %10401 = vmatpush3.msra.mxu1 %v9401_v14  ;;  %10649 = vmatpush3.msra.mxu0 %v9585_v34 }
 0xd82   : > { %10402 = vmatprep.subr.mxu1 %v9416_v9  ;;  %v9361_v31 = vsel %vm2767_vm6, %v9360_v25, %v10990_v19  ;;  %v9364_v1 = vsel %vm2767_vm6, %v9363_v4, %v10989_v3  ;;  %10650 = vmatprep.subr.mxu0 %v19943_v42 }
 0xd83   : > { %v10993_v28 = vpop.permute.xlu0 %10992  ;;  %10403 = vmatpush3.msra.mxu1 %v9400_v40  ;;  %10651 = vmatpush3.msra.mxu0 %v9584_v16 }
 0xd84   : > { %v10995_v33 = vunpack.i.h.bf16 %v10993_v28  ;;  %v10994_v36 = vunpack.i.l.bf16 %v10993_v28  ;;  %10404 = vmatprep.subr.mxu1 %v9415_v7  ;;  %10652 = vmatprep.subr.mxu0 %v19943_v42 }
 0xd85   : > { %10405 = vmatpush3.msra.mxu1 %v9399_v35  ;;  %10653 = vmatpush3.msra.mxu0 %v9583_v55 }
 0xd86   : > { %v9362_v20 = vsel %vm1476_vm4, %v9361_v31, %v10995_v33  ;;  %10406 = vmatprep.subr.mxu1 %v9414_v63  ;;  %v9365_v44 = vsel %vm1476_vm4, %v9364_v1, %v10994_v36  ;;  %10654 = vmatprep.subr.mxu0 %v19943_v42 }
 0xd87   : > { %10407 = vmatpush3.msra.mxu1 %v9398_v58  ;;  %9571 = vmatprep.mubr.f32.mxu1 %v9365_v44 }
 0xd88   : > { %9572 = vmatmul.mubr.f32.vlgmr.msra.gmra.mxu1 %v9362_v20  ;;  %10667 = vmatprep.subr.mxu1 %v19943_v42 }
 0xd89   : > { %10655 = vmatpush3.msra.mxu0 %v9582_v24  ;;  %10689 = vmatprep.mubr.msk.f32.mxu1 %vm11432_vm13, %v19943_v42 }
 0xd8a   : > { %10656 = vmatprep.subr.mxu0 %v19943_v42  ;;  %10668 = vmatpush3.msk.msra.mxu1 %vm9696_vm14, %v9684_v46 }
 0xd8b   : > { %10657 = vmatpush3.msra.mxu0 %v9581_v26  ;;  %10669 = vmatprep.subr.mxu1 %v19943_v42 }
 0xd8c   : > { %10658 = vmatprep.subr.mxu0 %v19943_v42  ;;  %10670 = vmatpush3.msra.mxu1 %v9683_v38 }
 0xd8d   : > { %10659 = vmatpush3.msra.mxu0 %v9580_v61  ;;  %10671 = vmatprep.subr.mxu1 %v19943_v42 }
 0xd8e   : > { %10660 = vmatprep.subr.mxu0 %v19943_v42  ;;  %10672 = vmatpush3.msra.mxu1 %v9682_v39 }
 0xd8f   : > { %10661 = vmatpush3.msra.mxu0 %v9579_v57  ;;  %10673 = vmatprep.subr.mxu1 %v19943_v42 }
 0xd90   : > { %10662 = vmatprep.subr.mxu0 %v19943_v42  ;;  %10674 = vmatpush3.msra.mxu1 %v9681_v53 }
 0xd91   : > { %10663 = vmatpush3.msra.mxu0 %v9578_v5  ;;  %10675 = vmatprep.subr.mxu1 %v19943_v42 }
 0xd92   : > { %10676 = vmatpush3.msra.mxu1 %v9680_v12 }
 0xd93   : > { %10677 = vmatprep.subr.mxu1 %v19943_v42 }
 0xd94   : > { %10678 = vmatpush3.msra.mxu1 %v9679_v60 }
 0xd95   : > { %10679 = vmatprep.subr.mxu1 %v19943_v42 }
 0xd96   : > { %10680 = vmatpush3.msra.mxu1 %v9678_v23 }
 0xd97   : > { %10681 = vmatprep.subr.mxu1 %v19943_v42 }
 0xd98   : > { %10682 = vmatpush3.msra.mxu1 %v9677_v6 }
 0xd99   : > { %10683 = vmatprep.subr.mxu1 %v19943_v42 }
 0xd9a   : > { %10684 = vmatpush3.msra.mxu1 %v9676_v52 }
 0xd9b   : > { %10685 = vmatprep.subr.mxu1 %v19943_v42 }
 0xd9c   : > { %10686 = vmatpush3.msra.mxu1 %v9675_v54 }
 0xd9d   : > { %10687 = vmatprep.subr.mxu1 %v19943_v42 }
 0xd9e   : > { %10688 = vmatpush3.msra.mxu1 %v9674_v18 }
 0xe28   : > { %v10373_v49 = vpop.f32.mrf.mxu1 }
 0xe2a   : > { %v10374_v2 = vpop.f32.mrf.mxu1 }
 0xe2b   : > { %v10375_v62 = vadd.f32 %v10374_v2, %v10373_v49 }
 0xe2d   : > { %v9504_v22 = vadd.f32 %v10375_v62, %v10226_v8 }
 0xe48   : > { %v10408_v51 = vpop.f32.mrf.mxu1 }
 0xe4a   : > { %v10409_v56 = vpop.f32.mrf.mxu1 }
 0xe4b   : > { %v10410_v29 = vadd.f32 %v10409_v56, %v10408_v51 }
 0xe4d   : > { %v9574_v41 = vadd.f32 %v10410_v29, %v9504_v22 }
 0xe4f   : > { %v9577_v0 = vmax.f32 %v9574_v41, 0.0 }
 0xe51   : > { %10665 = vmatmul.mubr.msk.f32.vlgmr.msra.gmra.mxu0 %vm1687_vm5, %v9577_v0 }
 0xf11   : > { %v9669_v43 = vpop.f32.mrf.mxu0 }
 0xf12   : > { %v9670_v27 = vadd.f32 %v10227_v47, %v9669_v43 }
 0xf13   : > { %v10666_v32 = vpop.f32.mrf.mxu0 }
 0xf14   : > { %v9673_v11 = vmax.f32 %v9670_v27, 0.0 }
 0xf16   : > { %10690 = vmatmul.mubr.msk.f32.vlgmr.msra.gmra.mxu1 %vm9692_vm15, %v9673_v11 }
 0xfd6   : > { %v9766_v42 = vpop.f32.mrf.mxu1 }
 0xfd7   : > { %v9767_v21 = vadd.f32 %v10229_v59, %v9766_v42 }
 0xfd8   : > { %v10691_v45 = vpop.f32.mrf.mxu1 }
 0xfd9   : > { %9770 = vst [vmem:[%s433_s20] sm:$0xff] %v9767_v21 }
 0xfda   : > { %11372 = shalt.err (!%p11369_p3)
}
 0xfdb   : > { %s11373_s2 = scalar_lea.hbm %s19331_s22, 128  ;;  %s11377_s20 = scalar_lea.hbm %s19379_s13, 256 }
 0xfdc   : > { %p11374_p4 = scmp.ne.s32.totalorder %s19331_s22, %s11373_s2  ;;  %p11378_p9 = scmp.lt.s32.totalorder %s19331_s22, %s19379_s13 }
 0xfdd   : > { %p11379_p10 = scmp.lt.s32.totalorder %s11377_s20, %s11373_s2 }
 0xfde   : > { %p11375_p7 = pnand %p11374_p4, %p11542_p5 }
 0xfdf   : > { %p11380_p11 = por %p11379_p10, %p11378_p9 }
 0xfe0   : > { %p11376_p8 = pneg %p11375_p7 }
 0xfe2   : > { %p11381_p12 = pnand %p11380_p11, %p11376_p8 }
 0xfe4   : > { %11384 = shalt.err (!%p11381_p12)
}
 0xfe5   : > { %10693 = dma.vmem_to_hbm [thread:$0]  (%p11542_p5), %s9786_s17, 128, %s19331_s22, %s9772_s21  }
 0xfe6 PF: > { %p10699_p13 = scmp.ge.s32.totalorder %s11419_s28, 2  ;;  %s9797_s24 = sand.u32 1, %s11407_s25  }
 0xfe7   : > { %s9798_s1 = scalar_lea.sflag [#allocation5], %s9797_s24 }
 0xfe8   : > { %p10696_p0 = pnand %p10699_p13, %p11546_p6 }
 0xfea   : > { %p10697_p1 = pneg %p10696_p0 }
 0xfec   : > { %11402 = dma.done.wait (%p10697_p1), %s9798_s1, 128  }
 0xfed   : > { %11404 = vsyncadd (%p10697_p1), %s9798_s1, 4294967168  ;;  %s19955_s29 = sld [smem:[#allocation7_spill]]  ;;  %p23_p2 = scmp.ge.s32.totalorder %s11529_s14, 4  }
 0xfee   : > { %s19956_s25 = smov %s11411_s26  ;;  %s19957_s26 = smov %s11415_s27 }
 0xfef   : > { %s19959_s28 = smov %s11529_s14  ;;  %25 = sbr.rel (!%p23_p2) target bundleno = 7 (0x7), region = 115 }
 0xff3   : > { %s19958_s27 = smov %s19955_s29 }
 0xff4   :  { %9803 = vsyncpa [#allocation5], 1 }
 0xff5   :  { %9805 = vsyncpa [#allocation5 + $0x1], 1 }

</bundles_post_ra>
